<compile_context>
chip_gen: v5e
topology: v5e:2x2
jax: 0.10.0
libtpu: 0.0.40
codegen_flags: <defaults>
</compile_context>

<pallas_src>
import jax
import jax.numpy as jnp
import numpy as np
from jax.experimental import pallas as pl
from jax.experimental.pallas import tpu as pltpu


def _tdnet_kernel(obs_ref, h0_ref, c0_ref,
                  w_ih_ref, w_hh_ref, b_ref,
                  w1c_ref, b1c_ref, w2q_ref, b2q_ref,
                  q_ref, emb_ref, hT_ref, cT_ref,
                  gates_scr, emb_scr):
    T, B, D = obs_ref.shape            # obs is passed TIME-MAJOR (T, B, D)
    H = h0_ref.shape[-1]

    # ---- input projection for the whole sequence (off the serial path) ------
    # Materialized into a time-major VMEM scratch so each recurrence step reads
    # one contiguous full-tile (B, 4H) slab.
    gates_scr[...] = (
        jnp.dot(obs_ref[...].reshape(T * B, D), w_ih_ref[...],
                preferred_element_type=jnp.float32)
        + b_ref[...]).reshape(T, B, 4 * H)

    # ---- LSTM recurrence (PyTorch gate order i, f, g, o), unrolled over T ----
    # w_hh is re-read from its VMEM ref each step: letting Mosaic stream weight
    # tiles per matmul avoids register-file-sized live ranges and spill churn.
    h = h0_ref[...]                                              # (B, H)
    c = c0_ref[...]                                              # (B, H)
    half = jnp.float32(0.5)
    one = jnp.float32(1.0)
    for t in range(T):
        gates = gates_scr[t] + jnp.dot(
            h, w_hh_ref[...], preferred_element_type=jnp.float32)  # (B, 4H)
        # sigmoid(x) == 0.5 * (1 + tanh(0.5 * x)): single EUP push per gate.
        i_g = half * (jnp.tanh(half * gates[:, 0 * H:1 * H]) + one)
        f_g = half * (jnp.tanh(half * gates[:, 1 * H:2 * H]) + one)
        g_g = jnp.tanh(gates[:, 2 * H:3 * H])
        o_g = half * (jnp.tanh(half * gates[:, 3 * H:4 * H]) + one)
        c = f_g * c + i_g * g_g
        h = o_g * jnp.tanh(c)
        emb_scr[t] = h          # 4 unmasked full-tile stores, time-major scratch

    # Final LSTM state (PyTorch (h_n, c_n) with the num_layers=1 axis squeezed).
    hT_ref[...] = h
    cT_ref[...] = c

    # ---- relayout to the caller's batch-first state_embedding layout --------
    # Done ONCE after the recurrence, so the masked sublane-strided stores no
    # longer compete with the serial loop for the store slot.
    for t in range(T):
        emb_ref[:, t, :] = emb_scr[t]

    # ---- dueling heads, one M = B*T pass over all rows -----------------------
    # The dueling combine (mean-subtract over actions + value broadcast) is
    # folded into w2q/b2q at pack time: just matmul + bias here.
    x = jnp.maximum(emb_ref[...].reshape(B * T, H), 0.0)          # relu(emb)
    hid = jnp.maximum(
        jnp.dot(x, w1c_ref[...], preferred_element_type=jnp.float32)
        + b1c_ref[...], 0.0)                                      # (B*T, 2H)
    q_ref[...] = (jnp.dot(hid, w2q_ref[...],
                          preferred_element_type=jnp.float32)
                  + b2q_ref[...])                                 # (B*T, A)


def pack_params(params):
    """One-time weight packing.

    * Hidden-layer weights of the two heads are concatenated -> one (H, 2H)
      matmul.
    * The dueling combine is linear, so it is folded into the output layer:
        q = hid_a @ (aw2 - mean_cols(aw2)) + (ab2 - mean(ab2))
            + hid_v @ vw2 + vb2            (value broadcast over all actions)
      giving a single (2H, A) matmul whose result IS q.
    """
    A = params["aw2"].shape[1]
    w1c = jnp.concatenate([params["aw1"], params["vw1"]], axis=1)      # (H, 2H)
    b1c = jnp.concatenate([params["ab1"], params["vb1"]], axis=1)      # (1, 2H)
    aw2c = params["aw2"] - jnp.mean(params["aw2"], axis=1, keepdims=True)  # (H, A)
    ab2c = params["ab2"] - jnp.mean(params["ab2"], axis=1, keepdims=True)  # (1, A)
    w2q = jnp.concatenate([aw2c, jnp.tile(params["vw2"], (1, A))], axis=0)  # (2H, A)
    b2q = ab2c + params["vb2"]                                              # (1, A)
    return dict(w_ih=params["w_ih"], w_hh=params["w_hh"], b=params["b"],
                w1c=w1c, b1c=b1c, w2q=w2q, b2q=b2q)


def temporal_difference_net_forward(obs, h0, c0, packed):
    """obs: (B, T, obs_dim) float32 (batch_first, like PyTorch).
       h0, c0: (B, H) float32.  packed: output of pack_params().
       Returns (q, (hT, cT), state_embedding); q: (B, T, A), emb: (B, T, H)."""
    B, T, D = obs.shape
    H = h0.shape[-1]
    A = packed["w2q"].shape[-1]

    # Layout plumbing only: present obs time-major so the in-kernel projection
    # can write a time-major gates scratch directly (no in-kernel transpose).
    obs_tm = jnp.swapaxes(obs, 0, 1)                      # (T, B, D), tiny

    out_shape = (
        jax.ShapeDtypeStruct((B * T, A), jnp.float32),    # q (2-D; reshaped below)
        jax.ShapeDtypeStruct((B, T, H), jnp.float32),     # state_embedding
        jax.ShapeDtypeStruct((B, H), jnp.float32),        # h_T
        jax.ShapeDtypeStruct((B, H), jnp.float32),        # c_T
    )
    in_specs = [pl.BlockSpec(memory_space=pltpu.MemorySpace.VMEM)
                for _ in range(10)]
    out_specs = tuple(pl.BlockSpec(memory_space=pltpu.MemorySpace.VMEM)
                      for _ in range(4))

    q2, emb, hT, cT = pl.pallas_call(
        _tdnet_kernel,
        out_shape=out_shape,
        in_specs=in_specs,
        out_specs=out_specs,
        scratch_shapes=[
            pltpu.VMEM((T, B, 4 * H), jnp.float32),   # time-major gates_x
            pltpu.VMEM((T, B, H), jnp.float32),       # time-major LSTM outputs
        ],
    )(obs_tm, h0, c0,
      packed["w_ih"], packed["w_hh"], packed["b"],
      packed["w1c"], packed["b1c"], packed["w2q"], packed["b2q"])
    # Free row-major view back to (B, T, A).
    return q2.reshape(B, T, A), (hT, cT), emb


def _ref_forward(obs, h0, c0, p):
    """Pure-JAX reference (matches PyTorch nn.LSTM + dueling head semantics)."""
    H = h0.shape[-1]

    def step(carry, x_t):
        h, c = carry
        gates = x_t @ p["w_ih"] + h @ p["w_hh"] + p["b"][0]
        i = jax.nn.sigmoid(gates[:, 0 * H:1 * H])
        f = jax.nn.sigmoid(gates[:, 1 * H:2 * H])
        g = jnp.tanh(gates[:, 2 * H:3 * H])
        o = jax.nn.sigmoid(gates[:, 3 * H:4 * H])
        c_new = f * c + i * g
        h_new = o * jnp.tanh(c_new)
        return (h_new, c_new), h_new

    (hT, cT), embs = jax.lax.scan(step, (h0, c0), jnp.transpose(obs, (1, 0, 2)))
    emb = jnp.transpose(embs, (1, 0, 2))
    x = jax.nn.relu(emb)
    adv = jax.nn.relu(x @ p["aw1"] + p["ab1"][0]) @ p["aw2"] + p["ab2"][0]
    val = jax.nn.relu(x @ p["vw1"] + p["vb1"][0]) @ p["vw2"] + p["vb2"][0]
    q = adv + val - adv.mean(axis=2, keepdims=True)
    return q, (hT, cT), emb


def _init_params(key, obs_dim, hidden_dim, action_dim):
    ks = jax.random.split(key, 12)
    s_lstm = 1.0 / np.sqrt(hidden_dim)
    s_lin = 1.0 / np.sqrt(hidden_dim)
    u = lambda k, shape, s: jax.random.uniform(k, shape, jnp.float32, -s, s)
    return dict(
        # LSTM weights stored transposed: (in, 4H) / (H, 4H); gate order i,f,g,o.
        w_ih=u(ks[0], (obs_dim, 4 * hidden_dim), s_lstm),
        w_hh=u(ks[1], (hidden_dim, 4 * hidden_dim), s_lstm),
        b=u(ks[2], (1, 4 * hidden_dim), s_lstm),      # b_ih + b_hh folded together
        aw1=u(ks[3], (hidden_dim, hidden_dim), s_lin),
        ab1=u(ks[4], (1, hidden_dim), s_lin),
        aw2=u(ks[5], (hidden_dim, action_dim), s_lin),
        ab2=u(ks[6], (1, action_dim), s_lin),
        vw1=u(ks[7], (hidden_dim, hidden_dim), s_lin),
        vb1=u(ks[8], (1, hidden_dim), s_lin),
        vw2=u(ks[9], (hidden_dim, 1), s_lin),
        vb2=u(ks[10], (1, 1), s_lin),
    )


if __name__ == "__main__":
    # Shapes implied by the module: actors=32 (batch), hidden_dim=128.
    B = 32            # actors
    T = 8             # sequence length
    OBS = 16          # observation_dim
    H = 128           # hidden_dim
    A = 4             # action_dim

    key = jax.random.PRNGKey(0)
    k_obs, k_par = jax.random.split(key)
    obs = jax.random.normal(k_obs, (B, T, OBS), jnp.float32)
    # PyTorch-style initial hidden: (num_layers=1, B, H) zeros -> kernel uses (B, H).
    h0 = jnp.zeros((B, H), jnp.float32)
    c0 = jnp.zeros((B, H), jnp.float32)
    params = _init_params(k_par, OBS, H, A)
    packed = pack_params(params)   # one-time weight packing for the kernel

    fwd = jax.jit(temporal_difference_net_forward)
    q, (hT, cT), emb = jax.block_until_ready(fwd(obs, h0, c0, packed))

    q_ref, (hT_ref, cT_ref), emb_ref = _ref_forward(obs, h0, c0, params)
    np.testing.assert_allclose(np.asarray(q), np.asarray(q_ref), rtol=2e-4, atol=2e-4)
    np.testing.assert_allclose(np.asarray(emb), np.asarray(emb_ref), rtol=2e-4, atol=2e-4)
    np.testing.assert_allclose(np.asarray(hT), np.asarray(hT_ref), rtol=2e-4, atol=2e-4)
    np.testing.assert_allclose(np.asarray(cT), np.asarray(cT_ref), rtol=2e-4, atol=2e-4)

    print("KERNEL_OK")
</pallas_src>

<mosaic_0001>
module attributes {stable_mosaic.version = 11 : i64} {
  func.func @_tdnet_kernel(%arg0: memref<8x32x16xf32, #tpu.memory_space<vmem>>, %arg1: memref<32x128xf32, #tpu.memory_space<vmem>>, %arg2: memref<32x128xf32, #tpu.memory_space<vmem>>, %arg3: memref<16x512xf32, #tpu.memory_space<vmem>>, %arg4: memref<128x512xf32, #tpu.memory_space<vmem>>, %arg5: memref<1x512xf32, #tpu.memory_space<vmem>>, %arg6: memref<128x256xf32, #tpu.memory_space<vmem>>, %arg7: memref<1x256xf32, #tpu.memory_space<vmem>>, %arg8: memref<256x4xf32, #tpu.memory_space<vmem>>, %arg9: memref<1x4xf32, #tpu.memory_space<vmem>>, %arg10: memref<256x4xf32, #tpu.memory_space<vmem>>, %arg11: memref<32x8x128xf32, #tpu.memory_space<vmem>>, %arg12: memref<32x128xf32, #tpu.memory_space<vmem>>, %arg13: memref<32x128xf32, #tpu.memory_space<vmem>>, %arg14: memref<8x32x512xf32, #tpu.memory_space<vmem>>, %arg15: memref<8x32x128xf32, #tpu.memory_space<vmem>>) attributes {dimension_semantics = [], scalar_prefetch = 0 : i64, scratch_operands = 2 : i64, tpu.core_type = #tpu.core_type<tc>} {
    %c0 = arith.constant 0 : index
    %c0_0 = arith.constant 0 : index
    %c0_1 = arith.constant 0 : index
    %0 = vector.load %arg0[%c0, %c0_0, %c0_1] : memref<8x32x16xf32, #tpu.memory_space<vmem>>, vector<8x32x16xf32>
    %1 = vector.shape_cast %0 : vector<8x32x16xf32> to vector<256x16xf32>
    %c0_2 = arith.constant 0 : index
    %c0_3 = arith.constant 0 : index
    %2 = vector.load %arg3[%c0_2, %c0_3] : memref<16x512xf32, #tpu.memory_space<vmem>>, vector<16x512xf32>
    %cst = arith.constant dense<0.000000e+00> : vector<256x512xf32>
    %3 = tpu.matmul %1, %2, %cst {dimension_numbers = #tpu.dot_dimension_numbers<[1], [0], [0], [1], [0, 0, 1, 1], [], []>} : vector<256x16xf32>, vector<16x512xf32>, vector<256x512xf32> -> vector<256x512xf32>
    %c0_4 = arith.constant 0 : index
    %c0_5 = arith.constant 0 : index
    %4 = vector.load %arg5[%c0_4, %c0_5] : memref<1x512xf32, #tpu.memory_space<vmem>>, vector<1x512xf32>
    %5 = vector.broadcast %4 : vector<1x512xf32> to vector<256x512xf32>
    %6 = arith.addf %3, %5 : vector<256x512xf32>
    %7 = vector.shape_cast %6 : vector<256x512xf32> to vector<8x32x512xf32>
    %c0_6 = arith.constant 0 : index
    %c0_7 = arith.constant 0 : index
    %c0_8 = arith.constant 0 : index
    %8 = vector.load %arg14[%c0_6, %c0_7, %c0_8] : memref<8x32x512xf32, #tpu.memory_space<vmem>>, vector<8x32x512xf32>
    tpu.vector_store %arg14[%c0_6, %c0_7, %c0_8], %7 {strides = array<i32>} : memref<8x32x512xf32, #tpu.memory_space<vmem>>, vector<8x32x512xf32>,
    %c0_9 = arith.constant 0 : index
    %c0_10 = arith.constant 0 : index
    %9 = vector.load %arg1[%c0_9, %c0_10] : memref<32x128xf32, #tpu.memory_space<vmem>>, vector<32x128xf32>
    %c0_11 = arith.constant 0 : index
    %c0_12 = arith.constant 0 : index
    %10 = vector.load %arg2[%c0_11, %c0_12] : memref<32x128xf32, #tpu.memory_space<vmem>>, vector<32x128xf32>
    %c0_13 = arith.constant 0 : index
    %c0_14 = arith.constant 0 : index
    %c0_15 = arith.constant 0 : index
    %11 = vector.load %arg14[%c0_13, %c0_14, %c0_15] : memref<8x32x512xf32, #tpu.memory_space<vmem>>, vector<1x32x512xf32>
    %12 = vector.shape_cast %11 : vector<1x32x512xf32> to vector<32x512xf32>
    %c0_16 = arith.constant 0 : index
    %c0_17 = arith.constant 0 : index
    %13 = vector.load %arg4[%c0_16, %c0_17] : memref<128x512xf32, #tpu.memory_space<vmem>>, vector<128x512xf32>
    %cst_18 = arith.constant dense<0.000000e+00> : vector<32x512xf32>
    %14 = tpu.matmul %9, %13, %cst_18 {dimension_numbers = #tpu.dot_dimension_numbers<[1], [0], [0], [1], [0, 0, 1, 1], [], []>} : vector<32x128xf32>, vector<128x512xf32>, vector<32x512xf32> -> vector<32x512xf32>
    %15 = arith.addf %12, %14 : vector<32x512xf32>
    %16 = vector.extract_strided_slice %15 {offsets = [0, 0], sizes = [32, 128], strides = [1, 1]} : vector<32x512xf32> to vector<32x128xf32>
    %cst_19 = arith.constant 5.000000e-01 : f32
    %17 = vector.broadcast %cst_19 : f32 to vector<32x128xf32>
    %18 = arith.mulf %17, %16 : vector<32x128xf32>
    %19 = math.tanh %18 : vector<32x128xf32>
    %cst_20 = arith.constant 1.000000e+00 : f32
    %20 = vector.broadcast %cst_20 : f32 to vector<32x128xf32>
    %21 = arith.addf %19, %20 : vector<32x128xf32>
    %cst_21 = arith.constant 5.000000e-01 : f32
    %22 = vector.broadcast %cst_21 : f32 to vector<32x128xf32>
    %23 = arith.mulf %22, %21 : vector<32x128xf32>
    %24 = vector.extract_strided_slice %15 {offsets = [0, 128], sizes = [32, 128], strides = [1, 1]} : vector<32x512xf32> to vector<32x128xf32>
    %cst_22 = arith.constant 5.000000e-01 : f32
    %25 = vector.broadcast %cst_22 : f32 to vector<32x128xf32>
    %26 = arith.mulf %25, %24 : vector<32x128xf32>
    %27 = math.tanh %26 : vector<32x128xf32>
    %cst_23 = arith.constant 1.000000e+00 : f32
    %28 = vector.broadcast %cst_23 : f32 to vector<32x128xf32>
    %29 = arith.addf %27, %28 : vector<32x128xf32>
    %cst_24 = arith.constant 5.000000e-01 : f32
    %30 = vector.broadcast %cst_24 : f32 to vector<32x128xf32>
    %31 = arith.mulf %30, %29 : vector<32x128xf32>
    %32 = vector.extract_strided_slice %15 {offsets = [0, 256], sizes = [32, 128], strides = [1, 1]} : vector<32x512xf32> to vector<32x128xf32>
    %33 = math.tanh %32 : vector<32x128xf32>
    %34 = vector.extract_strided_slice %15 {offsets = [0, 384], sizes = [32, 128], strides = [1, 1]} : vector<32x512xf32> to vector<32x128xf32>
    %cst_25 = arith.constant 5.000000e-01 : f32
    %35 = vector.broadcast %cst_25 : f32 to vector<32x128xf32>
    %36 = arith.mulf %35, %34 : vector<32x128xf32>
    %37 = math.tanh %36 : vector<32x128xf32>
    %cst_26 = arith.constant 1.000000e+00 : f32
    %38 = vector.broadcast %cst_26 : f32 to vector<32x128xf32>
    %39 = arith.addf %37, %38 : vector<32x128xf32>
    %cst_27 = arith.constant 5.000000e-01 : f32
    %40 = vector.broadcast %cst_27 : f32 to vector<32x128xf32>
    %41 = arith.mulf %40, %39 : vector<32x128xf32>
    %42 = arith.mulf %31, %10 : vector<32x128xf32>
    %43 = arith.mulf %23, %33 : vector<32x128xf32>
    %44 = arith.addf %42, %43 : vector<32x128xf32>
    %45 = math.tanh %44 : vector<32x128xf32>
    %46 = arith.mulf %41, %45 : vector<32x128xf32>
    %c0_28 = arith.constant 0 : index
    %c0_29 = arith.constant 0 : index
    %c0_30 = arith.constant 0 : index
    %47 = vector.load %arg15[%c0_28, %c0_29, %c0_30] : memref<8x32x128xf32, #tpu.memory_space<vmem>>, vector<1x32x128xf32>
    %48 = vector.shape_cast %47 : vector<1x32x128xf32> to vector<32x128xf32>
    %49 = vector.shape_cast %46 : vector<32x128xf32> to vector<1x32x128xf32>
    tpu.vector_store %arg15[%c0_28, %c0_29, %c0_30], %49 {strides = array<i32>} : memref<8x32x128xf32, #tpu.memory_space<vmem>>, vector<1x32x128xf32>,
    %c1 = arith.constant 1 : index
    %c0_31 = arith.constant 0 : index
    %c0_32 = arith.constant 0 : index
    %50 = vector.load %arg14[%c1, %c0_31, %c0_32] : memref<8x32x512xf32, #tpu.memory_space<vmem>>, vector<1x32x512xf32>
    %51 = vector.shape_cast %50 : vector<1x32x512xf32> to vector<32x512xf32>
    %c0_33 = arith.constant 0 : index
    %c0_34 = arith.constant 0 : index
    %52 = vector.load %arg4[%c0_33, %c0_34] : memref<128x512xf32, #tpu.memory_space<vmem>>, vector<128x512xf32>
    %cst_35 = arith.constant dense<0.000000e+00> : vector<32x512xf32>
    %53 = tpu.matmul %46, %52, %cst_35 {dimension_numbers = #tpu.dot_dimension_numbers<[1], [0], [0], [1], [0, 0, 1, 1], [], []>} : vector<32x128xf32>, vector<128x512xf32>, vector<32x512xf32> -> vector<32x512xf32>
    %54 = arith.addf %51, %53 : vector<32x512xf32>
    %55 = vector.extract_strided_slice %54 {offsets = [0, 0], sizes = [32, 128], strides = [1, 1]} : vector<32x512xf32> to vector<32x128xf32>
    %cst_36 = arith.constant 5.000000e-01 : f32
    %56 = vector.broadcast %cst_36 : f32 to vector<32x128xf32>
    %57 = arith.mulf %56, %55 : vector<32x128xf32>
    %58 = math.tanh %57 : vector<32x128xf32>
    %cst_37 = arith.constant 1.000000e+00 : f32
    %59 = vector.broadcast %cst_37 : f32 to vector<32x128xf32>
    %60 = arith.addf %58, %59 : vector<32x128xf32>
    %cst_38 = arith.constant 5.000000e-01 : f32
    %61 = vector.broadcast %cst_38 : f32 to vector<32x128xf32>
    %62 = arith.mulf %61, %60 : vector<32x128xf32>
    %63 = vector.extract_strided_slice %54 {offsets = [0, 128], sizes = [32, 128], strides = [1, 1]} : vector<32x512xf32> to vector<32x128xf32>
    %cst_39 = arith.constant 5.000000e-01 : f32
    %64 = vector.broadcast %cst_39 : f32 to vector<32x128xf32>
    %65 = arith.mulf %64, %63 : vector<32x128xf32>
    %66 = math.tanh %65 : vector<32x128xf32>
    %cst_40 = arith.constant 1.000000e+00 : f32
    %67 = vector.broadcast %cst_40 : f32 to vector<32x128xf32>
    %68 = arith.addf %66, %67 : vector<32x128xf32>
    %cst_41 = arith.constant 5.000000e-01 : f32
    %69 = vector.broadcast %cst_41 : f32 to vector<32x128xf32>
    %70 = arith.mulf %69, %68 : vector<32x128xf32>
    %71 = vector.extract_strided_slice %54 {offsets = [0, 256], sizes = [32, 128], strides = [1, 1]} : vector<32x512xf32> to vector<32x128xf32>
    %72 = math.tanh %71 : vector<32x128xf32>
    %73 = vector.extract_strided_slice %54 {offsets = [0, 384], sizes = [32, 128], strides = [1, 1]} : vector<32x512xf32> to vector<32x128xf32>
    %cst_42 = arith.constant 5.000000e-01 : f32
    %74 = vector.broadcast %cst_42 : f32 to vector<32x128xf32>
    %75 = arith.mulf %74, %73 : vector<32x128xf32>
    %76 = math.tanh %75 : vector<32x128xf32>
    %cst_43 = arith.constant 1.000000e+00 : f32
    %77 = vector.broadcast %cst_43 : f32 to vector<32x128xf32>
    %78 = arith.addf %76, %77 : vector<32x128xf32>
    %cst_44 = arith.constant 5.000000e-01 : f32
    %79 = vector.broadcast %cst_44 : f32 to vector<32x128xf32>
    %80 = arith.mulf %79, %78 : vector<32x128xf32>
    %81 = arith.mulf %70, %44 : vector<32x128xf32>
    %82 = arith.mulf %62, %72 : vector<32x128xf32>
    %83 = arith.addf %81, %82 : vector<32x128xf32>
    %84 = math.tanh %83 : vector<32x128xf32>
    %85 = arith.mulf %80, %84 : vector<32x128xf32>
    %c1_45 = arith.constant 1 : index
    %c0_46 = arith.constant 0 : index
    %c0_47 = arith.constant 0 : index
    %86 = vector.load %arg15[%c1_45, %c0_46, %c0_47] : memref<8x32x128xf32, #tpu.memory_space<vmem>>, vector<1x32x128xf32>
    %87 = vector.shape_cast %86 : vector<1x32x128xf32> to vector<32x128xf32>
    %88 = vector.shape_cast %85 : vector<32x128xf32> to vector<1x32x128xf32>
    tpu.vector_store %arg15[%c1_45, %c0_46, %c0_47], %88 {strides = array<i32>} : memref<8x32x128xf32, #tpu.memory_space<vmem>>, vector<1x32x128xf32>,
    %c2 = arith.constant 2 : index
    %c0_48 = arith.constant 0 : index
    %c0_49 = arith.constant 0 : index
    %89 = vector.load %arg14[%c2, %c0_48, %c0_49] : memref<8x32x512xf32, #tpu.memory_space<vmem>>, vector<1x32x512xf32>
    %90 = vector.shape_cast %89 : vector<1x32x512xf32> to vector<32x512xf32>
    %c0_50 = arith.constant 0 : index
    %c0_51 = arith.constant 0 : index
    %91 = vector.load %arg4[%c0_50, %c0_51] : memref<128x512xf32, #tpu.memory_space<vmem>>, vector<128x512xf32>
    %cst_52 = arith.constant dense<0.000000e+00> : vector<32x512xf32>
    %92 = tpu.matmul %85, %91, %cst_52 {dimension_numbers = #tpu.dot_dimension_numbers<[1], [0], [0], [1], [0, 0, 1, 1], [], []>} : vector<32x128xf32>, vector<128x512xf32>, vector<32x512xf32> -> vector<32x512xf32>
    %93 = arith.addf %90, %92 : vector<32x512xf32>
    %94 = vector.extract_strided_slice %93 {offsets = [0, 0], sizes = [32, 128], strides = [1, 1]} : vector<32x512xf32> to vector<32x128xf32>
    %cst_53 = arith.constant 5.000000e-01 : f32
    %95 = vector.broadcast %cst_53 : f32 to vector<32x128xf32>
    %96 = arith.mulf %95, %94 : vector<32x128xf32>
    %97 = math.tanh %96 : vector<32x128xf32>
    %cst_54 = arith.constant 1.000000e+00 : f32
    %98 = vector.broadcast %cst_54 : f32 to vector<32x128xf32>
    %99 = arith.addf %97, %98 : vector<32x128xf32>
    %cst_55 = arith.constant 5.000000e-01 : f32
    %100 = vector.broadcast %cst_55 : f32 to vector<32x128xf32>
    %101 = arith.mulf %100, %99 : vector<32x128xf32>
    %102 = vector.extract_strided_slice %93 {offsets = [0, 128], sizes = [32, 128], strides = [1, 1]} : vector<32x512xf32> to vector<32x128xf32>
    %cst_56 = arith.constant 5.000000e-01 : f32
    %103 = vector.broadcast %cst_56 : f32 to vector<32x128xf32>
    %104 = arith.mulf %103, %102 : vector<32x128xf32>
    %105 = math.tanh %104 : vector<32x128xf32>
    %cst_57 = arith.constant 1.000000e+00 : f32
    %106 = vector.broadcast %cst_57 : f32 to vector<32x128xf32>
    %107 = arith.addf %105, %106 : vector<32x128xf32>
    %cst_58 = arith.constant 5.000000e-01 : f32
    %108 = vector.broadcast %cst_58 : f32 to vector<32x128xf32>
    %109 = arith.mulf %108, %107 : vector<32x128xf32>
    %110 = vector.extract_strided_slice %93 {offsets = [0, 256], sizes = [32, 128], strides = [1, 1]} : vector<32x512xf32> to vector<32x128xf32>
    %111 = math.tanh %110 : vector<32x128xf32>
    %112 = vector.extract_strided_slice %93 {offsets = [0, 384], sizes = [32, 128], strides = [1, 1]} : vector<32x512xf32> to vector<32x128xf32>
    %cst_59 = arith.constant 5.000000e-01 : f32
    %113 = vector.broadcast %cst_59 : f32 to vector<32x128xf32>
    %114 = arith.mulf %113, %112 : vector<32x128xf32>
    %115 = math.tanh %114 : vector<32x128xf32>
    %cst_60 = arith.constant 1.000000e+00 : f32
    %116 = vector.broadcast %cst_60 : f32 to vector<32x128xf32>
    %117 = arith.addf %115, %116 : vector<32x128xf32>
    %cst_61 = arith.constant 5.000000e-01 : f32
    %118 = vector.broadcast %cst_61 : f32 to vector<32x128xf32>
    %119 = arith.mulf %118, %117 : vector<32x128xf32>
    %120 = arith.mulf %109, %83 : vector<32x128xf32>
    %121 = arith.mulf %101, %111 : vector<32x128xf32>
    %122 = arith.addf %120, %121 : vector<32x128xf32>
    %123 = math.tanh %122 : vector<32x128xf32>
    %124 = arith.mulf %119, %123 : vector<32x128xf32>
    %c2_62 = arith.constant 2 : index
    %c0_63 = arith.constant 0 : index
    %c0_64 = arith.constant 0 : index
    %125 = vector.load %arg15[%c2_62, %c0_63, %c0_64] : memref<8x32x128xf32, #tpu.memory_space<vmem>>, vector<1x32x128xf32>
    %126 = vector.shape_cast %125 : vector<1x32x128xf32> to vector<32x128xf32>
    %127 = vector.shape_cast %124 : vector<32x128xf32> to vector<1x32x128xf32>
    tpu.vector_store %arg15[%c2_62, %c0_63, %c0_64], %127 {strides = array<i32>} : memref<8x32x128xf32, #tpu.memory_space<vmem>>, vector<1x32x128xf32>,
    %c3 = arith.constant 3 : index
    %c0_65 = arith.constant 0 : index
    %c0_66 = arith.constant 0 : index
    %128 = vector.load %arg14[%c3, %c0_65, %c0_66] : memref<8x32x512xf32, #tpu.memory_space<vmem>>, vector<1x32x512xf32>
    %129 = vector.shape_cast %128 : vector<1x32x512xf32> to vector<32x512xf32>
    %c0_67 = arith.constant 0 : index
    %c0_68 = arith.constant 0 : index
    %130 = vector.load %arg4[%c0_67, %c0_68] : memref<128x512xf32, #tpu.memory_space<vmem>>, vector<128x512xf32>
    %cst_69 = arith.constant dense<0.000000e+00> : vector<32x512xf32>
    %131 = tpu.matmul %124, %130, %cst_69 {dimension_numbers = #tpu.dot_dimension_numbers<[1], [0], [0], [1], [0, 0, 1, 1], [], []>} : vector<32x128xf32>, vector<128x512xf32>, vector<32x512xf32> -> vector<32x512xf32>
    %132 = arith.addf %129, %131 : vector<32x512xf32>
    %133 = vector.extract_strided_slice %132 {offsets = [0, 0], sizes = [32, 128], strides = [1, 1]} : vector<32x512xf32> to vector<32x128xf32>
    %cst_70 = arith.constant 5.000000e-01 : f32
    %134 = vector.broadcast %cst_70 : f32 to vector<32x128xf32>
    %135 = arith.mulf %134, %133 : vector<32x128xf32>
    %136 = math.tanh %135 : vector<32x128xf32>
    %cst_71 = arith.constant 1.000000e+00 : f32
    %137 = vector.broadcast %cst_71 : f32 to vector<32x128xf32>
    %138 = arith.addf %136, %137 : vector<32x128xf32>
    %cst_72 = arith.constant 5.000000e-01 : f32
    %139 = vector.broadcast %cst_72 : f32 to vector<32x128xf32>
    %140 = arith.mulf %139, %138 : vector<32x128xf32>
    %141 = vector.extract_strided_slice %132 {offsets = [0, 128], sizes = [32, 128], strides = [1, 1]} : vector<32x512xf32> to vector<32x128xf32>
    %cst_73 = arith.constant 5.000000e-01 : f32
    %142 = vector.broadcast %cst_73 : f32 to vector<32x128xf32>
    %143 = arith.mulf %142, %141 : vector<32x128xf32>
    %144 = math.tanh %143 : vector<32x128xf32>
    %cst_74 = arith.constant 1.000000e+00 : f32
    %145 = vector.broadcast %cst_74 : f32 to vector<32x128xf32>
    %146 = arith.addf %144, %145 : vector<32x128xf32>
    %cst_75 = arith.constant 5.000000e-01 : f32
    %147 = vector.broadcast %cst_75 : f32 to vector<32x128xf32>
    %148 = arith.mulf %147, %146 : vector<32x128xf32>
    %149 = vector.extract_strided_slice %132 {offsets = [0, 256], sizes = [32, 128], strides = [1, 1]} : vector<32x512xf32> to vector<32x128xf32>
    %150 = math.tanh %149 : vector<32x128xf32>
    %151 = vector.extract_strided_slice %132 {offsets = [0, 384], sizes = [32, 128], strides = [1, 1]} : vector<32x512xf32> to vector<32x128xf32>
    %cst_76 = arith.constant 5.000000e-01 : f32
    %152 = vector.broadcast %cst_76 : f32 to vector<32x128xf32>
    %153 = arith.mulf %152, %151 : vector<32x128xf32>
    %154 = math.tanh %153 : vector<32x128xf32>
    %cst_77 = arith.constant 1.000000e+00 : f32
    %155 = vector.broadcast %cst_77 : f32 to vector<32x128xf32>
    %156 = arith.addf %154, %155 : vector<32x128xf32>
    %cst_78 = arith.constant 5.000000e-01 : f32
    %157 = vector.broadcast %cst_78 : f32 to vector<32x128xf32>
    %158 = arith.mulf %157, %156 : vector<32x128xf32>
    %159 = arith.mulf %148, %122 : vector<32x128xf32>
    %160 = arith.mulf %140, %150 : vector<32x128xf32>
    %161 = arith.addf %159, %160 : vector<32x128xf32>
    %162 = math.tanh %161 : vector<32x128xf32>
    %163 = arith.mulf %158, %162 : vector<32x128xf32>
    %c3_79 = arith.constant 3 : index
    %c0_80 = arith.constant 0 : index
    %c0_81 = arith.constant 0 : index
    %164 = vector.load %arg15[%c3_79, %c0_80, %c0_81] : memref<8x32x128xf32, #tpu.memory_space<vmem>>, vector<1x32x128xf32>
    %165 = vector.shape_cast %164 : vector<1x32x128xf32> to vector<32x128xf32>
    %166 = vector.shape_cast %163 : vector<32x128xf32> to vector<1x32x128xf32>
    tpu.vector_store %arg15[%c3_79, %c0_80, %c0_81], %166 {strides = array<i32>} : memref<8x32x128xf32, #tpu.memory_space<vmem>>, vector<1x32x128xf32>,
    %c4 = arith.constant 4 : index
    %c0_82 = arith.constant 0 : index
    %c0_83 = arith.constant 0 : index
    %167 = vector.load %arg14[%c4, %c0_82, %c0_83] : memref<8x32x512xf32, #tpu.memory_space<vmem>>, vector<1x32x512xf32>
    %168 = vector.shape_cast %167 : vector<1x32x512xf32> to vector<32x512xf32>
    %c0_84 = arith.constant 0 : index
    %c0_85 = arith.constant 0 : index
    %169 = vector.load %arg4[%c0_84, %c0_85] : memref<128x512xf32, #tpu.memory_space<vmem>>, vector<128x512xf32>
    %cst_86 = arith.constant dense<0.000000e+00> : vector<32x512xf32>
    %170 = tpu.matmul %163, %169, %cst_86 {dimension_numbers = #tpu.dot_dimension_numbers<[1], [0], [0], [1], [0, 0, 1, 1], [], []>} : vector<32x128xf32>, vector<128x512xf32>, vector<32x512xf32> -> vector<32x512xf32>
    %171 = arith.addf %168, %170 : vector<32x512xf32>
    %172 = vector.extract_strided_slice %171 {offsets = [0, 0], sizes = [32, 128], strides = [1, 1]} : vector<32x512xf32> to vector<32x128xf32>
    %cst_87 = arith.constant 5.000000e-01 : f32
    %173 = vector.broadcast %cst_87 : f32 to vector<32x128xf32>
    %174 = arith.mulf %173, %172 : vector<32x128xf32>
    %175 = math.tanh %174 : vector<32x128xf32>
    %cst_88 = arith.constant 1.000000e+00 : f32
    %176 = vector.broadcast %cst_88 : f32 to vector<32x128xf32>
    %177 = arith.addf %175, %176 : vector<32x128xf32>
    %cst_89 = arith.constant 5.000000e-01 : f32
    %178 = vector.broadcast %cst_89 : f32 to vector<32x128xf32>
    %179 = arith.mulf %178, %177 : vector<32x128xf32>
    %180 = vector.extract_strided_slice %171 {offsets = [0, 128], sizes = [32, 128], strides = [1, 1]} : vector<32x512xf32> to vector<32x128xf32>
    %cst_90 = arith.constant 5.000000e-01 : f32
    %181 = vector.broadcast %cst_90 : f32 to vector<32x128xf32>
    %182 = arith.mulf %181, %180 : vector<32x128xf32>
    %183 = math.tanh %182 : vector<32x128xf32>
    %cst_91 = arith.constant 1.000000e+00 : f32
    %184 = vector.broadcast %cst_91 : f32 to vector<32x128xf32>
    %185 = arith.addf %183, %184 : vector<32x128xf32>
    %cst_92 = arith.constant 5.000000e-01 : f32
    %186 = vector.broadcast %cst_92 : f32 to vector<32x128xf32>
    %187 = arith.mulf %186, %185 : vector<32x128xf32>
    %188 = vector.extract_strided_slice %171 {offsets = [0, 256], sizes = [32, 128], strides = [1, 1]} : vector<32x512xf32> to vector<32x128xf32>
    %189 = math.tanh %188 : vector<32x128xf32>
    %190 = vector.extract_strided_slice %171 {offsets = [0, 384], sizes = [32, 128], strides = [1, 1]} : vector<32x512xf32> to vector<32x128xf32>
    %cst_93 = arith.constant 5.000000e-01 : f32
    %191 = vector.broadcast %cst_93 : f32 to vector<32x128xf32>
    %192 = arith.mulf %191, %190 : vector<32x128xf32>
    %193 = math.tanh %192 : vector<32x128xf32>
    %cst_94 = arith.constant 1.000000e+00 : f32
    %194 = vector.broadcast %cst_94 : f32 to vector<32x128xf32>
    %195 = arith.addf %193, %194 : vector<32x128xf32>
    %cst_95 = arith.constant 5.000000e-01 : f32
    %196 = vector.broadcast %cst_95 : f32 to vector<32x128xf32>
    %197 = arith.mulf %196, %195 : vector<32x128xf32>
    %198 = arith.mulf %187, %161 : vector<32x128xf32>
    %199 = arith.mulf %179, %189 : vector<32x128xf32>
    %200 = arith.addf %198, %199 : vector<32x128xf32>
    %201 = math.tanh %200 : vector<32x128xf32>
    %202 = arith.mulf %197, %201 : vector<32x128xf32>
    %c4_96 = arith.constant 4 : index
    %c0_97 = arith.constant 0 : index
    %c0_98 = arith.constant 0 : index
    %203 = vector.load %arg15[%c4_96, %c0_97, %c0_98] : memref<8x32x128xf32, #tpu.memory_space<vmem>>, vector<1x32x128xf32>
    %204 = vector.shape_cast %203 : vector<1x32x128xf32> to vector<32x128xf32>
    %205 = vector.shape_cast %202 : vector<32x128xf32> to vector<1x32x128xf32>
    tpu.vector_store %arg15[%c4_96, %c0_97, %c0_98], %205 {strides = array<i32>} : memref<8x32x128xf32, #tpu.memory_space<vmem>>, vector<1x32x128xf32>,
    %c5 = arith.constant 5 : index
    %c0_99 = arith.constant 0 : index
    %c0_100 = arith.constant 0 : index
    %206 = vector.load %arg14[%c5, %c0_99, %c0_100] : memref<8x32x512xf32, #tpu.memory_space<vmem>>, vector<1x32x512xf32>
    %207 = vector.shape_cast %206 : vector<1x32x512xf32> to vector<32x512xf32>
    %c0_101 = arith.constant 0 : index
    %c0_102 = arith.constant 0 : index
    %208 = vector.load %arg4[%c0_101, %c0_102] : memref<128x512xf32, #tpu.memory_space<vmem>>, vector<128x512xf32>
    %cst_103 = arith.constant dense<0.000000e+00> : vector<32x512xf32>
    %209 = tpu.matmul %202, %208, %cst_103 {dimension_numbers = #tpu.dot_dimension_numbers<[1], [0], [0], [1], [0, 0, 1, 1], [], []>} : vector<32x128xf32>, vector<128x512xf32>, vector<32x512xf32> -> vector<32x512xf32>
    %210 = arith.addf %207, %209 : vector<32x512xf32>
    %211 = vector.extract_strided_slice %210 {offsets = [0, 0], sizes = [32, 128], strides = [1, 1]} : vector<32x512xf32> to vector<32x128xf32>
    %cst_104 = arith.constant 5.000000e-01 : f32
    %212 = vector.broadcast %cst_104 : f32 to vector<32x128xf32>
    %213 = arith.mulf %212, %211 : vector<32x128xf32>
    %214 = math.tanh %213 : vector<32x128xf32>
    %cst_105 = arith.constant 1.000000e+00 : f32
    %215 = vector.broadcast %cst_105 : f32 to vector<32x128xf32>
    %216 = arith.addf %214, %215 : vector<32x128xf32>
    %cst_106 = arith.constant 5.000000e-01 : f32
    %217 = vector.broadcast %cst_106 : f32 to vector<32x128xf32>
    %218 = arith.mulf %217, %216 : vector<32x128xf32>
    %219 = vector.extract_strided_slice %210 {offsets = [0, 128], sizes = [32, 128], strides = [1, 1]} : vector<32x512xf32> to vector<32x128xf32>
    %cst_107 = arith.constant 5.000000e-01 : f32
    %220 = vector.broadcast %cst_107 : f32 to vector<32x128xf32>
    %221 = arith.mulf %220, %219 : vector<32x128xf32>
    %222 = math.tanh %221 : vector<32x128xf32>
    %cst_108 = arith.constant 1.000000e+00 : f32
    %223 = vector.broadcast %cst_108 : f32 to vector<32x128xf32>
    %224 = arith.addf %222, %223 : vector<32x128xf32>
    %cst_109 = arith.constant 5.000000e-01 : f32
    %225 = vector.broadcast %cst_109 : f32 to vector<32x128xf32>
    %226 = arith.mulf %225, %224 : vector<32x128xf32>
    %227 = vector.extract_strided_slice %210 {offsets = [0, 256], sizes = [32, 128], strides = [1, 1]} : vector<32x512xf32> to vector<32x128xf32>
    %228 = math.tanh %227 : vector<32x128xf32>
    %229 = vector.extract_strided_slice %210 {offsets = [0, 384], sizes = [32, 128], strides = [1, 1]} : vector<32x512xf32> to vector<32x128xf32>
    %cst_110 = arith.constant 5.000000e-01 : f32
    %230 = vector.broadcast %cst_110 : f32 to vector<32x128xf32>
    %231 = arith.mulf %230, %229 : vector<32x128xf32>
    %232 = math.tanh %231 : vector<32x128xf32>
    %cst_111 = arith.constant 1.000000e+00 : f32
    %233 = vector.broadcast %cst_111 : f32 to vector<32x128xf32>
    %234 = arith.addf %232, %233 : vector<32x128xf32>
    %cst_112 = arith.constant 5.000000e-01 : f32
    %235 = vector.broadcast %cst_112 : f32 to vector<32x128xf32>
    %236 = arith.mulf %235, %234 : vector<32x128xf32>
    %237 = arith.mulf %226, %200 : vector<32x128xf32>
    %238 = arith.mulf %218, %228 : vector<32x128xf32>
    %239 = arith.addf %237, %238 : vector<32x128xf32>
    %240 = math.tanh %239 : vector<32x128xf32>
    %241 = arith.mulf %236, %240 : vector<32x128xf32>
    %c5_113 = arith.constant 5 : index
    %c0_114 = arith.constant 0 : index
    %c0_115 = arith.constant 0 : index
    %242 = vector.load %arg15[%c5_113, %c0_114, %c0_115] : memref<8x32x128xf32, #tpu.memory_space<vmem>>, vector<1x32x128xf32>
    %243 = vector.shape_cast %242 : vector<1x32x128xf32> to vector<32x128xf32>
    %244 = vector.shape_cast %241 : vector<32x128xf32> to vector<1x32x128xf32>
    tpu.vector_store %arg15[%c5_113, %c0_114, %c0_115], %244 {strides = array<i32>} : memref<8x32x128xf32, #tpu.memory_space<vmem>>, vector<1x32x128xf32>,
    %c6 = arith.constant 6 : index
    %c0_116 = arith.constant 0 : index
    %c0_117 = arith.constant 0 : index
    %245 = vector.load %arg14[%c6, %c0_116, %c0_117] : memref<8x32x512xf32, #tpu.memory_space<vmem>>, vector<1x32x512xf32>
    %246 = vector.shape_cast %245 : vector<1x32x512xf32> to vector<32x512xf32>
    %c0_118 = arith.constant 0 : index
    %c0_119 = arith.constant 0 : index
    %247 = vector.load %arg4[%c0_118, %c0_119] : memref<128x512xf32, #tpu.memory_space<vmem>>, vector<128x512xf32>
    %cst_120 = arith.constant dense<0.000000e+00> : vector<32x512xf32>
    %248 = tpu.matmul %241, %247, %cst_120 {dimension_numbers = #tpu.dot_dimension_numbers<[1], [0], [0], [1], [0, 0, 1, 1], [], []>} : vector<32x128xf32>, vector<128x512xf32>, vector<32x512xf32> -> vector<32x512xf32>
    %249 = arith.addf %246, %248 : vector<32x512xf32>
    %250 = vector.extract_strided_slice %249 {offsets = [0, 0], sizes = [32, 128], strides = [1, 1]} : vector<32x512xf32> to vector<32x128xf32>
    %cst_121 = arith.constant 5.000000e-01 : f32
    %251 = vector.broadcast %cst_121 : f32 to vector<32x128xf32>
    %252 = arith.mulf %251, %250 : vector<32x128xf32>
    %253 = math.tanh %252 : vector<32x128xf32>
    %cst_122 = arith.constant 1.000000e+00 : f32
    %254 = vector.broadcast %cst_122 : f32 to vector<32x128xf32>
    %255 = arith.addf %253, %254 : vector<32x128xf32>
    %cst_123 = arith.constant 5.000000e-01 : f32
    %256 = vector.broadcast %cst_123 : f32 to vector<32x128xf32>
    %257 = arith.mulf %256, %255 : vector<32x128xf32>
    %258 = vector.extract_strided_slice %249 {offsets = [0, 128], sizes = [32, 128], strides = [1, 1]} : vector<32x512xf32> to vector<32x128xf32>
    %cst_124 = arith.constant 5.000000e-01 : f32
    %259 = vector.broadcast %cst_124 : f32 to vector<32x128xf32>
    %260 = arith.mulf %259, %258 : vector<32x128xf32>
    %261 = math.tanh %260 : vector<32x128xf32>
    %cst_125 = arith.constant 1.000000e+00 : f32
    %262 = vector.broadcast %cst_125 : f32 to vector<32x128xf32>
    %263 = arith.addf %261, %262 : vector<32x128xf32>
    %cst_126 = arith.constant 5.000000e-01 : f32
    %264 = vector.broadcast %cst_126 : f32 to vector<32x128xf32>
    %265 = arith.mulf %264, %263 : vector<32x128xf32>
    %266 = vector.extract_strided_slice %249 {offsets = [0, 256], sizes = [32, 128], strides = [1, 1]} : vector<32x512xf32> to vector<32x128xf32>
    %267 = math.tanh %266 : vector<32x128xf32>
    %268 = vector.extract_strided_slice %249 {offsets = [0, 384], sizes = [32, 128], strides = [1, 1]} : vector<32x512xf32> to vector<32x128xf32>
    %cst_127 = arith.constant 5.000000e-01 : f32
    %269 = vector.broadcast %cst_127 : f32 to vector<32x128xf32>
    %270 = arith.mulf %269, %268 : vector<32x128xf32>
    %271 = math.tanh %270 : vector<32x128xf32>
    %cst_128 = arith.constant 1.000000e+00 : f32
    %272 = vector.broadcast %cst_128 : f32 to vector<32x128xf32>
    %273 = arith.addf %271, %272 : vector<32x128xf32>
    %cst_129 = arith.constant 5.000000e-01 : f32
    %274 = vector.broadcast %cst_129 : f32 to vector<32x128xf32>
    %275 = arith.mulf %274, %273 : vector<32x128xf32>
    %276 = arith.mulf %265, %239 : vector<32x128xf32>
    %277 = arith.mulf %257, %267 : vector<32x128xf32>
    %278 = arith.addf %276, %277 : vector<32x128xf32>
    %279 = math.tanh %278 : vector<32x128xf32>
    %280 = arith.mulf %275, %279 : vector<32x128xf32>
    %c6_130 = arith.constant 6 : index
    %c0_131 = arith.constant 0 : index
    %c0_132 = arith.constant 0 : index
    %281 = vector.load %arg15[%c6_130, %c0_131, %c0_132] : memref<8x32x128xf32, #tpu.memory_space<vmem>>, vector<1x32x128xf32>
    %282 = vector.shape_cast %281 : vector<1x32x128xf32> to vector<32x128xf32>
    %283 = vector.shape_cast %280 : vector<32x128xf32> to vector<1x32x128xf32>
    tpu.vector_store %arg15[%c6_130, %c0_131, %c0_132], %283 {strides = array<i32>} : memref<8x32x128xf32, #tpu.memory_space<vmem>>, vector<1x32x128xf32>,
    %c7 = arith.constant 7 : index
    %c0_133 = arith.constant 0 : index
    %c0_134 = arith.constant 0 : index
    %284 = vector.load %arg14[%c7, %c0_133, %c0_134] : memref<8x32x512xf32, #tpu.memory_space<vmem>>, vector<1x32x512xf32>
    %285 = vector.shape_cast %284 : vector<1x32x512xf32> to vector<32x512xf32>
    %c0_135 = arith.constant 0 : index
    %c0_136 = arith.constant 0 : index
    %286 = vector.load %arg4[%c0_135, %c0_136] : memref<128x512xf32, #tpu.memory_space<vmem>>, vector<128x512xf32>
    %cst_137 = arith.constant dense<0.000000e+00> : vector<32x512xf32>
    %287 = tpu.matmul %280, %286, %cst_137 {dimension_numbers = #tpu.dot_dimension_numbers<[1], [0], [0], [1], [0, 0, 1, 1], [], []>} : vector<32x128xf32>, vector<128x512xf32>, vector<32x512xf32> -> vector<32x512xf32>
    %288 = arith.addf %285, %287 : vector<32x512xf32>
    %289 = vector.extract_strided_slice %288 {offsets = [0, 0], sizes = [32, 128], strides = [1, 1]} : vector<32x512xf32> to vector<32x128xf32>
    %cst_138 = arith.constant 5.000000e-01 : f32
    %290 = vector.broadcast %cst_138 : f32 to vector<32x128xf32>
    %291 = arith.mulf %290, %289 : vector<32x128xf32>
    %292 = math.tanh %291 : vector<32x128xf32>
    %cst_139 = arith.constant 1.000000e+00 : f32
    %293 = vector.broadcast %cst_139 : f32 to vector<32x128xf32>
    %294 = arith.addf %292, %293 : vector<32x128xf32>
    %cst_140 = arith.constant 5.000000e-01 : f32
    %295 = vector.broadcast %cst_140 : f32 to vector<32x128xf32>
    %296 = arith.mulf %295, %294 : vector<32x128xf32>
    %297 = vector.extract_strided_slice %288 {offsets = [0, 128], sizes = [32, 128], strides = [1, 1]} : vector<32x512xf32> to vector<32x128xf32>
    %cst_141 = arith.constant 5.000000e-01 : f32
    %298 = vector.broadcast %cst_141 : f32 to vector<32x128xf32>
    %299 = arith.mulf %298, %297 : vector<32x128xf32>
    %300 = math.tanh %299 : vector<32x128xf32>
    %cst_142 = arith.constant 1.000000e+00 : f32
    %301 = vector.broadcast %cst_142 : f32 to vector<32x128xf32>
    %302 = arith.addf %300, %301 : vector<32x128xf32>
    %cst_143 = arith.constant 5.000000e-01 : f32
    %303 = vector.broadcast %cst_143 : f32 to vector<32x128xf32>
    %304 = arith.mulf %303, %302 : vector<32x128xf32>
    %305 = vector.extract_strided_slice %288 {offsets = [0, 256], sizes = [32, 128], strides = [1, 1]} : vector<32x512xf32> to vector<32x128xf32>
    %306 = math.tanh %305 : vector<32x128xf32>
    %307 = vector.extract_strided_slice %288 {offsets = [0, 384], sizes = [32, 128], strides = [1, 1]} : vector<32x512xf32> to vector<32x128xf32>
    %cst_144 = arith.constant 5.000000e-01 : f32
    %308 = vector.broadcast %cst_144 : f32 to vector<32x128xf32>
    %309 = arith.mulf %308, %307 : vector<32x128xf32>
    %310 = math.tanh %309 : vector<32x128xf32>
    %cst_145 = arith.constant 1.000000e+00 : f32
    %311 = vector.broadcast %cst_145 : f32 to vector<32x128xf32>
    %312 = arith.addf %310, %311 : vector<32x128xf32>
    %cst_146 = arith.constant 5.000000e-01 : f32
    %313 = vector.broadcast %cst_146 : f32 to vector<32x128xf32>
    %314 = arith.mulf %313, %312 : vector<32x128xf32>
    %315 = arith.mulf %304, %278 : vector<32x128xf32>
    %316 = arith.mulf %296, %306 : vector<32x128xf32>
    %317 = arith.addf %315, %316 : vector<32x128xf32>
    %318 = math.tanh %317 : vector<32x128xf32>
    %319 = arith.mulf %314, %318 : vector<32x128xf32>
    %c7_147 = arith.constant 7 : index
    %c0_148 = arith.constant 0 : index
    %c0_149 = arith.constant 0 : index
    %320 = vector.load %arg15[%c7_147, %c0_148, %c0_149] : memref<8x32x128xf32, #tpu.memory_space<vmem>>, vector<1x32x128xf32>
    %321 = vector.shape_cast %320 : vector<1x32x128xf32> to vector<32x128xf32>
    %322 = vector.shape_cast %319 : vector<32x128xf32> to vector<1x32x128xf32>
    tpu.vector_store %arg15[%c7_147, %c0_148, %c0_149], %322 {strides = array<i32>} : memref<8x32x128xf32, #tpu.memory_space<vmem>>, vector<1x32x128xf32>,
    %c0_150 = arith.constant 0 : index
    %c0_151 = arith.constant 0 : index
    %323 = vector.load %arg12[%c0_150, %c0_151] : memref<32x128xf32, #tpu.memory_space<vmem>>, vector<32x128xf32>
    tpu.vector_store %arg12[%c0_150, %c0_151], %319 {strides = array<i32>} : memref<32x128xf32, #tpu.memory_space<vmem>>, vector<32x128xf32>,
    %c0_152 = arith.constant 0 : index
    %c0_153 = arith.constant 0 : index
    %324 = vector.load %arg13[%c0_152, %c0_153] : memref<32x128xf32, #tpu.memory_space<vmem>>, vector<32x128xf32>
    tpu.vector_store %arg13[%c0_152, %c0_153], %317 {strides = array<i32>} : memref<32x128xf32, #tpu.memory_space<vmem>>, vector<32x128xf32>,
    %c0_154 = arith.constant 0 : index
    %c0_155 = arith.constant 0 : index
    %c0_156 = arith.constant 0 : index
    %325 = vector.load %arg15[%c0_154, %c0_155, %c0_156] : memref<8x32x128xf32, #tpu.memory_space<vmem>>, vector<1x32x128xf32>
    %326 = vector.shape_cast %325 : vector<1x32x128xf32> to vector<32x128xf32>
    %c0_157 = arith.constant 0 : index
    %c0_158 = arith.constant 0 : index
    %c0_159 = arith.constant 0 : index
    %327 = vector.load %arg11[%c0_157, %c0_158, %c0_159] : memref<32x8x128xf32, #tpu.memory_space<vmem>>, vector<32x1x128xf32>
    %328 = vector.shape_cast %327 : vector<32x1x128xf32> to vector<32x128xf32>
    %329 = vector.shape_cast %326 : vector<32x128xf32> to vector<32x1x128xf32>
    tpu.vector_store %arg11[%c0_157, %c0_158, %c0_159], %329 {strides = array<i32>} : memref<32x8x128xf32, #tpu.memory_space<vmem>>, vector<32x1x128xf32>,
    %c1_160 = arith.constant 1 : index
    %c0_161 = arith.constant 0 : index
    %c0_162 = arith.constant 0 : index
    %330 = vector.load %arg15[%c1_160, %c0_161, %c0_162] : memref<8x32x128xf32, #tpu.memory_space<vmem>>, vector<1x32x128xf32>
    %331 = vector.shape_cast %330 : vector<1x32x128xf32> to vector<32x128xf32>
    %c0_163 = arith.constant 0 : index
    %c1_164 = arith.constant 1 : index
    %c0_165 = arith.constant 0 : index
    %332 = vector.load %arg11[%c0_163, %c1_164, %c0_165] : memref<32x8x128xf32, #tpu.memory_space<vmem>>, vector<32x1x128xf32>
    %333 = vector.shape_cast %332 : vector<32x1x128xf32> to vector<32x128xf32>
    %334 = vector.shape_cast %331 : vector<32x128xf32> to vector<32x1x128xf32>
    tpu.vector_store %arg11[%c0_163, %c1_164, %c0_165], %334 {strides = array<i32>} : memref<32x8x128xf32, #tpu.memory_space<vmem>>, vector<32x1x128xf32>,
    %c2_166 = arith.constant 2 : index
    %c0_167 = arith.constant 0 : index
    %c0_168 = arith.constant 0 : index
    %335 = vector.load %arg15[%c2_166, %c0_167, %c0_168] : memref<8x32x128xf32, #tpu.memory_space<vmem>>, vector<1x32x128xf32>
    %336 = vector.shape_cast %335 : vector<1x32x128xf32> to vector<32x128xf32>
    %c0_169 = arith.constant 0 : index
    %c2_170 = arith.constant 2 : index
    %c0_171 = arith.constant 0 : index
    %337 = vector.load %arg11[%c0_169, %c2_170, %c0_171] : memref<32x8x128xf32, #tpu.memory_space<vmem>>, vector<32x1x128xf32>
    %338 = vector.shape_cast %337 : vector<32x1x128xf32> to vector<32x128xf32>
    %339 = vector.shape_cast %336 : vector<32x128xf32> to vector<32x1x128xf32>
    tpu.vector_store %arg11[%c0_169, %c2_170, %c0_171], %339 {strides = array<i32>} : memref<32x8x128xf32, #tpu.memory_space<vmem>>, vector<32x1x128xf32>,
    %c3_172 = arith.constant 3 : index
    %c0_173 = arith.constant 0 : index
    %c0_174 = arith.constant 0 : index
    %340 = vector.load %arg15[%c3_172, %c0_173, %c0_174] : memref<8x32x128xf32, #tpu.memory_space<vmem>>, vector<1x32x128xf32>
    %341 = vector.shape_cast %340 : vector<1x32x128xf32> to vector<32x128xf32>
    %c0_175 = arith.constant 0 : index
    %c3_176 = arith.constant 3 : index
    %c0_177 = arith.constant 0 : index
    %342 = vector.load %arg11[%c0_175, %c3_176, %c0_177] : memref<32x8x128xf32, #tpu.memory_space<vmem>>, vector<32x1x128xf32>
    %343 = vector.shape_cast %342 : vector<32x1x128xf32> to vector<32x128xf32>
    %344 = vector.shape_cast %341 : vector<32x128xf32> to vector<32x1x128xf32>
    tpu.vector_store %arg11[%c0_175, %c3_176, %c0_177], %344 {strides = array<i32>} : memref<32x8x128xf32, #tpu.memory_space<vmem>>, vector<32x1x128xf32>,
    %c4_178 = arith.constant 4 : index
    %c0_179 = arith.constant 0 : index
    %c0_180 = arith.constant 0 : index
    %345 = vector.load %arg15[%c4_178, %c0_179, %c0_180] : memref<8x32x128xf32, #tpu.memory_space<vmem>>, vector<1x32x128xf32>
    %346 = vector.shape_cast %345 : vector<1x32x128xf32> to vector<32x128xf32>
    %c0_181 = arith.constant 0 : index
    %c4_182 = arith.constant 4 : index
    %c0_183 = arith.constant 0 : index
    %347 = vector.load %arg11[%c0_181, %c4_182, %c0_183] : memref<32x8x128xf32, #tpu.memory_space<vmem>>, vector<32x1x128xf32>
    %348 = vector.shape_cast %347 : vector<32x1x128xf32> to vector<32x128xf32>
    %349 = vector.shape_cast %346 : vector<32x128xf32> to vector<32x1x128xf32>
    tpu.vector_store %arg11[%c0_181, %c4_182, %c0_183], %349 {strides = array<i32>} : memref<32x8x128xf32, #tpu.memory_space<vmem>>, vector<32x1x128xf32>,
    %c5_184 = arith.constant 5 : index
    %c0_185 = arith.constant 0 : index
    %c0_186 = arith.constant 0 : index
    %350 = vector.load %arg15[%c5_184, %c0_185, %c0_186] : memref<8x32x128xf32, #tpu.memory_space<vmem>>, vector<1x32x128xf32>
    %351 = vector.shape_cast %350 : vector<1x32x128xf32> to vector<32x128xf32>
    %c0_187 = arith.constant 0 : index
    %c5_188 = arith.constant 5 : index
    %c0_189 = arith.constant 0 : index
    %352 = vector.load %arg11[%c0_187, %c5_188, %c0_189] : memref<32x8x128xf32, #tpu.memory_space<vmem>>, vector<32x1x128xf32>
    %353 = vector.shape_cast %352 : vector<32x1x128xf32> to vector<32x128xf32>
    %354 = vector.shape_cast %351 : vector<32x128xf32> to vector<32x1x128xf32>
    tpu.vector_store %arg11[%c0_187, %c5_188, %c0_189], %354 {strides = array<i32>} : memref<32x8x128xf32, #tpu.memory_space<vmem>>, vector<32x1x128xf32>,
    %c6_190 = arith.constant 6 : index
    %c0_191 = arith.constant 0 : index
    %c0_192 = arith.constant 0 : index
    %355 = vector.load %arg15[%c6_190, %c0_191, %c0_192] : memref<8x32x128xf32, #tpu.memory_space<vmem>>, vector<1x32x128xf32>
    %356 = vector.shape_cast %355 : vector<1x32x128xf32> to vector<32x128xf32>
    %c0_193 = arith.constant 0 : index
    %c6_194 = arith.constant 6 : index
    %c0_195 = arith.constant 0 : index
    %357 = vector.load %arg11[%c0_193, %c6_194, %c0_195] : memref<32x8x128xf32, #tpu.memory_space<vmem>>, vector<32x1x128xf32>
    %358 = vector.shape_cast %357 : vector<32x1x128xf32> to vector<32x128xf32>
    %359 = vector.shape_cast %356 : vector<32x128xf32> to vector<32x1x128xf32>
    tpu.vector_store %arg11[%c0_193, %c6_194, %c0_195], %359 {strides = array<i32>} : memref<32x8x128xf32, #tpu.memory_space<vmem>>, vector<32x1x128xf32>,
    %c7_196 = arith.constant 7 : index
    %c0_197 = arith.constant 0 : index
    %c0_198 = arith.constant 0 : index
    %360 = vector.load %arg15[%c7_196, %c0_197, %c0_198] : memref<8x32x128xf32, #tpu.memory_space<vmem>>, vector<1x32x128xf32>
    %361 = vector.shape_cast %360 : vector<1x32x128xf32> to vector<32x128xf32>
    %c0_199 = arith.constant 0 : index
    %c7_200 = arith.constant 7 : index
    %c0_201 = arith.constant 0 : index
    %362 = vector.load %arg11[%c0_199, %c7_200, %c0_201] : memref<32x8x128xf32, #tpu.memory_space<vmem>>, vector<32x1x128xf32>
    %363 = vector.shape_cast %362 : vector<32x1x128xf32> to vector<32x128xf32>
    %364 = vector.shape_cast %361 : vector<32x128xf32> to vector<32x1x128xf32>
    tpu.vector_store %arg11[%c0_199, %c7_200, %c0_201], %364 {strides = array<i32>} : memref<32x8x128xf32, #tpu.memory_space<vmem>>, vector<32x1x128xf32>,
    %c0_202 = arith.constant 0 : index
    %c0_203 = arith.constant 0 : index
    %c0_204 = arith.constant 0 : index
    %365 = vector.load %arg11[%c0_202, %c0_203, %c0_204] : memref<32x8x128xf32, #tpu.memory_space<vmem>>, vector<32x8x128xf32>
    %366 = vector.shape_cast %365 : vector<32x8x128xf32> to vector<256x128xf32>
    %cst_205 = arith.constant 0.000000e+00 : f32
    %367 = vector.broadcast %cst_205 : f32 to vector<256x128xf32>
    %368 = arith.maximumf %366, %367 : vector<256x128xf32>
    %c0_206 = arith.constant 0 : index
    %c0_207 = arith.constant 0 : index
    %369 = vector.load %arg6[%c0_206, %c0_207] : memref<128x256xf32, #tpu.memory_space<vmem>>, vector<128x256xf32>
    %cst_208 = arith.constant dense<0.000000e+00> : vector<256x256xf32>
    %370 = tpu.matmul %368, %369, %cst_208 {dimension_numbers = #tpu.dot_dimension_numbers<[1], [0], [0], [1], [0, 0, 1, 1], [], []>} : vector<256x128xf32>, vector<128x256xf32>, vector<256x256xf32> -> vector<256x256xf32>
    %c0_209 = arith.constant 0 : index
    %c0_210 = arith.constant 0 : index
    %371 = vector.load %arg7[%c0_209, %c0_210] : memref<1x256xf32, #tpu.memory_space<vmem>>, vector<1x256xf32>
    %372 = vector.broadcast %371 : vector<1x256xf32> to vector<256x256xf32>
    %373 = arith.addf %370, %372 : vector<256x256xf32>
    %cst_211 = arith.constant 0.000000e+00 : f32
    %374 = vector.broadcast %cst_211 : f32 to vector<256x256xf32>
    %375 = arith.maximumf %373, %374 : vector<256x256xf32>
    %c0_212 = arith.constant 0 : index
    %c0_213 = arith.constant 0 : index
    %376 = vector.load %arg8[%c0_212, %c0_213] : memref<256x4xf32, #tpu.memory_space<vmem>>, vector<256x4xf32>
    %cst_214 = arith.constant dense<0.000000e+00> : vector<256x4xf32>
    %377 = tpu.matmul %375, %376, %cst_214 {dimension_numbers = #tpu.dot_dimension_numbers<[1], [0], [0], [1], [0, 0, 1, 1], [], []>} : vector<256x256xf32>, vector<256x4xf32>, vector<256x4xf32> -> vector<256x4xf32>
    %c0_215 = arith.constant 0 : index
    %c0_216 = arith.constant 0 : index
    %378 = vector.load %arg9[%c0_215, %c0_216] : memref<1x4xf32, #tpu.memory_space<vmem>>, vector<1x4xf32>
    %379 = vector.broadcast %378 : vector<1x4xf32> to vector<256x4xf32>
    %380 = arith.addf %377, %379 : vector<256x4xf32>
    %c0_217 = arith.constant 0 : index
    %c0_218 = arith.constant 0 : index
    %381 = vector.load %arg10[%c0_217, %c0_218] : memref<256x4xf32, #tpu.memory_space<vmem>>, vector<256x4xf32>
    tpu.vector_store %arg10[%c0_217, %c0_218], %380 {strides = array<i32>} : memref<256x4xf32, #tpu.memory_space<vmem>>, vector<256x4xf32>,
    return
  }
}

</mosaic_0001>

<bundles_post_ra>
// kernel: temporal_difference_net_forward.1
= control target key start
LH: loop header
LB: loop body
LE: loop exit
PB: predicated region body
PF: predicated region fallthrough
CT: control target
= control target key end

     0   :  { %19 = vsyncpa [#allocation5], 0  ;;  %s8364_s0 = inlined_call_operand.vmem [shape: f32[8,32,16], index: 0, kind: input, shape index: {}]   ;;  %s8365_s1 = inlined_call_operand.vmem [shape: f32[32,128], index: 1, kind: input, shape index: {}]   ;;  %s8366_s2 = inlined_call_operand.vmem [shape: f32[32,128], index: 2, kind: input, shape index: {}]   ;;  %s8367_s3 = inlined_call_operand.vmem [shape: f32[16,512], index: 3, kind: input, shape index: {}]   ;;  %s8368_s4 = inlined_call_operand.vmem [shape: f32[128,512], index: 4, kind: input, shape index: {}]   ;;  %s8369_s5 = inlined_call_operand.hbm [shape: f32[1,512], index: 5, kind: input, shape index: {}]   ;;  %s8370_s6 = inlined_call_operand.hbm [shape: f32[128,256], index: 6, kind: input, shape index: {}]   ;;  %s8371_s7 = inlined_call_operand.hbm [shape: f32[1,256], index: 7, kind: input, shape index: {}]   ;;  %s8372_s8 = inlined_call_operand.vmem [shape: f32[256,4], index: 8, kind: input, shape index: {}]   ;;  %s8373_s9 = inlined_call_operand.hbm [shape: f32[1,4], index: 9, kind: input, shape index: {}]   ;;  %s8374_s10 = inlined_call_operand.vmem [shape: f32[256,4], index: 10, kind: output, shape index: {0}]   ;;  %s8375_s11 = inlined_call_operand.hbm [shape: f32[32,8,128], index: 11, kind: output, shape index: {1}]   ;;  %s8376_s12 = inlined_call_operand.hbm [shape: f32[32,128], index: 12, kind: output, shape index: {2}]   ;;  %s8377_s13 = inlined_call_operand.hbm [shape: f32[32,128], index: 13, kind: output, shape index: {3}]  }
   0x1   :  { %20 = vsyncpa [#allocation8], 0 }
   0x2   :  { %21 = vsyncpa [#allocation11], 0 }
   0x3   :  { %22 = vsyncpa [#allocation6], 0  ;;  %s49_s27 = sshll.u32 %s8370_s6, 4  ;;  %s50_s27 = int_to_ptr.hbm [resolvable:$true] %s49_s27 }
   0x4   :  { %23 = vsyncpa [#allocation14], 0  ;;  %s5375_s28 = smov [#allocation7]   ;;  %s39_s15 = sshll.u32 %s8369_s5, 4  ;;  %s40_s15 = int_to_ptr.hbm [resolvable:$true] %s39_s15 }
   0x5   :  { %s51_s29 = sshll.u32 %s5375_s28, 4  ;;  %s5376_s16 = smov 256   ;;  %s52_s29 = int_to_ptr.vmem [resolvable:$true] %s51_s29 }
   0x6   :  { %s5377_s17 = smov 16   ;;  %s5378_s18 = smov [#allocation4]  }
   0x7   :  { %57 = dma.hbm_to_vmem [thread:$0]  %s50_s27, 4096, %s52_s29, [#allocation8], %s5376_s16, %s5376_s16, %s5377_s17  }
   0x8   :  { %s41_s19 = sshll.u32 %s5378_s18, 4  ;;  %s63_s22 = sshll.u32 %s8371_s7, 4  ;;  %s42_s19 = int_to_ptr.vmem [resolvable:$true] %s41_s19  ;;  %s64_s22 = int_to_ptr.hbm [resolvable:$true] %s63_s22 }
   0x9   :  { %44 = dma.hbm_to_vmem [thread:$0]  %s40_s15, 64, %s42_s19, [#allocation5]  }
   0xa   :  { %s76_s24 = sshll.u32 %s8373_s9, 4  ;;  %s5379_s25 = smov [#allocation9]   ;;  %s77_s24 = int_to_ptr.hbm [resolvable:$true] %s76_s24 }
   0xb   :  { %s65_s26 = sshll.u32 %s5379_s25, 4  ;;  %s5380_s5 = smov [#allocation10]   ;;  %s66_s26 = int_to_ptr.vmem [resolvable:$true] %s65_s26 }
   0xc   :  { %68 = dma.hbm_to_vmem [thread:$0]  %s64_s22, 32, %s66_s26, [#allocation8]  }
   0xd   :  { %s78_s27 = sshll.u32 %s5380_s5, 4  ;;  %s79_s27 = int_to_ptr.vmem [resolvable:$true] %s78_s27 }
   0xe   :  { %81 = dma.hbm_to_vmem [thread:$0]  %s77_s24, 16, %s79_s27, [#allocation11]  }
   0xf   :  { %5365 = dma.done.wait [#allocation5], 64  }
  0x10   :  { %5366 = vsyncadd [#allocation5], 4294967232 }
  0x11   :  { %5367 = dma.done.wait [#allocation8], 4128  }
  0x12   :  { %5368 = vsyncadd [#allocation8], 4294963168 }
  0x13   :  { %5369 = dma.done.wait [#allocation11], 16  }
  0x14   :  { %5370 = vsyncadd [#allocation11], 4294967280  ;;  %v134_v0 = vld [vmem:[%s8367_s3 + $0x20] sm:$0xff]  ;;  %v135_v1 = vld [vmem:[%s8367_s3 + $0x28] sm:$0xff]  ;;  %vm148_vm0 = vcmask 130048   ;;  %vm4581_vm1 = vcmask 31744  }
  0x15   :  { %v136_v2 = vld [vmem:[%s8367_s3 + $0x30] sm:$0xff]  ;;  %259 = vmatpush.msra.mxu0 %v134_v0  ;;  %372 = vmatpush.msra.mxu1 %v135_v1  ;;  %v137_v3 = vld [vmem:[%s8367_s3 + $0x38] sm:$0xff]  ;;  %v130_v4 = vld [vmem:[%s8367_s3] sm:$0xff]  ;;  %s4635_s28 = sshll.u32 %s8376_s12, 4  ;;  %s5382_s29 = smov 128   ;;  %s4636_s28 = int_to_ptr.hbm [resolvable:$true] %s4635_s28 }
  0x16   :  { %v131_v5 = vld [vmem:[%s8367_s3 + $0x8] sm:$0xff]  ;;  %485 = vmatpush.msra.mxu2 %v136_v2  ;;  %598 = vmatpush.msra.mxu3 %v137_v3  ;;  %v132_v6 = vld [vmem:[%s8367_s3 + $0x10] sm:$0xff]  ;;  %v133_v7 = vld [vmem:[%s8367_s3 + $0x18] sm:$0xff]  ;;  %s5383_s30 = smov 8   ;;  %s5384_s14 = smov [#allocation12]  }
  0x17   :  { %v98_v8 = vld [vmem:[%s8364_s0] sm:$0xff]  ;;  %260 = vmatpush.msra.mxu0 %v130_v4  ;;  %373 = vmatpush.msra.mxu1 %v131_v5  ;;  %v910_v10 = vld [vmem:[%s8368_s4 + $0x1e8] sm:$0xff]  ;;  %v911_v11 = vld [vmem:[%s8368_s4 + $0x1f0] sm:$0xff]  ;;  %s4620_s15 = sshll.u32 %s5384_s14, 4  ;;  %s4622_s17 = sshll.u32 %s8375_s11, 4  ;;  %s4621_s15 = int_to_ptr.vmem [resolvable:$true] %s4620_s15  ;;  %s4623_s17 = int_to_ptr.hbm [resolvable:$true] %s4622_s17 }
  0x18   :  { %486 = vmatpush.msra.mxu2 %v132_v6  ;;  %599 = vmatpush.msra.mxu3 %v133_v7  ;;  %v909_v9 = vld [vmem:[%s8368_s4 + $0x1e0] sm:$0xff]  ;;  %v912_v12 = vld [vmem:[%s8368_s4 + $0x1f8] sm:$0xff]  ;;  %v906_v14 = vld [vmem:[%s8368_s4 + $0x1c8] sm:$0xff]  ;;  %s5385_s21 = smov [#allocation15]  }
  0x19   :  { %4674 = vmatmul.msk.f32.vlgmr.msra.gmra.mxu0 %vm148_vm0, %v98_v8  ;;  %4706 = vmatmul.msk.f32.vlgmr.msra.gmra.mxu1 %vm148_vm0, %v98_v8  ;;  %v905_v13 = vld [vmem:[%s8368_s4 + $0x1c0] sm:$0xff]  ;;  %v907_v15 = vld [vmem:[%s8368_s4 + $0x1d0] sm:$0xff]  ;;  %v908_v16 = vld [vmem:[%s8368_s4 + $0x1d8] sm:$0xff]  ;;  %s4646_s22 = sshll.u32 %s5385_s21, 4  ;;  %s4647_s22 = int_to_ptr.vmem [resolvable:$true] %s4646_s22 }
  0x1a   :  { %4738 = vmatmul.msk.f32.vlgmr.msra.gmra.mxu2 %vm148_vm0, %v98_v8  ;;  %4770 = vmatmul.msk.f32.vlgmr.msra.gmra.mxu3 %vm148_vm0, %v98_v8  ;;  %v901_v17 = vld [vmem:[%s8368_s4 + $0x1a0] sm:$0xff]  ;;  %v902_v18 = vld [vmem:[%s8368_s4 + $0x1a8] sm:$0xff]  ;;  %v903_v19 = vld [vmem:[%s8368_s4 + $0x1b0] sm:$0xff] }
  0x1b   :  { %913 = vmatpush.msrb.mxu0 %v909_v9  ;;  %942 = vmatpush.msrb.mxu1 %v910_v10  ;;  %v904_v20 = vld [vmem:[%s8368_s4 + $0x1b8] sm:$0xff]  ;;  %v99_v21 = vld [vmem:[%s8364_s0 + $0x8] sm:$0xff]  ;;  %v100_v22 = vld [vmem:[%s8364_s0 + $0x10] sm:$0xff] }
  0x1c   :  { %971 = vmatpush.msrb.mxu2 %v911_v11  ;;  %1000 = vmatpush.msrb.mxu3 %v912_v12  ;;  %v897_v23 = vld [vmem:[%s8368_s4 + $0x180] sm:$0xff]  ;;  %v898_v24 = vld [vmem:[%s8368_s4 + $0x188] sm:$0xff]  ;;  %v899_v25 = vld [vmem:[%s8368_s4 + $0x190] sm:$0xff] }
  0x1d   :  { %914 = vmatpush.msrb.mxu0 %v905_v13  ;;  %943 = vmatpush.msrb.mxu1 %v906_v14  ;;  %v900_v26 = vld [vmem:[%s8368_s4 + $0x198] sm:$0xff]  ;;  %v102_v28 = vld [vmem:[%s8364_s0 + $0x20] sm:$0xff]  ;;  %v894_v30 = vld [vmem:[%s8368_s4 + $0x168] sm:$0xff] }
  0x1e   :  { %972 = vmatpush.msrb.mxu2 %v907_v15  ;;  %1001 = vmatpush.msrb.mxu3 %v908_v16  ;;  %v101_v27 = vld [vmem:[%s8364_s0 + $0x18] sm:$0xff]  ;;  %v893_v29 = vld [vmem:[%s8368_s4 + $0x160] sm:$0xff]  ;;  %v895_v31 = vld [vmem:[%s8368_s4 + $0x170] sm:$0xff] }
  0x1f   :  { %915 = vmatpush.msrb.mxu0 %v901_v17  ;;  %944 = vmatpush.msrb.mxu1 %v902_v18  ;;  %v896_v32 = vld [vmem:[%s8368_s4 + $0x178] sm:$0xff]  ;;  %v103_v33 = vld [vmem:[%s8364_s0 + $0x28] sm:$0xff]  ;;  %v104_v34 = vld [vmem:[%s8364_s0 + $0x30] sm:$0xff] }
  0x20   :  { %973 = vmatpush.msrb.mxu2 %v903_v19  ;;  %1002 = vmatpush.msrb.mxu3 %v904_v20  ;;  %v889_v35 = vld [vmem:[%s8368_s4 + $0x140] sm:$0xff]  ;;  %v890_v36 = vld [vmem:[%s8368_s4 + $0x148] sm:$0xff]  ;;  %v891_v37 = vld [vmem:[%s8368_s4 + $0x150] sm:$0xff] }
  0x21   :  { %4675 = vmatmul.msk.f32.gmra.mxu0 %vm148_vm0, %v99_v21  ;;  %4707 = vmatmul.msk.f32.gmra.mxu1 %vm148_vm0, %v99_v21  ;;  %v892_v38 = vld [vmem:[%s8368_s4 + $0x158] sm:$0xff]  ;;  %v106_v40 = vld [vmem:[%s8364_s0 + $0x40] sm:$0xff]  ;;  %v886_v42 = vld [vmem:[%s8368_s4 + $0x128] sm:$0xff] }
  0x22   :  { %4739 = vmatmul.msk.f32.gmra.mxu2 %vm148_vm0, %v99_v21  ;;  %4771 = vmatmul.msk.f32.gmra.mxu3 %vm148_vm0, %v99_v21  ;;  %v105_v39 = vld [vmem:[%s8364_s0 + $0x38] sm:$0xff]  ;;  %v885_v41 = vld [vmem:[%s8368_s4 + $0x120] sm:$0xff]  ;;  %v887_v43 = vld [vmem:[%s8368_s4 + $0x130] sm:$0xff] }
  0x23   :  { %916 = vmatpush.msrb.mxu0 %v897_v23  ;;  %945 = vmatpush.msrb.mxu1 %v898_v24  ;;  %v888_v44 = vld [vmem:[%s8368_s4 + $0x138] sm:$0xff]  ;;  %v107_v45 = vld [vmem:[%s8364_s0 + $0x48] sm:$0xff]  ;;  %v108_v46 = vld [vmem:[%s8364_s0 + $0x50] sm:$0xff] }
  0x24   :  { %974 = vmatpush.msrb.mxu2 %v899_v25  ;;  %1003 = vmatpush.msrb.mxu3 %v900_v26  ;;  %v881_v47 = vld [vmem:[%s8368_s4 + $0x100] sm:$0xff]  ;;  %v882_v48 = vld [vmem:[%s8368_s4 + $0x108] sm:$0xff]  ;;  %v883_v49 = vld [vmem:[%s8368_s4 + $0x110] sm:$0xff] }
  0x25   :  { %917 = vmatpush.msrb.mxu0 %v893_v29  ;;  %946 = vmatpush.msrb.mxu1 %v894_v30  ;;  %v884_v50 = vld [vmem:[%s8368_s4 + $0x118] sm:$0xff]  ;;  %v110_v52 = vld [vmem:[%s8364_s0 + $0x60] sm:$0xff]  ;;  %v878_v54 = vld [vmem:[%s8368_s4 + $0xe8] sm:$0xff] }
  0x26   :  { %975 = vmatpush.msrb.mxu2 %v895_v31  ;;  %1004 = vmatpush.msrb.mxu3 %v896_v32  ;;  %v109_v51 = vld [vmem:[%s8364_s0 + $0x58] sm:$0xff]  ;;  %v877_v53 = vld [vmem:[%s8368_s4 + $0xe0] sm:$0xff]  ;;  %v879_v55 = vld [vmem:[%s8368_s4 + $0xf0] sm:$0xff] }
  0x27   :  { %918 = vmatpush.msrb.mxu0 %v889_v35  ;;  %947 = vmatpush.msrb.mxu1 %v890_v36  ;;  %v111_v56 = vld [vmem:[%s8364_s0 + $0x68] sm:$0xff]  ;;  %v880_v57 = vld [vmem:[%s8368_s4 + $0xf8] sm:$0xff]  ;;  %v112_v58 = vld [vmem:[%s8364_s0 + $0x70] sm:$0xff] }
  0x28   :  { %976 = vmatpush.msrb.mxu2 %v891_v37  ;;  %1005 = vmatpush.msrb.mxu3 %v892_v38  ;;  %v5708_v59 = vld [vmem:[%s8368_s4 + $0xc0] sm:$0xff]  ;;  %v5713_v60 = vld [vmem:[%s8368_s4 + $0xc8] sm:$0xff]  ;;  %v5718_v61 = vld [vmem:[%s8368_s4 + $0xd0] sm:$0xff] }
  0x29   :  { %4676 = vmatmul.msk.f32.gmra.mxu0 %vm148_vm0, %v100_v22  ;;  %4708 = vmatmul.msk.f32.gmra.mxu1 %vm148_vm0, %v100_v22  ;;  %v113_v62 = vld [vmem:[%s8364_s0 + $0x78] sm:$0xff]  ;;  %v114_v2 = vld [vmem:[%s8364_s0 + $0x80] sm:$0xff]  ;;  %v5755_v4 = vld [vmem:[%s8368_s4 + $0xa8] sm:$0xff] }
  0x2a   :  { %4740 = vmatmul.msk.f32.gmra.mxu2 %vm148_vm0, %v100_v22  ;;  %4772 = vmatmul.msk.f32.gmra.mxu3 %vm148_vm0, %v100_v22  ;;  %v5729_v63 = vld [vmem:[%s8368_s4 + $0xd8] sm:$0xff]  ;;  %v5750_v3 = vld [vmem:[%s8368_s4 + $0xa0] sm:$0xff]  ;;  %v5760_v5 = vld [vmem:[%s8368_s4 + $0xb0] sm:$0xff] }
  0x2b   :  { %919 = vmatpush.msrb.mxu0 %v885_v41  ;;  %948 = vmatpush.msrb.mxu1 %v886_v42  ;;  %v115_v10 = vld [vmem:[%s8364_s0 + $0x88] sm:$0xff]  ;;  %v5779_v11 = vld [vmem:[%s8368_s4 + $0xb8] sm:$0xff]  ;;  %v116_v16 = vld [vmem:[%s8364_s0 + $0x90] sm:$0xff] }
  0x2c   :  { %977 = vmatpush.msrb.mxu2 %v887_v43  ;;  %1006 = vmatpush.msrb.mxu3 %v888_v44  ;;  %v5804_v17 = vld [vmem:[%s8368_s4 + $0x80] sm:$0xff]  ;;  %v5809_v18 = vld [vmem:[%s8368_s4 + $0x88] sm:$0xff]  ;;  %v5814_v19 = vld [vmem:[%s8368_s4 + $0x90] sm:$0xff] }
  0x2d   :  { %920 = vmatpush.msrb.mxu0 %v881_v47  ;;  %949 = vmatpush.msrb.mxu1 %v882_v48  ;;  %v117_v24 = vld [vmem:[%s8364_s0 + $0x98] sm:$0xff]  ;;  %v118_v30 = vld [vmem:[%s8364_s0 + $0xa0] sm:$0xff]  ;;  %v5863_v32 = vld [vmem:[%s8368_s4 + $0x68] sm:$0xff] }
  0x2e   :  { %978 = vmatpush.msrb.mxu2 %v883_v49  ;;  %1007 = vmatpush.msrb.mxu3 %v884_v50  ;;  %v5833_v25 = vld [vmem:[%s8368_s4 + $0x98] sm:$0xff]  ;;  %v5858_v31 = vld [vmem:[%s8368_s4 + $0x60] sm:$0xff]  ;;  %v119_v38 = vld [vmem:[%s8364_s0 + $0xa8] sm:$0xff] }
  0x2f   :  { %921 = vmatpush.msrb.mxu0 %v877_v53  ;;  %950 = vmatpush.msrb.mxu1 %v878_v54  ;;  %v120_v44 = vld [vmem:[%s8364_s0 + $0xb0] sm:$0xff]  ;;  %v5941_v53 = vld [vmem:[%s8368_s4 + $0x58] sm:$0xff] }
  0x30   :  { %979 = vmatpush.msrb.mxu2 %v879_v55  ;;  %1008 = vmatpush.msrb.mxu3 %v880_v57  ;;  %v5922_v47 = vld [vmem:[%s8368_s4 + $0x50] sm:$0xff] }
  0x31   :  { %4677 = vmatmul.msk.f32.gmra.mxu0 %vm148_vm0, %v101_v27  ;;  %4709 = vmatmul.msk.f32.gmra.mxu1 %vm148_vm0, %v101_v27 }
  0x32   :  { %4741 = vmatmul.msk.f32.gmra.mxu2 %vm148_vm0, %v101_v27  ;;  %4773 = vmatmul.msk.f32.gmra.mxu3 %vm148_vm0, %v101_v27 }
  0x33   :  { %922 = vmatpush.msrb.mxu0 %v5708_v59  ;;  %951 = vmatpush.msrb.mxu1 %v5713_v60 }
  0x34   :  { %980 = vmatpush.msrb.mxu2 %v5718_v61  ;;  %1009 = vmatpush.msrb.mxu3 %v5729_v63 }
  0x35   :  { %923 = vmatpush.msrb.mxu0 %v5750_v3  ;;  %952 = vmatpush.msrb.mxu1 %v5755_v4 }
  0x36   :  { %981 = vmatpush.msrb.mxu2 %v5760_v5  ;;  %1010 = vmatpush.msrb.mxu3 %v5779_v11 }
  0x37   :  { %924 = vmatpush.msrb.mxu0 %v5804_v17  ;;  %953 = vmatpush.msrb.mxu1 %v5809_v18 }
  0x38   :  { %982 = vmatpush.msrb.mxu2 %v5814_v19  ;;  %1011 = vmatpush.msrb.mxu3 %v5833_v25 }
  0x39   :  { %4678 = vmatmul.msk.f32.gmra.mxu0 %vm148_vm0, %v102_v28  ;;  %4710 = vmatmul.msk.f32.gmra.mxu1 %vm148_vm0, %v102_v28 }
  0x3a   :  { %4742 = vmatmul.msk.f32.gmra.mxu2 %vm148_vm0, %v102_v28  ;;  %4774 = vmatmul.msk.f32.gmra.mxu3 %vm148_vm0, %v102_v28 }
  0x3b   :  { %925 = vmatpush.msrb.mxu0 %v5858_v31  ;;  %954 = vmatpush.msrb.mxu1 %v5863_v32 }
  0x41   :  { %4679 = vmatmul.msk.f32.gmra.mxu0 %vm148_vm0, %v103_v33  ;;  %4711 = vmatmul.msk.f32.gmra.mxu1 %vm148_vm0, %v103_v33 }
  0x42   :  { %4743 = vmatmul.msk.f32.gmra.mxu2 %vm148_vm0, %v103_v33  ;;  %4775 = vmatmul.msk.f32.gmra.mxu3 %vm148_vm0, %v103_v33  ;;  %v5868_v33 = vld [vmem:[%s8368_s4 + $0x70] sm:$0xff] }
  0x43   :  { %983 = vmatpush.msrb.mxu2 %v5868_v33 }
  0x45   :  { %984 = vmatpush.msrb.mxu2 %v5922_v47 }
  0x49   :  { %4680 = vmatmul.msk.f32.gmra.mxu0 %vm148_vm0, %v104_v34  ;;  %4712 = vmatmul.msk.f32.gmra.mxu1 %vm148_vm0, %v104_v34 }
  0x4a   :  { %4744 = vmatmul.msk.f32.gmra.mxu2 %vm148_vm0, %v104_v34  ;;  %4776 = vmatmul.msk.f32.gmra.mxu3 %vm148_vm0, %v104_v34 }
  0x51   :  { %4681 = vmatmul.msk.f32.gmra.mxu0 %vm148_vm0, %v105_v39  ;;  %4713 = vmatmul.msk.f32.gmra.mxu1 %vm148_vm0, %v105_v39 }
  0x52   :  { %4745 = vmatmul.msk.f32.gmra.mxu2 %vm148_vm0, %v105_v39  ;;  %4777 = vmatmul.msk.f32.gmra.mxu3 %vm148_vm0, %v105_v39  ;;  %v5887_v39 = vld [vmem:[%s8368_s4 + $0x78] sm:$0xff] }
  0x53   :  { %1012 = vmatpush.msrb.mxu3 %v5887_v39 }
  0x55   :  { %1013 = vmatpush.msrb.mxu3 %v5941_v53 }
  0x59   :  { %4682 = vmatmul.msk.f32.gmra.mxu0 %vm148_vm0, %v106_v40  ;;  %4714 = vmatmul.msk.f32.gmra.mxu1 %vm148_vm0, %v106_v40 }
  0x5a   :  { %4746 = vmatmul.msk.f32.gmra.mxu2 %vm148_vm0, %v106_v40  ;;  %4778 = vmatmul.msk.f32.gmra.mxu3 %vm148_vm0, %v106_v40 }
  0x61   :  { %4683 = vmatmul.msk.f32.gmra.mxu0 %vm148_vm0, %v107_v45  ;;  %4715 = vmatmul.msk.f32.gmra.mxu1 %vm148_vm0, %v107_v45 }
  0x62   :  { %4747 = vmatmul.msk.f32.gmra.mxu2 %vm148_vm0, %v107_v45  ;;  %4779 = vmatmul.msk.f32.gmra.mxu3 %vm148_vm0, %v107_v45  ;;  %v5912_v45 = vld [vmem:[%s8368_s4 + $0x40] sm:$0xff] }
  0x63   :  { %926 = vmatpush.msrb.mxu0 %v5912_v45 }
  0x69   :  { %4684 = vmatmul.msk.f32.gmra.mxu0 %vm148_vm0, %v108_v46  ;;  %4716 = vmatmul.msk.f32.gmra.mxu1 %vm148_vm0, %v108_v46 }
  0x6a   :  { %4748 = vmatmul.msk.f32.gmra.mxu2 %vm148_vm0, %v108_v46  ;;  %4780 = vmatmul.msk.f32.gmra.mxu3 %vm148_vm0, %v108_v46  ;;  %v5917_v46 = vld [vmem:[%s8368_s4 + $0x48] sm:$0xff] }
  0x6b   :  { %955 = vmatpush.msrb.mxu1 %v5917_v46 }
  0x71   :  { %4685 = vmatmul.msk.f32.gmra.mxu0 %vm148_vm0, %v109_v51  ;;  %4717 = vmatmul.msk.f32.gmra.mxu1 %vm148_vm0, %v109_v51 }
  0x72   :  { %4749 = vmatmul.msk.f32.gmra.mxu2 %vm148_vm0, %v109_v51  ;;  %4781 = vmatmul.msk.f32.gmra.mxu3 %vm148_vm0, %v109_v51 }
  0x79   :  { %4686 = vmatmul.msk.f32.gmra.mxu0 %vm148_vm0, %v110_v52  ;;  %4718 = vmatmul.msk.f32.gmra.mxu1 %vm148_vm0, %v110_v52 }
  0x7a   :  { %4750 = vmatmul.msk.f32.gmra.mxu2 %vm148_vm0, %v110_v52  ;;  %4782 = vmatmul.msk.f32.gmra.mxu3 %vm148_vm0, %v110_v52  ;;  %v121_v52 = vld [vmem:[%s8364_s0 + $0xb8] sm:$0xff] }
  0x81   :  { %4687 = vmatmul.msk.f32.gmra.mxu0 %vm148_vm0, %v111_v56  ;;  %4719 = vmatmul.msk.f32.gmra.mxu1 %vm148_vm0, %v111_v56 }
  0x82   :  { %4751 = vmatmul.msk.f32.gmra.mxu2 %vm148_vm0, %v111_v56  ;;  %4783 = vmatmul.msk.f32.gmra.mxu3 %vm148_vm0, %v111_v56 }
  0x89   :  { %4688 = vmatmul.msk.f32.gmra.mxu0 %vm148_vm0, %v112_v58  ;;  %4720 = vmatmul.msk.f32.gmra.mxu1 %vm148_vm0, %v112_v58 }
  0x8a   :  { %4752 = vmatmul.msk.f32.gmra.mxu2 %vm148_vm0, %v112_v58  ;;  %4784 = vmatmul.msk.f32.gmra.mxu3 %vm148_vm0, %v112_v58  ;;  %v122_v58 = vld [vmem:[%s8364_s0 + $0xc0] sm:$0xff] }
  0x91   :  { %4689 = vmatmul.msk.f32.gmra.mxu0 %vm148_vm0, %v113_v62  ;;  %4721 = vmatmul.msk.f32.gmra.mxu1 %vm148_vm0, %v113_v62 }
  0x92   :  { %4753 = vmatmul.msk.f32.gmra.mxu2 %vm148_vm0, %v113_v62  ;;  %4785 = vmatmul.msk.f32.gmra.mxu3 %vm148_vm0, %v113_v62  ;;  %v5966_v62 = vld [vmem:[%s8368_s4 + $0x20] sm:$0xff] }
  0x93   :  { %927 = vmatpush.msrb.mxu0 %v5966_v62 }
  0x96   :  { %v5736_v0 = vpop.f32.mrf.mxu0  ;;  %v5738_v1 = vpop.f32.mrf.mxu1 }
  0x99   :  { %4690 = vmatmul.msk.f32.gmra.mxu0 %vm148_vm0, %v114_v2  ;;  %4722 = vmatmul.msk.f32.gmra.mxu1 %vm148_vm0, %v114_v2 }
  0x9a   :  { %4754 = vmatmul.msk.f32.gmra.mxu2 %vm148_vm0, %v114_v2  ;;  %4786 = vmatmul.msk.f32.gmra.mxu3 %vm148_vm0, %v114_v2  ;;  %v5971_v2 = vld [vmem:[%s8368_s4 + $0x28] sm:$0xff] }
  0x9b   :  { %956 = vmatpush.msrb.mxu1 %v5971_v2 }
  0x9d   :  { %v5765_v6 = vpop.f32.mrf.mxu2  ;;  %v5767_v7 = vpop.f32.mrf.mxu3 }
  0x9e   :  { %v5769_v8 = vpop.f32.mrf.mxu0  ;;  %v5771_v9 = vpop.f32.mrf.mxu1 }
  0xa1   :  { %4691 = vmatmul.msk.f32.gmra.mxu0 %vm148_vm0, %v115_v10  ;;  %4723 = vmatmul.msk.f32.gmra.mxu1 %vm148_vm0, %v115_v10 }
  0xa2   :  { %4755 = vmatmul.msk.f32.gmra.mxu2 %vm148_vm0, %v115_v10  ;;  %4787 = vmatmul.msk.f32.gmra.mxu3 %vm148_vm0, %v115_v10  ;;  %v5976_v10 = vld [vmem:[%s8368_s4 + $0x30] sm:$0xff] }
  0xa3   :  { %985 = vmatpush.msrb.mxu2 %v5976_v10 }
  0xa5   :  { %v5786_v12 = vpop.f32.mrf.mxu2  ;;  %v5788_v13 = vpop.f32.mrf.mxu3 }
  0xa6   :  { %8425 = vst [vmem:[#allocation21_spill] sm:$0xff] %v5786_v12  ;;  %v5790_v14 = vpop.f32.mrf.mxu0  ;;  %v5792_v15 = vpop.f32.mrf.mxu1  ;;  %v6416_v12 = vld [vmem:[%s8368_s4 + $0x108] sm:$0xff] }
  0xa7   :  { %8426 = vst [vmem:[#allocation22_spill] sm:$0xff] %v5788_v13  ;;  %v6411_v13 = vld [vmem:[%s8368_s4 + $0x100] sm:$0xff] }
  0xa8   :  { %8427 = vst [vmem:[#allocation23_spill] sm:$0xff] %v5790_v14  ;;  %v6404_v14 = vld [vmem:[%s8368_s4 + $0x138] sm:$0xff] }
  0xa9   :  { %8428 = vst [vmem:[#allocation24_spill] sm:$0xff] %v5792_v15  ;;  %4692 = vmatmul.msk.f32.gmra.mxu0 %vm148_vm0, %v116_v16  ;;  %4724 = vmatmul.msk.f32.gmra.mxu1 %vm148_vm0, %v116_v16  ;;  %v6397_v15 = vld [vmem:[%s8368_s4 + $0x130] sm:$0xff] }
  0xaa   :  { %4756 = vmatmul.msk.f32.gmra.mxu2 %vm148_vm0, %v116_v16  ;;  %4788 = vmatmul.msk.f32.gmra.mxu3 %vm148_vm0, %v116_v16  ;;  %8541 = vst [vmem:[#allocation137_spill] sm:$0xff] %v6397_v15 }
  0xab   :  { %8542 = vst [vmem:[#allocation138_spill] sm:$0xff] %v6404_v14 }
  0xac   :  { %8543 = vst [vmem:[#allocation139_spill] sm:$0xff] %v6411_v13 }
  0xad   :  { %v5819_v20 = vpop.f32.mrf.mxu2  ;;  %v5821_v21 = vpop.f32.mrf.mxu3  ;;  %8544 = vst [vmem:[#allocation140_spill] sm:$0xff] %v6416_v12 }
  0xae   :  { %8429 = vst [vmem:[#allocation25_spill] sm:$0xff] %v5819_v20  ;;  %v5823_v22 = vpop.f32.mrf.mxu0  ;;  %v5825_v23 = vpop.f32.mrf.mxu1  ;;  %v6392_v20 = vld [vmem:[%s8368_s4 + $0x128] sm:$0xff] }
  0xaf   :  { %8430 = vst [vmem:[#allocation26_spill] sm:$0xff] %v5821_v21  ;;  %v6387_v21 = vld [vmem:[%s8368_s4 + $0x120] sm:$0xff] }
  0xb0   :  { %8431 = vst [vmem:[#allocation27_spill] sm:$0xff] %v5823_v22 }
  0xb1   :  { %8432 = vst [vmem:[#allocation28_spill] sm:$0xff] %v5825_v23  ;;  %4693 = vmatmul.msk.f32.gmra.mxu0 %vm148_vm0, %v117_v24  ;;  %4725 = vmatmul.msk.f32.gmra.mxu1 %vm148_vm0, %v117_v24 }
  0xb2   :  { %4757 = vmatmul.msk.f32.gmra.mxu2 %vm148_vm0, %v117_v24  ;;  %4789 = vmatmul.msk.f32.gmra.mxu3 %vm148_vm0, %v117_v24  ;;  %8539 = vst [vmem:[#allocation135_spill] sm:$0xff] %v6387_v21 }
  0xb3   :  { %8540 = vst [vmem:[#allocation136_spill] sm:$0xff] %v6392_v20 }
  0xb5   :  { %v5840_v26 = vpop.f32.mrf.mxu2  ;;  %v5842_v27 = vpop.f32.mrf.mxu3 }
  0xb6   :  { %8433 = vst [vmem:[#allocation29_spill] sm:$0xff] %v5840_v26  ;;  %v5844_v28 = vpop.f32.mrf.mxu0  ;;  %v5846_v29 = vpop.f32.mrf.mxu1  ;;  %v6352_v26 = vld [vmem:[%s8368_s4 + $0x178] sm:$0xff] }
  0xb7   :  { %8434 = vst [vmem:[#allocation30_spill] sm:$0xff] %v5842_v27 }
  0xb8   :  { %8435 = vst [vmem:[#allocation31_spill] sm:$0xff] %v5844_v28 }
  0xb9   :  { %8436 = vst [vmem:[#allocation32_spill] sm:$0xff] %v5846_v29  ;;  %4694 = vmatmul.msk.f32.gmra.mxu0 %vm148_vm0, %v118_v30  ;;  %4726 = vmatmul.msk.f32.gmra.mxu1 %vm148_vm0, %v118_v30  ;;  %v6341_v29 = vld [vmem:[%s8368_s4 + $0x170] sm:$0xff] }
  0xba   :  { %4758 = vmatmul.msk.f32.gmra.mxu2 %vm148_vm0, %v118_v30  ;;  %4790 = vmatmul.msk.f32.gmra.mxu3 %vm148_vm0, %v118_v30 }
  0xbd   :  { %v5873_v34 = vpop.f32.mrf.mxu2  ;;  %v5875_v35 = vpop.f32.mrf.mxu3 }
  0xbe   :  { %8437 = vst [vmem:[#allocation33_spill] sm:$0xff] %v5873_v34  ;;  %v5877_v36 = vpop.f32.mrf.mxu0  ;;  %v5879_v37 = vpop.f32.mrf.mxu1  ;;  %v6336_v34 = vld [vmem:[%s8368_s4 + $0x168] sm:$0xff] }
  0xbf   :  { %8438 = vst [vmem:[#allocation34_spill] sm:$0xff] %v5875_v35  ;;  %v6331_v35 = vld [vmem:[%s8368_s4 + $0x160] sm:$0xff] }
  0xc0   :  { %8439 = vst [vmem:[#allocation35_spill] sm:$0xff] %v5877_v36  ;;  %v6324_v36 = vld [vmem:[%s8368_s4 + $0x198] sm:$0xff] }
  0xc1   :  { %8440 = vst [vmem:[#allocation36_spill] sm:$0xff] %v5879_v37  ;;  %4695 = vmatmul.msk.f32.gmra.mxu0 %vm148_vm0, %v119_v38  ;;  %4727 = vmatmul.msk.f32.gmra.mxu1 %vm148_vm0, %v119_v38  ;;  %v6317_v37 = vld [vmem:[%s8368_s4 + $0x190] sm:$0xff] }
  0xc2   :  { %4759 = vmatmul.msk.f32.gmra.mxu2 %vm148_vm0, %v119_v38  ;;  %4791 = vmatmul.msk.f32.gmra.mxu3 %vm148_vm0, %v119_v38 }
  0xc5   :  { %v5894_v40 = vpop.f32.mrf.mxu2  ;;  %v5896_v41 = vpop.f32.mrf.mxu3 }
  0xc6   :  { %8441 = vst [vmem:[#allocation37_spill] sm:$0xff] %v5894_v40  ;;  %v5898_v42 = vpop.f32.mrf.mxu0  ;;  %v5900_v43 = vpop.f32.mrf.mxu1  ;;  %v6312_v40 = vld [vmem:[%s8368_s4 + $0x188] sm:$0xff] }
  0xc7   :  { %8442 = vst [vmem:[#allocation38_spill] sm:$0xff] %v5896_v41  ;;  %v6307_v41 = vld [vmem:[%s8368_s4 + $0x180] sm:$0xff] }
  0xc8   :  { %8443 = vst [vmem:[#allocation39_spill] sm:$0xff] %v5898_v42  ;;  %v6300_v42 = vld [vmem:[%s8368_s4 + $0x1b8] sm:$0xff] }
  0xc9   :  { %8444 = vst [vmem:[#allocation40_spill] sm:$0xff] %v5900_v43  ;;  %4696 = vmatmul.msk.f32.gmra.mxu0 %vm148_vm0, %v120_v44  ;;  %4728 = vmatmul.msk.f32.gmra.mxu1 %vm148_vm0, %v120_v44 }
  0xca   :  { %4760 = vmatmul.msk.f32.gmra.mxu2 %vm148_vm0, %v120_v44  ;;  %4792 = vmatmul.msk.f32.gmra.mxu3 %vm148_vm0, %v120_v44  ;;  %v123_v44 = vld [vmem:[%s8364_s0 + $0xc8] sm:$0xff] }
  0xcd   :  { %v5927_v48 = vpop.f32.mrf.mxu2  ;;  %v5929_v49 = vpop.f32.mrf.mxu3 }
  0xce   :  { %8445 = vst [vmem:[#allocation41_spill] sm:$0xff] %v5927_v48  ;;  %v5931_v50 = vpop.f32.mrf.mxu0  ;;  %v5933_v51 = vpop.f32.mrf.mxu1 }
  0xcf   :  { %8446 = vst [vmem:[#allocation42_spill] sm:$0xff] %v5929_v49 }
  0xd0   :  { %8447 = vst [vmem:[#allocation43_spill] sm:$0xff] %v5931_v50 }
  0xd1   :  { %8448 = vst [vmem:[#allocation44_spill] sm:$0xff] %v5933_v51  ;;  %4697 = vmatmul.msk.f32.gmra.mxu0 %vm148_vm0, %v121_v52  ;;  %4729 = vmatmul.msk.f32.gmra.mxu1 %vm148_vm0, %v121_v52 }
  0xd2   :  { %4761 = vmatmul.msk.f32.gmra.mxu2 %vm148_vm0, %v121_v52  ;;  %4793 = vmatmul.msk.f32.gmra.mxu3 %vm148_vm0, %v121_v52  ;;  %v5995_v52 = vld [vmem:[%s8368_s4 + $0x38] sm:$0xff] }
  0xd3   :  { %1014 = vmatpush.msrb.mxu3 %v5995_v52 }
  0xd5   :  { %v5948_v54 = vpop.f32.mrf.mxu2  ;;  %v5950_v55 = vpop.f32.mrf.mxu3 }
  0xd6   :  { %8449 = vst [vmem:[#allocation45_spill] sm:$0xff] %v5948_v54  ;;  %v5952_v56 = vpop.f32.mrf.mxu0  ;;  %v5954_v57 = vpop.f32.mrf.mxu1  ;;  %v126_v54 = vld [vmem:[%s8364_s0 + $0xe0] sm:$0xff] }
  0xd7   :  { %8450 = vst [vmem:[#allocation46_spill] sm:$0xff] %v5950_v55  ;;  %v6049_v55 = vld [vmem:[%s8368_s4 + $0x18] sm:$0xff] }
  0xd8   :  { %8451 = vst [vmem:[#allocation47_spill] sm:$0xff] %v5952_v56  ;;  %v125_v56 = vld [vmem:[%s8364_s0 + $0xd8] sm:$0xff]  ;;  %1015 = vmatpush.msrb.mxu3 %v6049_v55 }
  0xd9   :  { %8452 = vst [vmem:[#allocation48_spill] sm:$0xff] %v5954_v57  ;;  %4698 = vmatmul.msk.f32.gmra.mxu0 %vm148_vm0, %v122_v58  ;;  %4730 = vmatmul.msk.f32.gmra.mxu1 %vm148_vm0, %v122_v58 }
  0xda   :  { %4762 = vmatmul.msk.f32.gmra.mxu2 %vm148_vm0, %v122_v58  ;;  %4794 = vmatmul.msk.f32.gmra.mxu3 %vm148_vm0, %v122_v58 }
  0xdd   :  { %v5981_v16 = vpop.f32.mrf.mxu2  ;;  %v5983_v24 = vpop.f32.mrf.mxu3 }
  0xde   :  { %8453 = vst [vmem:[#allocation49_spill] sm:$0xff] %v5981_v16  ;;  %v5985_v30 = vpop.f32.mrf.mxu0  ;;  %v5987_v38 = vpop.f32.mrf.mxu1  ;;  %v124_v16 = vld [vmem:[%s8364_s0 + $0xd0] sm:$0xff] }
  0xdf   :  { %8454 = vst [vmem:[#allocation50_spill] sm:$0xff] %v5983_v24 }
  0xe0   :  { %8455 = vst [vmem:[#allocation51_spill] sm:$0xff] %v5985_v30 }
  0xe1   :  { %8456 = vst [vmem:[#allocation52_spill] sm:$0xff] %v5987_v38  ;;  %4699 = vmatmul.msk.f32.gmra.mxu0 %vm148_vm0, %v123_v44  ;;  %4731 = vmatmul.msk.f32.gmra.mxu1 %vm148_vm0, %v123_v44 }
  0xe2   :  { %4763 = vmatmul.msk.f32.gmra.mxu2 %vm148_vm0, %v123_v44  ;;  %4795 = vmatmul.msk.f32.gmra.mxu3 %vm148_vm0, %v123_v44  ;;  %v6020_v44 = vld [vmem:[%s8368_s4] sm:$0xff] }
  0xe3   :  { %928 = vmatpush.msrb.mxu0 %v6020_v44 }
  0xe5   :  { %v6002_v58 = vpop.f32.mrf.mxu2  ;;  %v6004_v38 = vpop.f32.mrf.mxu3 }
  0xe6   :  { %8457 = vst [vmem:[#allocation53_spill] sm:$0xff] %v6002_v58  ;;  %v6006_v30 = vpop.f32.mrf.mxu0  ;;  %v6008_v24 = vpop.f32.mrf.mxu1 }
  0xe7   :  { %8458 = vst [vmem:[#allocation54_spill] sm:$0xff] %v6004_v38 }
  0xe8   :  { %8459 = vst [vmem:[#allocation55_spill] sm:$0xff] %v6006_v30  ;;  %v6030_v30 = vld [vmem:[%s8368_s4 + $0x10] sm:$0xff] }
  0xe9   :  { %8460 = vst [vmem:[#allocation56_spill] sm:$0xff] %v6008_v24  ;;  %4700 = vmatmul.msk.f32.gmra.mxu0 %vm148_vm0, %v124_v16  ;;  %4732 = vmatmul.msk.f32.gmra.mxu1 %vm148_vm0, %v124_v16  ;;  %v6025_v24 = vld [vmem:[%s8368_s4 + $0x8] sm:$0xff] }
  0xea   :  { %4764 = vmatmul.msk.f32.gmra.mxu2 %vm148_vm0, %v124_v16  ;;  %4796 = vmatmul.msk.f32.gmra.mxu3 %vm148_vm0, %v124_v16 }
  0xeb   :  { %957 = vmatpush.msrb.mxu1 %v6025_v24  ;;  %986 = vmatpush.msrb.mxu2 %v6030_v30 }
  0xed   :  { %v6035_v16 = vpop.f32.mrf.mxu2  ;;  %v6037_v38 = vpop.f32.mrf.mxu3 }
  0xee   :  { %8461 = vst [vmem:[#allocation57_spill] sm:$0xff] %v6035_v16  ;;  %v6039_v58 = vpop.f32.mrf.mxu0  ;;  %v6041_v57 = vpop.f32.mrf.mxu1 }
  0xef   :  { %8462 = vst [vmem:[#allocation58_spill] sm:$0xff] %v6037_v38 }
  0xf0   :  { %8463 = vst [vmem:[#allocation59_spill] sm:$0xff] %v6039_v58 }
  0xf1   :  { %8464 = vst [vmem:[#allocation60_spill] sm:$0xff] %v6041_v57  ;;  %4701 = vmatmul.msk.f32.gmra.mxu0 %vm148_vm0, %v125_v56  ;;  %4733 = vmatmul.msk.f32.gmra.mxu1 %vm148_vm0, %v125_v56 }
  0xf2   :  { %4765 = vmatmul.msk.f32.gmra.mxu2 %vm148_vm0, %v125_v56  ;;  %4797 = vmatmul.msk.f32.gmra.mxu3 %vm148_vm0, %v125_v56 }
  0xf5   :  { %v6056_v57 = vpop.f32.mrf.mxu2  ;;  %v6058_v58 = vpop.f32.mrf.mxu3 }
  0xf6   :  { %8465 = vst [vmem:[#allocation61_spill] sm:$0xff] %v6056_v57  ;;  %v6060_v38 = vpop.f32.mrf.mxu0  ;;  %v6062_v16 = vpop.f32.mrf.mxu1 }
  0xf7   :  { %8466 = vst [vmem:[#allocation62_spill] sm:$0xff] %v6058_v58 }
  0xf8   :  { %8467 = vst [vmem:[#allocation63_spill] sm:$0xff] %v6060_v38 }
  0xf9   :  { %8468 = vst [vmem:[#allocation64_spill] sm:$0xff] %v6062_v16  ;;  %4702 = vmatmul.msk.f32.gmra.mxu0 %vm148_vm0, %v126_v54  ;;  %4734 = vmatmul.msk.f32.gmra.mxu1 %vm148_vm0, %v126_v54  ;;  %v127_v16 = vld [vmem:[%s8364_s0 + $0xe8] sm:$0xff] }
  0xfa   :  { %4766 = vmatmul.msk.f32.gmra.mxu2 %vm148_vm0, %v126_v54  ;;  %4798 = vmatmul.msk.f32.gmra.mxu3 %vm148_vm0, %v126_v54 }
  0xfd   :  { %v6071_v56 = vpop.f32.mrf.mxu2  ;;  %v6073_v57 = vpop.f32.mrf.mxu3 }
  0xfe   :  { %8469 = vst [vmem:[#allocation65_spill] sm:$0xff] %v6071_v56  ;;  %v6075_v58 = vpop.f32.mrf.mxu0  ;;  %v6077_v38 = vpop.f32.mrf.mxu1 }
  0xff   :  { %8470 = vst [vmem:[#allocation66_spill] sm:$0xff] %v6073_v57 }
 0x100   :  { %8471 = vst [vmem:[#allocation67_spill] sm:$0xff] %v6075_v58 }
 0x101   :  { %8472 = vst [vmem:[#allocation68_spill] sm:$0xff] %v6077_v38  ;;  %4703 = vmatmul.msk.f32.gmra.mxu0 %vm148_vm0, %v127_v16  ;;  %4735 = vmatmul.msk.f32.gmra.mxu1 %vm148_vm0, %v127_v16  ;;  %v128_v38 = vld [vmem:[%s8364_s0 + $0xf0] sm:$0xff] }
 0x102   :  { %4767 = vmatmul.msk.f32.gmra.mxu2 %vm148_vm0, %v127_v16  ;;  %4799 = vmatmul.msk.f32.gmra.mxu3 %vm148_vm0, %v127_v16 }
 0x105   :  { %v6086_v54 = vpop.f32.mrf.mxu2  ;;  %v6088_v56 = vpop.f32.mrf.mxu3 }
 0x106   :  { %8473 = vst [vmem:[#allocation69_spill] sm:$0xff] %v6086_v54  ;;  %v6090_v57 = vpop.f32.mrf.mxu0  ;;  %v6092_v58 = vpop.f32.mrf.mxu1 }
 0x107   :  { %8474 = vst [vmem:[#allocation70_spill] sm:$0xff] %v6088_v56 }
 0x108   :  { %8475 = vst [vmem:[#allocation71_spill] sm:$0xff] %v6090_v57 }
 0x109   :  { %8476 = vst [vmem:[#allocation72_spill] sm:$0xff] %v6092_v58  ;;  %4704 = vmatmul.msk.f32.gmra.mxu0 %vm148_vm0, %v128_v38  ;;  %4736 = vmatmul.msk.f32.gmra.mxu1 %vm148_vm0, %v128_v38  ;;  %v129_v58 = vld [vmem:[%s8364_s0 + $0xf8] sm:$0xff]  ;;  %s4648_s0 = sshll.u32 %s8377_s13, 4  ;;  %s4649_s0 = int_to_ptr.hbm [resolvable:$true] %s4648_s0 }
 0x10a   :  { %4768 = vmatmul.msk.f32.gmra.mxu2 %vm148_vm0, %v128_v38  ;;  %4800 = vmatmul.msk.f32.gmra.mxu3 %vm148_vm0, %v128_v38 }
 0x10d   :  { %v6101_v16 = vpop.f32.mrf.mxu2  ;;  %v6103_v54 = vpop.f32.mrf.mxu3 }
 0x10e   :  { %8477 = vst [vmem:[#allocation73_spill] sm:$0xff] %v6101_v16  ;;  %v6105_v56 = vpop.f32.mrf.mxu0  ;;  %v6107_v57 = vpop.f32.mrf.mxu1 }
 0x10f   :  { %8478 = vst [vmem:[#allocation74_spill] sm:$0xff] %v6103_v54 }
 0x110   :  { %8479 = vst [vmem:[#allocation75_spill] sm:$0xff] %v6105_v56 }
 0x111   :  { %8480 = vst [vmem:[#allocation76_spill] sm:$0xff] %v6107_v57  ;;  %4705 = vmatmul.msk.f32.gmra.mxu0 %vm148_vm0, %v129_v58  ;;  %4737 = vmatmul.msk.f32.gmra.mxu1 %vm148_vm0, %v129_v58  ;;  %v825_v57 = vld [vmem:[%s8365_s1] sm:$0xff] }
 0x112   :  { %4769 = vmatmul.msk.f32.gmra.mxu2 %vm148_vm0, %v129_v58  ;;  %4801 = vmatmul.msk.f32.gmra.mxu3 %vm148_vm0, %v129_v58 }
 0x115   :  { %v6116_v38 = vpop.f32.mrf.mxu2  ;;  %v6118_v16 = vpop.f32.mrf.mxu3 }
 0x116   :  { %8481 = vst [vmem:[#allocation77_spill] sm:$0xff] %v6116_v38  ;;  %v6120_v54 = vpop.f32.mrf.mxu0  ;;  %v6122_v56 = vpop.f32.mrf.mxu1 }
 0x117   :  { %8482 = vst [vmem:[#allocation78_spill] sm:$0xff] %v6118_v16 }
 0x118   :  { %8483 = vst [vmem:[#allocation79_spill] sm:$0xff] %v6120_v54 }
 0x119   :  { %8484 = vst [vmem:[#allocation80_spill] sm:$0xff] %v6122_v56  ;;  %929 = vmatmul.f32.vlgmr.msrb.gmra.mxu0 %v825_v57  ;;  %958 = vmatmul.f32.vlgmr.msrb.gmra.mxu1 %v825_v57  ;;  %v826_v56 = vld [vmem:[%s8365_s1 + $0x8] sm:$0xff] }
 0x11a   :  { %987 = vmatmul.f32.vlgmr.msrb.gmra.mxu2 %v825_v57  ;;  %1016 = vmatmul.f32.vlgmr.msrb.gmra.mxu3 %v825_v57 }
 0x11d   :  { %v6127_v51 = vpop.f32.mrf.mxu2  ;;  %v6129_v50 = vpop.f32.mrf.mxu3 }
 0x11e   :  { %8485 = vst [vmem:[#allocation81_spill] sm:$0xff] %v6127_v51  ;;  %v6131_v58 = vpop.f32.mrf.mxu0  ;;  %v6133_v38 = vpop.f32.mrf.mxu1 }
 0x11f   :  { %8486 = vst [vmem:[#allocation82_spill] sm:$0xff] %v6129_v50 }
 0x120   :  { %8487 = vst [vmem:[#allocation83_spill] sm:$0xff] %v6131_v58 }
 0x121   :  { %8488 = vst [vmem:[#allocation84_spill] sm:$0xff] %v6133_v38  ;;  %932 = vmatmul.f32.gmra.mxu0 %v826_v56  ;;  %961 = vmatmul.f32.gmra.mxu1 %v826_v56  ;;  %v827_v38 = vld [vmem:[%s8365_s1 + $0x10] sm:$0xff] }
 0x122   :  { %990 = vmatmul.f32.gmra.mxu2 %v826_v56  ;;  %1019 = vmatmul.f32.gmra.mxu3 %v826_v56 }
 0x125   :  { %v6138_v54 = vpop.f32.mrf.mxu2  ;;  %v6140_v16 = vpop.f32.mrf.mxu3 }
 0x126   :  { %8489 = vst [vmem:[#allocation85_spill] sm:$0xff] %v6138_v54  ;;  %v6142_v57 = vpop.f32.mrf.mxu0  ;;  %v6144_v51 = vpop.f32.mrf.mxu1 }
 0x127   :  { %8490 = vst [vmem:[#allocation86_spill] sm:$0xff] %v6140_v16 }
 0x128   :  { %8491 = vst [vmem:[#allocation87_spill] sm:$0xff] %v6142_v57 }
 0x129   :  { %8492 = vst [vmem:[#allocation88_spill] sm:$0xff] %v6144_v51  ;;  %935 = vmatmul.f32.gmra.mxu0 %v827_v38  ;;  %964 = vmatmul.f32.gmra.mxu1 %v827_v38  ;;  %v828_v51 = vld [vmem:[%s8365_s1 + $0x18] sm:$0xff] }
 0x12a   :  { %993 = vmatmul.f32.gmra.mxu2 %v827_v38  ;;  %1022 = vmatmul.f32.gmra.mxu3 %v827_v38 }
 0x12d   :  { %v6149_v58 = vpop.f32.mrf.mxu2  ;;  %v6151_v50 = vpop.f32.mrf.mxu3 }
 0x12e   :  { %8493 = vst [vmem:[#allocation89_spill] sm:$0xff] %v6149_v58  ;;  %v6153_v56 = vpop.f32.mrf.mxu0  ;;  %v6155_v54 = vpop.f32.mrf.mxu1 }
 0x12f   :  { %8494 = vst [vmem:[#allocation90_spill] sm:$0xff] %v6151_v50 }
 0x130   :  { %8495 = vst [vmem:[#allocation91_spill] sm:$0xff] %v6153_v56 }
 0x131   :  { %8496 = vst [vmem:[#allocation92_spill] sm:$0xff] %v6155_v54  ;;  %938 = vmatmul.f32.gmra.mxu0 %v828_v51  ;;  %967 = vmatmul.f32.gmra.mxu1 %v828_v51 }
 0x132   :  { %996 = vmatmul.f32.gmra.mxu2 %v828_v51  ;;  %1025 = vmatmul.f32.gmra.mxu3 %v828_v51 }
 0x135   :  { %v6160_v57 = vpop.f32.mrf.mxu2  ;;  %v6162_v16 = vpop.f32.mrf.mxu3 }
 0x136   :  { %8497 = vst [vmem:[#allocation93_spill] sm:$0xff] %v6160_v57  ;;  %v6164_v38 = vpop.f32.mrf.mxu0  ;;  %v6166_v58 = vpop.f32.mrf.mxu1 }
 0x137   :  { %8498 = vst [vmem:[#allocation94_spill] sm:$0xff] %v6162_v16 }
 0x138   :  { %8499 = vst [vmem:[#allocation95_spill] sm:$0xff] %v6164_v38 }
 0x139   :  { %8500 = vst [vmem:[#allocation96_spill] sm:$0xff] %v6166_v58 }
 0x13d   :  { %v6168_v50 = vpop.f32.mrf.mxu2  ;;  %v6170_v56 = vpop.f32.mrf.mxu3 }
 0x13e   :  { %8501 = vst [vmem:[#allocation97_spill] sm:$0xff] %v6168_v50  ;;  %v6172_v54 = vpop.f32.mrf.mxu0  ;;  %v6174_v49 = vpop.f32.mrf.mxu1 }
 0x13f   :  { %8502 = vst [vmem:[#allocation98_spill] sm:$0xff] %v6170_v56 }
 0x140   :  { %8503 = vst [vmem:[#allocation99_spill] sm:$0xff] %v6172_v54 }
 0x141   :  { %8504 = vst [vmem:[#allocation100_spill] sm:$0xff] %v6174_v49 }
 0x145   :  { %v6176_v48 = vpop.f32.mrf.mxu2  ;;  %v6178_v43 = vpop.f32.mrf.mxu3 }
 0x146   :  { %8505 = vst [vmem:[#allocation101_spill] sm:$0xff] %v6176_v48  ;;  %v6180_v51 = vpop.f32.mrf.mxu0  ;;  %v6182_v57 = vpop.f32.mrf.mxu1 }
 0x147   :  { %8506 = vst [vmem:[#allocation102_spill] sm:$0xff] %v6178_v43 }
 0x148   :  { %8507 = vst [vmem:[#allocation103_spill] sm:$0xff] %v6180_v51 }
 0x149   :  { %8508 = vst [vmem:[#allocation104_spill] sm:$0xff] %v6182_v57 }
 0x14d   :  { %v6184_v16 = vpop.f32.mrf.mxu2  ;;  %v6186_v38 = vpop.f32.mrf.mxu3 }
 0x14e   :  { %8509 = vst [vmem:[#allocation105_spill] sm:$0xff] %v6184_v16  ;;  %v6188_v58 = vpop.f32.mrf.mxu0  ;;  %v6190_v50 = vpop.f32.mrf.mxu1 }
 0x14f   :  { %8510 = vst [vmem:[#allocation106_spill] sm:$0xff] %v6186_v38 }
 0x150   :  { %8511 = vst [vmem:[#allocation107_spill] sm:$0xff] %v6188_v58 }
 0x151   :  { %8512 = vst [vmem:[#allocation108_spill] sm:$0xff] %v6190_v50 }
 0x155   :  { %v6192_v56 = vpop.f32.mrf.mxu2  ;;  %v6194_v54 = vpop.f32.mrf.mxu3 }
 0x156   :  { %8513 = vst [vmem:[#allocation109_spill] sm:$0xff] %v6192_v56  ;;  %v6196_v49 = vpop.f32.mrf.mxu0  ;;  %v6198_v48 = vpop.f32.mrf.mxu1 }
 0x157   :  { %8514 = vst [vmem:[#allocation110_spill] sm:$0xff] %v6194_v54 }
 0x158   :  { %8515 = vst [vmem:[#allocation111_spill] sm:$0xff] %v6196_v49 }
 0x159   :  { %8516 = vst [vmem:[#allocation112_spill] sm:$0xff] %v6198_v48 }
 0x15d   :  { %v6200_v43 = vpop.f32.mrf.mxu2  ;;  %v6202_v51 = vpop.f32.mrf.mxu3 }
 0x15e   :  { %8517 = vst [vmem:[#allocation113_spill] sm:$0xff] %v6200_v43  ;;  %v6204_v57 = vpop.f32.mrf.mxu0  ;;  %v6206_v16 = vpop.f32.mrf.mxu1 }
 0x15f   :  { %8518 = vst [vmem:[#allocation114_spill] sm:$0xff] %v6202_v51  ;;  %v6293_v51 = vld [vmem:[%s8368_s4 + $0x1b0] sm:$0xff] }
 0x160   :  { %8519 = vst [vmem:[#allocation115_spill] sm:$0xff] %v6204_v57  ;;  %v6264_v57 = vld [vmem:[%s8368_s4 + $0x1c8] sm:$0xff] }
 0x161   :  { %8520 = vst [vmem:[#allocation116_spill] sm:$0xff] %v6206_v16  ;;  %v6227_v16 = vld [vmem:[%s8368_s4 + $0x1e0] sm:$0xff] }
 0x162   :  { %1202 = vmatpush.msra.mxu0 %v6227_v16 }
 0x165   :  { %v6208_v38 = vpop.f32.mrf.mxu2  ;;  %v6210_v58 = vpop.f32.mrf.mxu3 }
 0x166   :  { %8521 = vst [vmem:[#allocation117_spill] sm:$0xff] %v6208_v38  ;;  %v6212_v50 = vpop.f32.mrf.mxu0  ;;  %v6214_v56 = vpop.f32.mrf.mxu1  ;;  %v6259_v38 = vld [vmem:[%s8368_s4 + $0x1c0] sm:$0xff] }
 0x167   :  { %8522 = vst [vmem:[#allocation118_spill] sm:$0xff] %v6210_v58  ;;  %v6232_v58 = vld [vmem:[%s8368_s4 + $0x1e8] sm:$0xff]  ;;  %1203 = vmatpush.msra.mxu0 %v6259_v38 }
 0x168   :  { %8523 = vst [vmem:[#allocation119_spill] sm:$0xff] %v6212_v50  ;;  %1231 = vmatpush.msra.mxu1 %v6232_v58 }
 0x169   :  { %8524 = vst [vmem:[#allocation120_spill] sm:$0xff] %v6214_v56 }
 0x16a   :  { %1232 = vmatpush.msra.mxu1 %v6264_v57 }
 0x16d   :  { %v6216_v54 = vpop.f32.mrf.mxu2  ;;  %v6218_v49 = vpop.f32.mrf.mxu3 }
 0x16e   :  { %8525 = vst [vmem:[#allocation121_spill] sm:$0xff] %v6216_v54  ;;  %v6220_v48 = vpop.f32.mrf.mxu0  ;;  %v6222_v43 = vpop.f32.mrf.mxu1  ;;  %v6237_v54 = vld [vmem:[%s8368_s4 + $0x1f0] sm:$0xff] }
 0x16f   :  { %8526 = vst [vmem:[#allocation122_spill] sm:$0xff] %v6218_v49  ;;  %1260 = vmatpush.msra.mxu2 %v6237_v54 }
 0x170   :  { %8527 = vst [vmem:[#allocation123_spill] sm:$0xff] %v6220_v48 }
 0x171   :  { %8528 = vst [vmem:[#allocation124_spill] sm:$0xff] %v6222_v43  ;;  %v6245_v43 = vld [vmem:[%s8368_s4 + $0x1f8] sm:$0xff] }
 0x172   :  { %1289 = vmatpush.msra.mxu3 %v6245_v43 }
 0x175   :  { %v6247_v48 = vpop.f32.mrf.mxu2  ;;  %v6249_v49 = vpop.f32.mrf.mxu3 }
 0x176   :  { %8529 = vst [vmem:[#allocation125_spill] sm:$0xff] %v6247_v48  ;;  %v6252_v56 = vpop.f32.mrf.mxu0  ;;  %v6254_v50 = vpop.f32.mrf.mxu1  ;;  %v6288_v48 = vld [vmem:[%s8368_s4 + $0x1a8] sm:$0xff] }
 0x177   :  { %8530 = vst [vmem:[#allocation126_spill] sm:$0xff] %v6249_v49  ;;  %v6269_v49 = vld [vmem:[%s8368_s4 + $0x1d0] sm:$0xff]  ;;  %1233 = vmatpush.msra.mxu1 %v6288_v48 }
 0x178   :  { %8531 = vst [vmem:[#allocation127_spill] sm:$0xff] %v6252_v56  ;;  %1261 = vmatpush.msra.mxu2 %v6269_v49  ;;  %v6283_v56 = vld [vmem:[%s8368_s4 + $0x1a0] sm:$0xff] }
 0x179   :  { %8532 = vst [vmem:[#allocation128_spill] sm:$0xff] %v6254_v50  ;;  %v6276_v50 = vld [vmem:[%s8368_s4 + $0x1d8] sm:$0xff]  ;;  %1204 = vmatpush.msra.mxu0 %v6283_v56  ;;  %1234 = vmatpush.msra.mxu1 %v6312_v40 }
 0x17a   :  { %1290 = vmatpush.msra.mxu3 %v6276_v50  ;;  %1262 = vmatpush.msra.mxu2 %v6293_v51 }
 0x17b   :  { %1205 = vmatpush.msra.mxu0 %v6307_v41  ;;  %1235 = vmatpush.msra.mxu1 %v6336_v34 }
 0x17c   :  { %1291 = vmatpush.msra.mxu3 %v6300_v42  ;;  %1263 = vmatpush.msra.mxu2 %v6317_v37 }
 0x17d   :  { %v6343_v28 = vpop.f32.mrf.mxu2  ;;  %v6345_v27 = vpop.f32.mrf.mxu3  ;;  %1206 = vmatpush.msra.mxu0 %v6331_v35 }
 0x17e   :  { %1292 = vmatpush.msra.mxu3 %v6324_v36  ;;  %8533 = vst [vmem:[#allocation129_spill] sm:$0xff] %v6343_v28  ;;  %v6354_v23 = vpop.f32.mrf.mxu0  ;;  %v6356_v22 = vpop.f32.mrf.mxu1  ;;  %1264 = vmatpush.msra.mxu2 %v6341_v29  ;;  %v6368_v28 = vld [vmem:[%s8368_s4 + $0x148] sm:$0xff] }
 0x17f   :  { %8534 = vst [vmem:[#allocation130_spill] sm:$0xff] %v6345_v27  ;;  %v6363_v27 = vld [vmem:[%s8368_s4 + $0x140] sm:$0xff]  ;;  %1236 = vmatpush.msra.mxu1 %v6368_v28 }
 0x180   :  { %8535 = vst [vmem:[#allocation131_spill] sm:$0xff] %v6354_v23  ;;  %1293 = vmatpush.msra.mxu3 %v6352_v26  ;;  %v6373_v23 = vld [vmem:[%s8368_s4 + $0x150] sm:$0xff]  ;;  %1207 = vmatpush.msra.mxu0 %v6363_v27 }
 0x181   :  { %8536 = vst [vmem:[#allocation132_spill] sm:$0xff] %v6356_v22  ;;  %v6380_v22 = vld [vmem:[%s8368_s4 + $0x158] sm:$0xff]  ;;  %1265 = vmatpush.msra.mxu2 %v6373_v23  ;;  %1237 = vmatpush.msra.mxu1 %v6392_v20  ;;  %v6421_v20 = vld [vmem:[%s8368_s4 + $0x110] sm:$0xff] }
 0x182   :  { %8537 = vst [vmem:[#allocation133_spill] sm:$0xff] %v6373_v23  ;;  %1294 = vmatpush.msra.mxu3 %v6380_v22  ;;  %1208 = vmatpush.msra.mxu0 %v6387_v21 }
 0x183   :  { %8538 = vst [vmem:[#allocation134_spill] sm:$0xff] %v6380_v22  ;;  %1266 = vmatpush.msra.mxu2 %v6397_v15  ;;  %1238 = vmatpush.msra.mxu1 %v6416_v12  ;;  %v6435_v15 = vld [vmem:[%s8368_s4 + $0xe0] sm:$0xff] }
 0x184   :  { %1295 = vmatpush.msra.mxu3 %v6404_v14  ;;  %8545 = vst [vmem:[#allocation141_spill] sm:$0xff] %v6421_v20  ;;  %1209 = vmatpush.msra.mxu0 %v6411_v13  ;;  %v6428_v14 = vld [vmem:[%s8368_s4 + $0x118] sm:$0xff]  ;;  %v6440_v13 = vld [vmem:[%s8368_s4 + $0xe8] sm:$0xff] }
 0x185   :  { %8546 = vst [vmem:[#allocation142_spill] sm:$0xff] %v6428_v14  ;;  %1267 = vmatpush.msra.mxu2 %v6421_v20  ;;  %v6442_v12 = vpop.f32.mrf.mxu2  ;;  %v6444_v21 = vpop.f32.mrf.mxu3  ;;  %1239 = vmatpush.msra.mxu1 %v6440_v13  ;;  %v6456_v20 = vld [vmem:[%s8368_s4 + $0xf8] sm:$0xff] }
 0x186   :  { %1296 = vmatpush.msra.mxu3 %v6428_v14  ;;  %8547 = vst [vmem:[#allocation143_spill] sm:$0xff] %v6435_v15  ;;  %1210 = vmatpush.msra.mxu0 %v6435_v15  ;;  %v6451_v14 = vld [vmem:[%s8368_s4 + $0xf0] sm:$0xff]  ;;  %v6458_v22 = vpop.f32.mrf.mxu0  ;;  %v6460_v23 = vpop.f32.mrf.mxu1 }
 0x187   :  { %8548 = vst [vmem:[#allocation144_spill] sm:$0xff] %v6440_v13  ;;  %1268 = vmatpush.msra.mxu2 %v6451_v14  ;;  %1240 = vmatpush.msra.mxu1 %v5713_v60 }
 0x188   :  { %8549 = vst [vmem:[#allocation145_spill] sm:$0xff] %v6442_v12  ;;  %1297 = vmatpush.msra.mxu3 %v6456_v20  ;;  %1211 = vmatpush.msra.mxu0 %v5708_v59 }
 0x189   :  { %8550 = vst [vmem:[#allocation146_spill] sm:$0xff] %v6444_v21  ;;  %1269 = vmatpush.msra.mxu2 %v5718_v61  ;;  %1241 = vmatpush.msra.mxu1 %v5755_v4  ;;  %v138_v61 = vld [vmem:[#allocation4] sm:$0xf] }
 0x18a   :  { %8551 = vst [vmem:[#allocation147_spill] sm:$0xff] %v6451_v14  ;;  %1298 = vmatpush.msra.mxu3 %v5729_v63  ;;  %1212 = vmatpush.msra.mxu0 %v5750_v3  ;;  %v6492_v4 = vperm.slane %v138_v61, 0 }
 0x18b   :  { %8552 = vst [vmem:[#allocation148_spill] sm:$0xff] %v6456_v20  ;;  %1270 = vmatpush.msra.mxu2 %v5760_v5  ;;  %1242 = vmatpush.msra.mxu1 %v5809_v18  ;;  %v6494_v5 = vperm.slane %v138_v61, 1 }
 0x18c   :  { %8553 = vst [vmem:[#allocation149_spill] sm:$0xff] %v6458_v22  ;;  %1299 = vmatpush.msra.mxu3 %v5779_v11  ;;  %1213 = vmatpush.msra.mxu0 %v5804_v17  ;;  %v263_v11 = vadd.f32 %v5736_v0, %v6492_v4  ;;  %v6518_v0 = vperm.slane %v138_v61, 2 }
 0x18d   :  { %8554 = vst [vmem:[#allocation150_spill] sm:$0xff] %v6460_v23  ;;  %1271 = vmatpush.msra.mxu2 %v5814_v19  ;;  %v6476_v59 = vpop.f32.mrf.mxu2  ;;  %v6478_v60 = vpop.f32.mrf.mxu3  ;;  %1243 = vmatpush.msra.mxu1 %v5863_v32  ;;  %v376_v17 = vadd.f32 %v5738_v1, %v6494_v5  ;;  %v6520_v1 = vperm.slane %v138_v61, 3 }
 0x18e   :  { %1300 = vmatpush.msra.mxu3 %v5833_v25  ;;  %8555 = vst [vmem:[#allocation151_spill] sm:$0xff] %v6476_v59  ;;  %1214 = vmatpush.msra.mxu0 %v5858_v31  ;;  %v6482_v63 = vpop.f32.mrf.mxu0  ;;  %v6484_v3 = vpop.f32.mrf.mxu1 }
 0x18f   :  { %8556 = vst [vmem:[#allocation152_spill] sm:$0xff] %v6478_v60  ;;  %1272 = vmatpush.msra.mxu2 %v5868_v33  ;;  %1244 = vmatpush.msra.mxu1 %v5917_v46  ;;  %v489_v46 = vadd.f32 %v5765_v6, %v6518_v0 }
 0x190   :  { %8557 = vst [vmem:[#allocation153_spill] sm:$0xff] %v6482_v63  ;;  %1301 = vmatpush.msra.mxu3 %v5887_v39  ;;  %1215 = vmatpush.msra.mxu0 %v5912_v45 }
 0x191   :  { %8558 = vst [vmem:[#allocation154_spill] sm:$0xff] %v6484_v3  ;;  %1273 = vmatpush.msra.mxu2 %v5922_v47  ;;  %1245 = vmatpush.msra.mxu1 %v5971_v2  ;;  %v602_v47 = vadd.f32 %v5767_v7, %v6520_v1 }
 0x192   :  { %1302 = vmatpush.msra.mxu3 %v5941_v53  ;;  %1216 = vmatpush.msra.mxu0 %v5966_v62  ;;  %v266_v53 = vadd.f32 %v5769_v8, %v6492_v4 }
 0x193   :  { %1274 = vmatpush.msra.mxu2 %v5976_v10  ;;  %1246 = vmatpush.msra.mxu1 %v6025_v24 }
 0x194   :  { %1303 = vmatpush.msra.mxu3 %v5995_v52  ;;  %1217 = vmatpush.msra.mxu0 %v6020_v44  ;;  %v8562_v44 = vld [vmem:[#allocation134_spill] sm:$0xff] }
 0x195   :  { %1275 = vmatpush.msra.mxu2 %v6030_v30  ;;  %v6508_v18 = vpop.f32.mrf.mxu2  ;;  %v6510_v19 = vpop.f32.mrf.mxu3  ;;  %1521 = vmatpush.msrb.mxu1 %v6232_v58 }
 0x196   :  { %1304 = vmatpush.msra.mxu3 %v6049_v55  ;;  %8559 = vst [vmem:[#allocation155_spill] sm:$0xff] %v6508_v18  ;;  %1492 = vmatpush.msrb.mxu0 %v6227_v16  ;;  %v930_v25 = vpop.f32.mrf.mxu0  ;;  %v959_v31 = vpop.f32.mrf.mxu1  ;;  %v379_v55 = vadd.f32 %v5771_v9, %v6494_v5  ;;  %v8561_v9 = vld [vmem:[#allocation133_spill] sm:$0xff] }
 0x197   :  { %8560 = vst [vmem:[#allocation156_spill] sm:$0xff] %v6510_v19  ;;  %1550 = vmatpush.msrb.mxu2 %v6237_v54  ;;  %v1029_v32 = vadd.f32 %v930_v25, %v263_v11  ;;  %v1030_v33 = vadd.f32 %v959_v31, %v376_v17  ;;  %1522 = vmatpush.msrb.mxu1 %v6264_v57  ;;  %v8563_v25 = vld [vmem:[#allocation135_spill] sm:$0xff]  ;;  %v8564_v31 = vld [vmem:[#allocation136_spill] sm:$0xff] }
 0x198   :  { %1579 = vmatpush.msrb.mxu3 %v6245_v43  ;;  %1493 = vmatpush.msrb.mxu0 %v6259_v38 }
 0x199   :  { %1551 = vmatpush.msrb.mxu2 %v6269_v49  ;;  %v1045_v39 = vmul.f32 0.5, %v1029_v32  ;;  %v1061_v45 = vmul.f32 0.5, %v1030_v33  ;;  %1523 = vmatpush.msrb.mxu1 %v6288_v48 }
 0x19a   :  { %1580 = vmatpush.msrb.mxu3 %v6276_v50  ;;  %1494 = vmatpush.msrb.mxu0 %v6283_v56 }
 0x19b   :  { %1552 = vmatpush.msrb.mxu2 %v6293_v51  ;;  %4814 = vtanh.f32 %v1045_v39  ;;  %1524 = vmatpush.msrb.mxu1 %v6312_v40  ;;  %v8565_v39 = vld [vmem:[#allocation137_spill] sm:$0xff] }
 0x19c   :  { %1581 = vmatpush.msrb.mxu3 %v6300_v42  ;;  %1495 = vmatpush.msrb.mxu0 %v6307_v41  ;;  %4816 = vtanh.f32 %v1061_v45  ;;  %v8566_v45 = vld [vmem:[#allocation138_spill] sm:$0xff] }
 0x19d   :  { %1553 = vmatpush.msrb.mxu2 %v6317_v37  ;;  %v988_v62 = vpop.f32.mrf.mxu2  ;;  %v1017_v2 = vpop.f32.mrf.mxu3  ;;  %1525 = vmatpush.msrb.mxu1 %v6336_v34 }
 0x19e   :  { %1582 = vmatpush.msrb.mxu3 %v6324_v36  ;;  %1496 = vmatpush.msrb.mxu0 %v6331_v35  ;;  %v1031_v6 = vadd.f32 %v988_v62, %v489_v46  ;;  %v1032_v10 = vadd.f32 %v1017_v2, %v602_v47  ;;  %v933_v7 = vpop.f32.mrf.mxu0  ;;  %v962_v24 = vpop.f32.mrf.mxu1  ;;  %v8567_v47 = vld [vmem:[#allocation139_spill] sm:$0xff]  ;;  %v8570_v2 = vld [vmem:[#allocation22_spill] sm:$0xff] }
 0x19f   :  { %1554 = vmatpush.msrb.mxu2 %v6341_v29  ;;  %v1033_v30 = vadd.f32 %v933_v7, %v266_v53  ;;  %v1034_v52 = vadd.f32 %v962_v24, %v379_v55  ;;  %1526 = vmatpush.msrb.mxu1 %v6368_v28  ;;  %v8568_v53 = vld [vmem:[#allocation140_spill] sm:$0xff]  ;;  %v8569_v55 = vld [vmem:[#allocation21_spill] sm:$0xff] }
 0x1a0   :  { %1583 = vmatpush.msrb.mxu3 %v6352_v26  ;;  %1497 = vmatpush.msrb.mxu0 %v6363_v27  ;;  %4818 = vtanh.f32 %v1031_v6  ;;  %v1081_v8 = vmul.f32 0.5, %v1032_v10  ;;  %v492_v62 = vadd.f32 %v8569_v55, %v6518_v0  ;;  %v605_v6 = vadd.f32 %v8570_v2, %v6520_v1  ;;  %v829_v7 = vld [vmem:[%s8366_s2] sm:$0xff]  ;;  %v8571_v24 = vld [vmem:[#allocation141_spill] sm:$0xff] }
 0x1a1   :  { %1555 = vmatpush.msrb.mxu2 %v8561_v9  ;;  %v4815_v61 = vpop.eup %4814  ;;  %v1046_v11 = vmul.f32 0.5, %v1033_v30  ;;  %v1062_v17 = vmul.f32 0.5, %v1034_v52  ;;  %1527 = vmatpush.msrb.mxu1 %v8564_v31  ;;  %v8572_v30 = vld [vmem:[#allocation142_spill] sm:$0xff]  ;;  %v8573_v52 = vld [vmem:[#allocation23_spill] sm:$0xff] }
 0x1a2   :  { %1584 = vmatpush.msrb.mxu3 %v8562_v44  ;;  %1498 = vmatpush.msrb.mxu0 %v8563_v25  ;;  %v4817_v32 = vpop.eup %4816  ;;  %v1053_v33 = vadd.f32 1.0, %v4815_v61  ;;  %4820 = vtanh.f32 %v1081_v8  ;;  %v269_v8 = vadd.f32 %v8573_v52, %v6492_v4  ;;  %v8574_v61 = vld [vmem:[#allocation24_spill] sm:$0xff] }
 0x1a3   :  { %1556 = vmatpush.msrb.mxu2 %v8565_v39  ;;  %v1069_v46 = vadd.f32 1.0, %v4817_v32  ;;  %4822 = vtanh.f32 %v1046_v11  ;;  %1528 = vmatpush.msrb.mxu1 %v8568_v53  ;;  %v382_v11 = vadd.f32 %v8574_v61, %v6494_v5 }
 0x1a4   :  { %1585 = vmatpush.msrb.mxu3 %v8566_v45  ;;  %1499 = vmatpush.msrb.mxu0 %v8567_v47  ;;  %v1057_v10 = vmul.f32 0.5, %v1053_v33  ;;  %4824 = vtanh.f32 %v1062_v17 }
 0x1a5   :  { %1557 = vmatpush.msrb.mxu2 %v8571_v24  ;;  %v1073_v32 = vmul.f32 0.5, %v1069_v46  ;;  %v991_v55 = vpop.f32.mrf.mxu2  ;;  %v1020_v19 = vpop.f32.mrf.mxu3  ;;  %1529 = vmatpush.msrb.mxu1 %v6440_v13 }
 0x1a6   :  { %1586 = vmatpush.msrb.mxu3 %v8572_v30  ;;  %1500 = vmatpush.msrb.mxu0 %v6435_v15  ;;  %v4819_v33 = vpop.eup %4818  ;;  %v1035_v2 = vadd.f32 %v991_v55, %v492_v62  ;;  %v1036_v17 = vadd.f32 %v1020_v19, %v605_v6  ;;  %v936_v18 = vpop.f32.mrf.mxu0  ;;  %v8576_v6 = vld [vmem:[#allocation25_spill] sm:$0xff] }
 0x1a7   :  { %v965_v3 = vpop.f32.mrf.mxu1  ;;  %1558 = vmatpush.msrb.mxu2 %v6451_v14  ;;  %v1097_v52 = vmul.f32 %v1073_v32, %v829_v7  ;;  %v1101_v63 = vmul.f32 %v4819_v33, %v1057_v10  ;;  %v1037_v60 = vadd.f32 %v936_v18, %v269_v8  ;;  %v495_v55 = vadd.f32 %v8576_v6, %v6518_v0  ;;  %v8577_v18 = vld [vmem:[#allocation26_spill] sm:$0xff] }
 0x1a8   :  { %1587 = vmatpush.msrb.mxu3 %v6456_v20  ;;  %v1038_v61 = vadd.f32 %v965_v3, %v382_v11  ;;  %v4821_v46 = vpop.eup %4820  ;;  %4826 = vtanh.f32 %v1035_v2  ;;  %v1082_v59 = vmul.f32 0.5, %v1036_v17  ;;  %v608_v3 = vadd.f32 %v8577_v18, %v6520_v1 }
 0x1a9   :  { %v4823_v23 = vpop.eup %4822  ;;  %v6571_v22 = vadd.f32 %v1101_v63, %v1097_v52  ;;  %v1047_v21 = vmul.f32 0.5, %v1037_v60  ;;  %v1089_v10 = vadd.f32 1.0, %v4821_v46  ;;  %v830_v63 = vld [vmem:[%s8366_s2 + $0x8] sm:$0xff]  ;;  %v8578_v60 = vld [vmem:[#allocation27_spill] sm:$0xff] }
 0x1aa   :  { %v1063_v12 = vmul.f32 0.5, %v1038_v61  ;;  %v4825_v62 = vpop.eup %4824  ;;  %v1054_v19 = vadd.f32 1.0, %v4823_v23  ;;  %4828 = vtanh.f32 %v1082_v59  ;;  %v272_v23 = vadd.f32 %v8578_v60, %v6492_v4  ;;  %v8579_v59 = vld [vmem:[#allocation28_spill] sm:$0xff] }
 0x1ab   :  { %8575 = vst [vmem:[#allocation133_spill] sm:$0xff] %v6571_v22  ;;  %4830 = vtanh.f32 %v6571_v22  ;;  %v1070_v7 = vadd.f32 1.0, %v4825_v62  ;;  %v385_v11 = vadd.f32 %v8579_v59, %v6494_v5  ;;  %v1093_v14 = vmul.f32 0.5, %v1089_v10  ;;  %v8581_v22 = vld [vmem:[#allocation29_spill] sm:$0xff] }
 0x1ac   :  { %v1058_v8 = vmul.f32 0.5, %v1054_v19  ;;  %4832 = vtanh.f32 %v1047_v21 }
 0x1ad   :  { %v1074_v32 = vmul.f32 0.5, %v1070_v7  ;;  %4834 = vtanh.f32 %v1063_v12  ;;  %v994_v33 = vpop.f32.mrf.mxu2  ;;  %v1023_v2 = vpop.f32.mrf.mxu3 }
 0x1ae   :  { %v4827_v17 = vpop.eup %4826  ;;  %v1039_v52 = vadd.f32 %v994_v33, %v495_v55  ;;  %v1040_v61 = vadd.f32 %v1023_v2, %v608_v3  ;;  %v939_v46 = vpop.f32.mrf.mxu0  ;;  %v498_v55 = vadd.f32 %v8581_v22, %v6518_v0 }
 0x1af   :  { %v968_v62 = vpop.f32.mrf.mxu1  ;;  %v1098_v19 = vmul.f32 %v1074_v32, %v830_v63  ;;  %v1102_v6 = vmul.f32 %v4827_v17, %v1058_v8  ;;  %v1041_v18 = vadd.f32 %v939_v46, %v272_v23  ;;  %v8582_v8 = vld [vmem:[#allocation30_spill] sm:$0xff] }
 0x1b0   :  { %v1042_v20 = vadd.f32 %v968_v62, %v385_v11  ;;  %v4829_v21 = vpop.eup %4828  ;;  %4836 = vtanh.f32 %v1039_v52  ;;  %v1083_v60 = vmul.f32 0.5, %v1040_v61  ;;  %v611_v63 = vadd.f32 %v8582_v8, %v6520_v1 }
 0x1b1   :  { %v4831_v13 = vpop.eup %4830  ;;  %v6585_v15 = vadd.f32 %v1102_v6, %v1098_v19  ;;  %v1048_v7 = vmul.f32 0.5, %v1041_v18  ;;  %v1090_v10 = vadd.f32 1.0, %v4829_v21 }
 0x1b2   :  { %v1064_v12 = vmul.f32 0.5, %v1042_v20  ;;  %v4833_v59 = vpop.eup %4832  ;;  %v1113_v3 = vmul.f32 %v4831_v13, %v1093_v14  ;;  %4838 = vtanh.f32 %v1083_v60  ;;  %v831_v13 = vld [vmem:[%s8366_s2 + $0x10] sm:$0xff] }
 0x1b3   :  { %8580 = vst [vmem:[#allocation134_spill] sm:$0xff] %v6585_v15  ;;  %v4835_v33 = vpop.eup %4834  ;;  %4840 = vtanh.f32 %v6585_v15  ;;  %v1055_v23 = vadd.f32 1.0, %v4833_v59 }
 0x1b4   :  { %3223 = vst [vmem:[#allocation12] sm:$0x1] %v1113_v3  ;;  %v1071_v11 = vadd.f32 1.0, %v4835_v33  ;;  %4842 = vtanh.f32 %v1048_v7  ;;  %1218 = vmatmul.f32.vlgmr.msra.gmra.mxu0 %v1113_v3  ;;  %1247 = vmatmul.f32.vlgmr.msra.gmra.mxu1 %v1113_v3  ;;  %v3167_v20 = vrot.slane %v1113_v3, 1  ;;  %v3168_v32 = vrot.slane %v1113_v3, 2 }
 0x1b5   :  { %v1059_v2 = vmul.f32 0.5, %v1055_v23  ;;  %4844 = vtanh.f32 %v1064_v12  ;;  %1276 = vmatmul.f32.vlgmr.msra.gmra.mxu2 %v1113_v3  ;;  %1305 = vmatmul.f32.vlgmr.msra.gmra.mxu3 %v1113_v3  ;;  %v997_v14 = vpop.f32.mrf.mxu2  ;;  %v1026_v22 = vpop.f32.mrf.mxu3  ;;  %v3169_v17 = vrot.slane %v1113_v3, 3  ;;  %v3170_v52 = vrot.slane %v1113_v3, 4 }
 0x1b6   :  { %v4837_v61 = vpop.eup %4836  ;;  %v1075_v46 = vmul.f32 0.5, %v1071_v11  ;;  %v1043_v62 = vadd.f32 %v997_v14, %v498_v55  ;;  %v1044_v19 = vadd.f32 %v1026_v22, %v611_v63  ;;  %3224 = vst [vmem:[#allocation12 + $0x8] sm:$0x1] %v3167_v20  ;;  %v3171_v6 = vrot.slane %v1113_v3, 5 }
 0x1b7   :  { %v1103_v18 = vmul.f32 %v4837_v61, %v1059_v2  ;;  %3225 = vst [vmem:[#allocation12 + $0x10] sm:$0x1] %v3168_v32  ;;  %v3172_v21 = vrot.slane %v1113_v3, 6  ;;  %v1094_v7 = vmul.f32 0.5, %v1090_v10  ;;  %v3173_v8 = vrot.slane %v1113_v3, 7  ;;  %v832_v10 = vld [vmem:[%s8366_s2 + $0x18] sm:$0xff] }
 0x1b8   :  { %v4839_v60 = vpop.eup %4838  ;;  %v1099_v59 = vmul.f32 %v1075_v46, %v831_v13  ;;  %4846 = vtanh.f32 %v1043_v62  ;;  %v1084_v12 = vmul.f32 0.5, %v1044_v19  ;;  %3226 = vst [vmem:[#allocation12 + $0x18] sm:$0x1] %v3169_v17  ;;  %s5381_s2 = smov [#allocation13]  }
 0x1b9   :  { %v4841_v33 = vpop.eup %4840  ;;  %3227 = vst [vmem:[#allocation12 + $0x20] sm:$0x1] %v3170_v52  ;;  %v1091_v32 = vadd.f32 1.0, %v4839_v60  ;;  %s4633_s9 = sshll.u32 %s5381_s2, 4  ;;  %s4634_s9 = int_to_ptr.vmem [resolvable:$true] %s4633_s9 }
 0x1ba   :  { %v4843_v23 = vpop.eup %4842  ;;  %v1114_v15 = vmul.f32 %v4841_v33, %v1094_v7  ;;  %v6595_v30 = vadd.f32 %v1103_v18, %v1099_v59  ;;  %3228 = vst [vmem:[#allocation12 + $0x28] sm:$0x1] %v3171_v6  ;;  %4848 = vtanh.f32 %v1084_v12 }
 0x1bb   :  { %v4845_v55 = vpop.eup %4844  ;;  %v1056_v63 = vadd.f32 1.0, %v4843_v23  ;;  %3229 = vst [vmem:[#allocation12 + $0x30] sm:$0x1] %v3172_v21  ;;  %v1095_v18 = vmul.f32 0.5, %v1091_v32 }
 0x1bc   :  { %8583 = vst [vmem:[#allocation135_spill] sm:$0xff] %v6595_v30  ;;  %4850 = vtanh.f32 %v6595_v30  ;;  %v1072_v11 = vadd.f32 1.0, %v4845_v55  ;;  %1221 = vmatmul.f32.gmra.mxu0 %v1114_v15  ;;  %1250 = vmatmul.f32.gmra.mxu1 %v1114_v15  ;;  %v3174_v3 = vrot.slane %v1114_v15, 1  ;;  %v3175_v20 = vrot.slane %v1114_v15, 2 }
 0x1bd   :  { %3231 = vst [vmem:[#allocation12 + $0x40] sm:$0x1] %v1114_v15  ;;  %v1060_v2 = vmul.f32 0.5, %v1056_v63  ;;  %1279 = vmatmul.f32.gmra.mxu2 %v1114_v15  ;;  %1308 = vmatmul.f32.gmra.mxu3 %v1114_v15  ;;  %v3176_v13 = vrot.slane %v1114_v15, 3  ;;  %v3177_v14 = vrot.slane %v1114_v15, 4  ;;  %v3178_v52 = vrot.slane %v1114_v15, 5 }
 0x1be   :  { %3230 = vst [vmem:[#allocation12 + $0x38] sm:$0x1] %v3173_v8  ;;  %v4847_v22 = vpop.eup %4846  ;;  %v1076_v17 = vmul.f32 0.5, %v1072_v11  ;;  %v3179_v46 = vrot.slane %v1114_v15, 6  ;;  %v3180_v19 = vrot.slane %v1114_v15, 7 }
 0x1bf   :  { %3232 = vst [vmem:[#allocation12 + $0x48] sm:$0x1] %v3174_v3  ;;  %v1104_v61 = vmul.f32 %v4847_v22, %v1060_v2 }
 0x1c0   :  { %3233 = vst [vmem:[#allocation12 + $0x50] sm:$0x1] %v3175_v20  ;;  %v1100_v62 = vmul.f32 %v1076_v17, %v832_v10  ;;  %v4849_v6 = vpop.eup %4848 }
 0x1c1   :  { %3234 = vst [vmem:[#allocation12 + $0x58] sm:$0x1] %v3176_v13  ;;  %v1092_v59 = vadd.f32 1.0, %v4849_v6  ;;  %v6636_v6 = vld [vmem:[%s8368_s4 + $0xa8] sm:$0xff] }
 0x1c2   :  { %3235 = vst [vmem:[#allocation12 + $0x60] sm:$0x1] %v3177_v14  ;;  %v4851_v21 = vpop.eup %4850  ;;  %v6601_v60 = vadd.f32 %v1104_v61, %v1100_v62  ;;  %v6612_v61 = vld [vmem:[%s8368_s4 + $0xc8] sm:$0xff]  ;;  %v6624_v62 = vld [vmem:[%s8368_s4 + $0xd8] sm:$0xff] }
 0x1c3   :  { %3236 = vst [vmem:[#allocation12 + $0x68] sm:$0x1] %v3178_v52  ;;  %v1115_v7 = vmul.f32 %v4851_v21, %v1095_v18  ;;  %v1096_v63 = vmul.f32 0.5, %v1092_v59  ;;  %v6607_v52 = vld [vmem:[%s8368_s4 + $0xc0] sm:$0xff]  ;;  %1530 = vmatpush.msrb.mxu1 %v6612_v61  ;;  %1588 = vmatpush.msrb.mxu3 %v6624_v62  ;;  %v6641_v18 = vld [vmem:[%s8368_s4 + $0xb0] sm:$0xff]  ;;  %v6648_v21 = vld [vmem:[%s8368_s4 + $0xb8] sm:$0xff] }
 0x1c4   :  { %8584 = vst [vmem:[#allocation136_spill] sm:$0xff] %v6601_v60  ;;  %4852 = vtanh.f32 %v6601_v60  ;;  %1501 = vmatpush.msrb.mxu0 %v6607_v52  ;;  %v6660_v59 = vld [vmem:[%s8368_s4 + $0x88] sm:$0xff]  ;;  %v8592_v60 = vld [vmem:[#allocation31_spill] sm:$0xff] }
 0x1c5   :  { %3237 = vst [vmem:[#allocation12 + $0x70] sm:$0x1] %v3179_v46  ;;  %1224 = vmatmul.f32.gmra.mxu0 %v1115_v7  ;;  %1253 = vmatmul.f32.gmra.mxu1 %v1115_v7  ;;  %v3181_v12 = vrot.slane %v1115_v7, 1  ;;  %v3182_v33 = vrot.slane %v1115_v7, 2  ;;  %v3183_v8 = vrot.slane %v1115_v7, 3  ;;  %v3184_v15 = vrot.slane %v1115_v7, 4 }
 0x1c6   :  { %3238 = vst [vmem:[#allocation12 + $0x78] sm:$0x1] %v3180_v19  ;;  %1282 = vmatmul.f32.gmra.mxu2 %v1115_v7  ;;  %1311 = vmatmul.f32.gmra.mxu3 %v1115_v7  ;;  %v3185_v23 = vrot.slane %v1115_v7, 5  ;;  %v3186_v55 = vrot.slane %v1115_v7, 6  ;;  %v3187_v11 = vrot.slane %v1115_v7, 7  ;;  %v6617_v46 = vld [vmem:[%s8368_s4 + $0xd0] sm:$0xff]  ;;  %v275_v30 = vadd.f32 %v8592_v60, %v6492_v4 }
 0x1c7   :  { %3239 = vst [vmem:[#allocation12 + $0x80] sm:$0x1] %v1115_v7  ;;  %1559 = vmatpush.msrb.mxu2 %v6617_v46  ;;  %v6631_v19 = vld [vmem:[%s8368_s4 + $0xa0] sm:$0xff]  ;;  %1531 = vmatpush.msrb.mxu1 %v6636_v6 }
 0x1c8   :  { %3240 = vst [vmem:[#allocation12 + $0x88] sm:$0x1] %v3181_v12  ;;  %1502 = vmatpush.msrb.mxu0 %v6631_v19  ;;  %1589 = vmatpush.msrb.mxu3 %v6648_v21  ;;  %v6655_v7 = vld [vmem:[%s8368_s4 + $0x80] sm:$0xff]  ;;  %v6665_v12 = vld [vmem:[%s8368_s4 + $0x90] sm:$0xff] }
 0x1c9   :  { %3241 = vst [vmem:[#allocation12 + $0x90] sm:$0x1] %v3182_v33  ;;  %1560 = vmatpush.msrb.mxu2 %v6641_v18  ;;  %1532 = vmatpush.msrb.mxu1 %v6660_v59  ;;  %v6672_v33 = vld [vmem:[%s8368_s4 + $0x98] sm:$0xff] }
 0x1ca   :  { %3242 = vst [vmem:[#allocation12 + $0x98] sm:$0x1] %v3183_v8  ;;  %v4853_v10 = vpop.eup %4852  ;;  %1503 = vmatpush.msrb.mxu0 %v6655_v7  ;;  %1590 = vmatpush.msrb.mxu3 %v6672_v33  ;;  %v6679_v8 = vld [vmem:[%s8368_s4 + $0x60] sm:$0xff] }
 0x1cb   :  { %3243 = vst [vmem:[#allocation12 + $0xa0] sm:$0x1] %v3184_v15  ;;  %v1116_v3 = vmul.f32 %v4853_v10, %v1096_v63  ;;  %1561 = vmatpush.msrb.mxu2 %v6665_v12  ;;  %v6684_v15 = vld [vmem:[%s8368_s4 + $0x68] sm:$0xff]  ;;  %v6703_v63 = vld [vmem:[%s8368_s4 + $0x40] sm:$0xff] }
 0x1cc   :  { %3244 = vst [vmem:[#allocation12 + $0xa8] sm:$0x1] %v3185_v23  ;;  %v6689_v23 = vld [vmem:[%s8368_s4 + $0x70] sm:$0xff]  ;;  %1504 = vmatpush.msrb.mxu0 %v6679_v8  ;;  %1533 = vmatpush.msrb.mxu1 %v6684_v15  ;;  %v6708_v10 = vld [vmem:[%s8368_s4 + $0x48] sm:$0xff] }
 0x1cd   :  { %3245 = vst [vmem:[#allocation12 + $0xb0] sm:$0x1] %v3186_v55  ;;  %1227 = vmatmul.f32.gmra.mxu0 %v1116_v3  ;;  %1256 = vmatmul.f32.gmra.mxu1 %v1116_v3  ;;  %v3188_v20 = vrot.slane %v1116_v3, 1  ;;  %v3189_v32 = vrot.slane %v1116_v3, 2  ;;  %v3190_v2 = vrot.slane %v1116_v3, 3  ;;  %v3191_v13 = vrot.slane %v1116_v3, 4 }
 0x1ce   :  { %3247 = vst [vmem:[#allocation12 + $0xc0] sm:$0x1] %v1116_v3  ;;  %1285 = vmatmul.f32.gmra.mxu2 %v1116_v3  ;;  %1314 = vmatmul.f32.gmra.mxu3 %v1116_v3  ;;  %v3192_v14 = vrot.slane %v1116_v3, 5  ;;  %v3193_v22 = vrot.slane %v1116_v3, 6  ;;  %v3194_v17 = vrot.slane %v1116_v3, 7  ;;  %v6696_v55 = vld [vmem:[%s8368_s4 + $0x78] sm:$0xff] }
 0x1cf   :  { %3246 = vst [vmem:[#allocation12 + $0xb8] sm:$0x1] %v3187_v11  ;;  %1562 = vmatpush.msrb.mxu2 %v6689_v23  ;;  %1591 = vmatpush.msrb.mxu3 %v6696_v55  ;;  %v6713_v11 = vld [vmem:[%s8368_s4 + $0x50] sm:$0xff]  ;;  %v6720_v3 = vld [vmem:[%s8368_s4 + $0x58] sm:$0xff] }
 0x1d0   :  { %3248 = vst [vmem:[#allocation12 + $0xc8] sm:$0x1] %v3188_v20  ;;  %1505 = vmatpush.msrb.mxu0 %v6703_v63  ;;  %1534 = vmatpush.msrb.mxu1 %v6708_v10  ;;  %v6727_v20 = vld [vmem:[%s8368_s4 + $0x20] sm:$0xff] }
 0x1d1   :  { %3249 = vst [vmem:[#allocation12 + $0xd0] sm:$0x1] %v3189_v32  ;;  %1563 = vmatpush.msrb.mxu2 %v6713_v11  ;;  %1592 = vmatpush.msrb.mxu3 %v6720_v3  ;;  %v6732_v32 = vld [vmem:[%s8368_s4 + $0x28] sm:$0xff] }
 0x1d2   :  { %3250 = vst [vmem:[#allocation12 + $0xd8] sm:$0x1] %v3190_v2  ;;  %v6737_v2 = vld [vmem:[%s8368_s4 + $0x30] sm:$0xff]  ;;  %1506 = vmatpush.msrb.mxu0 %v6727_v20  ;;  %1535 = vmatpush.msrb.mxu1 %v6732_v32 }
 0x1d3   :  { %3251 = vst [vmem:[#allocation12 + $0xe0] sm:$0x1] %v3191_v13  ;;  %v6744_v13 = vld [vmem:[%s8368_s4 + $0x38] sm:$0xff]  ;;  %1564 = vmatpush.msrb.mxu2 %v6737_v2 }
 0x1d4   :  { %3252 = vst [vmem:[#allocation12 + $0xe8] sm:$0x1] %v3192_v14  ;;  %1593 = vmatpush.msrb.mxu3 %v6744_v13  ;;  %v6751_v14 = vld [vmem:[%s8368_s4] sm:$0xff] }
 0x1d5   :  { %3253 = vst [vmem:[#allocation12 + $0xf0] sm:$0x1] %v3193_v22  ;;  %v6756_v22 = vld [vmem:[%s8368_s4 + $0x8] sm:$0xff]  ;;  %1507 = vmatpush.msrb.mxu0 %v6751_v14 }
 0x1d6   :  { %3254 = vst [vmem:[#allocation12 + $0xf8] sm:$0x1] %v3194_v17  ;;  %v6761_v17 = vld [vmem:[%s8368_s4 + $0x10] sm:$0xff]  ;;  %1536 = vmatpush.msrb.mxu1 %v6756_v22 }
 0x1d7   :  { %8585 = vst [vmem:[#allocation137_spill] sm:$0xff] %v6713_v11  ;;  %1565 = vmatpush.msrb.mxu2 %v6761_v17  ;;  %1782 = vmatpush.msra.mxu0 %v6227_v16  ;;  %v8594_v16 = vld [vmem:[#allocation33_spill] sm:$0xff] }
 0x1d8   :  { %8586 = vst [vmem:[#allocation138_spill] sm:$0xff] %v6720_v3  ;;  %1811 = vmatpush.msra.mxu1 %v6232_v58 }
 0x1d9   :  { %8587 = vst [vmem:[#allocation139_spill] sm:$0xff] %v6727_v20  ;;  %1840 = vmatpush.msra.mxu2 %v6237_v54  ;;  %1783 = vmatpush.msra.mxu0 %v6259_v38  ;;  %v501_v54 = vadd.f32 %v8594_v16, %v6518_v0  ;;  %v8601_v16 = vld [vmem:[#allocation40_spill] sm:$0xff] }
 0x1da   :  { %8588 = vst [vmem:[#allocation140_spill] sm:$0xff] %v6732_v32  ;;  %v6772_v32 = vld [vmem:[%s8368_s4 + $0x18] sm:$0xff]  ;;  %1812 = vmatpush.msra.mxu1 %v6264_v57 }
 0x1db   :  { %8589 = vst [vmem:[#allocation21_spill] sm:$0xff] %v6737_v2  ;;  %1594 = vmatpush.msrb.mxu3 %v6772_v32  ;;  %1841 = vmatpush.msra.mxu2 %v6269_v49  ;;  %v8596_v49 = vld [vmem:[#allocation35_spill] sm:$0xff] }
 0x1dc   :  { %8590 = vst [vmem:[#allocation22_spill] sm:$0xff] %v6744_v13  ;;  %v8593_v13 = vld [vmem:[#allocation32_spill] sm:$0xff]  ;;  %1784 = vmatpush.msra.mxu0 %v6283_v56  ;;  %1813 = vmatpush.msra.mxu1 %v6288_v48  ;;  %v278_v57 = vadd.f32 %v8596_v49, %v6492_v4 }
 0x1dd   :  { %8591 = vst [vmem:[#allocation141_spill] sm:$0xff] %v6756_v22  ;;  %v388_v2 = vadd.f32 %v8593_v13, %v6494_v5  ;;  %1869 = vmatpush.msra.mxu3 %v6245_v43  ;;  %v8595_v43 = vld [vmem:[#allocation34_spill] sm:$0xff]  ;;  %1842 = vmatpush.msra.mxu2 %v6293_v51 }
 0x1de   :  { %v614_v58 = vadd.f32 %v8595_v43, %v6520_v1  ;;  %1785 = vmatpush.msra.mxu0 %v6307_v41  ;;  %1814 = vmatpush.msra.mxu1 %v6312_v40 }
 0x1df   :  { %1870 = vmatpush.msra.mxu3 %v6276_v50  ;;  %v8597_v50 = vld [vmem:[#allocation36_spill] sm:$0xff]  ;;  %1843 = vmatpush.msra.mxu2 %v6317_v37 }
 0x1e0   :  { %v391_v38 = vadd.f32 %v8597_v50, %v6494_v5  ;;  %1786 = vmatpush.msra.mxu0 %v6331_v35  ;;  %1815 = vmatpush.msra.mxu1 %v6336_v34 }
 0x1e1   :  { %1871 = vmatpush.msra.mxu3 %v6300_v42  ;;  %1844 = vmatpush.msra.mxu2 %v6341_v29 }
 0x1e2   :  { %1787 = vmatpush.msra.mxu0 %v6363_v27  ;;  %1816 = vmatpush.msra.mxu1 %v6368_v28  ;;  %v8599_v27 = vld [vmem:[#allocation38_spill] sm:$0xff] }
 0x1e3   :  { %1872 = vmatpush.msra.mxu3 %v6324_v36  ;;  %1845 = vmatpush.msra.mxu2 %v8561_v9  ;;  %v617_v35 = vadd.f32 %v8599_v27, %v6520_v1  ;;  %v8600_v9 = vld [vmem:[#allocation39_spill] sm:$0xff] }
 0x1e4   :  { %1788 = vmatpush.msra.mxu0 %v8563_v25  ;;  %1817 = vmatpush.msra.mxu1 %v8564_v31 }
 0x1e5   :  { %1873 = vmatpush.msra.mxu3 %v6352_v26  ;;  %v8598_v26 = vld [vmem:[#allocation37_spill] sm:$0xff]  ;;  %1846 = vmatpush.msra.mxu2 %v8565_v39  ;;  %v8602_v39 = vld [vmem:[#allocation142_spill] sm:$0xff] }
 0x1e6   :  { %v504_v29 = vadd.f32 %v8598_v26, %v6518_v0  ;;  %1789 = vmatpush.msra.mxu0 %v8567_v47  ;;  %1818 = vmatpush.msra.mxu1 %v8568_v53  ;;  %v8605_v47 = vld [vmem:[#allocation144_spill] sm:$0xff] }
 0x1e7   :  { %1874 = vmatpush.msra.mxu3 %v8562_v44  ;;  %v281_v44 = vadd.f32 %v8600_v9, %v6492_v4  ;;  %1847 = vmatpush.msra.mxu2 %v8571_v24 }
 0x1e8   :  { %1819 = vmatpush.msra.mxu1 %v8605_v47 }
 0x1e9   :  { %1875 = vmatpush.msra.mxu3 %v8566_v45  ;;  %v8603_v45 = vld [vmem:[#allocation133_spill] sm:$0xff] }
 0x1ea   :  { %1820 = vmatpush.msra.mxu1 %v6612_v61  ;;  %v8608_v61 = vld [vmem:[#allocation41_spill] sm:$0xff] }
 0x1eb   :  { %1876 = vmatpush.msra.mxu3 %v8602_v39 }
 0x1ec   :  { %1821 = vmatpush.msra.mxu1 %v6636_v6  ;;  %v8610_v6 = vld [vmem:[#allocation43_spill] sm:$0xff] }
 0x1ed   :  { %v284_v26 = vadd.f32 %v8610_v6, %v6492_v4 }
 0x1ee   :  { %1822 = vmatpush.msra.mxu1 %v6660_v59 }
 0x1f0   :  { %1823 = vmatpush.msra.mxu1 %v6684_v15  ;;  %v8614_v15 = vld [vmem:[#allocation137_spill] sm:$0xff] }
 0x1f2   :  { %1824 = vmatpush.msra.mxu1 %v6708_v10 }
 0x231   :  { %v1219_v20 = vpop.f32.mrf.mxu0  ;;  %v1248_v3 = vpop.f32.mrf.mxu1 }
 0x232   :  { %v1318_v11 = vadd.f32 %v1219_v20, %v275_v30  ;;  %v1319_v60 = vadd.f32 %v1248_v3, %v388_v2 }
 0x234   :  { %v1334_v13 = vmul.f32 0.5, %v1318_v11  ;;  %v1350_v22 = vmul.f32 0.5, %v1319_v60 }
 0x236   :  { %4854 = vtanh.f32 %v1334_v13 }
 0x237   :  { %4856 = vtanh.f32 %v1350_v22 }
 0x238   :  { %v1277_v56 = vpop.f32.mrf.mxu2  ;;  %v1306_v30 = vpop.f32.mrf.mxu3 }
 0x239   :  { %v1320_v48 = vadd.f32 %v1277_v56, %v501_v54  ;;  %v1321_v11 = vadd.f32 %v1306_v30, %v614_v58  ;;  %v1222_v3 = vpop.f32.mrf.mxu0  ;;  %v1251_v20 = vpop.f32.mrf.mxu1  ;;  %v394_v54 = vadd.f32 %v8601_v16, %v6494_v5  ;;  %v8604_v56 = vld [vmem:[#allocation143_spill] sm:$0xff] }
 0x23a   :  { %v1322_v42 = vadd.f32 %v1222_v3, %v278_v57  ;;  %v1323_v51 = vadd.f32 %v1251_v20, %v391_v38  ;;  %1790 = vmatpush.msra.mxu0 %v8604_v56  ;;  %v8606_v3 = vld [vmem:[#allocation147_spill] sm:$0xff]  ;;  %v8607_v20 = vld [vmem:[#allocation148_spill] sm:$0xff] }
 0x23b   :  { %4858 = vtanh.f32 %v1320_v48  ;;  %v1370_v2 = vmul.f32 0.5, %v1321_v11  ;;  %1848 = vmatpush.msra.mxu2 %v8606_v3  ;;  %1877 = vmatpush.msra.mxu3 %v8607_v20  ;;  %v8617_v56 = vld [vmem:[#allocation139_spill] sm:$0xff] }
 0x23c   :  { %v4855_v40 = vpop.eup %4854  ;;  %v1335_v41 = vmul.f32 0.5, %v1322_v42  ;;  %v1351_v22 = vmul.f32 0.5, %v1323_v51  ;;  %1791 = vmatpush.msra.mxu0 %v6607_v52 }
 0x23d   :  { %v4857_v36 = vpop.eup %4856  ;;  %v1342_v37 = vadd.f32 1.0, %v4855_v40  ;;  %4860 = vtanh.f32 %v1370_v2  ;;  %1849 = vmatpush.msra.mxu2 %v6617_v46  ;;  %1878 = vmatpush.msra.mxu3 %v6624_v62  ;;  %v8609_v46 = vld [vmem:[#allocation42_spill] sm:$0xff] }
 0x23e   :  { %v1358_v34 = vadd.f32 1.0, %v4857_v36  ;;  %4862 = vtanh.f32 %v1335_v41  ;;  %1792 = vmatpush.msra.mxu0 %v6631_v19  ;;  %v620_v62 = vadd.f32 %v8609_v46, %v6520_v1  ;;  %v8621_v46 = vld [vmem:[#allocation135_spill] sm:$0xff] }
 0x23f   :  { %v1346_v28 = vmul.f32 0.5, %v1342_v37  ;;  %4864 = vtanh.f32 %v1351_v22  ;;  %1850 = vmatpush.msra.mxu2 %v6641_v18  ;;  %1879 = vmatpush.msra.mxu3 %v6648_v21  ;;  %v507_v37 = vadd.f32 %v8608_v61, %v6518_v0  ;;  %v8611_v18 = vld [vmem:[#allocation44_spill] sm:$0xff] }
 0x240   :  { %v1362_v60 = vmul.f32 0.5, %v1358_v34  ;;  %v1280_v13 = vpop.f32.mrf.mxu2  ;;  %v1309_v25 = vpop.f32.mrf.mxu3  ;;  %1793 = vmatpush.msra.mxu0 %v6655_v7 }
 0x241   :  { %v4859_v31 = vpop.eup %4858  ;;  %v1324_v43 = vadd.f32 %v1280_v13, %v504_v29  ;;  %v1325_v58 = vadd.f32 %v1309_v25, %v617_v35  ;;  %v397_v29 = vadd.f32 %v8611_v18, %v6494_v5  ;;  %1851 = vmatpush.msra.mxu2 %v6665_v12  ;;  %1880 = vmatpush.msra.mxu3 %v6672_v33  ;;  %v8612_v35 = vld [vmem:[#allocation134_spill] sm:$0xff] }
 0x242   :  { %v1386_v49 = vmul.f32 %v1362_v60, %v8603_v45  ;;  %v1390_v57 = vmul.f32 %v4859_v31, %v1346_v28  ;;  %v1225_v50 = vpop.f32.mrf.mxu0  ;;  %v1254_v38 = vpop.f32.mrf.mxu1  ;;  %1794 = vmatpush.msra.mxu0 %v6679_v8  ;;  %v8613_v8 = vld [vmem:[#allocation45_spill] sm:$0xff] }
 0x243   :  { %v4861_v53 = vpop.eup %4860  ;;  %4866 = vtanh.f32 %v1324_v43  ;;  %v1371_v30 = vmul.f32 0.5, %v1325_v58  ;;  %v1326_v48 = vadd.f32 %v1225_v50, %v281_v44  ;;  %v1327_v11 = vadd.f32 %v1254_v38, %v394_v54  ;;  %1852 = vmatpush.msra.mxu2 %v6689_v23  ;;  %1881 = vmatpush.msra.mxu3 %v6696_v55  ;;  %v8616_v38 = vld [vmem:[#allocation138_spill] sm:$0xff] }
 0x244   :  { %v4863_v24 = vpop.eup %4862  ;;  %v6829_v42 = vadd.f32 %v1390_v57, %v1386_v49  ;;  %v1378_v36 = vadd.f32 1.0, %v4861_v53  ;;  %1795 = vmatpush.msra.mxu0 %v6703_v63  ;;  %v510_v58 = vadd.f32 %v8613_v8, %v6518_v0  ;;  %v8615_v57 = vld [vmem:[#allocation46_spill] sm:$0xff]  ;;  %v8623_v8 = vld [vmem:[#allocation136_spill] sm:$0xff] }
 0x245   :  { %v4865_v51 = vpop.eup %4864  ;;  %v1343_v2 = vadd.f32 1.0, %v4863_v24  ;;  %4868 = vtanh.f32 %v1371_v30  ;;  %v1336_v40 = vmul.f32 0.5, %v1326_v48  ;;  %v1352_v41 = vmul.f32 0.5, %v1327_v11  ;;  %1853 = vmatpush.msra.mxu2 %v8614_v15  ;;  %1882 = vmatpush.msra.mxu3 %v8616_v38 }
 0x246   :  { %4870 = vtanh.f32 %v6829_v42  ;;  %v1359_v22 = vadd.f32 1.0, %v4865_v51  ;;  %v1382_v25 = vmul.f32 0.5, %v1378_v36  ;;  %v623_v50 = vadd.f32 %v8615_v57, %v6520_v1  ;;  %1796 = vmatpush.msra.mxu0 %v8617_v56  ;;  %v8618_v51 = vld [vmem:[#allocation140_spill] sm:$0xff] }
 0x247   :  { %v1347_v52 = vmul.f32 0.5, %v1343_v2  ;;  %4872 = vtanh.f32 %v1336_v40  ;;  %1825 = vmatpush.msra.mxu1 %v8618_v51  ;;  %v8619_v2 = vld [vmem:[#allocation21_spill] sm:$0xff] }
 0x248   :  { %v1363_v34 = vmul.f32 0.5, %v1359_v22  ;;  %4874 = vtanh.f32 %v1352_v41  ;;  %1854 = vmatpush.msra.mxu2 %v8619_v2  ;;  %1797 = vmatpush.msra.mxu0 %v6751_v14 }
 0x249   :  { %v4867_v19 = vpop.eup %4866  ;;  %v1283_v21 = vpop.f32.mrf.mxu2 }
 0x24a   :  { %v1312_v27 = vpop.f32.mrf.mxu3  ;;  %v1387_v28 = vmul.f32 %v1363_v34, %v8612_v35  ;;  %v1391_v9 = vmul.f32 %v4867_v19, %v1347_v52  ;;  %v1328_v44 = vadd.f32 %v1283_v21, %v507_v37  ;;  %v1228_v60 = vpop.f32.mrf.mxu0  ;;  %v8620_v52 = vld [vmem:[#allocation22_spill] sm:$0xff]  ;;  %v8622_v19 = vld [vmem:[#allocation141_spill] sm:$0xff]  ;;  %1855 = vmatpush.msra.mxu2 %v6761_v17 }
 0x24b   :  { %v1329_v7 = vadd.f32 %v1312_v27, %v620_v62  ;;  %v1257_v59 = vpop.f32.mrf.mxu1  ;;  %v4869_v13 = vpop.eup %4868  ;;  %v1330_v31 = vadd.f32 %v1228_v60, %v284_v26  ;;  %1883 = vmatpush.msra.mxu3 %v8620_v52  ;;  %1826 = vmatpush.msra.mxu1 %v8622_v19  ;;  %v8626_v19 = vld [vmem:[#allocation49_spill] sm:$0xff] }
 0x24c   :  { %v1331_v16 = vadd.f32 %v1257_v59, %v397_v29  ;;  %v4871_v12 = vpop.eup %4870  ;;  %v6856_v54 = vadd.f32 %v1391_v9, %v1387_v28  ;;  %4876 = vtanh.f32 %v1328_v44  ;;  %v1379_v55 = vadd.f32 1.0, %v4869_v13 }
 0x24d   :  { %v1372_v33 = vmul.f32 0.5, %v1329_v7  ;;  %v4873_v43 = vpop.eup %4872  ;;  %v6862_v39 = vmul.f32 %v4871_v12, %v1382_v25  ;;  %v1337_v45 = vmul.f32 0.5, %v1330_v31  ;;  %1884 = vmatpush.msra.mxu3 %v6772_v32 }
 0x24e   :  { %v1353_v49 = vmul.f32 0.5, %v1331_v16  ;;  %v4875_v23 = vpop.eup %4874  ;;  %4878 = vtanh.f32 %v6856_v54  ;;  %v1344_v63 = vadd.f32 1.0, %v4873_v43  ;;  %v1383_v37 = vmul.f32 0.5, %v1379_v55 }
 0x24f   :  { %3319 = vst [vmem:[#allocation12 + $0x1] sm:$0x1] %v6862_v39  ;;  %v1360_v47 = vadd.f32 1.0, %v4875_v23  ;;  %4880 = vtanh.f32 %v1372_v33  ;;  %1508 = vmatmul.f32.vlgmr.msrb.gmra.mxu0 %v6862_v39  ;;  %1537 = vmatmul.f32.vlgmr.msrb.gmra.mxu1 %v6862_v39  ;;  %v3263_v10 = vrot.slane %v6862_v39, 1  ;;  %v3264_v53 = vrot.slane %v6862_v39, 2 }
 0x250   :  { %v1348_v30 = vmul.f32 0.5, %v1344_v63  ;;  %4882 = vtanh.f32 %v1337_v45  ;;  %1566 = vmatmul.f32.vlgmr.msrb.gmra.mxu2 %v6862_v39  ;;  %1595 = vmatmul.f32.vlgmr.msrb.gmra.mxu3 %v6862_v39  ;;  %v3265_v48 = vrot.slane %v6862_v39, 3  ;;  %v3266_v11 = vrot.slane %v6862_v39, 4 }
 0x251   :  { %v1364_v3 = vmul.f32 0.5, %v1360_v47  ;;  %4884 = vtanh.f32 %v1353_v49  ;;  %v1286_v20 = vpop.f32.mrf.mxu2  ;;  %3320 = vst [vmem:[#allocation12 + $0x9] sm:$0x1] %v3263_v10  ;;  %v3267_v40 = vrot.slane %v6862_v39, 5  ;;  %v3268_v61 = vrot.slane %v6862_v39, 6 }
 0x252   :  { %v1315_v24 = vpop.f32.mrf.mxu3  ;;  %v4877_v41 = vpop.eup %4876  ;;  %v1332_v22 = vadd.f32 %v1286_v20, %v510_v58  ;;  %3321 = vst [vmem:[#allocation12 + $0x11] sm:$0x1] %v3264_v53  ;;  %v3269_v14 = vrot.slane %v6862_v39, 7 }
 0x253   :  { %v1333_v36 = vadd.f32 %v1315_v24, %v623_v50  ;;  %v1388_v62 = vmul.f32 %v1364_v3, %v8621_v46  ;;  %v1392_v34 = vmul.f32 %v4877_v41, %v1348_v30  ;;  %3322 = vst [vmem:[#allocation12 + $0x19] sm:$0x1] %v3265_v48 }
 0x254   :  { %v4879_v6 = vpop.eup %4878  ;;  %4886 = vtanh.f32 %v1332_v22  ;;  %3323 = vst [vmem:[#allocation12 + $0x21] sm:$0x1] %v3266_v11  ;;  %v8625_v22 = vld [vmem:[#allocation48_spill] sm:$0xff] }
 0x255   :  { %v1373_v26 = vmul.f32 0.5, %v1333_v36  ;;  %v4881_v18 = vpop.eup %4880  ;;  %v1403_v29 = vmul.f32 %v4879_v6, %v1383_v37  ;;  %v6891_v21 = vadd.f32 %v1392_v34, %v1388_v62  ;;  %3324 = vst [vmem:[#allocation12 + $0x29] sm:$0x1] %v3267_v40  ;;  %v8624_v40 = vld [vmem:[#allocation47_spill] sm:$0xff]  ;;  %v400_v36 = vadd.f32 %v8625_v22, %v6494_v5 }
 0x256   :  { %v4883_v27 = vpop.eup %4882  ;;  %v1380_v35 = vadd.f32 1.0, %v4881_v18  ;;  %3325 = vst [vmem:[#allocation12 + $0x31] sm:$0x1] %v3268_v61  ;;  %v287_v41 = vadd.f32 %v8624_v40, %v6492_v4  ;;  %v513_v6 = vadd.f32 %v8626_v19, %v6518_v0  ;;  %v8628_v18 = vld [vmem:[#allocation51_spill] sm:$0xff]  ;;  %v8635_v19 = vld [vmem:[#allocation58_spill] sm:$0xff] }
 0x257   :  { %v4885_v28 = vpop.eup %4884  ;;  %3327 = vst [vmem:[#allocation12 + $0x41] sm:$0x1] %v1403_v29  ;;  %4888 = vtanh.f32 %v6891_v21  ;;  %v1345_v17 = vadd.f32 1.0, %v4883_v27  ;;  %1511 = vmatmul.f32.gmra.mxu0 %v1403_v29  ;;  %1540 = vmatmul.f32.gmra.mxu1 %v1403_v29  ;;  %v3270_v9 = vrot.slane %v1403_v29, 1  ;;  %v3271_v32 = vrot.slane %v1403_v29, 2  ;;  %v8629_v27 = vld [vmem:[#allocation52_spill] sm:$0xff] }
 0x258   :  { %v1361_v44 = vadd.f32 1.0, %v4885_v28  ;;  %4890 = vtanh.f32 %v1373_v26  ;;  %1569 = vmatmul.f32.gmra.mxu2 %v1403_v29  ;;  %1598 = vmatmul.f32.gmra.mxu3 %v1403_v29  ;;  %3326 = vst [vmem:[#allocation12 + $0x39] sm:$0x1] %v3269_v14  ;;  %v3272_v7 = vrot.slane %v1403_v29, 3  ;;  %v3273_v60 = vrot.slane %v1403_v29, 4  ;;  %v8627_v26 = vld [vmem:[#allocation50_spill] sm:$0xff] }
 0x259   :  { %v1349_v59 = vmul.f32 0.5, %v1345_v17  ;;  %3328 = vst [vmem:[#allocation12 + $0x49] sm:$0x1] %v3270_v9  ;;  %v3274_v13 = vrot.slane %v1403_v29, 5  ;;  %v3275_v16 = vrot.slane %v1403_v29, 6  ;;  %v3276_v33 = vrot.slane %v1403_v29, 7 }
 0x25a   :  { %v4887_v25 = vpop.eup %4886  ;;  %v1365_v31 = vmul.f32 0.5, %v1361_v44  ;;  %3329 = vst [vmem:[#allocation12 + $0x51] sm:$0x1] %v3271_v32  ;;  %v1384_v43 = vmul.f32 0.5, %v1380_v35  ;;  %v626_v14 = vadd.f32 %v8627_v26, %v6520_v1  ;;  %v290_v29 = vadd.f32 %v8628_v18, %v6492_v4 }
 0x25b   :  { %v1393_v12 = vmul.f32 %v4887_v25, %v1349_v59  ;;  %3330 = vst [vmem:[#allocation12 + $0x59] sm:$0x1] %v3272_v7  ;;  %v403_v35 = vadd.f32 %v8629_v27, %v6494_v5 }
 0x25c   :  { %v1389_v58 = vmul.f32 %v1365_v31, %v8623_v8  ;;  %3331 = vst [vmem:[#allocation12 + $0x61] sm:$0x1] %v3273_v60  ;;  %v8630_v8 = vld [vmem:[#allocation53_spill] sm:$0xff] }
 0x25d   :  { %v4889_v39 = vpop.eup %4888  ;;  %3332 = vst [vmem:[#allocation12 + $0x69] sm:$0x1] %v3274_v13 }
 0x25e   :  { %v4891_v45 = vpop.eup %4890  ;;  %v1404_v49 = vmul.f32 %v4889_v39, %v1384_v43  ;;  %v6895_v15 = vadd.f32 %v1393_v12, %v1389_v58  ;;  %3333 = vst [vmem:[#allocation12 + $0x71] sm:$0x1] %v3275_v16  ;;  %v516_v58 = vadd.f32 %v8630_v8, %v6518_v0  ;;  %v8631_v39 = vld [vmem:[#allocation54_spill] sm:$0xff]  ;;  %v6953_v8 = vld [vmem:[%s8368_s4 + $0x1f8] sm:$0xff] }
 0x25f   :  { %3334 = vst [vmem:[#allocation12 + $0x79] sm:$0x1] %v3276_v33  ;;  %v1381_v55 = vadd.f32 1.0, %v4891_v45  ;;  %v629_v45 = vadd.f32 %v8631_v39, %v6520_v1  ;;  %v6963_v39 = vld [vmem:[%s8368_s4 + $0x1c8] sm:$0xff]  ;;  %2159 = vmatpush.msrb.mxu3 %v6953_v8 }
 0x260   :  { %3335 = vst [vmem:[#allocation12 + $0x81] sm:$0x1] %v1404_v49  ;;  %4892 = vtanh.f32 %v6895_v15  ;;  %1514 = vmatmul.f32.gmra.mxu0 %v1404_v49  ;;  %1543 = vmatmul.f32.gmra.mxu1 %v1404_v49  ;;  %v3277_v23 = vrot.slane %v1404_v49, 1  ;;  %v3278_v57 = vrot.slane %v1404_v49, 2  ;;  %v3279_v50 = vrot.slane %v1404_v49, 3 }
 0x261   :  { %1572 = vmatmul.f32.gmra.mxu2 %v1404_v49  ;;  %1601 = vmatmul.f32.gmra.mxu3 %v1404_v49  ;;  %v3280_v63 = vrot.slane %v1404_v49, 4  ;;  %v3281_v38 = vrot.slane %v1404_v49, 5  ;;  %v3282_v56 = vrot.slane %v1404_v49, 6  ;;  %v3283_v47 = vrot.slane %v1404_v49, 7 }
 0x262   :  { %3336 = vst [vmem:[#allocation12 + $0x89] sm:$0x1] %v3277_v23  ;;  %v1385_v10 = vmul.f32 0.5, %v1381_v55 }
 0x263   :  { %3337 = vst [vmem:[#allocation12 + $0x91] sm:$0x1] %v3278_v57 }
 0x264   :  { %3338 = vst [vmem:[#allocation12 + $0x99] sm:$0x1] %v3279_v50 }
 0x265   :  { %3339 = vst [vmem:[#allocation12 + $0xa1] sm:$0x1] %v3280_v63  ;;  %v8632_v63 = vld [vmem:[#allocation55_spill] sm:$0xff] }
 0x266   :  { %v4893_v53 = vpop.eup %4892  ;;  %3340 = vst [vmem:[#allocation12 + $0xa9] sm:$0x1] %v3281_v38  ;;  %v293_v38 = vadd.f32 %v8632_v63, %v6492_v4 }
 0x267   :  { %v1405_v30 = vmul.f32 %v4893_v53, %v1385_v10  ;;  %3341 = vst [vmem:[#allocation12 + $0xb1] sm:$0x1] %v3282_v56  ;;  %v8633_v56 = vld [vmem:[#allocation56_spill] sm:$0xff] }
 0x268   :  { %3342 = vst [vmem:[#allocation12 + $0xb9] sm:$0x1] %v3283_v47  ;;  %v406_v47 = vadd.f32 %v8633_v56, %v6494_v5 }
 0x269   :  { %3343 = vst [vmem:[#allocation12 + $0xc1] sm:$0x1] %v1405_v30  ;;  %1517 = vmatmul.f32.gmra.mxu0 %v1405_v30  ;;  %1546 = vmatmul.f32.gmra.mxu1 %v1405_v30  ;;  %v3284_v48 = vrot.slane %v1405_v30, 1  ;;  %v3285_v11 = vrot.slane %v1405_v30, 2  ;;  %v3286_v3 = vrot.slane %v1405_v30, 3  ;;  %v3287_v20 = vrot.slane %v1405_v30, 4 }
 0x26a   :  { %1575 = vmatmul.f32.gmra.mxu2 %v1405_v30  ;;  %1604 = vmatmul.f32.gmra.mxu3 %v1405_v30  ;;  %v3288_v24 = vrot.slane %v1405_v30, 5  ;;  %v3289_v51 = vrot.slane %v1405_v30, 6  ;;  %v3290_v2 = vrot.slane %v1405_v30, 7 }
 0x26b   :  { %3344 = vst [vmem:[#allocation12 + $0xc9] sm:$0x1] %v3284_v48 }
 0x26c   :  { %3345 = vst [vmem:[#allocation12 + $0xd1] sm:$0x1] %v3285_v11 }
 0x26d   :  { %3346 = vst [vmem:[#allocation12 + $0xd9] sm:$0x1] %v3286_v3 }
 0x26e   :  { %3347 = vst [vmem:[#allocation12 + $0xe1] sm:$0x1] %v3287_v20 }
 0x26f   :  { %3348 = vst [vmem:[#allocation12 + $0xe9] sm:$0x1] %v3288_v24 }
 0x270   :  { %3349 = vst [vmem:[#allocation12 + $0xf1] sm:$0x1] %v3289_v51 }
 0x271   :  { %3350 = vst [vmem:[#allocation12 + $0xf9] sm:$0x1] %v3290_v2 }
 0x2cc   :  { %v1509_v52 = vpop.f32.mrf.mxu0  ;;  %v1538_v61 = vpop.f32.mrf.mxu1 }
 0x2cd   :  { %v1608_v37 = vadd.f32 %v1509_v52, %v287_v41  ;;  %v1609_v46 = vadd.f32 %v1538_v61, %v400_v36 }
 0x2cf   :  { %v1624_v62 = vmul.f32 0.5, %v1608_v37  ;;  %v1640_v34 = vmul.f32 0.5, %v1609_v46 }
 0x2d1   :  { %4894 = vtanh.f32 %v1624_v62  ;;  %v8634_v62 = vld [vmem:[#allocation57_spill] sm:$0xff] }
 0x2d2   :  { %4896 = vtanh.f32 %v1640_v34  ;;  %v519_v34 = vadd.f32 %v8634_v62, %v6518_v0 }
 0x2d3   :  { %v1567_v28 = vpop.f32.mrf.mxu2  ;;  %v1596_v17 = vpop.f32.mrf.mxu3 }
 0x2d4   :  { %v1610_v9 = vadd.f32 %v1567_v28, %v513_v6  ;;  %v1611_v32 = vadd.f32 %v1596_v17, %v626_v14  ;;  %v1512_v44 = vpop.f32.mrf.mxu0  ;;  %v1541_v7 = vpop.f32.mrf.mxu1  ;;  %v632_v6 = vadd.f32 %v8635_v19, %v6520_v1 }
 0x2d5   :  { %v1612_v60 = vadd.f32 %v1512_v44, %v290_v29  ;;  %v1613_v59 = vadd.f32 %v1541_v7, %v403_v35  ;;  %v8637_v7 = vld [vmem:[#allocation60_spill] sm:$0xff] }
 0x2d6   :  { %4898 = vtanh.f32 %v1610_v9  ;;  %v1660_v13 = vmul.f32 0.5, %v1611_v32  ;;  %v8636_v32 = vld [vmem:[#allocation59_spill] sm:$0xff] }
 0x2d7   :  { %v4895_v25 = vpop.eup %4894  ;;  %v1625_v31 = vmul.f32 0.5, %v1612_v60  ;;  %v1641_v16 = vmul.f32 0.5, %v1613_v59  ;;  %v296_v44 = vadd.f32 %v8636_v32, %v6492_v4  ;;  %v409_v60 = vadd.f32 %v8637_v7, %v6494_v5 }
 0x2d8   :  { %v4897_v12 = vpop.eup %4896  ;;  %v1632_v33 = vadd.f32 1.0, %v4895_v25  ;;  %4900 = vtanh.f32 %v1660_v13 }
 0x2d9   :  { %v1648_v43 = vadd.f32 1.0, %v4897_v12  ;;  %4902 = vtanh.f32 %v1625_v31  ;;  %v6934_v31 = vld [vmem:[%s8368_s4 + $0x1e0] sm:$0xff] }
 0x2da   :  { %v1636_v49 = vmul.f32 0.5, %v1632_v33  ;;  %4904 = vtanh.f32 %v1641_v16  ;;  %v6944_v16 = vld [vmem:[%s8368_s4 + $0x1f0] sm:$0xff]  ;;  %2072 = vmatpush.msrb.mxu0 %v6934_v31 }
 0x2db   :  { %v1652_v23 = vmul.f32 0.5, %v1648_v43  ;;  %v1570_v57 = vpop.f32.mrf.mxu2  ;;  %v1599_v50 = vpop.f32.mrf.mxu3  ;;  %2130 = vmatpush.msrb.mxu2 %v6944_v16 }
 0x2dc   :  { %v4899_v55 = vpop.eup %4898  ;;  %v1614_v10 = vadd.f32 %v1570_v57, %v516_v58  ;;  %v1615_v53 = vadd.f32 %v1599_v50, %v629_v45  ;;  %v6958_v58 = vld [vmem:[%s8368_s4 + $0x1c0] sm:$0xff] }
 0x2dd   :  { %v1676_v30 = vmul.f32 %v1652_v23, %v6829_v42  ;;  %v1680_v48 = vmul.f32 %v4899_v55, %v1636_v49  ;;  %v1515_v11 = vpop.f32.mrf.mxu0  ;;  %v1544_v3 = vpop.f32.mrf.mxu1  ;;  %v8638_v55 = vld [vmem:[#allocation61_spill] sm:$0xff]  ;;  %2073 = vmatpush.msrb.mxu0 %v6958_v58 }
 0x2de   :  { %v4901_v20 = vpop.eup %4900  ;;  %4906 = vtanh.f32 %v1614_v10  ;;  %v1661_v24 = vmul.f32 0.5, %v1615_v53  ;;  %v1616_v51 = vadd.f32 %v1515_v11, %v293_v38  ;;  %v1617_v2 = vadd.f32 %v1544_v3, %v406_v47  ;;  %v6977_v47 = vld [vmem:[%s8368_s4 + $0x1d0] sm:$0xff] }
 0x2df   :  { %v4903_v40 = vpop.eup %4902  ;;  %v6919_v41 = vadd.f32 %v1680_v48, %v1676_v30  ;;  %v1668_v42 = vadd.f32 1.0, %v4901_v20  ;;  %v522_v63 = vadd.f32 %v8638_v55, %v6518_v0  ;;  %2131 = vmatpush.msrb.mxu2 %v6977_v47 }
 0x2e0   :  { %v4905_v22 = vpop.eup %4904  ;;  %v1633_v36 = vadd.f32 1.0, %v4903_v40  ;;  %4908 = vtanh.f32 %v1661_v24  ;;  %v1626_v52 = vmul.f32 0.5, %v1616_v51  ;;  %v1642_v61 = vmul.f32 0.5, %v1617_v2  ;;  %v8639_v24 = vld [vmem:[#allocation62_spill] sm:$0xff] }
 0x2e1   :  { %4910 = vtanh.f32 %v6919_v41  ;;  %v1649_v37 = vadd.f32 1.0, %v4905_v22  ;;  %v1672_v59 = vmul.f32 0.5, %v1668_v42  ;;  %v635_v51 = vadd.f32 %v8639_v24, %v6520_v1 }
 0x2e2   :  { %v1637_v46 = vmul.f32 0.5, %v1633_v36  ;;  %4912 = vtanh.f32 %v1626_v52 }
 0x2e3   :  { %v1653_v26 = vmul.f32 0.5, %v1649_v37  ;;  %4914 = vtanh.f32 %v1642_v61 }
 0x2e4   :  { %v4907_v14 = vpop.eup %4906  ;;  %v1573_v18 = vpop.f32.mrf.mxu2 }
 0x2e5   :  { %v1602_v29 = vpop.f32.mrf.mxu3  ;;  %v1677_v27 = vmul.f32 %v1653_v26, %v6856_v54  ;;  %v1681_v35 = vmul.f32 %v4907_v14, %v1637_v46  ;;  %v1618_v28 = vadd.f32 %v1573_v18, %v519_v34  ;;  %v6939_v54 = vld [vmem:[%s8368_s4 + $0x1e8] sm:$0xff] }
 0x2e6   :  { %v1619_v17 = vadd.f32 %v1602_v29, %v632_v6  ;;  %v4909_v9 = vpop.eup %4908  ;;  %v1518_v13 = vpop.f32.mrf.mxu0  ;;  %2101 = vmatpush.msrb.mxu1 %v6939_v54 }
 0x2e7   :  { %v1547_v25 = vpop.f32.mrf.mxu1  ;;  %v4911_v12 = vpop.eup %4910  ;;  %v6946_v33 = vadd.f32 %v1681_v35, %v1677_v27  ;;  %4916 = vtanh.f32 %v1618_v28  ;;  %v1620_v23 = vadd.f32 %v1518_v13, %v296_v44  ;;  %v1669_v38 = vadd.f32 1.0, %v4909_v9 }
 0x2e8   :  { %v1662_v43 = vmul.f32 0.5, %v1619_v17  ;;  %v4913_v45 = vpop.eup %4912  ;;  %v6965_v49 = vmul.f32 %v4911_v12, %v1672_v59  ;;  %v1621_v57 = vadd.f32 %v1547_v25, %v409_v60  ;;  %2102 = vmatpush.msrb.mxu1 %v6963_v39 }
 0x2e9   :  { %v4915_v50 = vpop.eup %4914  ;;  %4918 = vtanh.f32 %v6946_v33  ;;  %v1634_v56 = vadd.f32 1.0, %v4913_v45  ;;  %v1627_v53 = vmul.f32 0.5, %v1620_v23  ;;  %v1673_v36 = vmul.f32 0.5, %v1669_v38 }
 0x2ea   :  { %3415 = vst [vmem:[#allocation12 + $0x2] sm:$0x1] %v6965_v49  ;;  %v1650_v10 = vadd.f32 1.0, %v4915_v50  ;;  %4920 = vtanh.f32 %v1662_v43  ;;  %v1643_v30 = vmul.f32 0.5, %v1621_v57  ;;  %1798 = vmatmul.f32.vlgmr.msra.gmra.mxu0 %v6965_v49  ;;  %1827 = vmatmul.f32.vlgmr.msra.gmra.mxu1 %v6965_v49  ;;  %v3359_v11 = vrot.slane %v6965_v49, 1 }
 0x2eb   :  { %v1638_v48 = vmul.f32 0.5, %v1634_v56  ;;  %1856 = vmatmul.f32.vlgmr.msra.gmra.mxu2 %v6965_v49  ;;  %1885 = vmatmul.f32.vlgmr.msra.gmra.mxu3 %v6965_v49  ;;  %v3360_v3 = vrot.slane %v6965_v49, 2  ;;  %v3361_v20 = vrot.slane %v6965_v49, 3  ;;  %4922 = vtanh.f32 %v1627_v53 }
 0x2ec   :  { %v1654_v2 = vmul.f32 0.5, %v1650_v10  ;;  %v3362_v40 = vrot.slane %v6965_v49, 4  ;;  %4924 = vtanh.f32 %v1643_v30  ;;  %3416 = vst [vmem:[#allocation12 + $0xa] sm:$0x1] %v3359_v11  ;;  %v3363_v37 = vrot.slane %v6965_v49, 5 }
 0x2ed   :  { %v4917_v22 = vpop.eup %4916  ;;  %v1576_v52 = vpop.f32.mrf.mxu2  ;;  %3417 = vst [vmem:[#allocation12 + $0x12] sm:$0x1] %v3360_v3  ;;  %v3364_v6 = vrot.slane %v6965_v49, 6  ;;  %v3365_v26 = vrot.slane %v6965_v49, 7 }
 0x2ee   :  { %v1605_v61 = vpop.f32.mrf.mxu3  ;;  %v1678_v42 = vmul.f32 %v1654_v2, %v6891_v21  ;;  %v1682_v46 = vmul.f32 %v4917_v22, %v1638_v48  ;;  %v1622_v62 = vadd.f32 %v1576_v52, %v522_v63  ;;  %3418 = vst [vmem:[#allocation12 + $0x1a] sm:$0x1] %v3361_v20 }
 0x2ef   :  { %v1623_v34 = vadd.f32 %v1605_v61, %v635_v51  ;;  %v4919_v19 = vpop.eup %4918  ;;  %3419 = vst [vmem:[#allocation12 + $0x22] sm:$0x1] %v3362_v40 }
 0x2f0   :  { %v4921_v14 = vpop.eup %4920  ;;  %v1693_v18 = vmul.f32 %v4919_v19, %v1673_v36  ;;  %v6995_v29 = vadd.f32 %v1682_v46, %v1678_v42  ;;  %4926 = vtanh.f32 %v1622_v62  ;;  %3420 = vst [vmem:[#allocation12 + $0x2a] sm:$0x1] %v3363_v37  ;;  %v7005_v42 = vld [vmem:[%s8368_s4 + $0x1d8] sm:$0xff]  ;;  %v7011_v46 = vld [vmem:[%s8368_s4 + $0x1a0] sm:$0xff]  ;;  %v7016_v62 = vld [vmem:[%s8368_s4 + $0x1a8] sm:$0xff] }
 0x2f1   :  { %v1663_v27 = vmul.f32 0.5, %v1623_v34  ;;  %v4923_v35 = vpop.eup %4922  ;;  %v1670_v9 = vadd.f32 1.0, %v4921_v14  ;;  %3421 = vst [vmem:[#allocation12 + $0x32] sm:$0x1] %v3364_v6  ;;  %2160 = vmatpush.msrb.mxu3 %v7005_v42  ;;  %v7021_v34 = vld [vmem:[%s8368_s4 + $0x1b0] sm:$0xff]  ;;  %2074 = vmatpush.msrb.mxu0 %v7011_v46  ;;  %v7028_v19 = vld [vmem:[%s8368_s4 + $0x1b8] sm:$0xff] }
 0x2f2   :  { %3423 = vst [vmem:[#allocation12 + $0x42] sm:$0x1] %v1693_v18  ;;  %4928 = vtanh.f32 %v6995_v29  ;;  %1801 = vmatmul.f32.gmra.mxu0 %v1693_v18  ;;  %1830 = vmatmul.f32.gmra.mxu1 %v1693_v18  ;;  %v3366_v21 = vrot.slane %v1693_v18, 1  ;;  %v3367_v28 = vrot.slane %v1693_v18, 2  ;;  %v4925_v17 = vpop.eup %4924  ;;  %v1635_v32 = vadd.f32 1.0, %v4923_v35  ;;  %v7035_v6 = vld [vmem:[%s8368_s4 + $0x180] sm:$0xff] }
 0x2f3   :  { %1859 = vmatmul.f32.gmra.mxu2 %v1693_v18  ;;  %1888 = vmatmul.f32.gmra.mxu3 %v1693_v18  ;;  %v3368_v44 = vrot.slane %v1693_v18, 3  ;;  %v1651_v7 = vadd.f32 1.0, %v4925_v17  ;;  %4930 = vtanh.f32 %v1663_v27  ;;  %3422 = vst [vmem:[#allocation12 + $0x3a] sm:$0x1] %v3365_v26  ;;  %v3369_v60 = vrot.slane %v1693_v18, 4  ;;  %v7040_v26 = vld [vmem:[%s8368_s4 + $0x188] sm:$0xff] }
 0x2f4   :  { %v1639_v59 = vmul.f32 0.5, %v1635_v32  ;;  %3424 = vst [vmem:[#allocation12 + $0x4a] sm:$0x1] %v3366_v21  ;;  %v3370_v13 = vrot.slane %v1693_v18, 5  ;;  %v3371_v43 = vrot.slane %v1693_v18, 6  ;;  %v1674_v45 = vmul.f32 0.5, %v1670_v9  ;;  %2103 = vmatpush.msrb.mxu1 %v7016_v62  ;;  %2132 = vmatpush.msrb.mxu2 %v7021_v34 }
 0x2f5   :  { %v1655_v12 = vmul.f32 0.5, %v1651_v7  ;;  %3425 = vst [vmem:[#allocation12 + $0x52] sm:$0x1] %v3367_v28  ;;  %v3372_v50 = vrot.slane %v1693_v18, 7  ;;  %2161 = vmatpush.msrb.mxu3 %v7028_v19  ;;  %v7045_v14 = vld [vmem:[%s8368_s4 + $0x190] sm:$0xff]  ;;  %2075 = vmatpush.msrb.mxu0 %v7035_v6  ;;  %v7052_v18 = vld [vmem:[%s8368_s4 + $0x198] sm:$0xff] }
 0x2f6   :  { %v4927_v25 = vpop.eup %4926  ;;  %3426 = vst [vmem:[#allocation12 + $0x5a] sm:$0x1] %v3368_v44  ;;  %2104 = vmatpush.msrb.mxu1 %v7040_v26  ;;  %2133 = vmatpush.msrb.mxu2 %v7045_v14  ;;  %v7059_v27 = vld [vmem:[%s8368_s4 + $0x160] sm:$0xff]  ;;  %v7064_v35 = vld [vmem:[%s8368_s4 + $0x168] sm:$0xff]  ;;  %v7069_v21 = vld [vmem:[%s8368_s4 + $0x170] sm:$0xff] }
 0x2f7   :  { %v1683_v49 = vmul.f32 %v4927_v25, %v1639_v59  ;;  %v1679_v57 = vmul.f32 %v1655_v12, %v6895_v15  ;;  %3427 = vst [vmem:[#allocation12 + $0x62] sm:$0x1] %v3369_v60  ;;  %2162 = vmatpush.msrb.mxu3 %v7052_v18  ;;  %2076 = vmatpush.msrb.mxu0 %v7059_v27  ;;  %v7076_v28 = vld [vmem:[%s8368_s4 + $0x178] sm:$0xff]  ;;  %v7083_v17 = vld [vmem:[%s8368_s4 + $0x140] sm:$0xff]  ;;  %v7088_v9 = vld [vmem:[%s8368_s4 + $0x148] sm:$0xff] }
 0x2f8   :  { %v4929_v23 = vpop.eup %4928  ;;  %3428 = vst [vmem:[#allocation12 + $0x6a] sm:$0x1] %v3370_v13  ;;  %2105 = vmatpush.msrb.mxu1 %v7064_v35  ;;  %2134 = vmatpush.msrb.mxu2 %v7069_v21  ;;  %v7093_v32 = vld [vmem:[%s8368_s4 + $0x150] sm:$0xff]  ;;  %v7100_v44 = vld [vmem:[%s8368_s4 + $0x158] sm:$0xff]  ;;  %v7107_v7 = vld [vmem:[%s8368_s4 + $0x120] sm:$0xff] }
 0x2f9   :  { %v1694_v55 = vmul.f32 %v4929_v23, %v1674_v45  ;;  %v4931_v63 = vpop.eup %4930  ;;  %v6999_v38 = vadd.f32 %v1683_v49, %v1679_v57  ;;  %3429 = vst [vmem:[#allocation12 + $0x72] sm:$0x1] %v3371_v43  ;;  %2163 = vmatpush.msrb.mxu3 %v7076_v28  ;;  %2077 = vmatpush.msrb.mxu0 %v7083_v17  ;;  %v7112_v60 = vld [vmem:[%s8368_s4 + $0x128] sm:$0xff]  ;;  %v7117_v59 = vld [vmem:[%s8368_s4 + $0x130] sm:$0xff]  ;;  %v7124_v13 = vld [vmem:[%s8368_s4 + $0x138] sm:$0xff] }
 0x2fa   :  { %3430 = vst [vmem:[#allocation12 + $0x7a] sm:$0x1] %v3372_v50  ;;  %v1671_v30 = vadd.f32 1.0, %v4931_v63  ;;  %2106 = vmatpush.msrb.mxu1 %v7088_v9  ;;  %2135 = vmatpush.msrb.mxu2 %v7093_v32  ;;  %v7131_v25 = vld [vmem:[%s8368_s4 + $0x100] sm:$0xff]  ;;  %v7136_v12 = vld [vmem:[%s8368_s4 + $0x108] sm:$0xff]  ;;  %v7141_v43 = vld [vmem:[%s8368_s4 + $0x110] sm:$0xff] }
 0x2fb   :  { %3431 = vst [vmem:[#allocation12 + $0x82] sm:$0x1] %v1694_v55  ;;  %1804 = vmatmul.f32.gmra.mxu0 %v1694_v55  ;;  %1833 = vmatmul.f32.gmra.mxu1 %v1694_v55  ;;  %v3373_v56 = vrot.slane %v1694_v55, 1  ;;  %v3374_v10 = vrot.slane %v1694_v55, 2  ;;  %v3375_v53 = vrot.slane %v1694_v55, 3  ;;  %4932 = vtanh.f32 %v6999_v38  ;;  %v7148_v45 = vld [vmem:[%s8368_s4 + $0x118] sm:$0xff] }
 0x2fc   :  { %1862 = vmatmul.f32.gmra.mxu2 %v1694_v55  ;;  %1891 = vmatmul.f32.gmra.mxu3 %v1694_v55  ;;  %v3376_v15 = vrot.slane %v1694_v55, 4  ;;  %v3377_v48 = vrot.slane %v1694_v55, 5  ;;  %v3378_v11 = vrot.slane %v1694_v55, 6  ;;  %v3379_v3 = vrot.slane %v1694_v55, 7  ;;  %v7155_v49 = vld [vmem:[%s8368_s4 + $0xe0] sm:$0xff]  ;;  %v7160_v23 = vld [vmem:[%s8368_s4 + $0xe8] sm:$0xff] }
 0x2fd   :  { %3432 = vst [vmem:[#allocation12 + $0x8a] sm:$0x1] %v3373_v56  ;;  %v1675_v20 = vmul.f32 0.5, %v1671_v30  ;;  %2164 = vmatpush.msrb.mxu3 %v7100_v44  ;;  %2078 = vmatpush.msrb.mxu0 %v7107_v7  ;;  %v7165_v57 = vld [vmem:[%s8368_s4 + $0xf0] sm:$0xff]  ;;  %v7172_v50 = vld [vmem:[%s8368_s4 + $0xf8] sm:$0xff]  ;;  %v5134_v55 = vld [vmem:[%s8368_s4 + $0xc0] sm:$0xff] }
 0x2fe   :  { %3433 = vst [vmem:[#allocation12 + $0x92] sm:$0x1] %v3374_v10  ;;  %2107 = vmatpush.msrb.mxu1 %v7112_v60  ;;  %2136 = vmatpush.msrb.mxu2 %v7117_v59  ;;  %v5135_v63 = vld [vmem:[%s8368_s4 + $0xc8] sm:$0xff]  ;;  %v5136_v56 = vld [vmem:[%s8368_s4 + $0xd0] sm:$0xff]  ;;  %v5137_v10 = vld [vmem:[%s8368_s4 + $0xd8] sm:$0xff] }
 0x2ff   :  { %3434 = vst [vmem:[#allocation12 + $0x9a] sm:$0x1] %v3375_v53  ;;  %2165 = vmatpush.msrb.mxu3 %v7124_v13  ;;  %2079 = vmatpush.msrb.mxu0 %v7131_v25  ;;  %v5138_v53 = vld [vmem:[%s8368_s4 + $0xa0] sm:$0xff]  ;;  %v5140_v30 = vld [vmem:[%s8368_s4 + $0xb0] sm:$0xff] }
 0x300   :  { %3435 = vst [vmem:[#allocation12 + $0xa2] sm:$0x1] %v3376_v15  ;;  %2108 = vmatpush.msrb.mxu1 %v7136_v12  ;;  %2137 = vmatpush.msrb.mxu2 %v7141_v43  ;;  %v5139_v15 = vld [vmem:[%s8368_s4 + $0xa8] sm:$0xff] }
 0x301   :  { %3436 = vst [vmem:[#allocation12 + $0xaa] sm:$0x1] %v3377_v48  ;;  %v4933_v24 = vpop.eup %4932  ;;  %2166 = vmatpush.msrb.mxu3 %v7148_v45  ;;  %2080 = vmatpush.msrb.mxu0 %v7155_v49  ;;  %v5141_v48 = vld [vmem:[%s8368_s4 + $0xb8] sm:$0xff] }
 0x302   :  { %3437 = vst [vmem:[#allocation12 + $0xb2] sm:$0x1] %v3378_v11  ;;  %v1695_v51 = vmul.f32 %v4933_v24, %v1675_v20  ;;  %2109 = vmatpush.msrb.mxu1 %v7160_v23  ;;  %2138 = vmatpush.msrb.mxu2 %v7165_v57  ;;  %v5142_v11 = vld [vmem:[%s8368_s4 + $0x80] sm:$0xff]  ;;  %v5144_v20 = vld [vmem:[%s8368_s4 + $0x90] sm:$0xff]  ;;  %v5145_v24 = vld [vmem:[%s8368_s4 + $0x98] sm:$0xff] }
 0x303   :  { %3438 = vst [vmem:[#allocation12 + $0xba] sm:$0x1] %v3379_v3  ;;  %2167 = vmatpush.msrb.mxu3 %v7172_v50  ;;  %2081 = vmatpush.msrb.mxu0 %v5134_v55  ;;  %v5143_v3 = vld [vmem:[%s8368_s4 + $0x88] sm:$0xff]  ;;  %v5154_v55 = vld [vmem:[%s8368_s4 + $0x20] sm:$0xff] }
 0x304   :  { %3439 = vst [vmem:[#allocation12 + $0xc2] sm:$0x1] %v1695_v51  ;;  %1807 = vmatmul.f32.gmra.mxu0 %v1695_v51  ;;  %1836 = vmatmul.f32.gmra.mxu1 %v1695_v51  ;;  %v3380_v2 = vrot.slane %v1695_v51, 1  ;;  %v3381_v40 = vrot.slane %v1695_v51, 2  ;;  %v3382_v22 = vrot.slane %v1695_v51, 3  ;;  %v3383_v36 = vrot.slane %v1695_v51, 4 }
 0x305   :  { %1865 = vmatmul.f32.gmra.mxu2 %v1695_v51  ;;  %1894 = vmatmul.f32.gmra.mxu3 %v1695_v51  ;;  %v3384_v52 = vrot.slane %v1695_v51, 5  ;;  %v3385_v61 = vrot.slane %v1695_v51, 6  ;;  %v3386_v37 = vrot.slane %v1695_v51, 7  ;;  %v5146_v51 = vld [vmem:[%s8368_s4 + $0x60] sm:$0xff] }
 0x306   :  { %3440 = vst [vmem:[#allocation12 + $0xca] sm:$0x1] %v3380_v2  ;;  %2110 = vmatpush.msrb.mxu1 %v5135_v63  ;;  %2139 = vmatpush.msrb.mxu2 %v5136_v56  ;;  %v5147_v2 = vld [vmem:[%s8368_s4 + $0x68] sm:$0xff]  ;;  %v8640_v56 = vld [vmem:[#allocation63_spill] sm:$0xff] }
 0x307   :  { %3441 = vst [vmem:[#allocation12 + $0xd2] sm:$0x1] %v3381_v40  ;;  %2168 = vmatpush.msrb.mxu3 %v5137_v10  ;;  %2082 = vmatpush.msrb.mxu0 %v5138_v53  ;;  %v5148_v40 = vld [vmem:[%s8368_s4 + $0x70] sm:$0xff]  ;;  %v5155_v63 = vld [vmem:[%s8368_s4 + $0x28] sm:$0xff]  ;;  %v299_v10 = vadd.f32 %v8640_v56, %v6492_v4  ;;  %v8641_v53 = vld [vmem:[#allocation64_spill] sm:$0xff] }
 0x308   :  { %3442 = vst [vmem:[#allocation12 + $0xda] sm:$0x1] %v3382_v22  ;;  %2111 = vmatpush.msrb.mxu1 %v5139_v15  ;;  %2140 = vmatpush.msrb.mxu2 %v5140_v30  ;;  %v5149_v22 = vld [vmem:[%s8368_s4 + $0x78] sm:$0xff]  ;;  %v412_v15 = vadd.f32 %v8641_v53, %v6494_v5  ;;  %v5156_v30 = vld [vmem:[%s8368_s4 + $0x30] sm:$0xff] }
 0x309   :  { %3443 = vst [vmem:[#allocation12 + $0xe2] sm:$0x1] %v3383_v36  ;;  %2169 = vmatpush.msrb.mxu3 %v5141_v48  ;;  %2083 = vmatpush.msrb.mxu0 %v5142_v11  ;;  %v5150_v36 = vld [vmem:[%s8368_s4 + $0x40] sm:$0xff]  ;;  %v5157_v48 = vld [vmem:[%s8368_s4 + $0x38] sm:$0xff] }
 0x30a   :  { %3444 = vst [vmem:[#allocation12 + $0xea] sm:$0x1] %v3384_v52  ;;  %2112 = vmatpush.msrb.mxu1 %v5143_v3  ;;  %2141 = vmatpush.msrb.mxu2 %v5144_v20  ;;  %v5151_v52 = vld [vmem:[%s8368_s4 + $0x48] sm:$0xff]  ;;  %v5158_v20 = vld [vmem:[%s8368_s4] sm:$0xff] }
 0x30b   :  { %3445 = vst [vmem:[#allocation12 + $0xf2] sm:$0x1] %v3385_v61  ;;  %2170 = vmatpush.msrb.mxu3 %v5145_v24  ;;  %2084 = vmatpush.msrb.mxu0 %v5146_v51  ;;  %v5152_v61 = vld [vmem:[%s8368_s4 + $0x50] sm:$0xff]  ;;  %v5159_v24 = vld [vmem:[%s8368_s4 + $0x8] sm:$0xff] }
 0x30c   :  { %3446 = vst [vmem:[#allocation12 + $0xfa] sm:$0x1] %v3386_v37  ;;  %2113 = vmatpush.msrb.mxu1 %v5147_v2  ;;  %2142 = vmatpush.msrb.mxu2 %v5148_v40  ;;  %v5153_v37 = vld [vmem:[%s8368_s4 + $0x58] sm:$0xff]  ;;  %v5160_v40 = vld [vmem:[%s8368_s4 + $0x10] sm:$0xff] }
 0x30d   :  { %2171 = vmatpush.msrb.mxu3 %v5149_v22  ;;  %2085 = vmatpush.msrb.mxu0 %v5150_v36  ;;  %v5161_v22 = vld [vmem:[%s8368_s4 + $0x18] sm:$0xff] }
 0x30e   :  { %2114 = vmatpush.msrb.mxu1 %v5151_v52  ;;  %2143 = vmatpush.msrb.mxu2 %v5152_v61  ;;  %v8642_v61 = vld [vmem:[#allocation65_spill] sm:$0xff] }
 0x30f   :  { %2172 = vmatpush.msrb.mxu3 %v5153_v37  ;;  %2086 = vmatpush.msrb.mxu0 %v5154_v55 }
 0x310   :  { %2115 = vmatpush.msrb.mxu1 %v5155_v63  ;;  %2144 = vmatpush.msrb.mxu2 %v5156_v30 }
 0x311   :  { %2173 = vmatpush.msrb.mxu3 %v5157_v48  ;;  %2087 = vmatpush.msrb.mxu0 %v5158_v20 }
 0x312   :  { %2116 = vmatpush.msrb.mxu1 %v5159_v24  ;;  %2145 = vmatpush.msrb.mxu2 %v5160_v40  ;;  %v8646_v40 = vld [vmem:[#allocation69_spill] sm:$0xff] }
 0x313   :  { %2174 = vmatpush.msrb.mxu3 %v5161_v22  ;;  %2362 = vmatpush.msra.mxu0 %v6934_v31  ;;  %v525_v31 = vadd.f32 %v8642_v61, %v6518_v0  ;;  %v528_v22 = vadd.f32 %v8646_v40, %v6518_v0 }
 0x314   :  { %2391 = vmatpush.msra.mxu1 %v6939_v54  ;;  %2420 = vmatpush.msra.mxu2 %v6944_v16  ;;  %v8643_v54 = vld [vmem:[#allocation66_spill] sm:$0xff]  ;;  %v8644_v16 = vld [vmem:[#allocation67_spill] sm:$0xff] }
 0x315   :  { %2449 = vmatpush.msra.mxu3 %v6953_v8  ;;  %2363 = vmatpush.msra.mxu0 %v6958_v58  ;;  %v638_v37 = vadd.f32 %v8643_v54, %v6520_v1  ;;  %v302_v8 = vadd.f32 %v8644_v16, %v6492_v4  ;;  %v8645_v58 = vld [vmem:[#allocation68_spill] sm:$0xff] }
 0x316   :  { %2392 = vmatpush.msra.mxu1 %v6963_v39  ;;  %2421 = vmatpush.msra.mxu2 %v6977_v47  ;;  %v415_v39 = vadd.f32 %v8645_v58, %v6494_v5 }
 0x317   :  { %2450 = vmatpush.msra.mxu3 %v7005_v42  ;;  %2364 = vmatpush.msra.mxu0 %v7011_v46 }
 0x318   :  { %2393 = vmatpush.msra.mxu1 %v7016_v62  ;;  %2422 = vmatpush.msra.mxu2 %v7021_v34 }
 0x319   :  { %2451 = vmatpush.msra.mxu3 %v7028_v19  ;;  %2365 = vmatpush.msra.mxu0 %v7035_v6 }
 0x31a   :  { %2394 = vmatpush.msra.mxu1 %v7040_v26  ;;  %2423 = vmatpush.msra.mxu2 %v7045_v14 }
 0x31b   :  { %2452 = vmatpush.msra.mxu3 %v7052_v18  ;;  %2366 = vmatpush.msra.mxu0 %v7059_v27 }
 0x31c   :  { %2395 = vmatpush.msra.mxu1 %v7064_v35  ;;  %2424 = vmatpush.msra.mxu2 %v7069_v21 }
 0x31d   :  { %2453 = vmatpush.msra.mxu3 %v7076_v28  ;;  %2367 = vmatpush.msra.mxu0 %v7083_v17 }
 0x31e   :  { %2396 = vmatpush.msra.mxu1 %v7088_v9  ;;  %2425 = vmatpush.msra.mxu2 %v7093_v32 }
 0x31f   :  { %2454 = vmatpush.msra.mxu3 %v7100_v44  ;;  %2368 = vmatpush.msra.mxu0 %v7107_v7 }
 0x320   :  { %2397 = vmatpush.msra.mxu1 %v7112_v60  ;;  %2426 = vmatpush.msra.mxu2 %v7117_v59 }
 0x321   :  { %2455 = vmatpush.msra.mxu3 %v7124_v13  ;;  %2369 = vmatpush.msra.mxu0 %v7131_v25 }
 0x322   :  { %2398 = vmatpush.msra.mxu1 %v7136_v12  ;;  %2427 = vmatpush.msra.mxu2 %v7141_v43 }
 0x323   :  { %2456 = vmatpush.msra.mxu3 %v7148_v45  ;;  %2370 = vmatpush.msra.mxu0 %v7155_v49 }
 0x324   :  { %2399 = vmatpush.msra.mxu1 %v7160_v23  ;;  %2428 = vmatpush.msra.mxu2 %v7165_v57 }
 0x325   :  { %2457 = vmatpush.msra.mxu3 %v7172_v50 }
 0x367   :  { %v1799_v11 = vpop.f32.mrf.mxu0  ;;  %v1828_v3 = vpop.f32.mrf.mxu1 }
 0x368   :  { %v1898_v51 = vadd.f32 %v1799_v11, %v299_v10  ;;  %v1899_v2 = vadd.f32 %v1828_v3, %v412_v15 }
 0x36a   :  { %v1914_v36 = vmul.f32 0.5, %v1898_v51  ;;  %v1930_v52 = vmul.f32 0.5, %v1899_v2 }
 0x36c   :  { %4934 = vtanh.f32 %v1914_v36  ;;  %v8647_v36 = vld [vmem:[#allocation70_spill] sm:$0xff] }
 0x36d   :  { %4936 = vtanh.f32 %v1930_v52  ;;  %v641_v52 = vadd.f32 %v8647_v36, %v6520_v1 }
 0x36e   :  { %v1857_v47 = vpop.f32.mrf.mxu2  ;;  %v1886_v55 = vpop.f32.mrf.mxu3 }
 0x36f   :  { %v1900_v63 = vadd.f32 %v1857_v47, %v525_v31  ;;  %v1901_v56 = vadd.f32 %v1886_v55, %v638_v37  ;;  %v1802_v10 = vpop.f32.mrf.mxu0  ;;  %v1831_v53 = vpop.f32.mrf.mxu1  ;;  %v8648_v31 = vld [vmem:[#allocation71_spill] sm:$0xff] }
 0x370   :  { %v1902_v15 = vadd.f32 %v1802_v10, %v302_v8  ;;  %v1903_v30 = vadd.f32 %v1831_v53, %v415_v39  ;;  %v305_v54 = vadd.f32 %v8648_v31, %v6492_v4  ;;  %v8649_v39 = vld [vmem:[#allocation72_spill] sm:$0xff] }
 0x371   :  { %4938 = vtanh.f32 %v1900_v63  ;;  %v1950_v48 = vmul.f32 0.5, %v1901_v56  ;;  %v418_v47 = vadd.f32 %v8649_v39, %v6494_v5 }
 0x372   :  { %v4935_v11 = vpop.eup %4934  ;;  %v1915_v3 = vmul.f32 0.5, %v1902_v15  ;;  %v1931_v20 = vmul.f32 0.5, %v1903_v30 }
 0x373   :  { %v4937_v24 = vpop.eup %4936  ;;  %v1922_v51 = vadd.f32 1.0, %v4935_v11  ;;  %4940 = vtanh.f32 %v1950_v48 }
 0x374   :  { %v1938_v2 = vadd.f32 1.0, %v4937_v24  ;;  %4942 = vtanh.f32 %v1915_v3 }
 0x375   :  { %v1926_v61 = vmul.f32 0.5, %v1922_v51  ;;  %4944 = vtanh.f32 %v1931_v20 }
 0x376   :  { %v1942_v37 = vmul.f32 0.5, %v1938_v2  ;;  %v1860_v16 = vpop.f32.mrf.mxu2  ;;  %v1889_v8 = vpop.f32.mrf.mxu3 }
 0x377   :  { %v4939_v58 = vpop.eup %4938  ;;  %v1904_v55 = vadd.f32 %v1860_v16, %v528_v22  ;;  %v1905_v63 = vadd.f32 %v1889_v8, %v641_v52 }
 0x378   :  { %v1966_v56 = vmul.f32 %v1942_v37, %v6919_v41  ;;  %v1970_v10 = vmul.f32 %v4939_v58, %v1926_v61  ;;  %v1805_v53 = vpop.f32.mrf.mxu0  ;;  %v1834_v15 = vpop.f32.mrf.mxu1  ;;  %v8650_v61 = vld [vmem:[#allocation73_spill] sm:$0xff] }
 0x379   :  { %v4941_v30 = vpop.eup %4940  ;;  %4946 = vtanh.f32 %v1904_v55  ;;  %v1951_v48 = vmul.f32 0.5, %v1905_v63  ;;  %v1906_v11 = vadd.f32 %v1805_v53, %v305_v54  ;;  %v1907_v3 = vadd.f32 %v1834_v15, %v418_v47  ;;  %v8651_v54 = vld [vmem:[#allocation74_spill] sm:$0xff]  ;;  %v8652_v53 = vld [vmem:[#allocation75_spill] sm:$0xff] }
 0x37a   :  { %v4943_v20 = vpop.eup %4942  ;;  %v7315_v24 = vadd.f32 %v1970_v10, %v1966_v56  ;;  %v1958_v36 = vadd.f32 1.0, %v4941_v30  ;;  %v531_v31 = vadd.f32 %v8650_v61, %v6518_v0  ;;  %v644_v37 = vadd.f32 %v8651_v54, %v6520_v1  ;;  %v8653_v30 = vld [vmem:[#allocation76_spill] sm:$0xff] }
 0x37b   :  { %v4945_v41 = vpop.eup %4944  ;;  %v1923_v51 = vadd.f32 1.0, %v4943_v20  ;;  %4948 = vtanh.f32 %v1951_v48  ;;  %v1916_v2 = vmul.f32 0.5, %v1906_v11  ;;  %v1932_v40 = vmul.f32 0.5, %v1907_v3 }
 0x37c   :  { %4950 = vtanh.f32 %v7315_v24  ;;  %v1939_v22 = vadd.f32 1.0, %v4945_v41  ;;  %v308_v15 = vadd.f32 %v8652_v53, %v6492_v4  ;;  %v421_v48 = vadd.f32 %v8653_v30, %v6494_v5 }
 0x37d   :  { %v1927_v52 = vmul.f32 0.5, %v1923_v51  ;;  %4952 = vtanh.f32 %v1916_v2  ;;  %v1962_v11 = vmul.f32 0.5, %v1958_v36 }
 0x37e   :  { %v1943_v16 = vmul.f32 0.5, %v1939_v22  ;;  %4954 = vtanh.f32 %v1932_v40 }
 0x37f   :  { %v4947_v8 = vpop.eup %4946  ;;  %v1863_v58 = vpop.f32.mrf.mxu2 }
 0x380   :  { %v1892_v39 = vpop.f32.mrf.mxu3  ;;  %v1967_v47 = vmul.f32 %v1943_v16, %v6946_v33  ;;  %v1971_v55 = vmul.f32 %v4947_v8, %v1927_v52  ;;  %v1908_v63 = vadd.f32 %v1863_v58, %v531_v31 }
 0x381   :  { %v1909_v56 = vadd.f32 %v1892_v39, %v644_v37  ;;  %v4949_v10 = vpop.eup %4948  ;;  %v1808_v51 = vpop.f32.mrf.mxu0 }
 0x382   :  { %v4951_v3 = vpop.eup %4950  ;;  %v7329_v20 = vadd.f32 %v1971_v55, %v1967_v47  ;;  %4956 = vtanh.f32 %v1908_v63  ;;  %v1837_v2 = vpop.f32.mrf.mxu1  ;;  %v1910_v22 = vadd.f32 %v1808_v51, %v308_v15  ;;  %v1959_v31 = vadd.f32 1.0, %v4949_v10  ;;  %v8654_v10 = vld [vmem:[#allocation77_spill] sm:$0xff]  ;;  %v8655_v15 = vld [vmem:[#allocation78_spill] sm:$0xff] }
 0x383   :  { %v1952_v41 = vmul.f32 0.5, %v1909_v56  ;;  %v4953_v40 = vpop.eup %4952  ;;  %v7331_v33 = vmul.f32 %v4951_v3, %v1962_v11  ;;  %v1911_v52 = vadd.f32 %v1837_v2, %v421_v48  ;;  %v534_v53 = vadd.f32 %v8654_v10, %v6518_v0 }
 0x384   :  { %v4955_v61 = vpop.eup %4954  ;;  %4958 = vtanh.f32 %v7329_v20  ;;  %v1924_v54 = vadd.f32 1.0, %v4953_v40  ;;  %v1917_v37 = vmul.f32 0.5, %v1910_v22  ;;  %v647_v30 = vadd.f32 %v8655_v15, %v6520_v1 }
 0x385   :  { %3511 = vst [vmem:[#allocation12 + $0x3] sm:$0x1] %v7331_v33  ;;  %v1940_v36 = vadd.f32 1.0, %v4955_v61  ;;  %4960 = vtanh.f32 %v1952_v41  ;;  %v1933_v16 = vmul.f32 0.5, %v1911_v52  ;;  %2088 = vmatmul.f32.vlgmr.msrb.gmra.mxu0 %v7331_v33  ;;  %2117 = vmatmul.f32.vlgmr.msrb.gmra.mxu1 %v7331_v33  ;;  %v3455_v58 = vrot.slane %v7331_v33, 1 }
 0x386   :  { %v1928_v8 = vmul.f32 0.5, %v1924_v54  ;;  %2146 = vmatmul.f32.vlgmr.msrb.gmra.mxu2 %v7331_v33  ;;  %2175 = vmatmul.f32.vlgmr.msrb.gmra.mxu3 %v7331_v33  ;;  %v3456_v39 = vrot.slane %v7331_v33, 2  ;;  %v3457_v47 = vrot.slane %v7331_v33, 3  ;;  %4962 = vtanh.f32 %v1917_v37 }
 0x387   :  { %v1944_v55 = vmul.f32 0.5, %v1940_v36  ;;  %v3458_v63 = vrot.slane %v7331_v33, 4  ;;  %4964 = vtanh.f32 %v1933_v16  ;;  %3512 = vst [vmem:[#allocation12 + $0xb] sm:$0x1] %v3455_v58  ;;  %v3459_v48 = vrot.slane %v7331_v33, 5 }
 0x388   :  { %v4957_v56 = vpop.eup %4956  ;;  %v1963_v11 = vmul.f32 0.5, %v1959_v31  ;;  %v1866_v51 = vpop.f32.mrf.mxu2  ;;  %3513 = vst [vmem:[#allocation12 + $0x13] sm:$0x1] %v3456_v39  ;;  %v3460_v61 = vrot.slane %v7331_v33, 6  ;;  %v3461_v16 = vrot.slane %v7331_v33, 7 }
 0x389   :  { %v1968_v3 = vmul.f32 %v1944_v55, %v6995_v29  ;;  %v1972_v41 = vmul.f32 %v4957_v56, %v1928_v8  ;;  %v1895_v2 = vpop.f32.mrf.mxu3  ;;  %v1912_v22 = vadd.f32 %v1866_v51, %v534_v53  ;;  %3514 = vst [vmem:[#allocation12 + $0x1b] sm:$0x1] %v3457_v47 }
 0x38a   :  { %v4959_v40 = vpop.eup %4958  ;;  %v1913_v52 = vadd.f32 %v1895_v2, %v647_v30  ;;  %3515 = vst [vmem:[#allocation12 + $0x23] sm:$0x1] %v3458_v63 }
 0x38b   :  { %v4961_v54 = vpop.eup %4960  ;;  %v1983_v36 = vmul.f32 %v4959_v40, %v1963_v11  ;;  %v7350_v37 = vadd.f32 %v1972_v41, %v1968_v3  ;;  %4966 = vtanh.f32 %v1912_v22  ;;  %3516 = vst [vmem:[#allocation12 + $0x2b] sm:$0x1] %v3459_v48 }
 0x38c   :  { %v1953_v31 = vmul.f32 0.5, %v1913_v52  ;;  %v4963_v29 = vpop.eup %4962  ;;  %v1960_v47 = vadd.f32 1.0, %v4961_v54  ;;  %3517 = vst [vmem:[#allocation12 + $0x33] sm:$0x1] %v3460_v61 }
 0x38d   :  { %8656 = vst [vmem:[#allocation23_spill] sm:$0xff] %v7350_v37  ;;  %4968 = vtanh.f32 %v7350_v37  ;;  %2091 = vmatmul.f32.gmra.mxu0 %v1983_v36  ;;  %2120 = vmatmul.f32.gmra.mxu1 %v1983_v36  ;;  %v3462_v8 = vrot.slane %v1983_v36, 1  ;;  %v3463_v58 = vrot.slane %v1983_v36, 2  ;;  %v4965_v39 = vpop.eup %4964  ;;  %v1925_v55 = vadd.f32 1.0, %v4963_v29  ;;  %v7509_v37 = vld [vmem:[%s8368_s4] sm:$0xff] }
 0x38e   :  { %3519 = vst [vmem:[#allocation12 + $0x43] sm:$0x1] %v1983_v36  ;;  %2149 = vmatmul.f32.gmra.mxu2 %v1983_v36  ;;  %2178 = vmatmul.f32.gmra.mxu3 %v1983_v36  ;;  %v3464_v63 = vrot.slane %v1983_v36, 3  ;;  %v1941_v56 = vadd.f32 1.0, %v4965_v39  ;;  %4970 = vtanh.f32 %v1953_v31  ;;  %v3465_v33 = vrot.slane %v1983_v36, 4 }
 0x38f   :  { %3518 = vst [vmem:[#allocation12 + $0x3b] sm:$0x1] %v3461_v16  ;;  %v1929_v10 = vmul.f32 0.5, %v1925_v55  ;;  %v3466_v53 = vrot.slane %v1983_v36, 5  ;;  %v3467_v30 = vrot.slane %v1983_v36, 6  ;;  %v1964_v11 = vmul.f32 0.5, %v1960_v47 }
 0x390   :  { %3520 = vst [vmem:[#allocation12 + $0x4b] sm:$0x1] %v3462_v8  ;;  %v1945_v15 = vmul.f32 0.5, %v1941_v56  ;;  %v3468_v2 = vrot.slane %v1983_v36, 7 }
 0x391   :  { %3521 = vst [vmem:[#allocation12 + $0x53] sm:$0x1] %v3463_v58  ;;  %v4967_v48 = vpop.eup %4966 }
 0x392   :  { %3522 = vst [vmem:[#allocation12 + $0x5b] sm:$0x1] %v3464_v63  ;;  %v1969_v41 = vmul.f32 %v1945_v15, %v6999_v38  ;;  %v1973_v51 = vmul.f32 %v4967_v48, %v1929_v10  ;;  %v7366_v48 = vld [vmem:[%s8368_s4 + $0xc8] sm:$0xff] }
 0x393   :  { %v4969_v3 = vpop.eup %4968  ;;  %3523 = vst [vmem:[#allocation12 + $0x63] sm:$0x1] %v3465_v33  ;;  %2400 = vmatpush.msra.mxu1 %v7366_v48 }
 0x394   :  { %v1984_v40 = vmul.f32 %v4969_v3, %v1964_v11  ;;  %3524 = vst [vmem:[#allocation12 + $0x6b] sm:$0x1] %v3466_v53  ;;  %v4971_v22 = vpop.eup %4970  ;;  %v7355_v52 = vadd.f32 %v1973_v51, %v1969_v41  ;;  %v7371_v11 = vld [vmem:[%s8368_s4 + $0xd0] sm:$0xff]  ;;  %v7378_v3 = vld [vmem:[%s8368_s4 + $0xd8] sm:$0xff]  ;;  %v7385_v41 = vld [vmem:[%s8368_s4 + $0xa0] sm:$0xff] }
 0x395   :  { %3525 = vst [vmem:[#allocation12 + $0x73] sm:$0x1] %v3467_v30  ;;  %v1961_v31 = vadd.f32 1.0, %v4971_v22  ;;  %v7361_v30 = vld [vmem:[%s8368_s4 + $0xc0] sm:$0xff]  ;;  %2429 = vmatpush.msra.mxu2 %v7371_v11  ;;  %2458 = vmatpush.msra.mxu3 %v7378_v3  ;;  %v7390_v51 = vld [vmem:[%s8368_s4 + $0xa8] sm:$0xff] }
 0x396   :  { %8657 = vst [vmem:[#allocation24_spill] sm:$0xff] %v7355_v52  ;;  %2094 = vmatmul.f32.gmra.mxu0 %v1984_v40  ;;  %2123 = vmatmul.f32.gmra.mxu1 %v1984_v40  ;;  %v3469_v61 = vrot.slane %v1984_v40, 1  ;;  %v3470_v54 = vrot.slane %v1984_v40, 2  ;;  %v3471_v16 = vrot.slane %v1984_v40, 3  ;;  %4972 = vtanh.f32 %v7355_v52  ;;  %v7409_v22 = vld [vmem:[%s8368_s4 + $0x80] sm:$0xff] }
 0x397   :  { %3527 = vst [vmem:[#allocation12 + $0x83] sm:$0x1] %v1984_v40  ;;  %2152 = vmatmul.f32.gmra.mxu2 %v1984_v40  ;;  %2181 = vmatmul.f32.gmra.mxu3 %v1984_v40  ;;  %v3472_v38 = vrot.slane %v1984_v40, 4  ;;  %v3473_v36 = vrot.slane %v1984_v40, 5  ;;  %v3474_v29 = vrot.slane %v1984_v40, 6  ;;  %v3475_v8 = vrot.slane %v1984_v40, 7 }
 0x398   :  { %3526 = vst [vmem:[#allocation12 + $0x7b] sm:$0x1] %v3468_v2  ;;  %v1965_v58 = vmul.f32 0.5, %v1961_v31  ;;  %2371 = vmatpush.msra.mxu0 %v7361_v30  ;;  %v7395_v2 = vld [vmem:[%s8368_s4 + $0xb0] sm:$0xff]  ;;  %2401 = vmatpush.msra.mxu1 %v7390_v51  ;;  %v7402_v40 = vld [vmem:[%s8368_s4 + $0xb8] sm:$0xff]  ;;  %v7438_v31 = vld [vmem:[%s8368_s4 + $0x68] sm:$0xff] }
 0x399   :  { %3528 = vst [vmem:[#allocation12 + $0x8b] sm:$0x1] %v3469_v61  ;;  %2430 = vmatpush.msra.mxu2 %v7395_v2  ;;  %2459 = vmatpush.msra.mxu3 %v7402_v40  ;;  %v7414_v61 = vld [vmem:[%s8368_s4 + $0x88] sm:$0xff] }
 0x39a   :  { %3529 = vst [vmem:[#allocation12 + $0x93] sm:$0x1] %v3470_v54  ;;  %2372 = vmatpush.msra.mxu0 %v7385_v41  ;;  %v7419_v54 = vld [vmem:[%s8368_s4 + $0x90] sm:$0xff]  ;;  %2402 = vmatpush.msra.mxu1 %v7414_v61 }
 0x39b   :  { %3530 = vst [vmem:[#allocation12 + $0x9b] sm:$0x1] %v3471_v16  ;;  %v7426_v16 = vld [vmem:[%s8368_s4 + $0x98] sm:$0xff]  ;;  %2431 = vmatpush.msra.mxu2 %v7419_v54 }
 0x39c   :  { %3531 = vst [vmem:[#allocation12 + $0xa3] sm:$0x1] %v3472_v38  ;;  %v4973_v39 = vpop.eup %4972  ;;  %2373 = vmatpush.msra.mxu0 %v7409_v22  ;;  %2460 = vmatpush.msra.mxu3 %v7426_v16  ;;  %v7433_v38 = vld [vmem:[%s8368_s4 + $0x60] sm:$0xff] }
 0x39d   :  { %3532 = vst [vmem:[#allocation12 + $0xab] sm:$0x1] %v3473_v36  ;;  %v1985_v47 = vmul.f32 %v4973_v39, %v1965_v58  ;;  %v7443_v36 = vld [vmem:[%s8368_s4 + $0x70] sm:$0xff]  ;;  %2403 = vmatpush.msra.mxu1 %v7438_v31  ;;  %v7462_v58 = vld [vmem:[%s8368_s4 + $0x48] sm:$0xff] }
 0x39e   :  { %3533 = vst [vmem:[#allocation12 + $0xb3] sm:$0x1] %v3474_v29  ;;  %2374 = vmatpush.msra.mxu0 %v7433_v38  ;;  %v7450_v29 = vld [vmem:[%s8368_s4 + $0x78] sm:$0xff]  ;;  %2432 = vmatpush.msra.mxu2 %v7443_v36  ;;  %v7467_v39 = vld [vmem:[%s8368_s4 + $0x50] sm:$0xff] }
 0x39f   :  { %3534 = vst [vmem:[#allocation12 + $0xbb] sm:$0x1] %v3475_v8  ;;  %2097 = vmatmul.f32.gmra.mxu0 %v1985_v47  ;;  %2126 = vmatmul.f32.gmra.mxu1 %v1985_v47  ;;  %v3476_v55 = vrot.slane %v1985_v47, 1  ;;  %v3477_v63 = vrot.slane %v1985_v47, 2  ;;  %v3478_v56 = vrot.slane %v1985_v47, 3  ;;  %v3479_v33 = vrot.slane %v1985_v47, 4 }
 0x3a0   :  { %3535 = vst [vmem:[#allocation12 + $0xc3] sm:$0x1] %v1985_v47  ;;  %2155 = vmatmul.f32.gmra.mxu2 %v1985_v47  ;;  %2184 = vmatmul.f32.gmra.mxu3 %v1985_v47  ;;  %v3480_v10 = vrot.slane %v1985_v47, 5  ;;  %v3481_v53 = vrot.slane %v1985_v47, 6  ;;  %v3482_v15 = vrot.slane %v1985_v47, 7  ;;  %v7457_v8 = vld [vmem:[%s8368_s4 + $0x40] sm:$0xff] }
 0x3a1   :  { %3536 = vst [vmem:[#allocation12 + $0xcb] sm:$0x1] %v3476_v55  ;;  %2461 = vmatpush.msra.mxu3 %v7450_v29  ;;  %2375 = vmatpush.msra.mxu0 %v7457_v8  ;;  %v7474_v47 = vld [vmem:[%s8368_s4 + $0x58] sm:$0xff]  ;;  %v7481_v55 = vld [vmem:[%s8368_s4 + $0x20] sm:$0xff] }
 0x3a2   :  { %3537 = vst [vmem:[#allocation12 + $0xd3] sm:$0x1] %v3477_v63  ;;  %2404 = vmatpush.msra.mxu1 %v7462_v58  ;;  %2433 = vmatpush.msra.mxu2 %v7467_v39  ;;  %v7486_v63 = vld [vmem:[%s8368_s4 + $0x28] sm:$0xff] }
 0x3a3   :  { %3538 = vst [vmem:[#allocation12 + $0xdb] sm:$0x1] %v3478_v56  ;;  %2462 = vmatpush.msra.mxu3 %v7474_v47  ;;  %v7491_v56 = vld [vmem:[%s8368_s4 + $0x30] sm:$0xff]  ;;  %2376 = vmatpush.msra.mxu0 %v7481_v55 }
 0x3a4   :  { %3539 = vst [vmem:[#allocation12 + $0xe3] sm:$0x1] %v3479_v33  ;;  %2405 = vmatpush.msra.mxu1 %v7486_v63  ;;  %v7498_v33 = vld [vmem:[%s8368_s4 + $0x38] sm:$0xff]  ;;  %2434 = vmatpush.msra.mxu2 %v7491_v56 }
 0x3a5   :  { %3540 = vst [vmem:[#allocation12 + $0xeb] sm:$0x1] %v3480_v10  ;;  %v8665_v10 = vld [vmem:[#allocation79_spill] sm:$0xff]  ;;  %2463 = vmatpush.msra.mxu3 %v7498_v33  ;;  %2377 = vmatpush.msra.mxu0 %v7509_v37 }
 0x3a6   :  { %3541 = vst [vmem:[#allocation12 + $0xf3] sm:$0x1] %v3481_v53  ;;  %v311_v53 = vadd.f32 %v8665_v10, %v6492_v4  ;;  %v7519_v10 = vld [vmem:[%s8368_s4 + $0x10] sm:$0xff] }
 0x3a7   :  { %3542 = vst [vmem:[#allocation12 + $0xfb] sm:$0x1] %v3482_v15  ;;  %v8666_v15 = vld [vmem:[#allocation80_spill] sm:$0xff]  ;;  %2435 = vmatpush.msra.mxu2 %v7519_v10 }
 0x3a8   :  { %8658 = vst [vmem:[#allocation25_spill] sm:$0xff] %v7462_v58  ;;  %v424_v52 = vadd.f32 %v8666_v15, %v6494_v5 }
 0x3a9   :  { %8659 = vst [vmem:[#allocation26_spill] sm:$0xff] %v7467_v39  ;;  %v5162_v39 = vld [vmem:[%s8368_s4 + $0x1e0] sm:$0xff] }
 0x3aa   :  { %8660 = vst [vmem:[#allocation27_spill] sm:$0xff] %v7474_v47  ;;  %2652 = vmatpush.msrb.mxu0 %v5162_v39  ;;  %v5166_v39 = vld [vmem:[%s8368_s4 + $0x1c0] sm:$0xff] }
 0x3ab   :  { %8661 = vst [vmem:[#allocation28_spill] sm:$0xff] %v7481_v55 }
 0x3ac   :  { %8662 = vst [vmem:[#allocation29_spill] sm:$0xff] %v7486_v63  ;;  %v7514_v63 = vld [vmem:[%s8368_s4 + $0x8] sm:$0xff]  ;;  %2653 = vmatpush.msrb.mxu0 %v5166_v39  ;;  %v8673_v39 = vld [vmem:[#allocation84_spill] sm:$0xff] }
 0x3ad   :  { %8663 = vst [vmem:[#allocation30_spill] sm:$0xff] %v7491_v56  ;;  %2406 = vmatpush.msra.mxu1 %v7514_v63 }
 0x3ae   :  { %8664 = vst [vmem:[#allocation31_spill] sm:$0xff] %v7498_v33  ;;  %v7526_v33 = vld [vmem:[%s8368_s4 + $0x18] sm:$0xff]  ;;  %2654 = vmatpush.msrb.mxu0 %v7011_v46 }
 0x3af   :  { %8667 = vst [vmem:[#allocation32_spill] sm:$0xff] %v7509_v37  ;;  %2464 = vmatpush.msra.mxu3 %v7526_v33 }
 0x3b0   :  { %8668 = vst [vmem:[#allocation33_spill] sm:$0xff] %v7514_v63  ;;  %v5163_v63 = vld [vmem:[%s8368_s4 + $0x1e8] sm:$0xff]  ;;  %2655 = vmatpush.msrb.mxu0 %v7035_v6 }
 0x3b1   :  { %8669 = vst [vmem:[#allocation34_spill] sm:$0xff] %v7526_v33  ;;  %2681 = vmatpush.msrb.mxu1 %v5163_v63  ;;  %v5167_v63 = vld [vmem:[%s8368_s4 + $0x1c8] sm:$0xff] }
 0x3b2   :  { %2656 = vmatpush.msrb.mxu0 %v7059_v27 }
 0x3b3   :  { %2682 = vmatpush.msrb.mxu1 %v5167_v63  ;;  %v427_v63 = vadd.f32 %v8673_v39, %v6494_v5 }
 0x3b4   :  { %2657 = vmatpush.msrb.mxu0 %v7083_v17  ;;  %v8676_v17 = vld [vmem:[#allocation87_spill] sm:$0xff] }
 0x3b5   :  { %2683 = vmatpush.msrb.mxu1 %v7016_v62 }
 0x3b6   :  { %2658 = vmatpush.msrb.mxu0 %v7107_v7 }
 0x3b7   :  { %2684 = vmatpush.msrb.mxu1 %v7040_v26 }
 0x3b8   :  { %2659 = vmatpush.msrb.mxu0 %v7131_v25 }
 0x3b9   :  { %2685 = vmatpush.msrb.mxu1 %v7064_v35  ;;  %v8675_v35 = vld [vmem:[#allocation86_spill] sm:$0xff] }
 0x3ba   :  { %2660 = vmatpush.msrb.mxu0 %v7155_v49 }
 0x3bb   :  { %2686 = vmatpush.msrb.mxu1 %v7088_v9  ;;  %v317_v9 = vadd.f32 %v8676_v17, %v6492_v4 }
 0x3bc   :  { %2661 = vmatpush.msrb.mxu0 %v7361_v30  ;;  %v8679_v30 = vld [vmem:[#allocation90_spill] sm:$0xff] }
 0x3bd   :  { %2687 = vmatpush.msrb.mxu1 %v7112_v60 }
 0x3be   :  { %2662 = vmatpush.msrb.mxu0 %v7385_v41 }
 0x3bf   :  { %2688 = vmatpush.msrb.mxu1 %v7136_v12 }
 0x3c0   :  { %2663 = vmatpush.msrb.mxu0 %v7409_v22 }
 0x3c1   :  { %2689 = vmatpush.msrb.mxu1 %v7160_v23 }
 0x3c2   :  { %2664 = vmatpush.msrb.mxu0 %v7433_v38 }
 0x3c3   :  { %2690 = vmatpush.msrb.mxu1 %v7366_v48  ;;  %v656_v48 = vadd.f32 %v8679_v30, %v6520_v1 }
 0x3c4   :  { %2665 = vmatpush.msrb.mxu0 %v7457_v8 }
 0x3c5   :  { %2691 = vmatpush.msrb.mxu1 %v7390_v51 }
 0x3c7   :  { %2692 = vmatpush.msrb.mxu1 %v7414_v61 }
 0x3c9   :  { %2693 = vmatpush.msrb.mxu1 %v7438_v31 }
 0x402   :  { %v2089_v15 = vpop.f32.mrf.mxu0  ;;  %v2118_v55 = vpop.f32.mrf.mxu1 }
 0x403   :  { %v2188_v56 = vadd.f32 %v2089_v15, %v311_v53  ;;  %v2189_v47 = vadd.f32 %v2118_v55, %v424_v52  ;;  %v5164_v52 = vld [vmem:[%s8368_s4 + $0x1f0] sm:$0xff]  ;;  %v5165_v55 = vld [vmem:[%s8368_s4 + $0x1f8] sm:$0xff] }
 0x404   :  { %2710 = vmatpush.msrb.mxu2 %v5164_v52  ;;  %2739 = vmatpush.msrb.mxu3 %v5165_v55  ;;  %v8671_v15 = vld [vmem:[#allocation82_spill] sm:$0xff] }
 0x405   :  { %v2204_v37 = vmul.f32 0.5, %v2188_v56  ;;  %v2220_v58 = vmul.f32 0.5, %v2189_v47  ;;  %v5168_v47 = vld [vmem:[%s8368_s4 + $0x1d0] sm:$0xff]  ;;  %v8670_v56 = vld [vmem:[#allocation81_spill] sm:$0xff]  ;;  %v650_v52 = vadd.f32 %v8671_v15, %v6520_v1 }
 0x406   :  { %2711 = vmatpush.msrb.mxu2 %v5168_v47  ;;  %2740 = vmatpush.msrb.mxu3 %v7005_v42  ;;  %v537_v53 = vadd.f32 %v8670_v56, %v6518_v0 }
 0x407   :  { %4974 = vtanh.f32 %v2204_v37  ;;  %v8672_v37 = vld [vmem:[#allocation83_spill] sm:$0xff] }
 0x408   :  { %4976 = vtanh.f32 %v2220_v58  ;;  %v314_v55 = vadd.f32 %v8672_v37, %v6492_v4  ;;  %2712 = vmatpush.msrb.mxu2 %v7021_v34  ;;  %2741 = vmatpush.msrb.mxu3 %v7028_v19 }
 0x409   :  { %v2147_v47 = vpop.f32.mrf.mxu2  ;;  %v2176_v33 = vpop.f32.mrf.mxu3 }
 0x40a   :  { %v2190_v42 = vadd.f32 %v2147_v47, %v537_v53  ;;  %v2191_v56 = vadd.f32 %v2176_v33, %v650_v52  ;;  %v2092_v15 = vpop.f32.mrf.mxu0  ;;  %v2121_v58 = vpop.f32.mrf.mxu1  ;;  %2713 = vmatpush.msrb.mxu2 %v7045_v14  ;;  %2742 = vmatpush.msrb.mxu3 %v7052_v18  ;;  %v8674_v18 = vld [vmem:[#allocation85_spill] sm:$0xff] }
 0x40b   :  { %v2192_v46 = vadd.f32 %v2092_v15, %v314_v55  ;;  %v2193_v62 = vadd.f32 %v2121_v58, %v427_v63  ;;  %v540_v27 = vadd.f32 %v8674_v18, %v6518_v0  ;;  %v8677_v55 = vld [vmem:[#allocation88_spill] sm:$0xff] }
 0x40c   :  { %4978 = vtanh.f32 %v2190_v42  ;;  %v2240_v37 = vmul.f32 0.5, %v2191_v56  ;;  %2714 = vmatpush.msrb.mxu2 %v7069_v21  ;;  %2743 = vmatpush.msrb.mxu3 %v7076_v28  ;;  %v653_v21 = vadd.f32 %v8675_v35, %v6520_v1  ;;  %v430_v39 = vadd.f32 %v8677_v55, %v6494_v5 }
 0x40d   :  { %v4975_v34 = vpop.eup %4974  ;;  %v2205_v19 = vmul.f32 0.5, %v2192_v46  ;;  %v2221_v33 = vmul.f32 0.5, %v2193_v62 }
 0x40e   :  { %v4977_v6 = vpop.eup %4976  ;;  %v2212_v26 = vadd.f32 1.0, %v4975_v34  ;;  %4980 = vtanh.f32 %v2240_v37  ;;  %2715 = vmatpush.msrb.mxu2 %v7093_v32  ;;  %2744 = vmatpush.msrb.mxu3 %v7100_v44 }
 0x40f   :  { %v2228_v14 = vadd.f32 1.0, %v4977_v6  ;;  %4982 = vtanh.f32 %v2205_v19 }
 0x410   :  { %v2216_v28 = vmul.f32 0.5, %v2212_v26  ;;  %4984 = vtanh.f32 %v2221_v33  ;;  %2716 = vmatpush.msrb.mxu2 %v7117_v59  ;;  %2745 = vmatpush.msrb.mxu3 %v7124_v13  ;;  %v8680_v26 = vld [vmem:[#allocation91_spill] sm:$0xff] }
 0x411   :  { %v2232_v53 = vmul.f32 0.5, %v2228_v14  ;;  %v2150_v52 = vpop.f32.mrf.mxu2  ;;  %v2179_v32 = vpop.f32.mrf.mxu3 }
 0x412   :  { %v4979_v44 = vpop.eup %4978  ;;  %v2194_v63 = vadd.f32 %v2150_v52, %v540_v27  ;;  %v2195_v47 = vadd.f32 %v2179_v32, %v653_v21  ;;  %2717 = vmatpush.msrb.mxu2 %v7141_v43  ;;  %2746 = vmatpush.msrb.mxu3 %v7148_v45  ;;  %v8683_v52 = vld [vmem:[#allocation26_spill] sm:$0xff] }
 0x413   :  { %v2256_v7 = vmul.f32 %v2232_v53, %v7315_v24  ;;  %v2260_v60 = vmul.f32 %v4979_v44, %v2216_v28  ;;  %v2095_v42 = vpop.f32.mrf.mxu0  ;;  %v2124_v56 = vpop.f32.mrf.mxu1  ;;  %v8682_v53 = vld [vmem:[#allocation25_spill] sm:$0xff] }
 0x414   :  { %v4981_v59 = vpop.eup %4980  ;;  %4986 = vtanh.f32 %v2194_v63  ;;  %v2241_v13 = vmul.f32 0.5, %v2195_v47  ;;  %v2196_v15 = vadd.f32 %v2095_v42, %v317_v9  ;;  %v2197_v58 = vadd.f32 %v2124_v56, %v430_v39  ;;  %2718 = vmatpush.msrb.mxu2 %v7165_v57  ;;  %2747 = vmatpush.msrb.mxu3 %v7172_v50  ;;  %v8678_v50 = vld [vmem:[#allocation89_spill] sm:$0xff]  ;;  %v8684_v63 = vld [vmem:[#allocation27_spill] sm:$0xff]  ;;  %v8685_v47 = vld [vmem:[#allocation28_spill] sm:$0xff] }
 0x415   :  { %v4983_v25 = vpop.eup %4982  ;;  %v7595_v12 = vadd.f32 %v2260_v60, %v2256_v7  ;;  %v2248_v23 = vadd.f32 1.0, %v4981_v59  ;;  %v543_v62 = vadd.f32 %v8678_v50, %v6518_v0  ;;  %2694 = vmatpush.msrb.mxu1 %v8682_v53  ;;  %2666 = vmatpush.msrb.mxu0 %v8685_v47  ;;  %v8686_v42 = vld [vmem:[#allocation93_spill] sm:$0xff]  ;;  %v8687_v59 = vld [vmem:[#allocation94_spill] sm:$0xff]  ;;  %v8692_v50 = vld [vmem:[#allocation32_spill] sm:$0xff] }
 0x416   :  { %v4985_v24 = vpop.eup %4984  ;;  %v2213_v43 = vadd.f32 1.0, %v4983_v25  ;;  %4988 = vtanh.f32 %v2241_v13  ;;  %v2206_v45 = vmul.f32 0.5, %v2196_v15  ;;  %v2222_v46 = vmul.f32 0.5, %v2197_v58  ;;  %2719 = vmatpush.msrb.mxu2 %v7371_v11  ;;  %2748 = vmatpush.msrb.mxu3 %v7378_v3  ;;  %v8688_v15 = vld [vmem:[#allocation29_spill] sm:$0xff]  ;;  %v8689_v58 = vld [vmem:[#allocation30_spill] sm:$0xff] }
 0x417   :  { %4990 = vtanh.f32 %v7595_v12  ;;  %v2229_v49 = vadd.f32 1.0, %v4985_v24  ;;  %v2252_v18 = vmul.f32 0.5, %v2248_v23  ;;  %v546_v56 = vadd.f32 %v8686_v42, %v6518_v0  ;;  %2695 = vmatpush.msrb.mxu1 %v8688_v15  ;;  %2667 = vmatpush.msrb.mxu0 %v8692_v50 }
 0x418   :  { %v2217_v57 = vmul.f32 0.5, %v2213_v43  ;;  %4992 = vtanh.f32 %v2206_v45  ;;  %2720 = vmatpush.msrb.mxu2 %v7395_v2  ;;  %2749 = vmatpush.msrb.mxu3 %v7402_v40  ;;  %v320_v2 = vadd.f32 %v8680_v26, %v6492_v4  ;;  %v8681_v40 = vld [vmem:[#allocation92_spill] sm:$0xff]  ;;  %v659_v13 = vadd.f32 %v8687_v59, %v6520_v1  ;;  %v8690_v43 = vld [vmem:[#allocation23_spill] sm:$0xff] }
 0x419   :  { %v2233_v37 = vmul.f32 0.5, %v2229_v49  ;;  %4994 = vtanh.f32 %v2222_v46  ;;  %v433_v14 = vadd.f32 %v8681_v40, %v6494_v5 }
 0x41a   :  { %v4987_v11 = vpop.eup %4986  ;;  %v2153_v3 = vpop.f32.mrf.mxu2  ;;  %2721 = vmatpush.msrb.mxu2 %v7419_v54  ;;  %2750 = vmatpush.msrb.mxu3 %v7426_v16 }
 0x41b   :  { %v2182_v34 = vpop.f32.mrf.mxu3  ;;  %v2257_v41 = vmul.f32 %v2233_v37, %v7329_v20  ;;  %v2261_v51 = vmul.f32 %v4987_v11, %v2217_v57  ;;  %v2198_v19 = vadd.f32 %v2153_v3, %v543_v62  ;;  %v8691_v57 = vld [vmem:[#allocation31_spill] sm:$0xff]  ;;  %v8693_v37 = vld [vmem:[#allocation33_spill] sm:$0xff] }
 0x41c   :  { %v2199_v33 = vadd.f32 %v2182_v34, %v656_v48  ;;  %v4989_v6 = vpop.eup %4988  ;;  %v2098_v27 = vpop.f32.mrf.mxu0  ;;  %2722 = vmatpush.msrb.mxu2 %v7443_v36  ;;  %2751 = vmatpush.msrb.mxu3 %v7450_v29 }
 0x41d   :  { %v4991_v22 = vpop.eup %4990  ;;  %v7622_v61 = vadd.f32 %v2261_v51, %v2257_v41  ;;  %4996 = vtanh.f32 %v2198_v19  ;;  %v2127_v35 = vpop.f32.mrf.mxu1  ;;  %v2200_v28 = vadd.f32 %v2098_v27, %v320_v2  ;;  %v2249_v38 = vadd.f32 1.0, %v4989_v6  ;;  %2696 = vmatpush.msrb.mxu1 %v8693_v37  ;;  %v8694_v51 = vld [vmem:[#allocation34_spill] sm:$0xff] }
 0x41e   :  { %v2242_v20 = vmul.f32 0.5, %v2199_v33  ;;  %v4993_v54 = vpop.eup %4992  ;;  %v7626_v21 = vmul.f32 %v4991_v22, %v2252_v18  ;;  %v2201_v17 = vadd.f32 %v2127_v35, %v433_v14  ;;  %2723 = vmatpush.msrb.mxu2 %v8683_v52  ;;  %2752 = vmatpush.msrb.mxu3 %v8684_v63 }
 0x41f   :  { %v4995_v16 = vpop.eup %4994  ;;  %4998 = vtanh.f32 %v7622_v61  ;;  %v2214_v9 = vadd.f32 1.0, %v4993_v54  ;;  %v2207_v36 = vmul.f32 0.5, %v2200_v28  ;;  %v2253_v24 = vmul.f32 0.5, %v2249_v38  ;;  %v8695_v38 = vld [vmem:[#allocation24_spill] sm:$0xff] }
 0x420   :  { %3607 = vst [vmem:[#allocation12 + $0x4] sm:$0x1] %v7626_v21  ;;  %v2230_v31 = vadd.f32 1.0, %v4995_v16  ;;  %5000 = vtanh.f32 %v2242_v20  ;;  %v2223_v32 = vmul.f32 0.5, %v2201_v17  ;;  %2378 = vmatmul.f32.vlgmr.msra.gmra.mxu0 %v7626_v21  ;;  %2407 = vmatmul.f32.vlgmr.msra.gmra.mxu1 %v7626_v21  ;;  %v3551_v8 = vrot.slane %v7626_v21, 1 }
 0x421   :  { %v2218_v29 = vmul.f32 0.5, %v2214_v9  ;;  %2436 = vmatmul.f32.vlgmr.msra.gmra.mxu2 %v7626_v21  ;;  %2465 = vmatmul.f32.vlgmr.msra.gmra.mxu3 %v7626_v21  ;;  %v3552_v44 = vrot.slane %v7626_v21, 2  ;;  %v3553_v55 = vrot.slane %v7626_v21, 3  ;;  %5002 = vtanh.f32 %v2207_v36 }
 0x422   :  { %v2234_v39 = vmul.f32 0.5, %v2230_v31  ;;  %v3554_v7 = vrot.slane %v7626_v21, 4  ;;  %5004 = vtanh.f32 %v2223_v32  ;;  %2724 = vmatpush.msrb.mxu2 %v8689_v58  ;;  %3608 = vst [vmem:[#allocation12 + $0xc] sm:$0x1] %v3551_v8  ;;  %v3555_v25 = vrot.slane %v7626_v21, 5  ;;  %2753 = vmatpush.msrb.mxu3 %v8691_v57 }
 0x423   :  { %v4997_v60 = vpop.eup %4996  ;;  %v2156_v49 = vpop.f32.mrf.mxu2  ;;  %3609 = vst [vmem:[#allocation12 + $0x14] sm:$0x1] %v3552_v44  ;;  %v3556_v11 = vrot.slane %v7626_v21, 6  ;;  %v3557_v19 = vrot.slane %v7626_v21, 7 }
 0x424   :  { %v2258_v45 = vmul.f32 %v2234_v39, %v8690_v43  ;;  %v2262_v46 = vmul.f32 %v4997_v60, %v2218_v29  ;;  %v2185_v23 = vpop.f32.mrf.mxu3  ;;  %v2202_v30 = vadd.f32 %v2156_v49, %v546_v56  ;;  %2725 = vmatpush.msrb.mxu2 %v7519_v10  ;;  %3610 = vst [vmem:[#allocation12 + $0x1c] sm:$0x1] %v3553_v55  ;;  %v8697_v49 = vld [vmem:[#allocation96_spill] sm:$0xff] }
 0x425   :  { %v4999_v62 = vpop.eup %4998  ;;  %v2203_v48 = vadd.f32 %v2185_v23, %v659_v13  ;;  %2754 = vmatpush.msrb.mxu3 %v8694_v51  ;;  %3611 = vst [vmem:[#allocation12 + $0x24] sm:$0x1] %v3554_v7  ;;  %v436_v23 = vadd.f32 %v8697_v49, %v6494_v5 }
 0x426   :  { %v5001_v3 = vpop.eup %5000  ;;  %v2273_v34 = vmul.f32 %v4999_v62, %v2253_v24  ;;  %v7657_v41 = vadd.f32 %v2262_v46, %v2258_v45  ;;  %5006 = vtanh.f32 %v2202_v30  ;;  %3612 = vst [vmem:[#allocation12 + $0x2c] sm:$0x1] %v3555_v25  ;;  %v8696_v45 = vld [vmem:[#allocation95_spill] sm:$0xff] }
 0x427   :  { %v2243_v33 = vmul.f32 0.5, %v2203_v48  ;;  %v5003_v6 = vpop.eup %5002  ;;  %v2250_v40 = vadd.f32 1.0, %v5001_v3  ;;  %3613 = vst [vmem:[#allocation12 + $0x34] sm:$0x1] %v3556_v11  ;;  %v323_v46 = vadd.f32 %v8696_v45, %v6492_v4  ;;  %v8698_v11 = vld [vmem:[#allocation97_spill] sm:$0xff] }
 0x428   :  { %3615 = vst [vmem:[#allocation12 + $0x44] sm:$0x1] %v2273_v34  ;;  %5008 = vtanh.f32 %v7657_v41  ;;  %2381 = vmatmul.f32.gmra.mxu0 %v2273_v34  ;;  %2410 = vmatmul.f32.gmra.mxu1 %v2273_v34  ;;  %v3558_v10 = vrot.slane %v2273_v34, 1  ;;  %v3559_v26 = vrot.slane %v2273_v34, 2  ;;  %v5005_v2 = vpop.eup %5004  ;;  %v2215_v14 = vadd.f32 1.0, %v5003_v6  ;;  %v8701_v6 = vld [vmem:[#allocation100_spill] sm:$0xff] }
 0x429   :  { %2439 = vmatmul.f32.gmra.mxu2 %v2273_v34  ;;  %2468 = vmatmul.f32.gmra.mxu3 %v2273_v34  ;;  %v3560_v18 = vrot.slane %v2273_v34, 3  ;;  %v2231_v22 = vadd.f32 1.0, %v5005_v2  ;;  %5010 = vtanh.f32 %v2243_v33  ;;  %3614 = vst [vmem:[#allocation12 + $0x3c] sm:$0x1] %v3557_v19  ;;  %v3561_v20 = vrot.slane %v2273_v34, 4  ;;  %v8700_v19 = vld [vmem:[#allocation99_spill] sm:$0xff] }
 0x42a   :  { %v2219_v27 = vmul.f32 0.5, %v2215_v14  ;;  %3616 = vst [vmem:[#allocation12 + $0x4c] sm:$0x1] %v3558_v10  ;;  %v3562_v35 = vrot.slane %v2273_v34, 5  ;;  %v3563_v21 = vrot.slane %v2273_v34, 6  ;;  %v2254_v17 = vmul.f32 0.5, %v2250_v40 }
 0x42b   :  { %v2235_v54 = vmul.f32 0.5, %v2231_v22  ;;  %3617 = vst [vmem:[#allocation12 + $0x54] sm:$0x1] %v3559_v26  ;;  %v3564_v52 = vrot.slane %v2273_v34, 7  ;;  %v549_v3 = vadd.f32 %v8698_v11, %v6518_v0  ;;  %v8699_v34 = vld [vmem:[#allocation98_spill] sm:$0xff]  ;;  %v326_v33 = vadd.f32 %v8700_v19, %v6492_v4 }
 0x42c   :  { %v5007_v28 = vpop.eup %5006  ;;  %3618 = vst [vmem:[#allocation12 + $0x5c] sm:$0x1] %v3560_v18  ;;  %v662_v51 = vadd.f32 %v8699_v34, %v6520_v1  ;;  %v439_v10 = vadd.f32 %v8701_v6, %v6494_v5  ;;  %v8707_v11 = vld [vmem:[#allocation106_spill] sm:$0xff] }
 0x42d   :  { %v2259_v9 = vmul.f32 %v2235_v54, %v8695_v38  ;;  %v2263_v53 = vmul.f32 %v5007_v28, %v2219_v27  ;;  %3619 = vst [vmem:[#allocation12 + $0x64] sm:$0x1] %v3561_v20 }
 0x42e   :  { %v5009_v16 = vpop.eup %5008  ;;  %3620 = vst [vmem:[#allocation12 + $0x6c] sm:$0x1] %v3562_v35 }
 0x42f   :  { %v2274_v31 = vmul.f32 %v5009_v16, %v2254_v17  ;;  %v5011_v36 = vpop.eup %5010  ;;  %v7663_v32 = vadd.f32 %v2263_v53, %v2259_v9  ;;  %3621 = vst [vmem:[#allocation12 + $0x74] sm:$0x1] %v3563_v21  ;;  %v8702_v9 = vld [vmem:[#allocation101_spill] sm:$0xff] }
 0x430   :  { %3622 = vst [vmem:[#allocation12 + $0x7c] sm:$0x1] %v3564_v52  ;;  %v2251_v39 = vadd.f32 1.0, %v5011_v36  ;;  %v552_v53 = vadd.f32 %v8702_v9, %v6518_v0  ;;  %v8703_v52 = vld [vmem:[#allocation102_spill] sm:$0xff]  ;;  %v2941_v9 = vld [vmem:[%s8368_s4 + $0x1f8] sm:$0xff] }
 0x431   :  { %3623 = vst [vmem:[#allocation12 + $0x84] sm:$0x1] %v2274_v31  ;;  %2384 = vmatmul.f32.gmra.mxu0 %v2274_v31  ;;  %2413 = vmatmul.f32.gmra.mxu1 %v2274_v31  ;;  %v3565_v29 = vrot.slane %v2274_v31, 1  ;;  %v3566_v8 = vrot.slane %v2274_v31, 2  ;;  %v3567_v44 = vrot.slane %v2274_v31, 3  ;;  %5012 = vtanh.f32 %v7663_v32 }
 0x432   :  { %2442 = vmatmul.f32.gmra.mxu2 %v2274_v31  ;;  %2471 = vmatmul.f32.gmra.mxu3 %v2274_v31  ;;  %v3568_v55 = vrot.slane %v2274_v31, 4  ;;  %v3569_v63 = vrot.slane %v2274_v31, 5  ;;  %v3570_v47 = vrot.slane %v2274_v31, 6  ;;  %v3571_v7 = vrot.slane %v2274_v31, 7 }
 0x433   :  { %3624 = vst [vmem:[#allocation12 + $0x8c] sm:$0x1] %v3565_v29  ;;  %v2255_v60 = vmul.f32 0.5, %v2251_v39  ;;  %v665_v31 = vadd.f32 %v8703_v52, %v6520_v1  ;;  %v8704_v39 = vld [vmem:[#allocation103_spill] sm:$0xff]  ;;  %v2935_v52 = vld [vmem:[%s8368_s4 + $0x1c8] sm:$0xff]  ;;  %3029 = vmatpush.msra.mxu3 %v2941_v9 }
 0x434   :  { %3625 = vst [vmem:[#allocation12 + $0x94] sm:$0x1] %v3566_v8 }
 0x435   :  { %3626 = vst [vmem:[#allocation12 + $0x9c] sm:$0x1] %v3567_v44 }
 0x436   :  { %3627 = vst [vmem:[#allocation12 + $0xa4] sm:$0x1] %v3568_v55 }
 0x437   :  { %3628 = vst [vmem:[#allocation12 + $0xac] sm:$0x1] %v3569_v63  ;;  %v5013_v42 = vpop.eup %5012  ;;  %v329_v63 = vadd.f32 %v8704_v39, %v6492_v4 }
 0x438   :  { %3629 = vst [vmem:[#allocation12 + $0xb4] sm:$0x1] %v3570_v47  ;;  %v2275_v56 = vmul.f32 %v5013_v42, %v2255_v60  ;;  %v8705_v47 = vld [vmem:[#allocation104_spill] sm:$0xff] }
 0x439   :  { %3630 = vst [vmem:[#allocation12 + $0xbc] sm:$0x1] %v3571_v7  ;;  %v442_v7 = vadd.f32 %v8705_v47, %v6494_v5 }
 0x43a   :  { %3631 = vst [vmem:[#allocation12 + $0xc4] sm:$0x1] %v2275_v56  ;;  %2387 = vmatmul.f32.gmra.mxu0 %v2275_v56  ;;  %2416 = vmatmul.f32.gmra.mxu1 %v2275_v56  ;;  %v3572_v59 = vrot.slane %v2275_v56, 1  ;;  %v3573_v13 = vrot.slane %v2275_v56, 2  ;;  %v3574_v15 = vrot.slane %v2275_v56, 3  ;;  %v3575_v58 = vrot.slane %v2275_v56, 4 }
 0x43b   :  { %2445 = vmatmul.f32.gmra.mxu2 %v2275_v56  ;;  %2474 = vmatmul.f32.gmra.mxu3 %v2275_v56  ;;  %v3576_v25 = vrot.slane %v2275_v56, 5  ;;  %v3577_v24 = vrot.slane %v2275_v56, 6  ;;  %v3578_v43 = vrot.slane %v2275_v56, 7 }
 0x43c   :  { %3632 = vst [vmem:[#allocation12 + $0xcc] sm:$0x1] %v3572_v59 }
 0x43d   :  { %3633 = vst [vmem:[#allocation12 + $0xd4] sm:$0x1] %v3573_v13 }
 0x43e   :  { %3634 = vst [vmem:[#allocation12 + $0xdc] sm:$0x1] %v3574_v15 }
 0x43f   :  { %3635 = vst [vmem:[#allocation12 + $0xe4] sm:$0x1] %v3575_v58 }
 0x440   :  { %3636 = vst [vmem:[#allocation12 + $0xec] sm:$0x1] %v3576_v25 }
 0x441   :  { %3637 = vst [vmem:[#allocation12 + $0xf4] sm:$0x1] %v3577_v24 }
 0x442   :  { %3638 = vst [vmem:[#allocation12 + $0xfc] sm:$0x1] %v3578_v43 }
 0x49d   :  { %v2379_v57 = vpop.f32.mrf.mxu0  ;;  %v2408_v50 = vpop.f32.mrf.mxu1 }
 0x49e   :  { %v2478_v62 = vadd.f32 %v2379_v57, %v323_v46  ;;  %v2479_v30 = vadd.f32 %v2408_v50, %v436_v23 }
 0x4a0   :  { %v2494_v48 = vmul.f32 0.5, %v2478_v62  ;;  %v2510_v37 = vmul.f32 0.5, %v2479_v30 }
 0x4a2   :  { %5014 = vtanh.f32 %v2494_v48  ;;  %v8706_v48 = vld [vmem:[#allocation105_spill] sm:$0xff] }
 0x4a3   :  { %5016 = vtanh.f32 %v2510_v37  ;;  %v555_v37 = vadd.f32 %v8706_v48, %v6518_v0 }
 0x4a4   :  { %v2437_v26 = vpop.f32.mrf.mxu2  ;;  %v2466_v2 = vpop.f32.mrf.mxu3 }
 0x4a5   :  { %v2480_v40 = vadd.f32 %v2437_v26, %v549_v3  ;;  %v2481_v14 = vadd.f32 %v2466_v2, %v662_v51  ;;  %v2382_v18 = vpop.f32.mrf.mxu0  ;;  %v2411_v22 = vpop.f32.mrf.mxu1  ;;  %v668_v3 = vadd.f32 %v8707_v11, %v6520_v1 }
 0x4a6   :  { %v2482_v20 = vadd.f32 %v2382_v18, %v326_v33  ;;  %v2483_v27 = vadd.f32 %v2411_v22, %v439_v10  ;;  %v8709_v22 = vld [vmem:[#allocation108_spill] sm:$0xff] }
 0x4a7   :  { %5018 = vtanh.f32 %v2480_v40  ;;  %v2530_v35 = vmul.f32 0.5, %v2481_v14  ;;  %v8708_v14 = vld [vmem:[#allocation107_spill] sm:$0xff] }
 0x4a8   :  { %v5015_v54 = vpop.eup %5014  ;;  %v2495_v21 = vmul.f32 0.5, %v2482_v20  ;;  %v2511_v28 = vmul.f32 0.5, %v2483_v27  ;;  %v332_v18 = vadd.f32 %v8708_v14, %v6492_v4  ;;  %v445_v20 = vadd.f32 %v8709_v22, %v6494_v5 }
 0x4a9   :  { %v5017_v17 = vpop.eup %5016  ;;  %v2502_v16 = vadd.f32 1.0, %v5015_v54  ;;  %5020 = vtanh.f32 %v2530_v35  ;;  %v2938_v35 = vld [vmem:[%s8368_s4 + $0x1e0] sm:$0xff]  ;;  %v2939_v54 = vld [vmem:[%s8368_s4 + $0x1e8] sm:$0xff] }
 0x4aa   :  { %v2518_v38 = vadd.f32 1.0, %v5017_v17  ;;  %5022 = vtanh.f32 %v2495_v21  ;;  %2942 = vmatpush.msra.mxu0 %v2938_v35  ;;  %2971 = vmatpush.msra.mxu1 %v2939_v54 }
 0x4ab   :  { %v2506_v36 = vmul.f32 0.5, %v2502_v16  ;;  %5024 = vtanh.f32 %v2511_v28 }
 0x4ac   :  { %v2522_v29 = vmul.f32 0.5, %v2518_v38  ;;  %v2440_v8 = vpop.f32.mrf.mxu2  ;;  %v2469_v44 = vpop.f32.mrf.mxu3  ;;  %2972 = vmatpush.msra.mxu1 %v2935_v52 }
 0x4ad   :  { %v5019_v55 = vpop.eup %5018  ;;  %v2484_v60 = vadd.f32 %v2440_v8, %v552_v53  ;;  %v2485_v42 = vadd.f32 %v2469_v44, %v665_v31  ;;  %v2934_v53 = vld [vmem:[%s8368_s4 + $0x1c0] sm:$0xff] }
 0x4ae   :  { %v2546_v56 = vmul.f32 %v2522_v29, %v7595_v12  ;;  %v2550_v59 = vmul.f32 %v5019_v55, %v2506_v36  ;;  %v2385_v13 = vpop.f32.mrf.mxu0  ;;  %v2414_v15 = vpop.f32.mrf.mxu1  ;;  %2943 = vmatpush.msra.mxu0 %v2934_v53 }
 0x4af   :  { %v5021_v58 = vpop.eup %5020  ;;  %5026 = vtanh.f32 %v2484_v60  ;;  %v2531_v25 = vmul.f32 0.5, %v2485_v42  ;;  %v2486_v24 = vadd.f32 %v2385_v13, %v329_v63  ;;  %v2487_v43 = vadd.f32 %v2414_v15, %v442_v7  ;;  %v2936_v63 = vld [vmem:[%s8368_s4 + $0x1d0] sm:$0xff] }
 0x4b0   :  { %v5023_v45 = vpop.eup %5022  ;;  %v7687_v46 = vadd.f32 %v2550_v59, %v2546_v56  ;;  %v2538_v12 = vadd.f32 1.0, %v5021_v58 }
 0x4b1   :  { %v5025_v49 = vpop.eup %5024  ;;  %v2503_v23 = vadd.f32 1.0, %v5023_v45  ;;  %5028 = vtanh.f32 %v2531_v25  ;;  %v2496_v57 = vmul.f32 0.5, %v2486_v24  ;;  %v2512_v50 = vmul.f32 0.5, %v2487_v43  ;;  %v8710_v24 = vld [vmem:[#allocation109_spill] sm:$0xff]  ;;  %v8711_v45 = vld [vmem:[#allocation110_spill] sm:$0xff] }
 0x4b2   :  { %5030 = vtanh.f32 %v7687_v46  ;;  %v2519_v62 = vadd.f32 1.0, %v5025_v49  ;;  %v2542_v27 = vmul.f32 0.5, %v2538_v12  ;;  %v558_v43 = vadd.f32 %v8710_v24, %v6518_v0 }
 0x4b3   :  { %v2507_v30 = vmul.f32 0.5, %v2503_v23  ;;  %5032 = vtanh.f32 %v2496_v57  ;;  %v671_v49 = vadd.f32 %v8711_v45, %v6520_v1  ;;  %v2930_v45 = vld [vmem:[%s8368_s4 + $0x1a0] sm:$0xff] }
 0x4b4   :  { %v2523_v34 = vmul.f32 0.5, %v2519_v62  ;;  %5034 = vtanh.f32 %v2512_v50  ;;  %2944 = vmatpush.msra.mxu0 %v2930_v45 }
 0x4b5   :  { %v5027_v51 = vpop.eup %5026  ;;  %v2443_v19 = vpop.f32.mrf.mxu2 }
 0x4b6   :  { %v2472_v33 = vpop.f32.mrf.mxu3  ;;  %v2547_v6 = vmul.f32 %v2523_v34, %v7622_v61  ;;  %v2551_v10 = vmul.f32 %v5027_v51, %v2507_v30  ;;  %v2488_v26 = vadd.f32 %v2443_v19, %v555_v37  ;;  %v2940_v61 = vld [vmem:[%s8368_s4 + $0x1f0] sm:$0xff] }
 0x4b7   :  { %v2489_v2 = vadd.f32 %v2472_v33, %v668_v3  ;;  %v5029_v40 = vpop.eup %5028  ;;  %v2388_v16 = vpop.f32.mrf.mxu0  ;;  %3000 = vmatpush.msra.mxu2 %v2940_v61 }
 0x4b8   :  { %v5031_v21 = vpop.eup %5030  ;;  %v7708_v28 = vadd.f32 %v2551_v10, %v2547_v6  ;;  %5036 = vtanh.f32 %v2488_v26  ;;  %v2417_v38 = vpop.f32.mrf.mxu1  ;;  %v2490_v29 = vadd.f32 %v2388_v16, %v332_v18  ;;  %v2539_v55 = vadd.f32 1.0, %v5029_v40 }
 0x4b9   :  { %v2532_v17 = vmul.f32 0.5, %v2489_v2  ;;  %v5033_v31 = vpop.eup %5032  ;;  %v7719_v36 = vmul.f32 %v5031_v21, %v2542_v27  ;;  %v2491_v8 = vadd.f32 %v2417_v38, %v445_v20  ;;  %3001 = vmatpush.msra.mxu2 %v2936_v63 }
 0x4ba   :  { %v5035_v44 = vpop.eup %5034  ;;  %5038 = vtanh.f32 %v7708_v28  ;;  %v2504_v39 = vadd.f32 1.0, %v5033_v31  ;;  %v2497_v7 = vmul.f32 0.5, %v2490_v29  ;;  %v2543_v57 = vmul.f32 0.5, %v2539_v55 }
 0x4bb   :  { %3703 = vst [vmem:[#allocation12 + $0x5] sm:$0x1] %v7719_v36  ;;  %v2520_v47 = vadd.f32 1.0, %v5035_v44  ;;  %5040 = vtanh.f32 %v2532_v17  ;;  %v2513_v60 = vmul.f32 0.5, %v2491_v8  ;;  %2668 = vmatmul.f32.vlgmr.msrb.gmra.mxu0 %v7719_v36  ;;  %2697 = vmatmul.f32.vlgmr.msrb.gmra.mxu1 %v7719_v36  ;;  %v3647_v56 = vrot.slane %v7719_v36, 1 }
 0x4bc   :  { %v2508_v42 = vmul.f32 0.5, %v2504_v39  ;;  %2726 = vmatmul.f32.vlgmr.msrb.gmra.mxu2 %v7719_v36  ;;  %2755 = vmatmul.f32.vlgmr.msrb.gmra.mxu3 %v7719_v36  ;;  %v3648_v59 = vrot.slane %v7719_v36, 2  ;;  %v3649_v13 = vrot.slane %v7719_v36, 3  ;;  %5042 = vtanh.f32 %v2497_v7 }
 0x4bd   :  { %v2524_v15 = vmul.f32 0.5, %v2520_v47  ;;  %v3650_v58 = vrot.slane %v7719_v36, 4  ;;  %5044 = vtanh.f32 %v2513_v60  ;;  %3704 = vst [vmem:[#allocation12 + $0xd] sm:$0x1] %v3647_v56  ;;  %v3651_v23 = vrot.slane %v7719_v36, 5 }
 0x4be   :  { %v5037_v25 = vpop.eup %5036  ;;  %v2446_v12 = vpop.f32.mrf.mxu2  ;;  %3705 = vst [vmem:[#allocation12 + $0x15] sm:$0x1] %v3648_v59  ;;  %v3652_v3 = vrot.slane %v7719_v36, 6  ;;  %v3653_v33 = vrot.slane %v7719_v36, 7 }
 0x4bf   :  { %v2548_v50 = vmul.f32 %v2524_v15, %v7657_v41  ;;  %v2552_v62 = vmul.f32 %v5037_v25, %v2508_v42  ;;  %v2475_v30 = vpop.f32.mrf.mxu3  ;;  %v2492_v37 = vadd.f32 %v2446_v12, %v558_v43  ;;  %3706 = vst [vmem:[#allocation12 + $0x1d] sm:$0x1] %v3649_v13  ;;  %v2937_v43 = vld [vmem:[%s8368_s4 + $0x1d8] sm:$0xff]  ;;  %v2928_v12 = vld [vmem:[%s8368_s4 + $0x190] sm:$0xff] }
 0x4c0   :  { %v5039_v48 = vpop.eup %5038  ;;  %v2493_v11 = vadd.f32 %v2475_v30, %v671_v49  ;;  %3707 = vst [vmem:[#allocation12 + $0x25] sm:$0x1] %v3650_v58  ;;  %3030 = vmatpush.msra.mxu3 %v2937_v43  ;;  %v2931_v49 = vld [vmem:[%s8368_s4 + $0x1a8] sm:$0xff]  ;;  %v2929_v30 = vld [vmem:[%s8368_s4 + $0x198] sm:$0xff] }
 0x4c1   :  { %v5041_v34 = vpop.eup %5040  ;;  %v2563_v51 = vmul.f32 %v5039_v48, %v2543_v57  ;;  %v7741_v19 = vadd.f32 %v2552_v62, %v2548_v50  ;;  %5046 = vtanh.f32 %v2492_v37  ;;  %3708 = vst [vmem:[#allocation12 + $0x2d] sm:$0x1] %v3651_v23  ;;  %v2932_v23 = vld [vmem:[%s8368_s4 + $0x1b0] sm:$0xff]  ;;  %2973 = vmatpush.msra.mxu1 %v2931_v49  ;;  %v2933_v57 = vld [vmem:[%s8368_s4 + $0x1b8] sm:$0xff]  ;;  %v2926_v50 = vld [vmem:[%s8368_s4 + $0x180] sm:$0xff] }
 0x4c2   :  { %v2533_v6 = vmul.f32 0.5, %v2493_v11  ;;  %v5043_v41 = vpop.eup %5042  ;;  %v2540_v40 = vadd.f32 1.0, %v5041_v34  ;;  %3709 = vst [vmem:[#allocation12 + $0x35] sm:$0x1] %v3652_v3  ;;  %3002 = vmatpush.msra.mxu2 %v2932_v23  ;;  %3031 = vmatpush.msra.mxu3 %v2933_v57  ;;  %v2927_v62 = vld [vmem:[%s8368_s4 + $0x188] sm:$0xff]  ;;  %v2922_v48 = vld [vmem:[%s8368_s4 + $0x160] sm:$0xff] }
 0x4c3   :  { %3711 = vst [vmem:[#allocation12 + $0x45] sm:$0x1] %v2563_v51  ;;  %5048 = vtanh.f32 %v7741_v19  ;;  %2671 = vmatmul.f32.gmra.mxu0 %v2563_v51  ;;  %2700 = vmatmul.f32.gmra.mxu1 %v2563_v51  ;;  %v3654_v10 = vrot.slane %v2563_v51, 1  ;;  %v3655_v26 = vrot.slane %v2563_v51, 2  ;;  %v5045_v2 = vpop.eup %5044  ;;  %v2505_v14 = vadd.f32 1.0, %v5043_v41  ;;  %v2923_v37 = vld [vmem:[%s8368_s4 + $0x168] sm:$0xff] }
 0x4c4   :  { %2729 = vmatmul.f32.gmra.mxu2 %v2563_v51  ;;  %2758 = vmatmul.f32.gmra.mxu3 %v2563_v51  ;;  %v3656_v18 = vrot.slane %v2563_v51, 3  ;;  %v2521_v22 = vadd.f32 1.0, %v5045_v2  ;;  %5050 = vtanh.f32 %v2533_v6  ;;  %3710 = vst [vmem:[#allocation12 + $0x3d] sm:$0x1] %v3653_v33  ;;  %v3657_v20 = vrot.slane %v2563_v51, 4  ;;  %v2924_v11 = vld [vmem:[%s8368_s4 + $0x170] sm:$0xff] }
 0x4c5   :  { %v2509_v27 = vmul.f32 0.5, %v2505_v14  ;;  %3712 = vst [vmem:[#allocation12 + $0x4d] sm:$0x1] %v3654_v10  ;;  %v3658_v35 = vrot.slane %v2563_v51, 5  ;;  %v3659_v61 = vrot.slane %v2563_v51, 6  ;;  %v2544_v17 = vmul.f32 0.5, %v2540_v40  ;;  %2945 = vmatpush.msra.mxu0 %v2926_v50  ;;  %2974 = vmatpush.msra.mxu1 %v2927_v62 }
 0x4c6   :  { %v2525_v54 = vmul.f32 0.5, %v2521_v22  ;;  %3713 = vst [vmem:[#allocation12 + $0x55] sm:$0x1] %v3655_v26  ;;  %v3660_v53 = vrot.slane %v2563_v51, 7  ;;  %3003 = vmatpush.msra.mxu2 %v2928_v12  ;;  %3032 = vmatpush.msra.mxu3 %v2929_v30  ;;  %v2925_v3 = vld [vmem:[%s8368_s4 + $0x178] sm:$0xff]  ;;  %v2918_v34 = vld [vmem:[%s8368_s4 + $0x140] sm:$0xff] }
 0x4c7   :  { %v5047_v21 = vpop.eup %5046  ;;  %3714 = vst [vmem:[#allocation12 + $0x5d] sm:$0x1] %v3656_v18  ;;  %2946 = vmatpush.msra.mxu0 %v2922_v48  ;;  %2975 = vmatpush.msra.mxu1 %v2923_v37  ;;  %v2919_v51 = vld [vmem:[%s8368_s4 + $0x148] sm:$0xff]  ;;  %v2920_v33 = vld [vmem:[%s8368_s4 + $0x150] sm:$0xff]  ;;  %v2921_v6 = vld [vmem:[%s8368_s4 + $0x158] sm:$0xff] }
 0x4c8   :  { %v2549_v38 = vmul.f32 %v2525_v54, %v7663_v32  ;;  %v2553_v9 = vmul.f32 %v5047_v21, %v2509_v27  ;;  %3715 = vst [vmem:[#allocation12 + $0x65] sm:$0x1] %v3657_v20  ;;  %3004 = vmatpush.msra.mxu2 %v2924_v11  ;;  %3033 = vmatpush.msra.mxu3 %v2925_v3  ;;  %v2914_v41 = vld [vmem:[%s8368_s4 + $0x120] sm:$0xff]  ;;  %v2915_v10 = vld [vmem:[%s8368_s4 + $0x128] sm:$0xff]  ;;  %v2916_v26 = vld [vmem:[%s8368_s4 + $0x130] sm:$0xff] }
 0x4c9   :  { %v5049_v16 = vpop.eup %5048  ;;  %3716 = vst [vmem:[#allocation12 + $0x6d] sm:$0x1] %v3658_v35  ;;  %2947 = vmatpush.msra.mxu0 %v2918_v34  ;;  %2976 = vmatpush.msra.mxu1 %v2919_v51  ;;  %v2917_v2 = vld [vmem:[%s8368_s4 + $0x138] sm:$0xff]  ;;  %v2910_v40 = vld [vmem:[%s8368_s4 + $0x100] sm:$0xff]  ;;  %v2911_v14 = vld [vmem:[%s8368_s4 + $0x108] sm:$0xff] }
 0x4ca   :  { %v2564_v52 = vmul.f32 %v5049_v16, %v2544_v17  ;;  %v5051_v31 = vpop.eup %5050  ;;  %v7746_v36 = vadd.f32 %v2553_v9, %v2549_v38  ;;  %3717 = vst [vmem:[#allocation12 + $0x75] sm:$0x1] %v3659_v61  ;;  %3005 = vmatpush.msra.mxu2 %v2920_v33  ;;  %3034 = vmatpush.msra.mxu3 %v2921_v6  ;;  %v2912_v18 = vld [vmem:[%s8368_s4 + $0x110] sm:$0xff]  ;;  %v2913_v22 = vld [vmem:[%s8368_s4 + $0x118] sm:$0xff]  ;;  %v2906_v20 = vld [vmem:[%s8368_s4 + $0xe0] sm:$0xff] }
 0x4cb   :  { %3718 = vst [vmem:[#allocation12 + $0x7d] sm:$0x1] %v3660_v53  ;;  %v2541_v55 = vadd.f32 1.0, %v5051_v31  ;;  %2948 = vmatpush.msra.mxu0 %v2914_v41  ;;  %2977 = vmatpush.msra.mxu1 %v2915_v10  ;;  %v2907_v27 = vld [vmem:[%s8368_s4 + $0xe8] sm:$0xff]  ;;  %v2908_v35 = vld [vmem:[%s8368_s4 + $0xf0] sm:$0xff]  ;;  %v2909_v54 = vld [vmem:[%s8368_s4 + $0xf8] sm:$0xff] }
 0x4cc   :  { %3719 = vst [vmem:[#allocation12 + $0x85] sm:$0x1] %v2564_v52  ;;  %2674 = vmatmul.f32.gmra.mxu0 %v2564_v52  ;;  %2703 = vmatmul.f32.gmra.mxu1 %v2564_v52  ;;  %v3661_v29 = vrot.slane %v2564_v52, 1  ;;  %v3662_v8 = vrot.slane %v2564_v52, 2  ;;  %v3663_v44 = vrot.slane %v2564_v52, 3  ;;  %5052 = vtanh.f32 %v7746_v36  ;;  %v5169_v61 = vld [vmem:[%s8368_s4 + $0xc0] sm:$0xff] }
 0x4cd   :  { %2732 = vmatmul.f32.gmra.mxu2 %v2564_v52  ;;  %2761 = vmatmul.f32.gmra.mxu3 %v2564_v52  ;;  %v3664_v32 = vrot.slane %v2564_v52, 4  ;;  %v3665_v39 = vrot.slane %v2564_v52, 5  ;;  %v3666_v63 = vrot.slane %v2564_v52, 6  ;;  %v3667_v47 = vrot.slane %v2564_v52, 7  ;;  %v5170_v21 = vld [vmem:[%s8368_s4 + $0xc8] sm:$0xff]  ;;  %v5171_v17 = vld [vmem:[%s8368_s4 + $0xd0] sm:$0xff] }
 0x4ce   :  { %3720 = vst [vmem:[#allocation12 + $0x8d] sm:$0x1] %v3661_v29  ;;  %v2545_v7 = vmul.f32 0.5, %v2541_v55  ;;  %3006 = vmatpush.msra.mxu2 %v2916_v26  ;;  %3035 = vmatpush.msra.mxu3 %v2917_v2  ;;  %v5172_v16 = vld [vmem:[%s8368_s4 + $0xd8] sm:$0xff]  ;;  %v5173_v38 = vld [vmem:[%s8368_s4 + $0xa0] sm:$0xff]  ;;  %v5174_v9 = vld [vmem:[%s8368_s4 + $0xa8] sm:$0xff] }
 0x4cf   :  { %3721 = vst [vmem:[#allocation12 + $0x95] sm:$0x1] %v3662_v8  ;;  %2949 = vmatpush.msra.mxu0 %v2910_v40  ;;  %2978 = vmatpush.msra.mxu1 %v2911_v14  ;;  %v5175_v53 = vld [vmem:[%s8368_s4 + $0xb0] sm:$0xff]  ;;  %v5176_v52 = vld [vmem:[%s8368_s4 + $0xb8] sm:$0xff]  ;;  %v5177_v31 = vld [vmem:[%s8368_s4 + $0x80] sm:$0xff] }
 0x4d0   :  { %3722 = vst [vmem:[#allocation12 + $0x9d] sm:$0x1] %v3663_v44  ;;  %3007 = vmatpush.msra.mxu2 %v2912_v18  ;;  %3036 = vmatpush.msra.mxu3 %v2913_v22  ;;  %v5178_v29 = vld [vmem:[%s8368_s4 + $0x88] sm:$0xff]  ;;  %v5179_v8 = vld [vmem:[%s8368_s4 + $0x90] sm:$0xff]  ;;  %v5180_v44 = vld [vmem:[%s8368_s4 + $0x98] sm:$0xff] }
 0x4d1   :  { %3723 = vst [vmem:[#allocation12 + $0xa5] sm:$0x1] %v3664_v32  ;;  %2950 = vmatpush.msra.mxu0 %v2906_v20  ;;  %2979 = vmatpush.msra.mxu1 %v2907_v27  ;;  %v5181_v32 = vld [vmem:[%s8368_s4 + $0x60] sm:$0xff]  ;;  %v5182_v55 = vld [vmem:[%s8368_s4 + $0x68] sm:$0xff]  ;;  %v5192_v43 = vld [vmem:[%s8368_s4 + $0x38] sm:$0xff] }
 0x4d2   :  { %3724 = vst [vmem:[#allocation12 + $0xad] sm:$0x1] %v3665_v39  ;;  %v5053_v60 = vpop.eup %5052  ;;  %3008 = vmatpush.msra.mxu2 %v2908_v35  ;;  %3037 = vmatpush.msra.mxu3 %v2909_v54  ;;  %v5183_v39 = vld [vmem:[%s8368_s4 + $0x70] sm:$0xff]  ;;  %v5193_v23 = vld [vmem:[%s8368_s4] sm:$0xff]  ;;  %v5194_v57 = vld [vmem:[%s8368_s4 + $0x8] sm:$0xff] }
 0x4d3   :  { %3725 = vst [vmem:[#allocation12 + $0xb5] sm:$0x1] %v3666_v63  ;;  %v2565_v42 = vmul.f32 %v5053_v60, %v2545_v7  ;;  %2951 = vmatpush.msra.mxu0 %v5169_v61  ;;  %2980 = vmatpush.msra.mxu1 %v5170_v21  ;;  %v5184_v63 = vld [vmem:[%s8368_s4 + $0x78] sm:$0xff]  ;;  %v5186_v7 = vld [vmem:[%s8368_s4 + $0x48] sm:$0xff]  ;;  %v5187_v60 = vld [vmem:[%s8368_s4 + $0x50] sm:$0xff] }
 0x4d4   :  { %3726 = vst [vmem:[#allocation12 + $0xbd] sm:$0x1] %v3667_v47  ;;  %3009 = vmatpush.msra.mxu2 %v5171_v17  ;;  %3038 = vmatpush.msra.mxu3 %v5172_v16  ;;  %v5185_v47 = vld [vmem:[%s8368_s4 + $0x40] sm:$0xff]  ;;  %v5195_v12 = vld [vmem:[%s8368_s4 + $0x10] sm:$0xff]  ;;  %v5196_v30 = vld [vmem:[%s8368_s4 + $0x18] sm:$0xff] }
 0x4d5   :  { %3727 = vst [vmem:[#allocation12 + $0xc5] sm:$0x1] %v2565_v42  ;;  %2677 = vmatmul.f32.gmra.mxu0 %v2565_v42  ;;  %2706 = vmatmul.f32.gmra.mxu1 %v2565_v42  ;;  %v3668_v56 = vrot.slane %v2565_v42, 1  ;;  %v3669_v59 = vrot.slane %v2565_v42, 2  ;;  %v3670_v13 = vrot.slane %v2565_v42, 3  ;;  %v3671_v15 = vrot.slane %v2565_v42, 4 }
 0x4d6   :  { %2735 = vmatmul.f32.gmra.mxu2 %v2565_v42  ;;  %2764 = vmatmul.f32.gmra.mxu3 %v2565_v42  ;;  %v3672_v58 = vrot.slane %v2565_v42, 5  ;;  %v3673_v25 = vrot.slane %v2565_v42, 6  ;;  %v3674_v24 = vrot.slane %v2565_v42, 7  ;;  %v5188_v42 = vld [vmem:[%s8368_s4 + $0x58] sm:$0xff]  ;;  %v8714_v11 = vld [vmem:[#allocation113_spill] sm:$0xff]  ;;  %v8715_v34 = vld [vmem:[#allocation114_spill] sm:$0xff] }
 0x4d7   :  { %3728 = vst [vmem:[#allocation12 + $0xcd] sm:$0x1] %v3668_v56  ;;  %2952 = vmatpush.msra.mxu0 %v5173_v38  ;;  %2981 = vmatpush.msra.mxu1 %v5174_v9  ;;  %v5189_v56 = vld [vmem:[%s8368_s4 + $0x20] sm:$0xff]  ;;  %v561_v3 = vadd.f32 %v8714_v11, %v6518_v0  ;;  %v674_v51 = vadd.f32 %v8715_v34, %v6520_v1  ;;  %v8716_v33 = vld [vmem:[#allocation115_spill] sm:$0xff]  ;;  %v8718_v9 = vld [vmem:[#allocation117_spill] sm:$0xff] }
 0x4d8   :  { %3729 = vst [vmem:[#allocation12 + $0xd5] sm:$0x1] %v3669_v59  ;;  %3010 = vmatpush.msra.mxu2 %v5175_v53  ;;  %3039 = vmatpush.msra.mxu3 %v5176_v52  ;;  %v5190_v59 = vld [vmem:[%s8368_s4 + $0x28] sm:$0xff]  ;;  %v338_v6 = vadd.f32 %v8716_v33, %v6492_v4  ;;  %v8717_v41 = vld [vmem:[#allocation116_spill] sm:$0xff]  ;;  %v564_v53 = vadd.f32 %v8718_v9, %v6518_v0  ;;  %v8719_v52 = vld [vmem:[#allocation118_spill] sm:$0xff] }
 0x4d9   :  { %3730 = vst [vmem:[#allocation12 + $0xdd] sm:$0x1] %v3670_v13  ;;  %2953 = vmatpush.msra.mxu0 %v5177_v31  ;;  %2982 = vmatpush.msra.mxu1 %v5178_v29  ;;  %v8712_v13 = vld [vmem:[#allocation111_spill] sm:$0xff]  ;;  %v451_v10 = vadd.f32 %v8717_v41, %v6494_v5  ;;  %v677_v31 = vadd.f32 %v8719_v52, %v6520_v1  ;;  %v8723_v11 = vld [vmem:[#allocation122_spill] sm:$0xff] }
 0x4da   :  { %3731 = vst [vmem:[#allocation12 + $0xe5] sm:$0x1] %v3671_v15  ;;  %3011 = vmatpush.msra.mxu2 %v5179_v8  ;;  %3040 = vmatpush.msra.mxu3 %v5180_v44  ;;  %v335_v15 = vadd.f32 %v8712_v13, %v6492_v4 }
 0x4db   :  { %3732 = vst [vmem:[#allocation12 + $0xed] sm:$0x1] %v3672_v58  ;;  %2954 = vmatpush.msra.mxu0 %v5181_v32  ;;  %2983 = vmatpush.msra.mxu1 %v5182_v55  ;;  %v8713_v58 = vld [vmem:[#allocation112_spill] sm:$0xff] }
 0x4dc   :  { %3733 = vst [vmem:[#allocation12 + $0xf5] sm:$0x1] %v3673_v25  ;;  %3012 = vmatpush.msra.mxu2 %v5183_v39  ;;  %3041 = vmatpush.msra.mxu3 %v5184_v63  ;;  %v448_v25 = vadd.f32 %v8713_v58, %v6494_v5  ;;  %v8720_v39 = vld [vmem:[#allocation119_spill] sm:$0xff] }
 0x4dd   :  { %3734 = vst [vmem:[#allocation12 + $0xfd] sm:$0x1] %v3674_v24  ;;  %2955 = vmatpush.msra.mxu0 %v5185_v47  ;;  %2984 = vmatpush.msra.mxu1 %v5186_v7  ;;  %v5191_v24 = vld [vmem:[%s8368_s4 + $0x30] sm:$0xff]  ;;  %v341_v63 = vadd.f32 %v8720_v39, %v6492_v4  ;;  %v8721_v47 = vld [vmem:[#allocation120_spill] sm:$0xff] }
 0x4de   :  { %3013 = vmatpush.msra.mxu2 %v5187_v60  ;;  %3042 = vmatpush.msra.mxu3 %v5188_v42  ;;  %v454_v7 = vadd.f32 %v8721_v47, %v6494_v5 }
 0x4df   :  { %2956 = vmatpush.msra.mxu0 %v5189_v56  ;;  %2985 = vmatpush.msra.mxu1 %v5190_v59 }
 0x4e0   :  { %3014 = vmatpush.msra.mxu2 %v5191_v24  ;;  %3043 = vmatpush.msra.mxu3 %v5192_v43 }
 0x4e1   :  { %2957 = vmatpush.msra.mxu0 %v5193_v23  ;;  %2986 = vmatpush.msra.mxu1 %v5194_v57 }
 0x4e2   :  { %3015 = vmatpush.msra.mxu2 %v5195_v12  ;;  %3044 = vmatpush.msra.mxu3 %v5196_v30 }
 0x538   :  { %v2669_v45 = vpop.f32.mrf.mxu0  ;;  %v2698_v49 = vpop.f32.mrf.mxu1 }
 0x539   :  { %v2768_v50 = vadd.f32 %v2669_v45, %v335_v15  ;;  %v2769_v62 = vadd.f32 %v2698_v49, %v448_v25 }
 0x53b   :  { %v2784_v48 = vmul.f32 0.5, %v2768_v50  ;;  %v2800_v37 = vmul.f32 0.5, %v2769_v62 }
 0x53d   :  { %5054 = vtanh.f32 %v2784_v48  ;;  %v8722_v48 = vld [vmem:[#allocation121_spill] sm:$0xff] }
 0x53e   :  { %5056 = vtanh.f32 %v2800_v37  ;;  %v567_v37 = vadd.f32 %v8722_v48, %v6518_v0 }
 0x53f   :  { %v2727_v26 = vpop.f32.mrf.mxu2  ;;  %v2756_v2 = vpop.f32.mrf.mxu3 }
 0x540   :  { %v2770_v40 = vadd.f32 %v2727_v26, %v561_v3  ;;  %v2771_v14 = vadd.f32 %v2756_v2, %v674_v51  ;;  %v2672_v18 = vpop.f32.mrf.mxu0  ;;  %v2701_v22 = vpop.f32.mrf.mxu1  ;;  %v680_v3 = vadd.f32 %v8723_v11, %v6520_v1 }
 0x541   :  { %v2772_v20 = vadd.f32 %v2672_v18, %v338_v6  ;;  %v2773_v27 = vadd.f32 %v2701_v22, %v451_v10  ;;  %v8725_v22 = vld [vmem:[#allocation124_spill] sm:$0xff] }
 0x542   :  { %5058 = vtanh.f32 %v2770_v40  ;;  %v2820_v35 = vmul.f32 0.5, %v2771_v14  ;;  %v8724_v14 = vld [vmem:[#allocation123_spill] sm:$0xff] }
 0x543   :  { %v5055_v54 = vpop.eup %5054  ;;  %v2785_v61 = vmul.f32 0.5, %v2772_v20  ;;  %v2801_v21 = vmul.f32 0.5, %v2773_v27  ;;  %v344_v18 = vadd.f32 %v8724_v14, %v6492_v4  ;;  %v457_v20 = vadd.f32 %v8725_v22, %v6494_v5 }
 0x544   :  { %v5057_v17 = vpop.eup %5056  ;;  %v2792_v16 = vadd.f32 1.0, %v5055_v54  ;;  %5060 = vtanh.f32 %v2820_v35 }
 0x545   :  { %v2808_v38 = vadd.f32 1.0, %v5057_v17  ;;  %5062 = vtanh.f32 %v2785_v61 }
 0x546   :  { %v2796_v29 = vmul.f32 0.5, %v2792_v16  ;;  %5064 = vtanh.f32 %v2801_v21 }
 0x547   :  { %v2812_v8 = vmul.f32 0.5, %v2808_v38  ;;  %v2730_v44 = vpop.f32.mrf.mxu2  ;;  %v2759_v32 = vpop.f32.mrf.mxu3 }
 0x548   :  { %v5059_v55 = vpop.eup %5058  ;;  %v2774_v60 = vadd.f32 %v2730_v44, %v564_v53  ;;  %v2775_v42 = vadd.f32 %v2759_v32, %v677_v31 }
 0x549   :  { %v2836_v56 = vmul.f32 %v2812_v8, %v7687_v46  ;;  %v2840_v59 = vmul.f32 %v5059_v55, %v2796_v29  ;;  %v2675_v13 = vpop.f32.mrf.mxu0  ;;  %v2704_v15 = vpop.f32.mrf.mxu1 }
 0x54a   :  { %v5061_v58 = vpop.eup %5060  ;;  %5066 = vtanh.f32 %v2774_v60  ;;  %v2821_v25 = vmul.f32 0.5, %v2775_v42  ;;  %v2776_v24 = vadd.f32 %v2675_v13, %v341_v63  ;;  %v2777_v43 = vadd.f32 %v2704_v15, %v454_v7  ;;  %v8726_v42 = vld [vmem:[#allocation125_spill] sm:$0xff] }
 0x54b   :  { %v5063_v45 = vpop.eup %5062  ;;  %v7941_v49 = vadd.f32 %v2840_v59, %v2836_v56  ;;  %v2828_v46 = vadd.f32 1.0, %v5061_v58  ;;  %v570_v56 = vadd.f32 %v8726_v42, %v6518_v0  ;;  %v8727_v59 = vld [vmem:[#allocation126_spill] sm:$0xff] }
 0x54c   :  { %v5065_v23 = vpop.eup %5064  ;;  %v2793_v57 = vadd.f32 1.0, %v5063_v45  ;;  %5068 = vtanh.f32 %v2821_v25  ;;  %v2786_v50 = vmul.f32 0.5, %v2776_v24  ;;  %v2802_v62 = vmul.f32 0.5, %v2777_v43 }
 0x54d   :  { %5070 = vtanh.f32 %v7941_v49  ;;  %v2809_v12 = vadd.f32 1.0, %v5065_v23  ;;  %v2832_v27 = vmul.f32 0.5, %v2828_v46  ;;  %v683_v13 = vadd.f32 %v8727_v59, %v6520_v1  ;;  %v4022_v59 = vld [vmem:[#allocation7 + $0xf8] sm:$0xff] }
 0x54e   :  { %v2797_v30 = vmul.f32 0.5, %v2793_v57  ;;  %5072 = vtanh.f32 %v2786_v50  ;;  %4142 = vmatpush.msrb.mxu1 %v4022_v59  ;;  %v3991_v59 = vld [vmem:[#allocation7] sm:$0xff] }
 0x54f   :  { %v2813_v34 = vmul.f32 0.5, %v2809_v12  ;;  %5074 = vtanh.f32 %v2802_v62 }
 0x550   :  { %v5067_v51 = vpop.eup %5066  ;;  %v2733_v33 = vpop.f32.mrf.mxu2 }
 0x551   :  { %v2762_v6 = vpop.f32.mrf.mxu3  ;;  %v2837_v41 = vmul.f32 %v2813_v34, %v7708_v28  ;;  %v2841_v10 = vmul.f32 %v5067_v51, %v2797_v30  ;;  %v2778_v26 = vadd.f32 %v2733_v33, %v567_v37 }
 0x552   :  { %v2779_v2 = vadd.f32 %v2762_v6, %v680_v3  ;;  %v5069_v40 = vpop.eup %5068  ;;  %v2678_v21 = vpop.f32.mrf.mxu0 }
 0x553   :  { %v5071_v35 = vpop.eup %5070  ;;  %v7953_v54 = vadd.f32 %v2841_v10, %v2837_v41  ;;  %5076 = vtanh.f32 %v2778_v26  ;;  %v2707_v17 = vpop.f32.mrf.mxu1  ;;  %v2780_v38 = vadd.f32 %v2678_v21, %v344_v18  ;;  %v2829_v52 = vadd.f32 1.0, %v5069_v40 }
 0x554   :  { %v2822_v61 = vmul.f32 0.5, %v2779_v2  ;;  %v5073_v16 = vpop.eup %5072  ;;  %v7955_v28 = vmul.f32 %v5071_v35, %v2832_v27  ;;  %v2781_v9 = vadd.f32 %v2707_v17, %v457_v20 }
 0x555   :  { %v5075_v53 = vpop.eup %5074  ;;  %5078 = vtanh.f32 %v7953_v54  ;;  %v2794_v31 = vadd.f32 1.0, %v5073_v16  ;;  %v2787_v8 = vmul.f32 0.5, %v2780_v38  ;;  %v2833_v58 = vmul.f32 0.5, %v2829_v52 }
 0x556   :  { %3799 = vst [vmem:[#allocation12 + $0x6] sm:$0x1] %v7955_v28  ;;  %v2810_v29 = vadd.f32 1.0, %v5075_v53  ;;  %5080 = vtanh.f32 %v2822_v61  ;;  %v2803_v44 = vmul.f32 0.5, %v2781_v9  ;;  %2958 = vmatmul.f32.vlgmr.msra.gmra.mxu0 %v7955_v28  ;;  %2987 = vmatmul.f32.vlgmr.msra.gmra.mxu1 %v7955_v28  ;;  %v3743_v55 = vrot.slane %v7955_v28, 1 }
 0x557   :  { %v2798_v32 = vmul.f32 0.5, %v2794_v31  ;;  %3016 = vmatmul.f32.vlgmr.msra.gmra.mxu2 %v7955_v28  ;;  %3045 = vmatmul.f32.vlgmr.msra.gmra.mxu3 %v7955_v28  ;;  %v3744_v39 = vrot.slane %v7955_v28, 2  ;;  %v3745_v63 = vrot.slane %v7955_v28, 3  ;;  %5082 = vtanh.f32 %v2787_v8 }
 0x558   :  { %v2814_v47 = vmul.f32 0.5, %v2810_v29  ;;  %v3746_v7 = vrot.slane %v7955_v28, 4  ;;  %5084 = vtanh.f32 %v2803_v44  ;;  %3800 = vst [vmem:[#allocation12 + $0xe] sm:$0x1] %v3743_v55  ;;  %v3747_v15 = vrot.slane %v7955_v28, 5 }
 0x559   :  { %v5077_v60 = vpop.eup %5076  ;;  %v2736_v43 = vpop.f32.mrf.mxu2  ;;  %3801 = vst [vmem:[#allocation12 + $0x16] sm:$0x1] %v3744_v39  ;;  %v3748_v62 = vrot.slane %v7955_v28, 6  ;;  %v3749_v48 = vrot.slane %v7955_v28, 7 }
 0x55a   :  { %v2838_v25 = vmul.f32 %v2814_v47, %v7741_v19  ;;  %v2842_v24 = vmul.f32 %v5077_v60, %v2798_v32  ;;  %v2765_v45 = vpop.f32.mrf.mxu3  ;;  %v2782_v57 = vadd.f32 %v2736_v43, %v570_v56  ;;  %3802 = vst [vmem:[#allocation12 + $0x1e] sm:$0x1] %v3745_v63  ;;  %v4021_v56 = vld [vmem:[#allocation7 + $0xf0] sm:$0xff]  ;;  %v4016_v43 = vld [vmem:[#allocation7 + $0xc8] sm:$0xff] }
 0x55b   :  { %v5079_v23 = vpop.eup %5078  ;;  %v2783_v50 = vadd.f32 %v2765_v45, %v683_v13  ;;  %3803 = vst [vmem:[#allocation12 + $0x26] sm:$0x1] %v3746_v7  ;;  %4029 = vmatpush.msrb.mxu0 %v4021_v56  ;;  %v4019_v13 = vld [vmem:[#allocation7 + $0xe0] sm:$0xff]  ;;  %v4013_v45 = vld [vmem:[#allocation7 + $0xb0] sm:$0xff] }
 0x55c   :  { %v5081_v12 = vpop.eup %5080  ;;  %v2853_v46 = vmul.f32 %v5079_v23, %v2833_v58  ;;  %v7974_v30 = vadd.f32 %v2842_v24, %v2838_v25  ;;  %5086 = vtanh.f32 %v2782_v57  ;;  %3804 = vst [vmem:[#allocation12 + $0x2e] sm:$0x1] %v3747_v15  ;;  %v4020_v15 = vld [vmem:[#allocation7 + $0xe8] sm:$0xff]  ;;  %v4017_v58 = vld [vmem:[#allocation7 + $0xd0] sm:$0xff]  ;;  %v4018_v25 = vld [vmem:[#allocation7 + $0xd8] sm:$0xff] }
 0x55d   :  { %v2823_v37 = vmul.f32 0.5, %v2783_v50  ;;  %v5083_v19 = vpop.eup %5082  ;;  %v2830_v51 = vadd.f32 1.0, %v5081_v12  ;;  %3805 = vst [vmem:[#allocation12 + $0x36] sm:$0x1] %v3748_v62  ;;  %4030 = vmatpush.msrb.mxu0 %v4019_v13  ;;  %4143 = vmatpush.msrb.mxu1 %v4020_v15  ;;  %v4015_v24 = vld [vmem:[#allocation7 + $0xc0] sm:$0xff]  ;;  %v4014_v23 = vld [vmem:[#allocation7 + $0xb8] sm:$0xff] }
 0x55e   :  { %3807 = vst [vmem:[#allocation12 + $0x46] sm:$0x1] %v2853_v46  ;;  %5088 = vtanh.f32 %v7974_v30  ;;  %2961 = vmatmul.f32.gmra.mxu0 %v2853_v46  ;;  %2990 = vmatmul.f32.gmra.mxu1 %v2853_v46  ;;  %v3750_v11 = vrot.slane %v2853_v46, 1  ;;  %v3751_v3 = vrot.slane %v2853_v46, 2  ;;  %v5085_v34 = vpop.eup %5084  ;;  %v2795_v33 = vadd.f32 1.0, %v5083_v19  ;;  %v4011_v57 = vld [vmem:[#allocation7 + $0xa0] sm:$0xff] }
 0x55f   :  { %3019 = vmatmul.f32.gmra.mxu2 %v2853_v46  ;;  %3048 = vmatmul.f32.gmra.mxu3 %v2853_v46  ;;  %v3752_v6 = vrot.slane %v2853_v46, 3  ;;  %v2811_v41 = vadd.f32 1.0, %v5085_v34  ;;  %5090 = vtanh.f32 %v2823_v37  ;;  %3806 = vst [vmem:[#allocation12 + $0x3e] sm:$0x1] %v3749_v48  ;;  %v3753_v10 = vrot.slane %v2853_v46, 4  ;;  %v4012_v50 = vld [vmem:[#allocation7 + $0xa8] sm:$0xff] }
 0x560   :  { %v2799_v26 = vmul.f32 0.5, %v2795_v33  ;;  %3808 = vst [vmem:[#allocation12 + $0x4e] sm:$0x1] %v3750_v11  ;;  %v3754_v2 = vrot.slane %v2853_v46, 5  ;;  %v3755_v14 = vrot.slane %v2853_v46, 6  ;;  %v2834_v22 = vmul.f32 0.5, %v2830_v51  ;;  %4031 = vmatpush.msrb.mxu0 %v4017_v58  ;;  %4144 = vmatpush.msrb.mxu1 %v4018_v25 }
 0x561   :  { %v2815_v40 = vmul.f32 0.5, %v2811_v41  ;;  %3809 = vst [vmem:[#allocation12 + $0x56] sm:$0x1] %v3751_v3  ;;  %v3756_v61 = vrot.slane %v2853_v46, 7  ;;  %v4009_v62 = vld [vmem:[#allocation7 + $0x90] sm:$0xff]  ;;  %v4010_v12 = vld [vmem:[#allocation7 + $0x98] sm:$0xff] }
 0x562   :  { %v5087_v18 = vpop.eup %5086  ;;  %3810 = vst [vmem:[#allocation12 + $0x5e] sm:$0x1] %v3752_v6  ;;  %4032 = vmatpush.msrb.mxu0 %v4015_v24  ;;  %4145 = vmatpush.msrb.mxu1 %v4016_v43  ;;  %v4007_v46 = vld [vmem:[#allocation7 + $0x80] sm:$0xff]  ;;  %v4008_v48 = vld [vmem:[#allocation7 + $0x88] sm:$0xff]  ;;  %v4005_v37 = vld [vmem:[#allocation7 + $0x70] sm:$0xff] }
 0x563   :  { %v2839_v27 = vmul.f32 %v2815_v40, %v7746_v36  ;;  %v2843_v35 = vmul.f32 %v5087_v18, %v2799_v26  ;;  %3811 = vst [vmem:[#allocation12 + $0x66] sm:$0x1] %v3753_v10  ;;  %v4006_v19 = vld [vmem:[#allocation7 + $0x78] sm:$0xff]  ;;  %v4003_v11 = vld [vmem:[#allocation7 + $0x60] sm:$0xff]  ;;  %v4004_v3 = vld [vmem:[#allocation7 + $0x68] sm:$0xff] }
 0x564   :  { %v5089_v20 = vpop.eup %5088  ;;  %3812 = vst [vmem:[#allocation12 + $0x6e] sm:$0x1] %v3754_v2  ;;  %4033 = vmatpush.msrb.mxu0 %v4013_v45  ;;  %4146 = vmatpush.msrb.mxu1 %v4014_v23  ;;  %v8728_v34 = vld [vmem:[#allocation127_spill] sm:$0xff]  ;;  %v8729_v33 = vld [vmem:[#allocation128_spill] sm:$0xff]  ;;  %v3992_v13 = vld [vmem:[#allocation7 + $0x8] sm:$0xff] }
 0x565   :  { %v2854_v21 = vmul.f32 %v5089_v20, %v2834_v22  ;;  %v5091_v17 = vpop.eup %5090  ;;  %v7979_v16 = vadd.f32 %v2843_v35, %v2839_v27  ;;  %3813 = vst [vmem:[#allocation12 + $0x76] sm:$0x1] %v3755_v14  ;;  %v347_v51 = vadd.f32 %v8728_v34, %v6492_v4  ;;  %v460_v6 = vadd.f32 %v8729_v33, %v6494_v5  ;;  %v4001_v41 = vld [vmem:[#allocation7 + $0x50] sm:$0xff]  ;;  %v4002_v10 = vld [vmem:[#allocation7 + $0x58] sm:$0xff]  ;;  %v3999_v18 = vld [vmem:[#allocation7 + $0x40] sm:$0xff] }
 0x566   :  { %3814 = vst [vmem:[#allocation12 + $0x7e] sm:$0x1] %v3756_v61  ;;  %v2831_v53 = vadd.f32 1.0, %v5091_v17  ;;  %4034 = vmatpush.msrb.mxu0 %v4011_v57  ;;  %4147 = vmatpush.msrb.mxu1 %v4012_v50  ;;  %v4000_v22 = vld [vmem:[#allocation7 + $0x48] sm:$0xff]  ;;  %v3997_v35 = vld [vmem:[#allocation7 + $0x30] sm:$0xff]  ;;  %v3998_v61 = vld [vmem:[#allocation7 + $0x38] sm:$0xff] }
 0x567   :  { %3815 = vst [vmem:[#allocation12 + $0x86] sm:$0x1] %v2854_v21  ;;  %2964 = vmatmul.f32.gmra.mxu0 %v2854_v21  ;;  %2993 = vmatmul.f32.gmra.mxu1 %v2854_v21  ;;  %v3757_v28 = vrot.slane %v2854_v21, 1  ;;  %v3758_v38 = vrot.slane %v2854_v21, 2  ;;  %v3759_v9 = vrot.slane %v2854_v21, 3  ;;  %5092 = vtanh.f32 %v7979_v16  ;;  %v8734_v23 = vld [vmem:[#allocation145_spill] sm:$0xff] }
 0x568   :  { %3022 = vmatmul.f32.gmra.mxu2 %v2854_v21  ;;  %3051 = vmatmul.f32.gmra.mxu3 %v2854_v21  ;;  %v3760_v36 = vrot.slane %v2854_v21, 4  ;;  %v3761_v52 = vrot.slane %v2854_v21, 5  ;;  %v3762_v31 = vrot.slane %v2854_v21, 6  ;;  %v3763_v29 = vrot.slane %v2854_v21, 7  ;;  %v8730_v21 = vld [vmem:[#allocation129_spill] sm:$0xff]  ;;  %v8735_v50 = vld [vmem:[#allocation146_spill] sm:$0xff] }
 0x569   :  { %3816 = vst [vmem:[#allocation12 + $0x8e] sm:$0x1] %v3757_v28  ;;  %v2835_v8 = vmul.f32 0.5, %v2831_v53  ;;  %4035 = vmatpush.msrb.mxu0 %v4009_v62  ;;  %4148 = vmatpush.msrb.mxu1 %v4010_v12  ;;  %v573_v17 = vadd.f32 %v8730_v21, %v6518_v0  ;;  %v8731_v28 = vld [vmem:[#allocation130_spill] sm:$0xff]  ;;  %v8732_v53 = vld [vmem:[#allocation131_spill] sm:$0xff]  ;;  %v576_v57 = vadd.f32 %v8734_v23, %v6518_v0 }
 0x56a   :  { %3817 = vst [vmem:[#allocation12 + $0x96] sm:$0x1] %v3758_v38  ;;  %v686_v38 = vadd.f32 %v8731_v28, %v6520_v1  ;;  %v689_v62 = vadd.f32 %v8735_v50, %v6520_v1  ;;  %v8737_v34 = vld [vmem:[#allocation150_spill] sm:$0xff] }
 0x56b   :  { %3818 = vst [vmem:[#allocation12 + $0x9e] sm:$0x1] %v3759_v9  ;;  %4036 = vmatpush.msrb.mxu0 %v4007_v46  ;;  %4149 = vmatpush.msrb.mxu1 %v4008_v48  ;;  %v3995_v9 = vld [vmem:[#allocation7 + $0x20] sm:$0xff] }
 0x56c   :  { %3819 = vst [vmem:[#allocation12 + $0xa6] sm:$0x1] %v3760_v36  ;;  %v3996_v36 = vld [vmem:[#allocation7 + $0x28] sm:$0xff] }
 0x56d   :  { %3820 = vst [vmem:[#allocation12 + $0xae] sm:$0x1] %v3761_v52  ;;  %v5093_v44 = vpop.eup %5092  ;;  %4037 = vmatpush.msrb.mxu0 %v4005_v37  ;;  %4150 = vmatpush.msrb.mxu1 %v4006_v19  ;;  %v350_v52 = vadd.f32 %v8732_v53, %v6492_v4  ;;  %v8739_v53 = vld [vmem:[#allocation152_spill] sm:$0xff] }
 0x56e   :  { %3821 = vst [vmem:[#allocation12 + $0xb6] sm:$0x1] %v3762_v31  ;;  %v2855_v32 = vmul.f32 %v5093_v44, %v2835_v8  ;;  %v8733_v31 = vld [vmem:[#allocation132_spill] sm:$0xff] }
 0x56f   :  { %3822 = vst [vmem:[#allocation12 + $0xbe] sm:$0x1] %v3763_v29  ;;  %4038 = vmatpush.msrb.mxu0 %v4003_v11  ;;  %4151 = vmatpush.msrb.mxu1 %v4004_v3  ;;  %v463_v29 = vadd.f32 %v8733_v31, %v6494_v5  ;;  %v8736_v11 = vld [vmem:[#allocation149_spill] sm:$0xff] }
 0x570   :  { %3823 = vst [vmem:[#allocation12 + $0xc6] sm:$0x1] %v2855_v32  ;;  %2967 = vmatmul.f32.gmra.mxu0 %v2855_v32  ;;  %2996 = vmatmul.f32.gmra.mxu1 %v2855_v32  ;;  %v3764_v55 = vrot.slane %v2855_v32, 1  ;;  %v3765_v39 = vrot.slane %v2855_v32, 2  ;;  %v3766_v63 = vrot.slane %v2855_v32, 3  ;;  %v3767_v47 = vrot.slane %v2855_v32, 4 }
 0x571   :  { %3025 = vmatmul.f32.gmra.mxu2 %v2855_v32  ;;  %3054 = vmatmul.f32.gmra.mxu3 %v2855_v32  ;;  %v3768_v7 = vrot.slane %v2855_v32, 5  ;;  %v3769_v60 = vrot.slane %v2855_v32, 6  ;;  %v3770_v42 = vrot.slane %v2855_v32, 7  ;;  %v353_v3 = vadd.f32 %v8736_v11, %v6492_v4 }
 0x572   :  { %3824 = vst [vmem:[#allocation12 + $0xce] sm:$0x1] %v3764_v55  ;;  %4039 = vmatpush.msrb.mxu0 %v4001_v41  ;;  %4152 = vmatpush.msrb.mxu1 %v4002_v10 }
 0x573   :  { %3825 = vst [vmem:[#allocation12 + $0xd6] sm:$0x1] %v3765_v39 }
 0x574   :  { %3826 = vst [vmem:[#allocation12 + $0xde] sm:$0x1] %v3766_v63  ;;  %4040 = vmatpush.msrb.mxu0 %v3999_v18  ;;  %4153 = vmatpush.msrb.mxu1 %v4000_v22 }
 0x575   :  { %3827 = vst [vmem:[#allocation12 + $0xe6] sm:$0x1] %v3767_v47  ;;  %v3993_v47 = vld [vmem:[#allocation7 + $0x10] sm:$0xff] }
 0x576   :  { %3828 = vst [vmem:[#allocation12 + $0xee] sm:$0x1] %v3768_v7  ;;  %4041 = vmatpush.msrb.mxu0 %v3997_v35  ;;  %4154 = vmatpush.msrb.mxu1 %v3998_v61  ;;  %v3994_v7 = vld [vmem:[#allocation7 + $0x18] sm:$0xff] }
 0x577   :  { %3829 = vst [vmem:[#allocation12 + $0xf6] sm:$0x1] %v3769_v60 }
 0x578   :  { %3830 = vst [vmem:[#allocation12 + $0xfe] sm:$0x1] %v3770_v42  ;;  %4042 = vmatpush.msrb.mxu0 %v3995_v9  ;;  %4155 = vmatpush.msrb.mxu1 %v3996_v36  ;;  %v8738_v9 = vld [vmem:[#allocation151_spill] sm:$0xff] }
 0x579   :  { %v579_v36 = vadd.f32 %v8738_v9, %v6518_v0 }
 0x57a   :  { %4043 = vmatpush.msrb.mxu0 %v3993_v47  ;;  %4156 = vmatpush.msrb.mxu1 %v3994_v7  ;;  %v8740_v7 = vld [vmem:[#allocation153_spill] sm:$0xff] }
 0x57c   :  { %4044 = vmatpush.msrb.mxu0 %v3991_v59  ;;  %4157 = vmatpush.msrb.mxu1 %v3992_v13 }
 0x5d3   :  { %v2959_v26 = vpop.f32.mrf.mxu0  ;;  %v2988_v2 = vpop.f32.mrf.mxu1 }
 0x5d4   :  { %v3058_v40 = vadd.f32 %v2959_v26, %v347_v51  ;;  %v3059_v14 = vadd.f32 %v2988_v2, %v460_v6  ;;  %v466_v51 = vadd.f32 %v8737_v34, %v6494_v5 }
 0x5d6   :  { %v3074_v20 = vmul.f32 0.5, %v3058_v40  ;;  %v3090_v27 = vmul.f32 0.5, %v3059_v14 }
 0x5d8   :  { %5094 = vtanh.f32 %v3074_v20 }
 0x5d9   :  { %5096 = vtanh.f32 %v3090_v27 }
 0x5da   :  { %v3017_v8 = vpop.f32.mrf.mxu2  ;;  %v3046_v44 = vpop.f32.mrf.mxu3 }
 0x5db   :  { %v3060_v32 = vadd.f32 %v3017_v8, %v573_v17  ;;  %v3061_v55 = vadd.f32 %v3046_v44, %v686_v38  ;;  %v2962_v39 = vpop.f32.mrf.mxu0  ;;  %v2991_v63 = vpop.f32.mrf.mxu1 }
 0x5dc   :  { %v3062_v60 = vadd.f32 %v2962_v39, %v350_v52  ;;  %v3063_v42 = vadd.f32 %v2991_v63, %v463_v29  ;;  %v692_v52 = vadd.f32 %v8739_v53, %v6520_v1 }
 0x5dd   :  { %5098 = vtanh.f32 %v3060_v32  ;;  %v3110_v56 = vmul.f32 0.5, %v3061_v55 }
 0x5de   :  { %v5095_v15 = vpop.eup %5094  ;;  %v3075_v58 = vmul.f32 0.5, %v3062_v60  ;;  %v3091_v25 = vmul.f32 0.5, %v3063_v42  ;;  %v356_v60 = vadd.f32 %v8740_v7, %v6492_v4  ;;  %v8741_v42 = vld [vmem:[#allocation154_spill] sm:$0xff] }
 0x5df   :  { %v5097_v24 = vpop.eup %5096  ;;  %v3082_v43 = vadd.f32 1.0, %v5095_v15  ;;  %5100 = vtanh.f32 %v3110_v56  ;;  %v469_v56 = vadd.f32 %v8741_v42, %v6494_v5 }
 0x5e0   :  { %v3098_v45 = vadd.f32 1.0, %v5097_v24  ;;  %5102 = vtanh.f32 %v3075_v58 }
 0x5e1   :  { %v3086_v12 = vmul.f32 0.5, %v3082_v43  ;;  %5104 = vtanh.f32 %v3091_v25 }
 0x5e2   :  { %v3102_v46 = vmul.f32 0.5, %v3098_v45  ;;  %v3020_v48 = vpop.f32.mrf.mxu2  ;;  %v3049_v37 = vpop.f32.mrf.mxu3 }
 0x5e3   :  { %v5099_v19 = vpop.eup %5098  ;;  %v3064_v33 = vadd.f32 %v3020_v48, %v576_v57  ;;  %v3065_v6 = vadd.f32 %v3049_v37, %v689_v62 }
 0x5e4   :  { %v3126_v41 = vmul.f32 %v3102_v46, %v7941_v49  ;;  %v3130_v10 = vmul.f32 %v5099_v19, %v3086_v12  ;;  %v2965_v26 = vpop.f32.mrf.mxu0  ;;  %v2994_v2 = vpop.f32.mrf.mxu1 }
 0x5e5   :  { %v5101_v40 = vpop.eup %5100  ;;  %5106 = vtanh.f32 %v3064_v33  ;;  %v3111_v14 = vmul.f32 0.5, %v3065_v6  ;;  %v3066_v18 = vadd.f32 %v2965_v26, %v353_v3  ;;  %v3067_v22 = vadd.f32 %v2994_v2, %v466_v51  ;;  %v8742_v51 = vld [vmem:[#allocation155_spill] sm:$0xff]  ;;  %v8743_v6 = vld [vmem:[#allocation156_spill] sm:$0xff] }
 0x5e6   :  { %v5103_v20 = vpop.eup %5102  ;;  %v3134_v27 = vadd.f32 %v3130_v10, %v3126_v41  ;;  %v3118_v38 = vadd.f32 1.0, %v5101_v40  ;;  %v582_v33 = vadd.f32 %v8742_v51, %v6518_v0  ;;  %v695_v41 = vadd.f32 %v8743_v6, %v6520_v1 }
 0x5e7   :  { %v5105_v35 = vpop.eup %5104  ;;  %v3083_v61 = vadd.f32 1.0, %v5103_v20  ;;  %5108 = vtanh.f32 %v3111_v14  ;;  %v3076_v21 = vmul.f32 0.5, %v3066_v18  ;;  %v3092_v17 = vmul.f32 0.5, %v3067_v22 }
 0x5e8   :  { %5110 = vtanh.f32 %v3134_v27  ;;  %3155 = vst [vmem:[#allocation15] sm:$0xff] %v3134_v27  ;;  %v3099_v28 = vadd.f32 1.0, %v5105_v35  ;;  %v3122_v59 = vmul.f32 0.5, %v3118_v38 }
 0x5e9   :  { %v3087_v49 = vmul.f32 0.5, %v3083_v61  ;;  %5112 = vtanh.f32 %v3076_v21 }
 0x5ea   :  { %v3103_v31 = vmul.f32 0.5, %v3099_v28  ;;  %5114 = vtanh.f32 %v3092_v17 }
 0x5eb   :  { %v5107_v29 = vpop.eup %5106  ;;  %v3023_v8 = vpop.f32.mrf.mxu2 }
 0x5ec   :  { %v3052_v44 = vpop.f32.mrf.mxu3  ;;  %v3127_v32 = vmul.f32 %v3103_v31, %v7953_v54  ;;  %v3131_v55 = vmul.f32 %v5107_v29, %v3087_v49  ;;  %v3068_v39 = vadd.f32 %v3023_v8, %v579_v36 }
 0x5ed   :  { %v3069_v63 = vadd.f32 %v3052_v44, %v692_v52  ;;  %v5109_v47 = vpop.eup %5108  ;;  %v2968_v25 = vpop.f32.mrf.mxu0 }
 0x5ee   :  { %v5111_v13 = vpop.eup %5110  ;;  %v3135_v15 = vadd.f32 %v3131_v55, %v3127_v32  ;;  %5116 = vtanh.f32 %v3068_v39  ;;  %v2997_v24 = vpop.f32.mrf.mxu1  ;;  %v3070_v54 = vadd.f32 %v2968_v25, %v356_v60  ;;  %v3119_v50 = vadd.f32 1.0, %v5109_v47 }
 0x5ef   :  { %v3112_v58 = vmul.f32 0.5, %v3069_v63  ;;  %v5113_v43 = vpop.eup %5112  ;;  %v8012_v45 = vmul.f32 %v5111_v13, %v3122_v59  ;;  %v3071_v23 = vadd.f32 %v2997_v24, %v469_v56 }
 0x5f0   :  { %v5115_v57 = vpop.eup %5114  ;;  %5118 = vtanh.f32 %v3135_v15  ;;  %3156 = vst [vmem:[#allocation15 + $0x8] sm:$0xff] %v3135_v15  ;;  %v3084_v4 = vadd.f32 1.0, %v5113_v43  ;;  %v3077_v62 = vmul.f32 0.5, %v3070_v54  ;;  %v3123_v26 = vmul.f32 0.5, %v3119_v50 }
 0x5f1   :  { %3151 = vst [vmem:[#allocation13] sm:$0xff] %v8012_v45  ;;  %v3100_v5 = vadd.f32 1.0, %v5115_v57  ;;  %5120 = vtanh.f32 %v3112_v58  ;;  %v3093_v12 = vmul.f32 0.5, %v3071_v23  ;;  %v3839_v48 = vrot.slane %v8012_v45, 1 }
 0x5f2   :  { %3895 = vst [vmem:[#allocation12 + $0x7] sm:$0x1] %v8012_v45  ;;  %v3088_v46 = vmul.f32 0.5, %v3084_v4  ;;  %v3840_v37 = vrot.slane %v8012_v45, 2  ;;  %v3841_v19 = vrot.slane %v8012_v45, 3  ;;  %5122 = vtanh.f32 %v3077_v62 }
 0x5f3   :  { %v3104_v11 = vmul.f32 0.5, %v3100_v5  ;;  %v3842_v3 = vrot.slane %v8012_v45, 4  ;;  %5124 = vtanh.f32 %v3093_v12  ;;  %3896 = vst [vmem:[#allocation12 + $0xf] sm:$0x1] %v3839_v48  ;;  %v3843_v10 = vrot.slane %v8012_v45, 5 }
 0x5f4   :  { %v5117_v34 = vpop.eup %5116  ;;  %v3026_v14 = vpop.f32.mrf.mxu2  ;;  %3897 = vst [vmem:[#allocation12 + $0x17] sm:$0x1] %v3840_v37  ;;  %v3844_v21 = vrot.slane %v8012_v45, 6  ;;  %v3845_v28 = vrot.slane %v8012_v45, 7 }
 0x5f5   :  { %v3128_v2 = vmul.f32 %v3104_v11, %v7974_v30  ;;  %v3132_v40 = vmul.f32 %v5117_v34, %v3088_v46  ;;  %v3055_v18 = vpop.f32.mrf.mxu3  ;;  %v3072_v20 = vadd.f32 %v3026_v14, %v582_v33  ;;  %3898 = vst [vmem:[#allocation12 + $0x1f] sm:$0x1] %v3841_v19 }
 0x5f6   :  { %v5119_v22 = vpop.eup %5118  ;;  %v3073_v27 = vadd.f32 %v3055_v18, %v695_v41  ;;  %3899 = vst [vmem:[#allocation12 + $0x27] sm:$0x1] %v3842_v3 }
 0x5f7   :  { %v5121_v35 = vpop.eup %5120  ;;  %v3143_v0 = vmul.f32 %v5119_v22, %v3123_v26  ;;  %v3136_v61 = vadd.f32 %v3132_v40, %v3128_v2  ;;  %5126 = vtanh.f32 %v3072_v20  ;;  %3900 = vst [vmem:[#allocation12 + $0x2f] sm:$0x1] %v3843_v10 }
 0x5f8   :  { %v3113_v1 = vmul.f32 0.5, %v3073_v27  ;;  %v5123_v17 = vpop.eup %5122  ;;  %v3120_v49 = vadd.f32 1.0, %v5121_v35  ;;  %3901 = vst [vmem:[#allocation12 + $0x37] sm:$0x1] %v3844_v21  ;;  %v4334_v35 = vld [vmem:[%s8372_s8 + $0x78] sm:$0xff]  ;;  %v4332_v21 = vld [vmem:[%s8372_s8 + $0x68] sm:$0xff] }
 0x5f9   :  { %3152 = vst [vmem:[#allocation13 + $0x8] sm:$0xff] %v3143_v0  ;;  %5128 = vtanh.f32 %v3136_v61  ;;  %v3927_v30 = vld [vmem:[#allocation12] sm:$0xff]  ;;  %v5125_v38 = vpop.eup %5124  ;;  %v3085_v9 = vadd.f32 1.0, %v5123_v17  ;;  %v3846_v53 = vrot.slane %v3143_v0, 1  ;;  %v3847_v31 = vrot.slane %v3143_v0, 2  ;;  %4355 = vmatpush.msrb.mxu2 %v4334_v35 }
 0x5fa   :  { %3903 = vst [vmem:[#allocation12 + $0x47] sm:$0x1] %v3143_v0  ;;  %v3959_v36 = vmax.f32 %v3927_v30, 0.0  ;;  %v3101_v52 = vadd.f32 1.0, %v5125_v38  ;;  %5130 = vtanh.f32 %v3113_v1  ;;  %v3848_v8 = vrot.slane %v3143_v0, 3  ;;  %v3928_v60 = vld [vmem:[#allocation12 + $0x8] sm:$0xff] }
 0x5fb   :  { %3157 = vst [vmem:[#allocation15 + $0x10] sm:$0xff] %v3136_v61  ;;  %v3089_v29 = vmul.f32 0.5, %v3085_v9  ;;  %v3849_v32 = vrot.slane %v3143_v0, 4  ;;  %v3124_v39 = vmul.f32 0.5, %v3120_v49  ;;  %v3850_v13 = vrot.slane %v3143_v0, 5  ;;  %v3929_v54 = vld [vmem:[#allocation12 + $0x10] sm:$0xff] }
 0x5fc   :  { %4045 = vmatmul.f32.vlgmr.msrb.gmra.mxu0 %v3959_v36  ;;  %4158 = vmatmul.f32.vlgmr.msrb.gmra.mxu1 %v3959_v36  ;;  %v3105_v44 = vmul.f32 0.5, %v3101_v52  ;;  %3902 = vst [vmem:[#allocation12 + $0x3f] sm:$0x1] %v3845_v28  ;;  %v3960_v15 = vmax.f32 %v3928_v60, 0.0  ;;  %v3851_v58 = vrot.slane %v3143_v0, 6  ;;  %v3852_v25 = vrot.slane %v3143_v0, 7 }
 0x5fd   :  { %v5127_v55 = vpop.eup %5126  ;;  %3904 = vst [vmem:[#allocation12 + $0x4f] sm:$0x1] %v3846_v53  ;;  %v3961_v5 = vmax.f32 %v3929_v54, 0.0  ;;  %v3930_v19 = vld [vmem:[#allocation12 + $0x18] sm:$0xff]  ;;  %v3931_v41 = vld [vmem:[#allocation12 + $0x20] sm:$0xff]  ;;  %v4350_v0 = vld [vmem:[%s8372_s8 + $0xf8] sm:$0xff] }
 0x5fe   :  { %v3129_v47 = vmul.f32 %v3105_v44, %v7979_v16  ;;  %v3133_v7 = vmul.f32 %v5127_v55, %v3089_v29  ;;  %3905 = vst [vmem:[#allocation12 + $0x57] sm:$0x1] %v3847_v31  ;;  %v3962_v51 = vmax.f32 %v3930_v19, 0.0  ;;  %v3963_v10 = vmax.f32 %v3931_v41, 0.0  ;;  %v3932_v26 = vld [vmem:[#allocation12 + $0x28] sm:$0xff]  ;;  %4468 = vmatpush.msrb.mxu3 %v4350_v0  ;;  %v4348_v17 = vld [vmem:[%s8372_s8 + $0xe8] sm:$0xff] }
 0x5ff   :  { %v5129_v63 = vpop.eup %5128  ;;  %3906 = vst [vmem:[#allocation12 + $0x5f] sm:$0x1] %v3848_v8  ;;  %v3964_v2 = vmax.f32 %v3932_v26, 0.0  ;;  %v3933_v40 = vld [vmem:[#allocation12 + $0x30] sm:$0xff]  ;;  %v4333_v61 = vld [vmem:[%s8372_s8 + $0x70] sm:$0xff]  ;;  %v4331_v38 = vld [vmem:[%s8372_s8 + $0x60] sm:$0xff] }
 0x600   :  { %v3144_v42 = vmul.f32 %v5129_v63, %v3124_v39  ;;  %v5131_v56 = vpop.eup %5130  ;;  %v3137_v59 = vadd.f32 %v3133_v7, %v3129_v47  ;;  %3907 = vst [vmem:[#allocation12 + $0x67] sm:$0x1] %v3849_v32  ;;  %v3965_v14 = vmax.f32 %v3933_v40, 0.0  ;;  %v4349_v1 = vld [vmem:[%s8372_s8 + $0xf0] sm:$0xff]  ;;  %4356 = vmatpush.msrb.mxu2 %v4333_v61  ;;  %v4347_v49 = vld [vmem:[%s8372_s8 + $0xe0] sm:$0xff]  ;;  %v4330_v9 = vld [vmem:[%s8372_s8 + $0x58] sm:$0xff] }
 0x601   :  { %v3121_v24 = vadd.f32 1.0, %v5131_v56  ;;  %3908 = vst [vmem:[#allocation12 + $0x6f] sm:$0x1] %v3850_v13  ;;  %v3935_v20 = vld [vmem:[#allocation12 + $0x40] sm:$0xff]  ;;  %4469 = vmatpush.msrb.mxu3 %v4349_v1  ;;  %v4346_v36 = vld [vmem:[%s8372_s8 + $0xd8] sm:$0xff]  ;;  %v4329_v53 = vld [vmem:[%s8372_s8 + $0x50] sm:$0xff] }
 0x602   :  { %3153 = vst [vmem:[#allocation13 + $0x10] sm:$0xff] %v3144_v42  ;;  %5132 = vtanh.f32 %v3137_v59  ;;  %v3853_v16 = vrot.slane %v3144_v42, 1  ;;  %v3854_v43 = vrot.slane %v3144_v42, 2  ;;  %v3855_v45 = vrot.slane %v3144_v42, 3  ;;  %4357 = vmatpush.msrb.mxu2 %v4332_v21  ;;  %v4345_v52 = vld [vmem:[%s8372_s8 + $0xd0] sm:$0xff]  ;;  %v4328_v29 = vld [vmem:[%s8372_s8 + $0x48] sm:$0xff] }
 0x603   :  { %3911 = vst [vmem:[#allocation12 + $0x87] sm:$0x1] %v3144_v42  ;;  %v3856_v23 = vrot.slane %v3144_v42, 4  ;;  %v3125_v57 = vmul.f32 0.5, %v3121_v24  ;;  %v3857_v62 = vrot.slane %v3144_v42, 5  ;;  %v3858_v12 = vrot.slane %v3144_v42, 6  ;;  %4470 = vmatpush.msrb.mxu3 %v4348_v17 }
 0x604   :  { %3158 = vst [vmem:[#allocation15 + $0x18] sm:$0xff] %v3137_v59  ;;  %4048 = vmatmul.f32.gmra.mxu0 %v3960_v15  ;;  %4161 = vmatmul.f32.gmra.mxu1 %v3960_v15  ;;  %v3859_v46 = vrot.slane %v3144_v42, 7  ;;  %v3934_v18 = vld [vmem:[#allocation12 + $0x38] sm:$0xff]  ;;  %v3967_v27 = vmax.f32 %v3935_v20, 0.0  ;;  %v3936_v30 = vld [vmem:[#allocation12 + $0x48] sm:$0xff]  ;;  %v4344_v8 = vld [vmem:[%s8372_s8 + $0xc8] sm:$0xff] }
 0x605   :  { %3909 = vst [vmem:[#allocation12 + $0x77] sm:$0x1] %v3851_v58  ;;  %v3966_v22 = vmax.f32 %v3934_v18, 0.0  ;;  %v3968_v28 = vmax.f32 %v3936_v30, 0.0  ;;  %4358 = vmatpush.msrb.mxu2 %v4331_v38  ;;  %4471 = vmatpush.msrb.mxu3 %v4347_v49  ;;  %v3937_v31 = vld [vmem:[#allocation12 + $0x50] sm:$0xff]  ;;  %v4327_v32 = vld [vmem:[%s8372_s8 + $0x40] sm:$0xff] }
 0x606   :  { %3910 = vst [vmem:[#allocation12 + $0x7f] sm:$0x1] %v3852_v25  ;;  %v3969_v44 = vmax.f32 %v3937_v31, 0.0  ;;  %v4343_v55 = vld [vmem:[%s8372_s8 + $0xc0] sm:$0xff]  ;;  %v4326_v39 = vld [vmem:[%s8372_s8 + $0x38] sm:$0xff]  ;;  %v4325_v47 = vld [vmem:[%s8372_s8 + $0x30] sm:$0xff] }
 0x607   :  { %3912 = vst [vmem:[#allocation12 + $0x8f] sm:$0x1] %v3853_v16  ;;  %4359 = vmatpush.msrb.mxu2 %v4330_v9  ;;  %4472 = vmatpush.msrb.mxu3 %v4346_v36  ;;  %v4342_v63 = vld [vmem:[%s8372_s8 + $0xb8] sm:$0xff]  ;;  %v4341_v7 = vld [vmem:[%s8372_s8 + $0xb0] sm:$0xff]  ;;  %v3938_v60 = vld [vmem:[#allocation12 + $0x58] sm:$0xff] }
 0x608   :  { %v5133_v50 = vpop.eup %5132  ;;  %3913 = vst [vmem:[#allocation12 + $0x97] sm:$0x1] %v3854_v43  ;;  %v4324_v42 = vld [vmem:[%s8372_s8 + $0x28] sm:$0xff]  ;;  %v3970_v59 = vmax.f32 %v3938_v60, 0.0  ;;  %v4323_v13 = vld [vmem:[%s8372_s8 + $0x20] sm:$0xff]  ;;  %v4322_v58 = vld [vmem:[%s8372_s8 + $0x18] sm:$0xff] }
 0x609   :  { %v3145_v4 = vmul.f32 %v5133_v50, %v3125_v57  ;;  %3914 = vst [vmem:[#allocation12 + $0x9f] sm:$0x1] %v3855_v45  ;;  %4360 = vmatpush.msrb.mxu2 %v4329_v53  ;;  %4473 = vmatpush.msrb.mxu3 %v4345_v52  ;;  %v4340_v56 = vld [vmem:[%s8372_s8 + $0xa8] sm:$0xff]  ;;  %v4339_v15 = vld [vmem:[%s8372_s8 + $0xa0] sm:$0xff]  ;;  %v4338_v25 = vld [vmem:[%s8372_s8 + $0x98] sm:$0xff] }
 0x60a   :  { %3915 = vst [vmem:[#allocation12 + $0xa7] sm:$0x1] %v3856_v23  ;;  %v4321_v24 = vld [vmem:[%s8372_s8 + $0x10] sm:$0xff]  ;;  %v3939_v16 = vld [vmem:[#allocation12 + $0x60] sm:$0xff]  ;;  %v4319_v57 = vld [vmem:[%s8372_s8] sm:$0xff] }
 0x60b   :  { %3154 = vst [vmem:[#allocation13 + $0x18] sm:$0xff] %v3145_v4  ;;  %v3860_v48 = vrot.slane %v3145_v4, 1  ;;  %v3861_v37 = vrot.slane %v3145_v4, 2  ;;  %v3862_v11 = vrot.slane %v3145_v4, 3  ;;  %v3863_v3 = vrot.slane %v3145_v4, 4  ;;  %4361 = vmatpush.msrb.mxu2 %v4328_v29  ;;  %4474 = vmatpush.msrb.mxu3 %v4344_v8  ;;  %v4337_v45 = vld [vmem:[%s8372_s8 + $0x90] sm:$0xff] }
 0x60c   :  { %4051 = vmatmul.f32.gmra.mxu0 %v3961_v5  ;;  %4164 = vmatmul.f32.gmra.mxu1 %v3961_v5  ;;  %3919 = vst [vmem:[#allocation12 + $0xc7] sm:$0x1] %v3145_v4  ;;  %v3864_v34 = vrot.slane %v3145_v4, 5  ;;  %v3865_v33 = vrot.slane %v3145_v4, 6  ;;  %v3866_v6 = vrot.slane %v3145_v4, 7  ;;  %v3971_v43 = vmax.f32 %v3939_v16, 0.0 }
 0x60d   :  { %3916 = vst [vmem:[#allocation12 + $0xaf] sm:$0x1] %v3857_v62  ;;  %4362 = vmatpush.msrb.mxu2 %v4327_v32  ;;  %4475 = vmatpush.msrb.mxu3 %v4343_v55  ;;  %v4320_v54 = vld [vmem:[%s8372_s8 + $0x8] sm:$0xff]  ;;  %v4335_v50 = vld [vmem:[%s8372_s8 + $0x80] sm:$0xff]  ;;  %v3940_v4 = vld [vmem:[#allocation12 + $0x68] sm:$0xff] }
 0x60e   :  { %3917 = vst [vmem:[#allocation12 + $0xb7] sm:$0x1] %v3858_v12  ;;  %v4336_v23 = vld [vmem:[%s8372_s8 + $0x88] sm:$0xff]  ;;  %v3972_v5 = vmax.f32 %v3940_v4, 0.0  ;;  %v3941_v62 = vld [vmem:[#allocation12 + $0x70] sm:$0xff] }
 0x60f   :  { %3918 = vst [vmem:[#allocation12 + $0xbf] sm:$0x1] %v3859_v46  ;;  %4363 = vmatpush.msrb.mxu2 %v4326_v39  ;;  %4476 = vmatpush.msrb.mxu3 %v4342_v63  ;;  %v3973_v12 = vmax.f32 %v3941_v62, 0.0  ;;  %v3942_v46 = vld [vmem:[#allocation12 + $0x78] sm:$0xff]  ;;  %v3945_v0 = vld [vmem:[#allocation12 + $0x90] sm:$0xff] }
 0x610   :  { %3920 = vst [vmem:[#allocation12 + $0xcf] sm:$0x1] %v3860_v48  ;;  %v3974_v48 = vmax.f32 %v3942_v46, 0.0  ;;  %v3977_v30 = vmax.f32 %v3945_v0, 0.0  ;;  %v3946_v49 = vld [vmem:[#allocation12 + $0x98] sm:$0xff] }
 0x611   :  { %3921 = vst [vmem:[#allocation12 + $0xd7] sm:$0x1] %v3861_v37  ;;  %4364 = vmatpush.msrb.mxu2 %v4325_v47  ;;  %4477 = vmatpush.msrb.mxu3 %v4341_v7  ;;  %v4023_v37 = vld [vmem:[#allocation9] sm:$0x3]  ;;  %v3978_v31 = vmax.f32 %v3946_v49, 0.0 }
 0x612   :  { %3922 = vst [vmem:[#allocation12 + $0xdf] sm:$0x1] %v3862_v11  ;;  %v8125_v19 = vperm.slane %v4023_v37, 0  ;;  %v8127_v11 = vperm.slane %v4023_v37, 1  ;;  %4641 = dma.vmem_to_hbm [thread:$0]  %s4634_s9, 512, %s4636_s28, [#allocation14], %s5382_s29, %s5382_s29, %s5383_s30  }
 0x613   :  { %3923 = vst [vmem:[#allocation12 + $0xe7] sm:$0x1] %v3863_v3  ;;  %4365 = vmatpush.msrb.mxu2 %v4324_v42  ;;  %4478 = vmatpush.msrb.mxu3 %v4340_v56  ;;  %v3943_v3 = vld [vmem:[#allocation12 + $0x80] sm:$0xff]  ;;  %4654 = dma.vmem_to_hbm [thread:$0]  %s4647_s22, 512, %s4649_s0, [#allocation14], %s5382_s29, %s5382_s29, %s5383_s30  }
 0x614   :  { %4054 = vmatmul.f32.gmra.mxu0 %v3962_v51  ;;  %4167 = vmatmul.f32.gmra.mxu1 %v3962_v51  ;;  %3924 = vst [vmem:[#allocation12 + $0xef] sm:$0x1] %v3864_v34  ;;  %v3975_v41 = vmax.f32 %v3943_v3, 0.0  ;;  %v3948_v42 = vld [vmem:[#allocation12 + $0xa8] sm:$0xff] }
 0x615   :  { %3925 = vst [vmem:[#allocation12 + $0xf7] sm:$0x1] %v3865_v33  ;;  %4366 = vmatpush.msrb.mxu2 %v4323_v13  ;;  %4479 = vmatpush.msrb.mxu3 %v4339_v15  ;;  %v3949_v16 = vld [vmem:[#allocation12 + $0xb0] sm:$0xff] }
 0x616   :  { %3926 = vst [vmem:[#allocation12 + $0xff] sm:$0x1] %v3866_v6 }
 0x617   :  { %4367 = vmatpush.msrb.mxu2 %v4322_v58  ;;  %4480 = vmatpush.msrb.mxu3 %v4338_v25  ;;  %v3980_v58 = vmax.f32 %v3948_v42, 0.0  ;;  %4628 = dma.vmem_to_hbm [thread:$0]  %s4621_s15, 4096, %s4623_s17, [#allocation6], %s5382_s29, %s5382_s29, %s5383_s30  }
 0x619   :  { %4368 = vmatpush.msrb.mxu2 %v4321_v24  ;;  %4481 = vmatpush.msrb.mxu3 %v4337_v45 }
 0x61b   :  { %4369 = vmatpush.msrb.mxu2 %v4320_v54  ;;  %4482 = vmatpush.msrb.mxu3 %v4336_v23 }
 0x61c   :  { %4057 = vmatmul.f32.gmra.mxu0 %v3963_v10  ;;  %4170 = vmatmul.f32.gmra.mxu1 %v3963_v10 }
 0x61d   :  { %4370 = vmatpush.msrb.mxu2 %v4319_v57  ;;  %4483 = vmatpush.msrb.mxu3 %v4335_v50  ;;  %v3981_v57 = vmax.f32 %v3949_v16, 0.0 }
 0x624   :  { %4060 = vmatmul.f32.gmra.mxu0 %v3964_v2  ;;  %4173 = vmatmul.f32.gmra.mxu1 %v3964_v2  ;;  %v3944_v2 = vld [vmem:[#allocation12 + $0x88] sm:$0xff] }
 0x625   :  { %v3976_v20 = vmax.f32 %v3944_v2, 0.0 }
 0x62c   :  { %4063 = vmatmul.f32.gmra.mxu0 %v3965_v14  ;;  %4176 = vmatmul.f32.gmra.mxu1 %v3965_v14 }
 0x634   :  { %4066 = vmatmul.f32.gmra.mxu0 %v3966_v22  ;;  %4179 = vmatmul.f32.gmra.mxu1 %v3966_v22 }
 0x63c   :  { %4069 = vmatmul.f32.gmra.mxu0 %v3967_v27  ;;  %4182 = vmatmul.f32.gmra.mxu1 %v3967_v27 }
 0x644   :  { %4072 = vmatmul.f32.gmra.mxu0 %v3968_v28  ;;  %4185 = vmatmul.f32.gmra.mxu1 %v3968_v28 }
 0x64c   :  { %4075 = vmatmul.f32.gmra.mxu0 %v3969_v44  ;;  %4188 = vmatmul.f32.gmra.mxu1 %v3969_v44  ;;  %v3947_v44 = vld [vmem:[#allocation12 + $0xa0] sm:$0xff] }
 0x64d   :  { %v3979_v47 = vmax.f32 %v3947_v44, 0.0 }
 0x654   :  { %4078 = vmatmul.f32.gmra.mxu0 %v3970_v59  ;;  %4191 = vmatmul.f32.gmra.mxu1 %v3970_v59 }
 0x65c   :  { %4081 = vmatmul.f32.gmra.mxu0 %v3971_v43  ;;  %4194 = vmatmul.f32.gmra.mxu1 %v3971_v43 }
 0x664   :  { %4084 = vmatmul.f32.gmra.mxu0 %v3972_v5  ;;  %4197 = vmatmul.f32.gmra.mxu1 %v3972_v5  ;;  %v3950_v5 = vld [vmem:[#allocation12 + $0xb8] sm:$0xff] }
 0x665   :  { %v3982_v37 = vmax.f32 %v3950_v5, 0.0 }
 0x66c   :  { %4087 = vmatmul.f32.gmra.mxu0 %v3973_v12  ;;  %4200 = vmatmul.f32.gmra.mxu1 %v3973_v12 }
 0x674   :  { %4090 = vmatmul.f32.gmra.mxu0 %v3974_v48  ;;  %4203 = vmatmul.f32.gmra.mxu1 %v3974_v48 }
 0x679   :  { %v4046_v34 = vpop.f32.mrf.mxu0  ;;  %v4159_v51 = vpop.f32.mrf.mxu1 }
 0x67a   :  { %v4047_v33 = vadd.f32 %v4046_v34, %v8125_v19  ;;  %v4160_v6 = vadd.f32 %v4159_v51, %v8127_v11  ;;  %v3951_v51 = vld [vmem:[#allocation12 + $0xc0] sm:$0xff] }
 0x67c   :  { %v4255_v10 = vmax.f32 %v4047_v33, 0.0  ;;  %v4256_v26 = vmax.f32 %v4160_v6, 0.0  ;;  %4093 = vmatmul.f32.gmra.mxu0 %v3975_v41  ;;  %4206 = vmatmul.f32.gmra.mxu1 %v3975_v41 }
 0x67e   :  { %4371 = vmatmul.f32.vlgmr.msrb.gmra.mxu2 %v4255_v10  ;;  %4484 = vmatmul.f32.vlgmr.msrb.gmra.mxu3 %v4256_v26  ;;  %v3983_v26 = vmax.f32 %v3951_v51, 0.0 }
 0x681   :  { %v4049_v40 = vpop.f32.mrf.mxu0  ;;  %v4162_v14 = vpop.f32.mrf.mxu1 }
 0x682   :  { %v4050_v18 = vadd.f32 %v4049_v40, %v8125_v19  ;;  %v4163_v22 = vadd.f32 %v4162_v14, %v8127_v11  ;;  %v3952_v14 = vld [vmem:[#allocation12 + $0xc8] sm:$0xff] }
 0x684   :  { %v4257_v27 = vmax.f32 %v4050_v18, 0.0  ;;  %v4258_v35 = vmax.f32 %v4163_v22, 0.0  ;;  %4096 = vmatmul.f32.gmra.mxu0 %v3976_v20  ;;  %4209 = vmatmul.f32.gmra.mxu1 %v3976_v20 }
 0x686   :  { %4374 = vmatmul.f32.gmra.mxu2 %v4257_v27  ;;  %4487 = vmatmul.f32.gmra.mxu3 %v4258_v35  ;;  %v3984_v35 = vmax.f32 %v3952_v14, 0.0  ;;  %v8163_v14 = vld [vmem:[#allocation10] ss:$0 sm:$0xff] }
 0x689   :  { %v4052_v61 = vpop.f32.mrf.mxu0  ;;  %v4165_v1 = vpop.f32.mrf.mxu1 }
 0x68a   :  { %v4053_v21 = vadd.f32 %v4052_v61, %v8125_v19  ;;  %v4166_v17 = vadd.f32 %v4165_v1, %v8127_v11  ;;  %v3953_v1 = vld [vmem:[#allocation12 + $0xd0] sm:$0xff] }
 0x68c   :  { %v4259_v28 = vmax.f32 %v4053_v21, 0.0  ;;  %v4260_v38 = vmax.f32 %v4166_v17, 0.0  ;;  %4099 = vmatmul.f32.gmra.mxu0 %v3977_v30  ;;  %4212 = vmatmul.f32.gmra.mxu1 %v3977_v30 }
 0x68e   :  { %4377 = vmatmul.f32.gmra.mxu2 %v4259_v28  ;;  %4490 = vmatmul.f32.gmra.mxu3 %v4260_v38  ;;  %v3985_v38 = vmax.f32 %v3953_v1, 0.0 }
 0x691   :  { %v4055_v9 = vpop.f32.mrf.mxu0  ;;  %v4168_v36 = vpop.f32.mrf.mxu1 }
 0x692   :  { %v4056_v53 = vadd.f32 %v4055_v9, %v8125_v19  ;;  %v4169_v52 = vadd.f32 %v4168_v36, %v8127_v11  ;;  %v3954_v36 = vld [vmem:[#allocation12 + $0xd8] sm:$0xff] }
 0x694   :  { %v4261_v29 = vmax.f32 %v4056_v53, 0.0  ;;  %v4262_v8 = vmax.f32 %v4169_v52, 0.0  ;;  %4102 = vmatmul.f32.gmra.mxu0 %v3978_v31  ;;  %4215 = vmatmul.f32.gmra.mxu1 %v3978_v31 }
 0x696   :  { %4380 = vmatmul.f32.gmra.mxu2 %v4261_v29  ;;  %4493 = vmatmul.f32.gmra.mxu3 %v4262_v8  ;;  %v3986_v8 = vmax.f32 %v3954_v36, 0.0 }
 0x699   :  { %v4058_v32 = vpop.f32.mrf.mxu0  ;;  %v4171_v55 = vpop.f32.mrf.mxu1 }
 0x69a   :  { %v4059_v39 = vadd.f32 %v4058_v32, %v8125_v19  ;;  %v4172_v63 = vadd.f32 %v4171_v55, %v8127_v11  ;;  %v3955_v55 = vld [vmem:[#allocation12 + $0xe0] sm:$0xff] }
 0x69c   :  { %v4263_v7 = vmax.f32 %v4059_v39, 0.0  ;;  %v4264_v60 = vmax.f32 %v4172_v63, 0.0  ;;  %4105 = vmatmul.f32.gmra.mxu0 %v3979_v47  ;;  %4218 = vmatmul.f32.gmra.mxu1 %v3979_v47 }
 0x69e   :  { %4383 = vmatmul.f32.gmra.mxu2 %v4263_v7  ;;  %4496 = vmatmul.f32.gmra.mxu3 %v4264_v60  ;;  %v3987_v60 = vmax.f32 %v3955_v55, 0.0 }
 0x6a1   :  { %v4061_v56 = vpop.f32.mrf.mxu0  ;;  %v4174_v59 = vpop.f32.mrf.mxu1 }
 0x6a2   :  { %v4062_v13 = vadd.f32 %v4061_v56, %v8125_v19  ;;  %v4175_v15 = vadd.f32 %v4174_v59, %v8127_v11  ;;  %v3956_v59 = vld [vmem:[#allocation12 + $0xe8] sm:$0xff] }
 0x6a4   :  { %v4265_v25 = vmax.f32 %v4062_v13, 0.0  ;;  %v4266_v24 = vmax.f32 %v4175_v15, 0.0  ;;  %4108 = vmatmul.f32.gmra.mxu0 %v3980_v58  ;;  %4221 = vmatmul.f32.gmra.mxu1 %v3980_v58 }
 0x6a6   :  { %4386 = vmatmul.f32.gmra.mxu2 %v4265_v25  ;;  %4499 = vmatmul.f32.gmra.mxu3 %v4266_v24  ;;  %v3988_v24 = vmax.f32 %v3956_v59, 0.0 }
 0x6a9   :  { %v4064_v43 = vpop.f32.mrf.mxu0  ;;  %v4177_v45 = vpop.f32.mrf.mxu1 }
 0x6aa   :  { %v4065_v54 = vadd.f32 %v4064_v43, %v8125_v19  ;;  %v4178_v23 = vadd.f32 %v4177_v45, %v8127_v11  ;;  %v3957_v45 = vld [vmem:[#allocation12 + $0xf0] sm:$0xff] }
 0x6ac   :  { %v4267_v50 = vmax.f32 %v4065_v54, 0.0  ;;  %v4268_v4 = vmax.f32 %v4178_v23, 0.0  ;;  %4111 = vmatmul.f32.gmra.mxu0 %v3981_v57  ;;  %4224 = vmatmul.f32.gmra.mxu1 %v3981_v57 }
 0x6ae   :  { %4389 = vmatmul.f32.gmra.mxu2 %v4267_v50  ;;  %4502 = vmatmul.f32.gmra.mxu3 %v4268_v4  ;;  %v3989_v4 = vmax.f32 %v3957_v45, 0.0 }
 0x6b1   :  { %v4067_v62 = vpop.f32.mrf.mxu0  ;;  %v4180_v12 = vpop.f32.mrf.mxu1 }
 0x6b2   :  { %v4068_v46 = vadd.f32 %v4067_v62, %v8125_v19  ;;  %v4181_v48 = vadd.f32 %v4180_v12, %v8127_v11  ;;  %v3958_v12 = vld [vmem:[#allocation12 + $0xf8] sm:$0xff] }
 0x6b4   :  { %v4269_v3 = vmax.f32 %v4068_v46, 0.0  ;;  %v4270_v34 = vmax.f32 %v4181_v48, 0.0  ;;  %4114 = vmatmul.f32.gmra.mxu0 %v3982_v37  ;;  %4227 = vmatmul.f32.gmra.mxu1 %v3982_v37 }
 0x6b6   :  { %4392 = vmatmul.f32.gmra.mxu2 %v4269_v3  ;;  %4505 = vmatmul.f32.gmra.mxu3 %v4270_v34  ;;  %v3990_v34 = vmax.f32 %v3958_v12, 0.0 }
 0x6b9   :  { %v4070_v33 = vpop.f32.mrf.mxu0  ;;  %v4183_v6 = vpop.f32.mrf.mxu1 }
 0x6ba   :  { %v4071_v41 = vadd.f32 %v4070_v33, %v8125_v19  ;;  %v4184_v10 = vadd.f32 %v4183_v6, %v8127_v11 }
 0x6bc   :  { %v4271_v2 = vmax.f32 %v4071_v41, 0.0  ;;  %v4272_v40 = vmax.f32 %v4184_v10, 0.0  ;;  %4117 = vmatmul.f32.gmra.mxu0 %v3983_v26  ;;  %4230 = vmatmul.f32.gmra.mxu1 %v3983_v26 }
 0x6be   :  { %4395 = vmatmul.f32.gmra.mxu2 %v4271_v2  ;;  %4508 = vmatmul.f32.gmra.mxu3 %v4272_v40 }
 0x6c1   :  { %v4073_v18 = vpop.f32.mrf.mxu0  ;;  %v4186_v22 = vpop.f32.mrf.mxu1 }
 0x6c2   :  { %v4074_v20 = vadd.f32 %v4073_v18, %v8125_v19  ;;  %v4187_v27 = vadd.f32 %v4186_v22, %v8127_v11 }
 0x6c4   :  { %v4273_v0 = vmax.f32 %v4074_v20, 0.0  ;;  %v4274_v61 = vmax.f32 %v4187_v27, 0.0  ;;  %4120 = vmatmul.f32.gmra.mxu0 %v3984_v35  ;;  %4233 = vmatmul.f32.gmra.mxu1 %v3984_v35 }
 0x6c6   :  { %4398 = vmatmul.f32.gmra.mxu2 %v4273_v0  ;;  %4511 = vmatmul.f32.gmra.mxu3 %v4274_v61 }
 0x6c9   :  { %v4076_v21 = vpop.f32.mrf.mxu0  ;;  %v4189_v17 = vpop.f32.mrf.mxu1 }
 0x6ca   :  { %v4077_v30 = vadd.f32 %v4076_v21, %v8125_v19  ;;  %v4190_v28 = vadd.f32 %v4189_v17, %v8127_v11 }
 0x6cc   :  { %v4275_v49 = vmax.f32 %v4077_v30, 0.0  ;;  %v4276_v9 = vmax.f32 %v4190_v28, 0.0  ;;  %4123 = vmatmul.f32.gmra.mxu0 %v3985_v38  ;;  %4236 = vmatmul.f32.gmra.mxu1 %v3985_v38 }
 0x6ce   :  { %4401 = vmatmul.f32.gmra.mxu2 %v4275_v49  ;;  %4514 = vmatmul.f32.gmra.mxu3 %v4276_v9 }
 0x6d1   :  { %v4079_v53 = vpop.f32.mrf.mxu0  ;;  %v4192_v52 = vpop.f32.mrf.mxu1 }
 0x6d2   :  { %v4080_v31 = vadd.f32 %v4079_v53, %v8125_v19  ;;  %v4193_v29 = vadd.f32 %v4192_v52, %v8127_v11 }
 0x6d4   :  { %v4277_v44 = vmax.f32 %v4080_v31, 0.0  ;;  %v4278_v32 = vmax.f32 %v4193_v29, 0.0  ;;  %4126 = vmatmul.f32.gmra.mxu0 %v3986_v8  ;;  %4239 = vmatmul.f32.gmra.mxu1 %v3986_v8 }
 0x6d6   :  { %4404 = vmatmul.f32.gmra.mxu2 %v4277_v44  ;;  %4517 = vmatmul.f32.gmra.mxu3 %v4278_v32 }
 0x6d9   :  { %v4082_v39 = vpop.f32.mrf.mxu0  ;;  %v4195_v63 = vpop.f32.mrf.mxu1 }
 0x6da   :  { %v4083_v47 = vadd.f32 %v4082_v39, %v8125_v19  ;;  %v4196_v7 = vadd.f32 %v4195_v63, %v8127_v11 }
 0x6dc   :  { %v4279_v42 = vmax.f32 %v4083_v47, 0.0  ;;  %v4280_v56 = vmax.f32 %v4196_v7, 0.0  ;;  %4129 = vmatmul.f32.gmra.mxu0 %v3987_v60  ;;  %4242 = vmatmul.f32.gmra.mxu1 %v3987_v60 }
 0x6de   :  { %4407 = vmatmul.f32.gmra.mxu2 %v4279_v42  ;;  %4520 = vmatmul.f32.gmra.mxu3 %v4280_v56 }
 0x6e1   :  { %v4085_v13 = vpop.f32.mrf.mxu0  ;;  %v4198_v15 = vpop.f32.mrf.mxu1 }
 0x6e2   :  { %v4086_v58 = vadd.f32 %v4085_v13, %v8125_v19  ;;  %v4199_v25 = vadd.f32 %v4198_v15, %v8127_v11 }
 0x6e4   :  { %v4281_v16 = vmax.f32 %v4086_v58, 0.0  ;;  %v4282_v43 = vmax.f32 %v4199_v25, 0.0  ;;  %4132 = vmatmul.f32.gmra.mxu0 %v3988_v24  ;;  %4245 = vmatmul.f32.gmra.mxu1 %v3988_v24 }
 0x6e6   :  { %4410 = vmatmul.f32.gmra.mxu2 %v4281_v16  ;;  %4523 = vmatmul.f32.gmra.mxu3 %v4282_v43 }
 0x6e9   :  { %v4088_v54 = vpop.f32.mrf.mxu0  ;;  %v4201_v23 = vpop.f32.mrf.mxu1 }
 0x6ea   :  { %v4089_v57 = vadd.f32 %v4088_v54, %v8125_v19  ;;  %v4202_v50 = vadd.f32 %v4201_v23, %v8127_v11 }
 0x6ec   :  { %v4283_v5 = vmax.f32 %v4089_v57, 0.0  ;;  %v4284_v62 = vmax.f32 %v4202_v50, 0.0  ;;  %4135 = vmatmul.f32.gmra.mxu0 %v3989_v4  ;;  %4248 = vmatmul.f32.gmra.mxu1 %v3989_v4 }
 0x6ee   :  { %4413 = vmatmul.f32.gmra.mxu2 %v4283_v5  ;;  %4526 = vmatmul.f32.gmra.mxu3 %v4284_v62 }
 0x6f1   :  { %v4091_v46 = vpop.f32.mrf.mxu0  ;;  %v4204_v48 = vpop.f32.mrf.mxu1 }
 0x6f2   :  { %v4092_v37 = vadd.f32 %v4091_v46, %v8125_v19  ;;  %v4205_v3 = vadd.f32 %v4204_v48, %v8127_v11 }
 0x6f4   :  { %v4285_v51 = vmax.f32 %v4092_v37, 0.0  ;;  %v4286_v33 = vmax.f32 %v4205_v3, 0.0  ;;  %4138 = vmatmul.f32.gmra.mxu0 %v3990_v34  ;;  %4251 = vmatmul.f32.gmra.mxu1 %v3990_v34 }
 0x6f6   :  { %4416 = vmatmul.f32.gmra.mxu2 %v4285_v51  ;;  %4529 = vmatmul.f32.gmra.mxu3 %v4286_v33 }
 0x6f9   :  { %v4094_v6 = vpop.f32.mrf.mxu0  ;;  %v4207_v41 = vpop.f32.mrf.mxu1 }
 0x6fa   :  { %v4095_v10 = vadd.f32 %v4094_v6, %v8125_v19  ;;  %v4208_v26 = vadd.f32 %v4207_v41, %v8127_v11 }
 0x6fc   :  { %v4287_v2 = vmax.f32 %v4095_v10, 0.0  ;;  %v4288_v40 = vmax.f32 %v4208_v26, 0.0 }
 0x6fe   :  { %4419 = vmatmul.f32.gmra.mxu2 %v4287_v2  ;;  %4532 = vmatmul.f32.gmra.mxu3 %v4288_v40 }
 0x701   :  { %v4097_v18 = vpop.f32.mrf.mxu0  ;;  %v4210_v22 = vpop.f32.mrf.mxu1 }
 0x702   :  { %v4098_v20 = vadd.f32 %v4097_v18, %v8125_v19  ;;  %v4211_v27 = vadd.f32 %v4210_v22, %v8127_v11  ;;  %v4372_v35 = vpop.f32.mrf.mxu2  ;;  %v4485_v0 = vpop.f32.mrf.mxu3 }
 0x703   :  { %v4373_v61 = vadd.f32 %v8163_v14, %v4372_v35 }
 0x704   :  { %v4289_v1 = vmax.f32 %v4098_v20, 0.0  ;;  %v4290_v21 = vmax.f32 %v4211_v27, 0.0 }
 0x705   :  { %v4486_v17 = vadd.f32 %v4485_v0, %v4373_v61 }
 0x706   :  { %4422 = vmatmul.f32.gmra.mxu2 %v4289_v1  ;;  %4535 = vmatmul.f32.gmra.mxu3 %v4290_v21 }
 0x707   :  { %4582 = vst.msk [vmem:[%s8374_s10] sm:$0xff] %vm4581_vm1, %v4486_v17 }
 0x709   :  { %v4100_v30 = vpop.f32.mrf.mxu0  ;;  %v4213_v28 = vpop.f32.mrf.mxu1 }
 0x70a   :  { %v4101_v38 = vadd.f32 %v4100_v30, %v8125_v19  ;;  %v4214_v49 = vadd.f32 %v4213_v28, %v8127_v11  ;;  %v4375_v9 = vpop.f32.mrf.mxu2  ;;  %v4488_v36 = vpop.f32.mrf.mxu3 }
 0x70b   :  { %v4376_v53 = vadd.f32 %v8163_v14, %v4375_v9 }
 0x70c   :  { %v4291_v52 = vmax.f32 %v4101_v38, 0.0  ;;  %v4292_v31 = vmax.f32 %v4214_v49, 0.0 }
 0x70d   :  { %v4489_v29 = vadd.f32 %v4488_v36, %v4376_v53 }
 0x70e   :  { %4425 = vmatmul.f32.gmra.mxu2 %v4291_v52  ;;  %4538 = vmatmul.f32.gmra.mxu3 %v4292_v31 }
 0x70f   :  { %4583 = vst.msk [vmem:[%s8374_s10 + $0x8] sm:$0xff] %vm4581_vm1, %v4489_v29 }
 0x711   :  { %v4103_v8 = vpop.f32.mrf.mxu0  ;;  %v4216_v44 = vpop.f32.mrf.mxu1 }
 0x712   :  { %v4104_v32 = vadd.f32 %v4103_v8, %v8125_v19  ;;  %v4217_v55 = vadd.f32 %v4216_v44, %v8127_v11  ;;  %v4378_v39 = vpop.f32.mrf.mxu2  ;;  %v4491_v63 = vpop.f32.mrf.mxu3 }
 0x713   :  { %v4379_v47 = vadd.f32 %v8163_v14, %v4378_v39 }
 0x714   :  { %v4293_v7 = vmax.f32 %v4104_v32, 0.0  ;;  %v4294_v60 = vmax.f32 %v4217_v55, 0.0 }
 0x715   :  { %v4492_v42 = vadd.f32 %v4491_v63, %v4379_v47 }
 0x716   :  { %4428 = vmatmul.f32.gmra.mxu2 %v4293_v7  ;;  %4541 = vmatmul.f32.gmra.mxu3 %v4294_v60 }
 0x717   :  { %4584 = vst.msk [vmem:[%s8374_s10 + $0x10] sm:$0xff] %vm4581_vm1, %v4492_v42 }
 0x719   :  { %v4106_v56 = vpop.f32.mrf.mxu0  ;;  %v4219_v59 = vpop.f32.mrf.mxu1 }
 0x71a   :  { %v4107_v13 = vadd.f32 %v4106_v56, %v8125_v19  ;;  %v4220_v15 = vadd.f32 %v4219_v59, %v8127_v11  ;;  %v4381_v58 = vpop.f32.mrf.mxu2  ;;  %v4494_v25 = vpop.f32.mrf.mxu3 }
 0x71b   :  { %v4382_v24 = vadd.f32 %v8163_v14, %v4381_v58 }
 0x71c   :  { %v4295_v16 = vmax.f32 %v4107_v13, 0.0  ;;  %v4296_v43 = vmax.f32 %v4220_v15, 0.0 }
 0x71d   :  { %v4495_v45 = vadd.f32 %v4494_v25, %v4382_v24 }
 0x71e   :  { %4431 = vmatmul.f32.gmra.mxu2 %v4295_v16  ;;  %4544 = vmatmul.f32.gmra.mxu3 %v4296_v43 }
 0x71f   :  { %4585 = vst.msk [vmem:[%s8374_s10 + $0x18] sm:$0xff] %vm4581_vm1, %v4495_v45 }
 0x721   :  { %v4109_v54 = vpop.f32.mrf.mxu0  ;;  %v4222_v23 = vpop.f32.mrf.mxu1 }
 0x722   :  { %v4110_v57 = vadd.f32 %v4109_v54, %v8125_v19  ;;  %v4223_v50 = vadd.f32 %v4222_v23, %v8127_v11  ;;  %v4384_v4 = vpop.f32.mrf.mxu2  ;;  %v4497_v5 = vpop.f32.mrf.mxu3 }
 0x723   :  { %v4385_v62 = vadd.f32 %v8163_v14, %v4384_v4 }
 0x724   :  { %v4297_v12 = vmax.f32 %v4110_v57, 0.0  ;;  %v4298_v46 = vmax.f32 %v4223_v50, 0.0 }
 0x725   :  { %v4498_v48 = vadd.f32 %v4497_v5, %v4385_v62 }
 0x726   :  { %4434 = vmatmul.f32.gmra.mxu2 %v4297_v12  ;;  %4547 = vmatmul.f32.gmra.mxu3 %v4298_v46 }
 0x727   :  { %4586 = vst.msk [vmem:[%s8374_s10 + $0x20] sm:$0xff] %vm4581_vm1, %v4498_v48 }
 0x729   :  { %v4112_v37 = vpop.f32.mrf.mxu0  ;;  %v4225_v3 = vpop.f32.mrf.mxu1 }
 0x72a   :  { %v4113_v34 = vadd.f32 %v4112_v37, %v8125_v19  ;;  %v4226_v51 = vadd.f32 %v4225_v3, %v8127_v11  ;;  %v4387_v33 = vpop.f32.mrf.mxu2  ;;  %v4500_v6 = vpop.f32.mrf.mxu3 }
 0x72b   :  { %v4388_v41 = vadd.f32 %v8163_v14, %v4387_v33 }
 0x72c   :  { %v4299_v10 = vmax.f32 %v4113_v34, 0.0  ;;  %v4300_v26 = vmax.f32 %v4226_v51, 0.0 }
 0x72d   :  { %v4501_v2 = vadd.f32 %v4500_v6, %v4388_v41 }
 0x72e   :  { %4437 = vmatmul.f32.gmra.mxu2 %v4299_v10  ;;  %4550 = vmatmul.f32.gmra.mxu3 %v4300_v26 }
 0x72f   :  { %4587 = vst.msk [vmem:[%s8374_s10 + $0x28] sm:$0xff] %vm4581_vm1, %v4501_v2 }
 0x731   :  { %v4115_v40 = vpop.f32.mrf.mxu0  ;;  %v4228_v18 = vpop.f32.mrf.mxu1 }
 0x732   :  { %v4116_v22 = vadd.f32 %v4115_v40, %v8125_v19  ;;  %v4229_v20 = vadd.f32 %v4228_v18, %v8127_v11  ;;  %v4390_v27 = vpop.f32.mrf.mxu2  ;;  %v4503_v35 = vpop.f32.mrf.mxu3 }
 0x733   :  { %v4391_v0 = vadd.f32 %v8163_v14, %v4390_v27 }
 0x734   :  { %v4301_v61 = vmax.f32 %v4116_v22, 0.0  ;;  %v4302_v1 = vmax.f32 %v4229_v20, 0.0 }
 0x735   :  { %v4504_v21 = vadd.f32 %v4503_v35, %v4391_v0 }
 0x736   :  { %4440 = vmatmul.f32.gmra.mxu2 %v4301_v61  ;;  %4553 = vmatmul.f32.gmra.mxu3 %v4302_v1 }
 0x737   :  { %4588 = vst.msk [vmem:[%s8374_s10 + $0x30] sm:$0xff] %vm4581_vm1, %v4504_v21 }
 0x739   :  { %v4118_v17 = vpop.f32.mrf.mxu0  ;;  %v4231_v30 = vpop.f32.mrf.mxu1 }
 0x73a   :  { %v4119_v28 = vadd.f32 %v4118_v17, %v8125_v19  ;;  %v4232_v38 = vadd.f32 %v4231_v30, %v8127_v11  ;;  %v4393_v49 = vpop.f32.mrf.mxu2  ;;  %v4506_v9 = vpop.f32.mrf.mxu3 }
 0x73b   :  { %v4394_v36 = vadd.f32 %v8163_v14, %v4393_v49 }
 0x73c   :  { %v4303_v53 = vmax.f32 %v4119_v28, 0.0  ;;  %v4304_v52 = vmax.f32 %v4232_v38, 0.0 }
 0x73d   :  { %v4507_v31 = vadd.f32 %v4506_v9, %v4394_v36 }
 0x73e   :  { %4443 = vmatmul.f32.gmra.mxu2 %v4303_v53  ;;  %4556 = vmatmul.f32.gmra.mxu3 %v4304_v52 }
 0x73f   :  { %4589 = vst.msk [vmem:[%s8374_s10 + $0x38] sm:$0xff] %vm4581_vm1, %v4507_v31 }
 0x741   :  { %v4121_v29 = vpop.f32.mrf.mxu0  ;;  %v4234_v8 = vpop.f32.mrf.mxu1 }
 0x742   :  { %v4122_v44 = vadd.f32 %v4121_v29, %v8125_v19  ;;  %v4235_v32 = vadd.f32 %v4234_v8, %v8127_v11  ;;  %v4396_v55 = vpop.f32.mrf.mxu2  ;;  %v4509_v39 = vpop.f32.mrf.mxu3 }
 0x743   :  { %v4397_v63 = vadd.f32 %v8163_v14, %v4396_v55 }
 0x744   :  { %v4305_v47 = vmax.f32 %v4122_v44, 0.0  ;;  %v4306_v7 = vmax.f32 %v4235_v32, 0.0 }
 0x745   :  { %v4510_v60 = vadd.f32 %v4509_v39, %v4397_v63 }
 0x746   :  { %4446 = vmatmul.f32.gmra.mxu2 %v4305_v47  ;;  %4559 = vmatmul.f32.gmra.mxu3 %v4306_v7 }
 0x747   :  { %4590 = vst.msk [vmem:[%s8374_s10 + $0x40] sm:$0xff] %vm4581_vm1, %v4510_v60 }
 0x749   :  { %v4124_v42 = vpop.f32.mrf.mxu0  ;;  %v4237_v56 = vpop.f32.mrf.mxu1 }
 0x74a   :  { %v4125_v59 = vadd.f32 %v4124_v42, %v8125_v19  ;;  %v4238_v13 = vadd.f32 %v4237_v56, %v8127_v11  ;;  %v4399_v15 = vpop.f32.mrf.mxu2  ;;  %v4512_v58 = vpop.f32.mrf.mxu3 }
 0x74b   :  { %v4400_v25 = vadd.f32 %v8163_v14, %v4399_v15 }
 0x74c   :  { %v4307_v24 = vmax.f32 %v4125_v59, 0.0  ;;  %v4308_v16 = vmax.f32 %v4238_v13, 0.0 }
 0x74d   :  { %v4513_v43 = vadd.f32 %v4512_v58, %v4400_v25 }
 0x74e   :  { %4449 = vmatmul.f32.gmra.mxu2 %v4307_v24  ;;  %4562 = vmatmul.f32.gmra.mxu3 %v4308_v16 }
 0x74f   :  { %4591 = vst.msk [vmem:[%s8374_s10 + $0x48] sm:$0xff] %vm4581_vm1, %v4513_v43 }
 0x751   :  { %v4127_v45 = vpop.f32.mrf.mxu0  ;;  %v4240_v54 = vpop.f32.mrf.mxu1 }
 0x752   :  { %v4128_v23 = vadd.f32 %v4127_v45, %v8125_v19  ;;  %v4241_v57 = vadd.f32 %v4240_v54, %v8127_v11  ;;  %v4402_v50 = vpop.f32.mrf.mxu2  ;;  %v4515_v4 = vpop.f32.mrf.mxu3 }
 0x753   :  { %v4403_v5 = vadd.f32 %v8163_v14, %v4402_v50 }
 0x754   :  { %v4309_v62 = vmax.f32 %v4128_v23, 0.0  ;;  %v4310_v12 = vmax.f32 %v4241_v57, 0.0 }
 0x755   :  { %v4516_v46 = vadd.f32 %v4515_v4, %v4403_v5 }
 0x756   :  { %4452 = vmatmul.f32.gmra.mxu2 %v4309_v62  ;;  %4565 = vmatmul.f32.gmra.mxu3 %v4310_v12 }
 0x757   :  { %4592 = vst.msk [vmem:[%s8374_s10 + $0x50] sm:$0xff] %vm4581_vm1, %v4516_v46 }
 0x759   :  { %v4130_v48 = vpop.f32.mrf.mxu0  ;;  %v4243_v37 = vpop.f32.mrf.mxu1 }
 0x75a   :  { %v4131_v3 = vadd.f32 %v4130_v48, %v8125_v19  ;;  %v4244_v34 = vadd.f32 %v4243_v37, %v8127_v11  ;;  %v4405_v51 = vpop.f32.mrf.mxu2  ;;  %v4518_v33 = vpop.f32.mrf.mxu3 }
 0x75b   :  { %v4406_v6 = vadd.f32 %v8163_v14, %v4405_v51 }
 0x75c   :  { %v4311_v41 = vmax.f32 %v4131_v3, 0.0  ;;  %v4312_v10 = vmax.f32 %v4244_v34, 0.0 }
 0x75d   :  { %v4519_v26 = vadd.f32 %v4518_v33, %v4406_v6 }
 0x75e   :  { %4455 = vmatmul.f32.gmra.mxu2 %v4311_v41  ;;  %4568 = vmatmul.f32.gmra.mxu3 %v4312_v10 }
 0x75f   :  { %4593 = vst.msk [vmem:[%s8374_s10 + $0x58] sm:$0xff] %vm4581_vm1, %v4519_v26 }
 0x761   :  { %v4133_v2 = vpop.f32.mrf.mxu0  ;;  %v4246_v40 = vpop.f32.mrf.mxu1 }
 0x762   :  { %v4134_v18 = vadd.f32 %v4133_v2, %v8125_v19  ;;  %v4247_v22 = vadd.f32 %v4246_v40, %v8127_v11  ;;  %v4408_v20 = vpop.f32.mrf.mxu2  ;;  %v4521_v27 = vpop.f32.mrf.mxu3 }
 0x763   :  { %v4409_v35 = vadd.f32 %v8163_v14, %v4408_v20 }
 0x764   :  { %v4313_v0 = vmax.f32 %v4134_v18, 0.0  ;;  %v4314_v61 = vmax.f32 %v4247_v22, 0.0 }
 0x765   :  { %v4522_v1 = vadd.f32 %v4521_v27, %v4409_v35 }
 0x766   :  { %4458 = vmatmul.f32.gmra.mxu2 %v4313_v0  ;;  %4571 = vmatmul.f32.gmra.mxu3 %v4314_v61 }
 0x767   :  { %4594 = vst.msk [vmem:[%s8374_s10 + $0x60] sm:$0xff] %vm4581_vm1, %v4522_v1 }
 0x769   :  { %v4136_v21 = vpop.f32.mrf.mxu0  ;;  %v4249_v17 = vpop.f32.mrf.mxu1 }
 0x76a   :  { %v4137_v30 = vadd.f32 %v4136_v21, %v8125_v19  ;;  %v4250_v28 = vadd.f32 %v4249_v17, %v8127_v11  ;;  %v4411_v38 = vpop.f32.mrf.mxu2  ;;  %v4524_v49 = vpop.f32.mrf.mxu3 }
 0x76b   :  { %v4412_v9 = vadd.f32 %v8163_v14, %v4411_v38 }
 0x76c   :  { %v4315_v36 = vmax.f32 %v4137_v30, 0.0  ;;  %v4316_v53 = vmax.f32 %v4250_v28, 0.0 }
 0x76d   :  { %v4525_v52 = vadd.f32 %v4524_v49, %v4412_v9 }
 0x76e   :  { %4461 = vmatmul.f32.gmra.mxu2 %v4315_v36  ;;  %4574 = vmatmul.f32.gmra.mxu3 %v4316_v53 }
 0x76f   :  { %4595 = vst.msk [vmem:[%s8374_s10 + $0x68] sm:$0xff] %vm4581_vm1, %v4525_v52 }
 0x771   :  { %v4139_v31 = vpop.f32.mrf.mxu0  ;;  %v4252_v29 = vpop.f32.mrf.mxu1 }
 0x772   :  { %v4140_v8 = vadd.f32 %v4139_v31, %v8125_v19  ;;  %v4253_v44 = vadd.f32 %v4252_v29, %v8127_v11  ;;  %v4414_v32 = vpop.f32.mrf.mxu2  ;;  %v4527_v55 = vpop.f32.mrf.mxu3 }
 0x773   :  { %v4415_v39 = vadd.f32 %v8163_v14, %v4414_v32 }
 0x774   :  { %v4317_v63 = vmax.f32 %v4140_v8, 0.0  ;;  %v4318_v47 = vmax.f32 %v4253_v44, 0.0 }
 0x775   :  { %v4528_v7 = vadd.f32 %v4527_v55, %v4415_v39 }
 0x776   :  { %4464 = vmatmul.f32.gmra.mxu2 %v4317_v63  ;;  %4577 = vmatmul.f32.gmra.mxu3 %v4318_v47 }
 0x777   :  { %4596 = vst.msk [vmem:[%s8374_s10 + $0x70] sm:$0xff] %vm4581_vm1, %v4528_v7 }
 0x77a   :  { %v4417_v60 = vpop.f32.mrf.mxu2  ;;  %v4530_v42 = vpop.f32.mrf.mxu3 }
 0x77b   :  { %v4418_v19 = vadd.f32 %v8163_v14, %v4417_v60 }
 0x77d   :  { %v4531_v56 = vadd.f32 %v4530_v42, %v4418_v19 }
 0x77f   :  { %4597 = vst.msk [vmem:[%s8374_s10 + $0x78] sm:$0xff] %vm4581_vm1, %v4531_v56 }
 0x782   :  { %v4420_v11 = vpop.f32.mrf.mxu2  ;;  %v4533_v59 = vpop.f32.mrf.mxu3 }
 0x783   :  { %v4421_v13 = vadd.f32 %v8163_v14, %v4420_v11 }
 0x785   :  { %v4534_v15 = vadd.f32 %v4533_v59, %v4421_v13 }
 0x787   :  { %4598 = vst.msk [vmem:[%s8374_s10 + $0x80] sm:$0xff] %vm4581_vm1, %v4534_v15 }
 0x78a   :  { %v4423_v58 = vpop.f32.mrf.mxu2  ;;  %v4536_v25 = vpop.f32.mrf.mxu3 }
 0x78b   :  { %v4424_v24 = vadd.f32 %v8163_v14, %v4423_v58 }
 0x78d   :  { %v4537_v16 = vadd.f32 %v4536_v25, %v4424_v24 }
 0x78f   :  { %4599 = vst.msk [vmem:[%s8374_s10 + $0x88] sm:$0xff] %vm4581_vm1, %v4537_v16 }
 0x792   :  { %v4426_v43 = vpop.f32.mrf.mxu2  ;;  %v4539_v45 = vpop.f32.mrf.mxu3 }
 0x793   :  { %v4427_v54 = vadd.f32 %v8163_v14, %v4426_v43 }
 0x795   :  { %v4540_v23 = vadd.f32 %v4539_v45, %v4427_v54 }
 0x797   :  { %4600 = vst.msk [vmem:[%s8374_s10 + $0x90] sm:$0xff] %vm4581_vm1, %v4540_v23 }
 0x79a   :  { %v4429_v57 = vpop.f32.mrf.mxu2  ;;  %v4542_v50 = vpop.f32.mrf.mxu3 }
 0x79b   :  { %v4430_v4 = vadd.f32 %v8163_v14, %v4429_v57 }
 0x79d   :  { %v4543_v5 = vadd.f32 %v4542_v50, %v4430_v4 }
 0x79f   :  { %4601 = vst.msk [vmem:[%s8374_s10 + $0x98] sm:$0xff] %vm4581_vm1, %v4543_v5 }
 0x7a2   :  { %v4432_v62 = vpop.f32.mrf.mxu2  ;;  %v4545_v12 = vpop.f32.mrf.mxu3 }
 0x7a3   :  { %v4433_v46 = vadd.f32 %v8163_v14, %v4432_v62 }
 0x7a5   :  { %v4546_v48 = vadd.f32 %v4545_v12, %v4433_v46 }
 0x7a7   :  { %4602 = vst.msk [vmem:[%s8374_s10 + $0xa0] sm:$0xff] %vm4581_vm1, %v4546_v48 }
 0x7aa   :  { %v4435_v37 = vpop.f32.mrf.mxu2  ;;  %v4548_v3 = vpop.f32.mrf.mxu3 }
 0x7ab   :  { %v4436_v34 = vadd.f32 %v8163_v14, %v4435_v37 }
 0x7ad   :  { %v4549_v51 = vadd.f32 %v4548_v3, %v4436_v34 }
 0x7af   :  { %4603 = vst.msk [vmem:[%s8374_s10 + $0xa8] sm:$0xff] %vm4581_vm1, %v4549_v51 }
 0x7b2   :  { %v4438_v33 = vpop.f32.mrf.mxu2  ;;  %v4551_v6 = vpop.f32.mrf.mxu3 }
 0x7b3   :  { %v4439_v41 = vadd.f32 %v8163_v14, %v4438_v33 }
 0x7b5   :  { %v4552_v10 = vadd.f32 %v4551_v6, %v4439_v41 }
 0x7b7   :  { %4604 = vst.msk [vmem:[%s8374_s10 + $0xb0] sm:$0xff] %vm4581_vm1, %v4552_v10 }
 0x7ba   :  { %v4441_v26 = vpop.f32.mrf.mxu2  ;;  %v4554_v2 = vpop.f32.mrf.mxu3 }
 0x7bb   :  { %v4442_v40 = vadd.f32 %v8163_v14, %v4441_v26 }
 0x7bd   :  { %v4555_v18 = vadd.f32 %v4554_v2, %v4442_v40 }
 0x7bf   :  { %4605 = vst.msk [vmem:[%s8374_s10 + $0xb8] sm:$0xff] %vm4581_vm1, %v4555_v18 }
 0x7c2   :  { %v4444_v22 = vpop.f32.mrf.mxu2  ;;  %v4557_v20 = vpop.f32.mrf.mxu3 }
 0x7c3   :  { %v4445_v27 = vadd.f32 %v8163_v14, %v4444_v22 }
 0x7c5   :  { %v4558_v35 = vadd.f32 %v4557_v20, %v4445_v27 }
 0x7c7   :  { %4606 = vst.msk [vmem:[%s8374_s10 + $0xc0] sm:$0xff] %vm4581_vm1, %v4558_v35 }
 0x7ca   :  { %v4447_v0 = vpop.f32.mrf.mxu2  ;;  %v4560_v61 = vpop.f32.mrf.mxu3 }
 0x7cb   :  { %v4448_v1 = vadd.f32 %v8163_v14, %v4447_v0 }
 0x7cd   :  { %v4561_v21 = vadd.f32 %v4560_v61, %v4448_v1 }
 0x7cf   :  { %4607 = vst.msk [vmem:[%s8374_s10 + $0xc8] sm:$0xff] %vm4581_vm1, %v4561_v21 }
 0x7d2   :  { %v4450_v17 = vpop.f32.mrf.mxu2  ;;  %v4563_v30 = vpop.f32.mrf.mxu3 }
 0x7d3   :  { %v4451_v28 = vadd.f32 %v8163_v14, %v4450_v17 }
 0x7d5   :  { %v4564_v38 = vadd.f32 %v4563_v30, %v4451_v28 }
 0x7d7   :  { %4608 = vst.msk [vmem:[%s8374_s10 + $0xd0] sm:$0xff] %vm4581_vm1, %v4564_v38 }
 0x7da   :  { %v4453_v49 = vpop.f32.mrf.mxu2  ;;  %v4566_v9 = vpop.f32.mrf.mxu3 }
 0x7db   :  { %v4454_v36 = vadd.f32 %v8163_v14, %v4453_v49 }
 0x7dd   :  { %v4567_v53 = vadd.f32 %v4566_v9, %v4454_v36 }
 0x7df   :  { %4609 = vst.msk [vmem:[%s8374_s10 + $0xd8] sm:$0xff] %vm4581_vm1, %v4567_v53 }
 0x7e2   :  { %v4456_v52 = vpop.f32.mrf.mxu2  ;;  %v4569_v31 = vpop.f32.mrf.mxu3 }
 0x7e3   :  { %v4457_v29 = vadd.f32 %v8163_v14, %v4456_v52 }
 0x7e5   :  { %v4570_v8 = vadd.f32 %v4569_v31, %v4457_v29 }
 0x7e7   :  { %4610 = vst.msk [vmem:[%s8374_s10 + $0xe0] sm:$0xff] %vm4581_vm1, %v4570_v8 }
 0x7ea   :  { %v4459_v44 = vpop.f32.mrf.mxu2  ;;  %v4572_v32 = vpop.f32.mrf.mxu3 }
 0x7eb   :  { %v4460_v55 = vadd.f32 %v8163_v14, %v4459_v44 }
 0x7ed   :  { %v4573_v39 = vadd.f32 %v4572_v32, %v4460_v55 }
 0x7ef   :  { %4611 = vst.msk [vmem:[%s8374_s10 + $0xe8] sm:$0xff] %vm4581_vm1, %v4573_v39 }
 0x7f2   :  { %v4462_v63 = vpop.f32.mrf.mxu2  ;;  %v4575_v47 = vpop.f32.mrf.mxu3 }
 0x7f3   :  { %v4463_v7 = vadd.f32 %v8163_v14, %v4462_v63 }
 0x7f5   :  { %v4576_v60 = vadd.f32 %v4575_v47, %v4463_v7 }
 0x7f7   :  { %4612 = vst.msk [vmem:[%s8374_s10 + $0xf0] sm:$0xff] %vm4581_vm1, %v4576_v60 }
 0x7fa   :  { %v4465_v42 = vpop.f32.mrf.mxu2  ;;  %v4578_v56 = vpop.f32.mrf.mxu3 }
 0x7fb   :  { %v4466_v19 = vadd.f32 %v8163_v14, %v4465_v42 }
 0x7fd   :  { %v4579_v11 = vadd.f32 %v4578_v56, %v4466_v19 }
 0x7ff   :  { %4613 = vst.msk [vmem:[%s8374_s10 + $0xf8] sm:$0xff] %vm4581_vm1, %v4579_v11 }
 0x800   :  { %5371 = dma.done.wait [#allocation6], 4096  }
 0x801   :  { %5372 = vsyncadd [#allocation6], 4294963200 }
 0x802   :  { %5373 = dma.done.wait [#allocation14], 1024  }
 0x803   :  { %5374 = vsyncadd [#allocation14], 4294966272 }
 0x804   :  { %4669 = vsyncpa [#allocation5], 1 }
 0x805   :  { %4670 = vsyncpa [#allocation8], 1 }
 0x806   :  { %4671 = vsyncpa [#allocation11], 1 }
 0x807   :  { %4672 = vsyncpa [#allocation6], 1 }
 0x808   :  { %4673 = vsyncpa [#allocation14], 1 }

</bundles_post_ra>
